<compile_context>
chip_gen: v6e
topology: v6e:2x2x1
jax: 0.10.0
libtpu: 0.0.40
codegen_flags: <defaults>
</compile_context>

<pallas_src>
import numpy as np

import jax
import jax.numpy as jnp
from jax.experimental import pallas as pl
from jax.experimental.pallas import tpu as pltpu

# ----------------------------- model sizes (small, forward-consistent) -------
ACTION_SIZE = 8          # output_size
STOCH = 16               # stochastic_size
DETER = 128              # deterministic_size
HIDDEN = 128             # hidden_size
ACTION_HIDDEN = 128
VALUE_HIDDEN = 128
REWARD_HIDDEN = 128
EMBED = 1280             # encoder_embed_size (hard-coded in the module)
FEATURE = STOCH + DETER  # 144

C_IN, C1, C2 = 4, 16, 32  # encoder conv channels
IMG = 16                  # spatial size of the observation

BPAD = 8                  # batch padded to a full sublane group
PREV_IN = 128             # padded width of the [stoch | action | 0] input slab
SLAB_W = 256              # single lane-dense output slab width

# output slab layout (lane offsets)
OFF_DETER = 0                          # 128 wide
OFF_STOCH = OFF_DETER + DETER          # 128
OFF_MEAN = OFF_STOCH + STOCH           # 144
OFF_STD = OFF_MEAN + STOCH             # 160
OFF_LOGITS = OFF_STD + STOCH           # 176
OFF_PROBS = OFF_LOGITS + ACTION_SIZE   # 184
OFF_ACTION = OFF_PROBS + ACTION_SIZE   # 192
OFF_VALUE = OFF_ACTION + ACTION_SIZE   # 200
OFF_REWARD = OFF_VALUE + 1             # 201
SLAB_USED = OFF_REWARD + 1             # 202


# ----------------------------- in-kernel math helpers -------------------------
def _elu(x):
    # exp(min(x,0)) avoids spurious inf on the untaken branch.
    # TODO(synk): jnp.expm1 would be slightly more precise near 0.
    return jnp.where(x > 0.0, x, jnp.exp(jnp.minimum(x, 0.0)) - 1.0)


def _softplus(x):
    # numerically-stable softplus built only from exp/log (robust Mosaic lowering)
    return jnp.maximum(x, 0.0) + jnp.log(1.0 + jnp.exp(-jnp.abs(x)))


def _vspec():
    return pl.BlockSpec(memory_space=pltpu.MemorySpace.VMEM)


# ----------------------------- the single fused kernel ------------------------
def _fused_forward_kernel(
        # data
        obs_ref, eps_ref, gum_ref, prev_in_ref, prev_deter_ref,
        # encoder params
        s1_ref, sr_ref, s2_ref, mpool_ref,
        w1_ref, b1_ref, wr1_ref, br1_ref, wr2_ref, br2_ref,
        w2_ref, b2_ref, wp_ref, bp_ref,
        # RSSM params
        w_in_ref, b_in_ref, wi_ref, bi_ref, wh_ref, bh_ref,
        wpd_ref, wpe_ref, bp1_ref, wp2_ref, bp2_ref,
        # heads params
        hw1_ref, hb1_ref, hw2_ref, hb2_ref, hw3_ref, hb3_ref, hw4_ref, hb4_ref,
        # output
        o_ref):
    f32, bf16 = jnp.float32, jnp.bfloat16
    D, H = DETER, ACTION_HIDDEN

    def conv3x3(x_bf16, s_ref, w_ref, b_ref):
        # 9 tap gathers (S_t @ x) concatenated along lanes -> one (R, 9C)@(9C, Cout) GEMM.
        # TODO(synk): the gathers could become pltpu.roll sublane shifts + edge masks.
        taps = [jnp.dot(s_ref[t], x_bf16, preferred_element_type=f32) for t in range(9)]
        cols = jnp.concatenate(taps, axis=1).astype(bf16)       # (R_out, 9*C_in)
        return jnp.dot(cols, w_ref[...], preferred_element_type=f32) + b_ref[...]

    # ---------------- observation encoder (stand-in resnet encoder) ----------------
    x0 = obs_ref[...]                                                        # (B*256, 4) bf16
    x1 = jnp.maximum(conv3x3(x0, s1_ref, w1_ref, b1_ref), 0.0)               # conv1 s2 -> (B*64, 16)
    h = jnp.maximum(conv3x3(x1.astype(bf16), sr_ref, wr1_ref, br1_ref), 0.0)
    h = conv3x3(h.astype(bf16), sr_ref, wr2_ref, br2_ref)
    x1 = jnp.maximum(h + x1, 0.0)                                            # residual add + relu
    x2 = jnp.maximum(conv3x3(x1.astype(bf16), s2_ref, w2_ref, b2_ref), 0.0)  # conv2 s2 -> (B*16, 32)

    # global mean pool (+ batch pad to 8 rows) as one matmul, then projection to 1280
    pooled = jnp.dot(mpool_ref[...], x2.astype(bf16), preferred_element_type=f32)     # (8, 32)
    embed = jnp.maximum(
        jnp.dot(pooled.astype(bf16), wp_ref[...], preferred_element_type=f32) + bp_ref[...],
        0.0)                                                                 # (8, 1280)

    # ---------------- RSSM posterior (representation) step ----------------
    x = _elu(jnp.dot(prev_in_ref[...].astype(bf16), w_in_ref[...],
                     preferred_element_type=f32) + b_in_ref[...])            # rnn input model
    h_prev = prev_deter_ref[...]                                             # (8, 128)

    # GRUCell (PyTorch gate order r, z, n)
    gi = jnp.dot(x.astype(bf16), wi_ref[...], preferred_element_type=f32) + bi_ref[...]
    gh = jnp.dot(h_prev.astype(bf16), wh_ref[...], preferred_element_type=f32) + bh_ref[...]
    r = jax.nn.sigmoid(gi[:, 0:D] + gh[:, 0:D])
    z = jax.nn.sigmoid(gi[:, D:2 * D] + gh[:, D:2 * D])
    n = jnp.tanh(gi[:, 2 * D:3 * D] + r * gh[:, 2 * D:3 * D])
    deter = (1.0 - z) * n + z * h_prev                                       # (8, 128)

    # posterior head on concat(deter, obs_embed) as a split GEMM
    hq = _elu(jnp.dot(deter.astype(bf16), wpd_ref[...], preferred_element_type=f32)
              + jnp.dot(embed.astype(bf16), wpe_ref[...], preferred_element_type=f32)
              + bp1_ref[...])
    stats = jnp.dot(hq.astype(bf16), wp2_ref[...], preferred_element_type=f32) + bp2_ref[...]
    mean = stats[:, 0:STOCH]
    std = _softplus(stats[:, STOCH:2 * STOCH]) + 0.1
    stoch = mean + std * eps_ref[...]                                        # (8, 16)

    # ---------------- actor / value / reward heads (stacked 384-wide GEMMs) ----------------
    feat = jnp.concatenate([stoch, deter], axis=1).astype(bf16)              # (8, 144)
    h1 = _elu(jnp.dot(feat, hw1_ref[...], preferred_element_type=f32) + hb1_ref[...])            # (8, 384)
    h2 = _elu(jnp.dot(h1.astype(bf16), hw2_ref[...], preferred_element_type=f32) + hb2_ref[...]) # (8, 384)
    h3 = jnp.dot(h2.astype(bf16), hw3_ref[...], preferred_element_type=f32) + hb3_ref[...]       # (8, 256)
    a3 = _elu(h3[:, 0:H])                                                    # actor hidden-3 (ELU)
    vr = h3[:, H:H + 2]                                                      # [value | reward] (no act)
    logits = jnp.dot(a3.astype(bf16), hw4_ref[...], preferred_element_type=f32) + hb4_ref[...]   # (8, 8)

    # ---------------- one_hot action sampling (softmax + Gumbel-max), in-kernel ----------------
    lmax = jnp.max(logits, axis=-1, keepdims=True)
    ex = jnp.exp(logits - lmax)
    probs = ex / jnp.sum(ex, axis=-1, keepdims=True)
    pert = logits + gum_ref[...]                                             # Gumbel-max == categorical
    sample = jnp.where(pert >= jnp.max(pert, axis=-1, keepdims=True), 1.0, 0.0)
    # straight-through: action = sample + probs - stop_gradient(probs); forward value == sample
    action = sample

    # ---------------- single lane-dense (8, 256) store ----------------
    zpad = jnp.zeros((BPAD, SLAB_W - SLAB_USED), f32)
    o_ref[...] = jnp.concatenate(
        [deter, stoch, mean, std, logits, probs, action, vr, zpad], axis=1)


# ----------------------------- full forward -----------------------------------
def trading_model_forward(params, observation, rng):
    B = observation.shape[0]
    enc, rssm, heads = params["enc"], params["rssm"], params["heads"]

    # only wrapper-side layout op: NCHW -> (B*H*W, C_IN) rows for the in-kernel conv taps
    obs_rows = observation.transpose(0, 2, 3, 1).reshape(B * IMG * IMG, C_IN).astype(jnp.bfloat16)

    k_prior, k_post, k_action = jax.random.split(rng, 3)
    del k_prior  # prior (transition) sample is discarded by forward(); key unused on purpose
    eps = jax.random.normal(k_post, (BPAD, STOCH), jnp.float32)        # pad rows are sliced away
    gumbel = jax.random.gumbel(k_action, (BPAD, ACTION_SIZE), jnp.float32)

    # default forward path: prev_action / prev_state are zeros
    prev_in = jnp.zeros((BPAD, PREV_IN), jnp.float32)                  # [stoch | action | 0]
    prev_deter = jnp.zeros((BPAD, DETER), jnp.float32)

    args = ([obs_rows, eps, gumbel, prev_in, prev_deter]
            + [enc[k] for k in ("s1", "sr", "s2", "mpool", "w1", "b1", "wr1", "br1",
                                "wr2", "br2", "w2", "b2", "wp", "bp")]
            + [rssm[k] for k in ("w_in", "b_in", "wi", "bi", "wh", "bh",
                                 "wpd", "wpe", "bp1", "wp2", "bp2")]
            + [heads[k] for k in ("w1", "b1", "w2", "b2", "w3", "b3", "w4", "b4")])

    slab = pl.pallas_call(
        _fused_forward_kernel,
        in_specs=[_vspec() for _ in args],
        out_specs=_vspec(),
        out_shape=jax.ShapeDtypeStruct((BPAD, SLAB_W), jnp.float32),
    )(*args)

    # slice the single lane-dense slab back into the module's outputs
    deter = slab[:B, OFF_DETER:OFF_DETER + DETER]
    stoch = slab[:B, OFF_STOCH:OFF_STOCH + STOCH]
    mean = slab[:B, OFF_MEAN:OFF_MEAN + STOCH]
    std = slab[:B, OFF_STD:OFF_STD + STOCH]
    logits = slab[:B, OFF_LOGITS:OFF_LOGITS + ACTION_SIZE]
    probs = slab[:B, OFF_PROBS:OFF_PROBS + ACTION_SIZE]
    action = slab[:B, OFF_ACTION:OFF_ACTION + ACTION_SIZE]
    value = slab[:B, OFF_VALUE:OFF_VALUE + 1]
    reward = slab[:B, OFF_REWARD:OFF_REWARD + 1]

    state = {"mean": mean, "std": std, "stoch": stoch, "deter": deter}
    action_distribution = {"logits": logits, "probs": probs}
    return action, action_distribution, value, reward, state


# ----------------------------- deterministic parameter init -------------------
def _init_linear(key, fan_in, fan_out):
    kw, kb = jax.random.split(key)
    scale = 1.0 / np.sqrt(float(fan_in))
    w = jax.random.uniform(kw, (fan_in, fan_out), jnp.float32, -scale, scale)
    b = jax.random.uniform(kb, (fan_out,), jnp.float32, -scale, scale)
    return w, b


def _make_select(batch, h_in, w_in, stride):
    """0/1 selection matrices S[t] (9, R_out, R_in) for a 3x3 SAME conv."""
    h_out = -(-h_in // stride)
    w_out = -(-w_in // stride)
    pad_h = max((h_out - 1) * stride + 3 - h_in, 0)
    pad_w = max((w_out - 1) * stride + 3 - w_in, 0)
    ph, pw = pad_h // 2, pad_w // 2
    s = np.zeros((9, batch * h_out * w_out, batch * h_in * w_in), np.float32)
    for dh in range(3):
        for dw in range(3):
            t = dh * 3 + dw
            for n in range(batch):
                for oh in range(h_out):
                    for ow in range(w_out):
                        ih = oh * stride + dh - ph
                        iw = ow * stride + dw - pw
                        if 0 <= ih < h_in and 0 <= iw < w_in:
                            ro = (n * h_out + oh) * w_out + ow
                            ri = (n * h_in + ih) * w_in + iw
                            s[t, ro, ri] = 1.0
    return s


def init_params(key, batch=2):
    keys = iter(jax.random.split(key, 64))
    bf16, f32 = jnp.bfloat16, jnp.float32

    # ------------------ encoder ------------------
    w1, b1 = _init_linear(next(keys), C_IN * 9, C1)       # conv1: rows ordered (tap, channel)
    wr1, br1 = _init_linear(next(keys), C1 * 9, C1)
    wr2, br2 = _init_linear(next(keys), C1 * 9, C1)
    w2, b2 = _init_linear(next(keys), C1 * 9, C2)
    wp, bp = _init_linear(next(keys), C2, EMBED)

    s1 = _make_select(batch, IMG, IMG, 2)                  # (9, B*64, B*256)
    sr = _make_select(batch, 8, 8, 1)                      # (9, B*64, B*64)
    s2 = _make_select(batch, 8, 8, 2)                      # (9, B*16, B*64)
    mpool = np.zeros((BPAD, batch * 16), np.float32)
    for n in range(batch):
        mpool[n, n * 16:(n + 1) * 16] = 1.0 / 16.0         # mean pool + batch pad to 8 rows

    enc = dict(
        s1=jnp.asarray(s1, bf16), sr=jnp.asarray(sr, bf16), s2=jnp.asarray(s2, bf16),
        mpool=jnp.asarray(mpool, bf16),
        w1=w1.astype(bf16), b1=b1.reshape(1, -1),
        wr1=wr1.astype(bf16), br1=br1.reshape(1, -1),
        wr2=wr2.astype(bf16), br2=br2.reshape(1, -1),
        w2=w2.astype(bf16), b2=b2.reshape(1, -1),
        wp=wp.astype(bf16), bp=bp.reshape(1, -1),
    )

    # ------------------ RSSM (representation / transition core) ------------------
    w_in, b_in = _init_linear(next(keys), STOCH + ACTION_SIZE, HIDDEN)
    w_in_pad = jnp.zeros((PREV_IN, HIDDEN), f32).at[:STOCH + ACTION_SIZE].set(w_in)
    gw_i, gb_i = _init_linear(next(keys), HIDDEN, 3 * DETER)
    gw_h, gb_h = _init_linear(next(keys), DETER, 3 * DETER)
    pw1, pb1 = _init_linear(next(keys), DETER + EMBED, HIDDEN)
    pw2, pb2 = _init_linear(next(keys), HIDDEN, 2 * STOCH)

    rssm = dict(
        w_in=w_in_pad.astype(bf16), b_in=b_in.reshape(1, -1),
        wi=gw_i.astype(bf16), bi=gb_i.reshape(1, -1),
        wh=gw_h.astype(bf16), bh=gb_h.reshape(1, -1),
        wpd=pw1[:DETER].astype(bf16), wpe=pw1[DETER:].astype(bf16), bp1=pb1.reshape(1, -1),
        wp2=pw2.astype(bf16), bp2=pb2.reshape(1, -1),
    )

    # ------------------ heads (actor 4 layers, value/reward 3 layers) ------------------
    aw1, ab1 = _init_linear(next(keys), FEATURE, ACTION_HIDDEN)
    aw2, ab2 = _init_linear(next(keys), ACTION_HIDDEN, ACTION_HIDDEN)
    aw3, ab3 = _init_linear(next(keys), ACTION_HIDDEN, ACTION_HIDDEN)
    aw4, ab4 = _init_linear(next(keys), ACTION_HIDDEN, ACTION_SIZE)
    vw1, vb1 = _init_linear(next(keys), FEATURE, VALUE_HIDDEN)
    vw2, vb2 = _init_linear(next(keys), VALUE_HIDDEN, VALUE_HIDDEN)
    vw3, vb3 = _init_linear(next(keys), VALUE_HIDDEN, 1)
    rw1, rb1 = _init_linear(next(keys), FEATURE, REWARD_HIDDEN)
    rw2, rb2 = _init_linear(next(keys), REWARD_HIDDEN, REWARD_HIDDEN)
    rw3, rb3 = _init_linear(next(keys), REWARD_HIDDEN, 1)

    H = ACTION_HIDDEN
    w1s = jnp.concatenate([aw1, vw1, rw1], axis=1)                       # (144, 384)
    b1s = jnp.concatenate([ab1, vb1, rb1]).reshape(1, -1)
    # NOTE(v5e): w2s is block-diagonal; accepted as-is since the kernel is latency-bound.
    w2s = jnp.zeros((3 * H, 3 * H), f32)
    w2s = w2s.at[0:H, 0:H].set(aw2).at[H:2 * H, H:2 * H].set(vw2).at[2 * H:3 * H, 2 * H:3 * H].set(rw2)
    b2s = jnp.concatenate([ab2, vb2, rb2]).reshape(1, -1)
    w3s = jnp.zeros((3 * H, 2 * H), f32)
    w3s = w3s.at[0:H, 0:H].set(aw3).at[H:2 * H, H:H + 1].set(vw3).at[2 * H:3 * H, H + 1:H + 2].set(rw3)
    b3s = jnp.zeros((1, 2 * H), f32)
    b3s = b3s.at[0, 0:H].set(ab3).at[0, H].set(vb3[0]).at[0, H + 1].set(rb3[0])

    heads = dict(
        w1=w1s.astype(bf16), b1=b1s,
        w2=w2s.astype(bf16), b2=b2s,
        w3=w3s.astype(bf16), b3=b3s,
        w4=aw4.astype(bf16), b4=ab4.reshape(1, -1),
    )

    return {"enc": enc, "rssm": rssm, "heads": heads}


# ----------------------------- driver -----------------------------------------
if __name__ == "__main__":
    root = jax.random.PRNGKey(0)
    k_params, k_obs, k_fwd = jax.random.split(root, 3)

    params = init_params(k_params, batch=2)
    observation = jax.random.normal(k_obs, (2, C_IN, IMG, IMG), jnp.float32)  # NCHW

    fwd = jax.jit(trading_model_forward)
    action, action_dist, value, reward, state = fwd(params, observation, k_fwd)
    jax.block_until_ready((action, action_dist, value, reward, state))

    assert action.shape == (2, ACTION_SIZE)
    assert action_dist["logits"].shape == (2, ACTION_SIZE)
    assert value.shape == (2, 1) and reward.shape == (2, 1)
    assert state["stoch"].shape == (2, STOCH) and state["deter"].shape == (2, DETER)
    # each action row is a valid one-hot sample; probs must sum to 1
    assert bool(jnp.all(jnp.sum(action, axis=-1) == 1.0))
    assert bool(jnp.allclose(jnp.sum(action_dist["probs"], axis=-1), 1.0, atol=1e-5))
    assert bool(jnp.all(jnp.isfinite(action))) and bool(jnp.all(jnp.isfinite(value)))
    assert bool(jnp.all(state["std"] > 0.1 - 1e-6))
    print("KERNEL_OK")
</pallas_src>

<mosaic_0001>
module attributes {stable_mosaic.version = 11 : i64} {
  func.func @_fused_forward_kernel(%arg0: memref<512x4xbf16, #tpu.memory_space<vmem>>, %arg1: memref<8x16xf32, #tpu.memory_space<vmem>>, %arg2: memref<8x8xf32, #tpu.memory_space<vmem>>, %arg3: memref<8x128xf32, #tpu.memory_space<vmem>>, %arg4: memref<8x128xf32, #tpu.memory_space<vmem>>, %arg5: memref<9x128x512xbf16, #tpu.memory_space<vmem>>, %arg6: memref<9x128x128xbf16, #tpu.memory_space<vmem>>, %arg7: memref<9x32x128xbf16, #tpu.memory_space<vmem>>, %arg8: memref<8x32xbf16, #tpu.memory_space<vmem>>, %arg9: memref<36x16xbf16, #tpu.memory_space<vmem>>, %arg10: memref<1x16xf32, #tpu.memory_space<vmem>>, %arg11: memref<144x16xbf16, #tpu.memory_space<vmem>>, %arg12: memref<1x16xf32, #tpu.memory_space<vmem>>, %arg13: memref<144x16xbf16, #tpu.memory_space<vmem>>, %arg14: memref<1x16xf32, #tpu.memory_space<vmem>>, %arg15: memref<144x32xbf16, #tpu.memory_space<vmem>>, %arg16: memref<1x32xf32, #tpu.memory_space<vmem>>, %arg17: memref<32x1280xbf16, #tpu.memory_space<vmem>>, %arg18: memref<1x1280xf32, #tpu.memory_space<vmem>>, %arg19: memref<128x128xbf16, #tpu.memory_space<vmem>>, %arg20: memref<1x128xf32, #tpu.memory_space<vmem>>, %arg21: memref<128x384xbf16, #tpu.memory_space<vmem>>, %arg22: memref<1x384xf32, #tpu.memory_space<vmem>>, %arg23: memref<128x384xbf16, #tpu.memory_space<vmem>>, %arg24: memref<1x384xf32, #tpu.memory_space<vmem>>, %arg25: memref<128x128xbf16, #tpu.memory_space<vmem>>, %arg26: memref<1280x128xbf16, #tpu.memory_space<vmem>>, %arg27: memref<1x128xf32, #tpu.memory_space<vmem>>, %arg28: memref<128x32xbf16, #tpu.memory_space<vmem>>, %arg29: memref<1x32xf32, #tpu.memory_space<vmem>>, %arg30: memref<144x384xbf16, #tpu.memory_space<vmem>>, %arg31: memref<1x384xf32, #tpu.memory_space<vmem>>, %arg32: memref<384x384xbf16, #tpu.memory_space<vmem>>, %arg33: memref<1x384xf32, #tpu.memory_space<vmem>>, %arg34: memref<384x256xbf16, #tpu.memory_space<vmem>>, %arg35: memref<1x256xf32, #tpu.memory_space<vmem>>, %arg36: memref<128x8xbf16, #tpu.memory_space<vmem>>, %arg37: memref<1x8xf32, #tpu.memory_space<vmem>>, %arg38: memref<8x256xf32, #tpu.memory_space<vmem>>) attributes {dimension_semantics = [], scalar_prefetch = 0 : i64, scratch_operands = 0 : i64, tpu.core_type = #tpu.core_type<tc>} {
    %c0 = arith.constant 0 : index
    %c0_0 = arith.constant 0 : index
    %0 = vector.load %arg0[%c0, %c0_0] : memref<512x4xbf16, #tpu.memory_space<vmem>>, vector<512x4xbf16>
    %c0_1 = arith.constant 0 : index
    %c0_2 = arith.constant 0 : index
    %c0_3 = arith.constant 0 : index
    %1 = vector.load %arg5[%c0_1, %c0_2, %c0_3] : memref<9x128x512xbf16, #tpu.memory_space<vmem>>, vector<1x128x512xbf16>
    %2 = vector.shape_cast %1 : vector<1x128x512xbf16> to vector<128x512xbf16>
    %cst = arith.constant dense<0.000000e+00> : vector<128x4xf32>
    %3 = tpu.matmul %2, %0, %cst {dimension_numbers = #tpu.dot_dimension_numbers<[1], [0], [0], [1], [0, 0, 1, 1], [], []>} : vector<128x512xbf16>, vector<512x4xbf16>, vector<128x4xf32> -> vector<128x4xf32>
    %c1 = arith.constant 1 : index
    %c0_4 = arith.constant 0 : index
    %c0_5 = arith.constant 0 : index
    %4 = vector.load %arg5[%c1, %c0_4, %c0_5] : memref<9x128x512xbf16, #tpu.memory_space<vmem>>, vector<1x128x512xbf16>
    %5 = vector.shape_cast %4 : vector<1x128x512xbf16> to vector<128x512xbf16>
    %cst_6 = arith.constant dense<0.000000e+00> : vector<128x4xf32>
    %6 = tpu.matmul %5, %0, %cst_6 {dimension_numbers = #tpu.dot_dimension_numbers<[1], [0], [0], [1], [0, 0, 1, 1], [], []>} : vector<128x512xbf16>, vector<512x4xbf16>, vector<128x4xf32> -> vector<128x4xf32>
    %c2 = arith.constant 2 : index
    %c0_7 = arith.constant 0 : index
    %c0_8 = arith.constant 0 : index
    %7 = vector.load %arg5[%c2, %c0_7, %c0_8] : memref<9x128x512xbf16, #tpu.memory_space<vmem>>, vector<1x128x512xbf16>
    %8 = vector.shape_cast %7 : vector<1x128x512xbf16> to vector<128x512xbf16>
    %cst_9 = arith.constant dense<0.000000e+00> : vector<128x4xf32>
    %9 = tpu.matmul %8, %0, %cst_9 {dimension_numbers = #tpu.dot_dimension_numbers<[1], [0], [0], [1], [0, 0, 1, 1], [], []>} : vector<128x512xbf16>, vector<512x4xbf16>, vector<128x4xf32> -> vector<128x4xf32>
    %c3 = arith.constant 3 : index
    %c0_10 = arith.constant 0 : index
    %c0_11 = arith.constant 0 : index
    %10 = vector.load %arg5[%c3, %c0_10, %c0_11] : memref<9x128x512xbf16, #tpu.memory_space<vmem>>, vector<1x128x512xbf16>
    %11 = vector.shape_cast %10 : vector<1x128x512xbf16> to vector<128x512xbf16>
    %cst_12 = arith.constant dense<0.000000e+00> : vector<128x4xf32>
    %12 = tpu.matmul %11, %0, %cst_12 {dimension_numbers = #tpu.dot_dimension_numbers<[1], [0], [0], [1], [0, 0, 1, 1], [], []>} : vector<128x512xbf16>, vector<512x4xbf16>, vector<128x4xf32> -> vector<128x4xf32>
    %c4 = arith.constant 4 : index
    %c0_13 = arith.constant 0 : index
    %c0_14 = arith.constant 0 : index
    %13 = vector.load %arg5[%c4, %c0_13, %c0_14] : memref<9x128x512xbf16, #tpu.memory_space<vmem>>, vector<1x128x512xbf16>
    %14 = vector.shape_cast %13 : vector<1x128x512xbf16> to vector<128x512xbf16>
    %cst_15 = arith.constant dense<0.000000e+00> : vector<128x4xf32>
    %15 = tpu.matmul %14, %0, %cst_15 {dimension_numbers = #tpu.dot_dimension_numbers<[1], [0], [0], [1], [0, 0, 1, 1], [], []>} : vector<128x512xbf16>, vector<512x4xbf16>, vector<128x4xf32> -> vector<128x4xf32>
    %c5 = arith.constant 5 : index
    %c0_16 = arith.constant 0 : index
    %c0_17 = arith.constant 0 : index
    %16 = vector.load %arg5[%c5, %c0_16, %c0_17] : memref<9x128x512xbf16, #tpu.memory_space<vmem>>, vector<1x128x512xbf16>
    %17 = vector.shape_cast %16 : vector<1x128x512xbf16> to vector<128x512xbf16>
    %cst_18 = arith.constant dense<0.000000e+00> : vector<128x4xf32>
    %18 = tpu.matmul %17, %0, %cst_18 {dimension_numbers = #tpu.dot_dimension_numbers<[1], [0], [0], [1], [0, 0, 1, 1], [], []>} : vector<128x512xbf16>, vector<512x4xbf16>, vector<128x4xf32> -> vector<128x4xf32>
    %c6 = arith.constant 6 : index
    %c0_19 = arith.constant 0 : index
    %c0_20 = arith.constant 0 : index
    %19 = vector.load %arg5[%c6, %c0_19, %c0_20] : memref<9x128x512xbf16, #tpu.memory_space<vmem>>, vector<1x128x512xbf16>
    %20 = vector.shape_cast %19 : vector<1x128x512xbf16> to vector<128x512xbf16>
    %cst_21 = arith.constant dense<0.000000e+00> : vector<128x4xf32>
    %21 = tpu.matmul %20, %0, %cst_21 {dimension_numbers = #tpu.dot_dimension_numbers<[1], [0], [0], [1], [0, 0, 1, 1], [], []>} : vector<128x512xbf16>, vector<512x4xbf16>, vector<128x4xf32> -> vector<128x4xf32>
    %c7 = arith.constant 7 : index
    %c0_22 = arith.constant 0 : index
    %c0_23 = arith.constant 0 : index
    %22 = vector.load %arg5[%c7, %c0_22, %c0_23] : memref<9x128x512xbf16, #tpu.memory_space<vmem>>, vector<1x128x512xbf16>
    %23 = vector.shape_cast %22 : vector<1x128x512xbf16> to vector<128x512xbf16>
    %cst_24 = arith.constant dense<0.000000e+00> : vector<128x4xf32>
    %24 = tpu.matmul %23, %0, %cst_24 {dimension_numbers = #tpu.dot_dimension_numbers<[1], [0], [0], [1], [0, 0, 1, 1], [], []>} : vector<128x512xbf16>, vector<512x4xbf16>, vector<128x4xf32> -> vector<128x4xf32>
    %c8 = arith.constant 8 : index
    %c0_25 = arith.constant 0 : index
    %c0_26 = arith.constant 0 : index
    %25 = vector.load %arg5[%c8, %c0_25, %c0_26] : memref<9x128x512xbf16, #tpu.memory_space<vmem>>, vector<1x128x512xbf16>
    %26 = vector.shape_cast %25 : vector<1x128x512xbf16> to vector<128x512xbf16>
    %cst_27 = arith.constant dense<0.000000e+00> : vector<128x4xf32>
    %27 = tpu.matmul %26, %0, %cst_27 {dimension_numbers = #tpu.dot_dimension_numbers<[1], [0], [0], [1], [0, 0, 1, 1], [], []>} : vector<128x512xbf16>, vector<512x4xbf16>, vector<128x4xf32> -> vector<128x4xf32>
    %28 = tpu.concatenate %3, %6, %9, %12, %15, %18, %21, %24, %27 in 1 : vector<128x4xf32>, vector<128x4xf32>, vector<128x4xf32>, vector<128x4xf32>, vector<128x4xf32>, vector<128x4xf32>, vector<128x4xf32>, vector<128x4xf32>, vector<128x4xf32> -> vector<128x36xf32>
    %29 = arith.truncf %28 : vector<128x36xf32> to vector<128x36xbf16>
    %c0_28 = arith.constant 0 : index
    %c0_29 = arith.constant 0 : index
    %30 = vector.load %arg9[%c0_28, %c0_29] : memref<36x16xbf16, #tpu.memory_space<vmem>>, vector<36x16xbf16>
    %cst_30 = arith.constant dense<0.000000e+00> : vector<128x16xf32>
    %31 = tpu.matmul %29, %30, %cst_30 {dimension_numbers = #tpu.dot_dimension_numbers<[1], [0], [0], [1], [0, 0, 1, 1], [], []>} : vector<128x36xbf16>, vector<36x16xbf16>, vector<128x16xf32> -> vector<128x16xf32>
    %c0_31 = arith.constant 0 : index
    %c0_32 = arith.constant 0 : index
    %32 = vector.load %arg10[%c0_31, %c0_32] : memref<1x16xf32, #tpu.memory_space<vmem>>, vector<1x16xf32>
    %33 = vector.broadcast %32 : vector<1x16xf32> to vector<128x16xf32>
    %34 = arith.addf %31, %33 : vector<128x16xf32>
    %cst_33 = arith.constant 0.000000e+00 : f32
    %35 = vector.broadcast %cst_33 : f32 to vector<128x16xf32>
    %36 = arith.maximumf %34, %35 : vector<128x16xf32>
    %37 = arith.truncf %36 : vector<128x16xf32> to vector<128x16xbf16>
    %c0_34 = arith.constant 0 : index
    %c0_35 = arith.constant 0 : index
    %c0_36 = arith.constant 0 : index
    %38 = vector.load %arg6[%c0_34, %c0_35, %c0_36] : memref<9x128x128xbf16, #tpu.memory_space<vmem>>, vector<1x128x128xbf16>
    %39 = vector.shape_cast %38 : vector<1x128x128xbf16> to vector<128x128xbf16>
    %cst_37 = arith.constant dense<0.000000e+00> : vector<128x16xf32>
    %40 = tpu.matmul %39, %37, %cst_37 {dimension_numbers = #tpu.dot_dimension_numbers<[1], [0], [0], [1], [0, 0, 1, 1], [], []>} : vector<128x128xbf16>, vector<128x16xbf16>, vector<128x16xf32> -> vector<128x16xf32>
    %c1_38 = arith.constant 1 : index
    %c0_39 = arith.constant 0 : index
    %c0_40 = arith.constant 0 : index
    %41 = vector.load %arg6[%c1_38, %c0_39, %c0_40] : memref<9x128x128xbf16, #tpu.memory_space<vmem>>, vector<1x128x128xbf16>
    %42 = vector.shape_cast %41 : vector<1x128x128xbf16> to vector<128x128xbf16>
    %cst_41 = arith.constant dense<0.000000e+00> : vector<128x16xf32>
    %43 = tpu.matmul %42, %37, %cst_41 {dimension_numbers = #tpu.dot_dimension_numbers<[1], [0], [0], [1], [0, 0, 1, 1], [], []>} : vector<128x128xbf16>, vector<128x16xbf16>, vector<128x16xf32> -> vector<128x16xf32>
    %c2_42 = arith.constant 2 : index
    %c0_43 = arith.constant 0 : index
    %c0_44 = arith.constant 0 : index
    %44 = vector.load %arg6[%c2_42, %c0_43, %c0_44] : memref<9x128x128xbf16, #tpu.memory_space<vmem>>, vector<1x128x128xbf16>
    %45 = vector.shape_cast %44 : vector<1x128x128xbf16> to vector<128x128xbf16>
    %cst_45 = arith.constant dense<0.000000e+00> : vector<128x16xf32>
    %46 = tpu.matmul %45, %37, %cst_45 {dimension_numbers = #tpu.dot_dimension_numbers<[1], [0], [0], [1], [0, 0, 1, 1], [], []>} : vector<128x128xbf16>, vector<128x16xbf16>, vector<128x16xf32> -> vector<128x16xf32>
    %c3_46 = arith.constant 3 : index
    %c0_47 = arith.constant 0 : index
    %c0_48 = arith.constant 0 : index
    %47 = vector.load %arg6[%c3_46, %c0_47, %c0_48] : memref<9x128x128xbf16, #tpu.memory_space<vmem>>, vector<1x128x128xbf16>
    %48 = vector.shape_cast %47 : vector<1x128x128xbf16> to vector<128x128xbf16>
    %cst_49 = arith.constant dense<0.000000e+00> : vector<128x16xf32>
    %49 = tpu.matmul %48, %37, %cst_49 {dimension_numbers = #tpu.dot_dimension_numbers<[1], [0], [0], [1], [0, 0, 1, 1], [], []>} : vector<128x128xbf16>, vector<128x16xbf16>, vector<128x16xf32> -> vector<128x16xf32>
    %c4_50 = arith.constant 4 : index
    %c0_51 = arith.constant 0 : index
    %c0_52 = arith.constant 0 : index
    %50 = vector.load %arg6[%c4_50, %c0_51, %c0_52] : memref<9x128x128xbf16, #tpu.memory_space<vmem>>, vector<1x128x128xbf16>
    %51 = vector.shape_cast %50 : vector<1x128x128xbf16> to vector<128x128xbf16>
    %cst_53 = arith.constant dense<0.000000e+00> : vector<128x16xf32>
    %52 = tpu.matmul %51, %37, %cst_53 {dimension_numbers = #tpu.dot_dimension_numbers<[1], [0], [0], [1], [0, 0, 1, 1], [], []>} : vector<128x128xbf16>, vector<128x16xbf16>, vector<128x16xf32> -> vector<128x16xf32>
    %c5_54 = arith.constant 5 : index
    %c0_55 = arith.constant 0 : index
    %c0_56 = arith.constant 0 : index
    %53 = vector.load %arg6[%c5_54, %c0_55, %c0_56] : memref<9x128x128xbf16, #tpu.memory_space<vmem>>, vector<1x128x128xbf16>
    %54 = vector.shape_cast %53 : vector<1x128x128xbf16> to vector<128x128xbf16>
    %cst_57 = arith.constant dense<0.000000e+00> : vector<128x16xf32>
    %55 = tpu.matmul %54, %37, %cst_57 {dimension_numbers = #tpu.dot_dimension_numbers<[1], [0], [0], [1], [0, 0, 1, 1], [], []>} : vector<128x128xbf16>, vector<128x16xbf16>, vector<128x16xf32> -> vector<128x16xf32>
    %c6_58 = arith.constant 6 : index
    %c0_59 = arith.constant 0 : index
    %c0_60 = arith.constant 0 : index
    %56 = vector.load %arg6[%c6_58, %c0_59, %c0_60] : memref<9x128x128xbf16, #tpu.memory_space<vmem>>, vector<1x128x128xbf16>
    %57 = vector.shape_cast %56 : vector<1x128x128xbf16> to vector<128x128xbf16>
    %cst_61 = arith.constant dense<0.000000e+00> : vector<128x16xf32>
    %58 = tpu.matmul %57, %37, %cst_61 {dimension_numbers = #tpu.dot_dimension_numbers<[1], [0], [0], [1], [0, 0, 1, 1], [], []>} : vector<128x128xbf16>, vector<128x16xbf16>, vector<128x16xf32> -> vector<128x16xf32>
    %c7_62 = arith.constant 7 : index
    %c0_63 = arith.constant 0 : index
    %c0_64 = arith.constant 0 : index
    %59 = vector.load %arg6[%c7_62, %c0_63, %c0_64] : memref<9x128x128xbf16, #tpu.memory_space<vmem>>, vector<1x128x128xbf16>
    %60 = vector.shape_cast %59 : vector<1x128x128xbf16> to vector<128x128xbf16>
    %cst_65 = arith.constant dense<0.000000e+00> : vector<128x16xf32>
    %61 = tpu.matmul %60, %37, %cst_65 {dimension_numbers = #tpu.dot_dimension_numbers<[1], [0], [0], [1], [0, 0, 1, 1], [], []>} : vector<128x128xbf16>, vector<128x16xbf16>, vector<128x16xf32> -> vector<128x16xf32>
    %c8_66 = arith.constant 8 : index
    %c0_67 = arith.constant 0 : index
    %c0_68 = arith.constant 0 : index
    %62 = vector.load %arg6[%c8_66, %c0_67, %c0_68] : memref<9x128x128xbf16, #tpu.memory_space<vmem>>, vector<1x128x128xbf16>
    %63 = vector.shape_cast %62 : vector<1x128x128xbf16> to vector<128x128xbf16>
    %cst_69 = arith.constant dense<0.000000e+00> : vector<128x16xf32>
    %64 = tpu.matmul %63, %37, %cst_69 {dimension_numbers = #tpu.dot_dimension_numbers<[1], [0], [0], [1], [0, 0, 1, 1], [], []>} : vector<128x128xbf16>, vector<128x16xbf16>, vector<128x16xf32> -> vector<128x16xf32>
    %65 = tpu.concatenate %40, %43, %46, %49, %52, %55, %58, %61, %64 in 1 : vector<128x16xf32>, vector<128x16xf32>, vector<128x16xf32>, vector<128x16xf32>, vector<128x16xf32>, vector<128x16xf32>, vector<128x16xf32>, vector<128x16xf32>, vector<128x16xf32> -> vector<128x144xf32>
    %66 = arith.truncf %65 : vector<128x144xf32> to vector<128x144xbf16>
    %c0_70 = arith.constant 0 : index
    %c0_71 = arith.constant 0 : index
    %67 = vector.load %arg11[%c0_70, %c0_71] : memref<144x16xbf16, #tpu.memory_space<vmem>>, vector<144x16xbf16>
    %cst_72 = arith.constant dense<0.000000e+00> : vector<128x16xf32>
    %68 = tpu.matmul %66, %67, %cst_72 {dimension_numbers = #tpu.dot_dimension_numbers<[1], [0], [0], [1], [0, 0, 1, 1], [], []>} : vector<128x144xbf16>, vector<144x16xbf16>, vector<128x16xf32> -> vector<128x16xf32>
    %c0_73 = arith.constant 0 : index
    %c0_74 = arith.constant 0 : index
    %69 = vector.load %arg12[%c0_73, %c0_74] : memref<1x16xf32, #tpu.memory_space<vmem>>, vector<1x16xf32>
    %70 = vector.broadcast %69 : vector<1x16xf32> to vector<128x16xf32>
    %71 = arith.addf %68, %70 : vector<128x16xf32>
    %cst_75 = arith.constant 0.000000e+00 : f32
    %72 = vector.broadcast %cst_75 : f32 to vector<128x16xf32>
    %73 = arith.maximumf %71, %72 : vector<128x16xf32>
    %74 = arith.truncf %73 : vector<128x16xf32> to vector<128x16xbf16>
    %c0_76 = arith.constant 0 : index
    %c0_77 = arith.constant 0 : index
    %c0_78 = arith.constant 0 : index
    %75 = vector.load %arg6[%c0_76, %c0_77, %c0_78] : memref<9x128x128xbf16, #tpu.memory_space<vmem>>, vector<1x128x128xbf16>
    %76 = vector.shape_cast %75 : vector<1x128x128xbf16> to vector<128x128xbf16>
    %cst_79 = arith.constant dense<0.000000e+00> : vector<128x16xf32>
    %77 = tpu.matmul %76, %74, %cst_79 {dimension_numbers = #tpu.dot_dimension_numbers<[1], [0], [0], [1], [0, 0, 1, 1], [], []>} : vector<128x128xbf16>, vector<128x16xbf16>, vector<128x16xf32> -> vector<128x16xf32>
    %c1_80 = arith.constant 1 : index
    %c0_81 = arith.constant 0 : index
    %c0_82 = arith.constant 0 : index
    %78 = vector.load %arg6[%c1_80, %c0_81, %c0_82] : memref<9x128x128xbf16, #tpu.memory_space<vmem>>, vector<1x128x128xbf16>
    %79 = vector.shape_cast %78 : vector<1x128x128xbf16> to vector<128x128xbf16>
    %cst_83 = arith.constant dense<0.000000e+00> : vector<128x16xf32>
    %80 = tpu.matmul %79, %74, %cst_83 {dimension_numbers = #tpu.dot_dimension_numbers<[1], [0], [0], [1], [0, 0, 1, 1], [], []>} : vector<128x128xbf16>, vector<128x16xbf16>, vector<128x16xf32> -> vector<128x16xf32>
    %c2_84 = arith.constant 2 : index
    %c0_85 = arith.constant 0 : index
    %c0_86 = arith.constant 0 : index
    %81 = vector.load %arg6[%c2_84, %c0_85, %c0_86] : memref<9x128x128xbf16, #tpu.memory_space<vmem>>, vector<1x128x128xbf16>
    %82 = vector.shape_cast %81 : vector<1x128x128xbf16> to vector<128x128xbf16>
    %cst_87 = arith.constant dense<0.000000e+00> : vector<128x16xf32>
    %83 = tpu.matmul %82, %74, %cst_87 {dimension_numbers = #tpu.dot_dimension_numbers<[1], [0], [0], [1], [0, 0, 1, 1], [], []>} : vector<128x128xbf16>, vector<128x16xbf16>, vector<128x16xf32> -> vector<128x16xf32>
    %c3_88 = arith.constant 3 : index
    %c0_89 = arith.constant 0 : index
    %c0_90 = arith.constant 0 : index
    %84 = vector.load %arg6[%c3_88, %c0_89, %c0_90] : memref<9x128x128xbf16, #tpu.memory_space<vmem>>, vector<1x128x128xbf16>
    %85 = vector.shape_cast %84 : vector<1x128x128xbf16> to vector<128x128xbf16>
    %cst_91 = arith.constant dense<0.000000e+00> : vector<128x16xf32>
    %86 = tpu.matmul %85, %74, %cst_91 {dimension_numbers = #tpu.dot_dimension_numbers<[1], [0], [0], [1], [0, 0, 1, 1], [], []>} : vector<128x128xbf16>, vector<128x16xbf16>, vector<128x16xf32> -> vector<128x16xf32>
    %c4_92 = arith.constant 4 : index
    %c0_93 = arith.constant 0 : index
    %c0_94 = arith.constant 0 : index
    %87 = vector.load %arg6[%c4_92, %c0_93, %c0_94] : memref<9x128x128xbf16, #tpu.memory_space<vmem>>, vector<1x128x128xbf16>
    %88 = vector.shape_cast %87 : vector<1x128x128xbf16> to vector<128x128xbf16>
    %cst_95 = arith.constant dense<0.000000e+00> : vector<128x16xf32>
    %89 = tpu.matmul %88, %74, %cst_95 {dimension_numbers = #tpu.dot_dimension_numbers<[1], [0], [0], [1], [0, 0, 1, 1], [], []>} : vector<128x128xbf16>, vector<128x16xbf16>, vector<128x16xf32> -> vector<128x16xf32>
    %c5_96 = arith.constant 5 : index
    %c0_97 = arith.constant 0 : index
    %c0_98 = arith.constant 0 : index
    %90 = vector.load %arg6[%c5_96, %c0_97, %c0_98] : memref<9x128x128xbf16, #tpu.memory_space<vmem>>, vector<1x128x128xbf16>
    %91 = vector.shape_cast %90 : vector<1x128x128xbf16> to vector<128x128xbf16>
    %cst_99 = arith.constant dense<0.000000e+00> : vector<128x16xf32>
    %92 = tpu.matmul %91, %74, %cst_99 {dimension_numbers = #tpu.dot_dimension_numbers<[1], [0], [0], [1], [0, 0, 1, 1], [], []>} : vector<128x128xbf16>, vector<128x16xbf16>, vector<128x16xf32> -> vector<128x16xf32>
    %c6_100 = arith.constant 6 : index
    %c0_101 = arith.constant 0 : index
    %c0_102 = arith.constant 0 : index
    %93 = vector.load %arg6[%c6_100, %c0_101, %c0_102] : memref<9x128x128xbf16, #tpu.memory_space<vmem>>, vector<1x128x128xbf16>
    %94 = vector.shape_cast %93 : vector<1x128x128xbf16> to vector<128x128xbf16>
    %cst_103 = arith.constant dense<0.000000e+00> : vector<128x16xf32>
    %95 = tpu.matmul %94, %74, %cst_103 {dimension_numbers = #tpu.dot_dimension_numbers<[1], [0], [0], [1], [0, 0, 1, 1], [], []>} : vector<128x128xbf16>, vector<128x16xbf16>, vector<128x16xf32> -> vector<128x16xf32>
    %c7_104 = arith.constant 7 : index
    %c0_105 = arith.constant 0 : index
    %c0_106 = arith.constant 0 : index
    %96 = vector.load %arg6[%c7_104, %c0_105, %c0_106] : memref<9x128x128xbf16, #tpu.memory_space<vmem>>, vector<1x128x128xbf16>
    %97 = vector.shape_cast %96 : vector<1x128x128xbf16> to vector<128x128xbf16>
    %cst_107 = arith.constant dense<0.000000e+00> : vector<128x16xf32>
    %98 = tpu.matmul %97, %74, %cst_107 {dimension_numbers = #tpu.dot_dimension_numbers<[1], [0], [0], [1], [0, 0, 1, 1], [], []>} : vector<128x128xbf16>, vector<128x16xbf16>, vector<128x16xf32> -> vector<128x16xf32>
    %c8_108 = arith.constant 8 : index
    %c0_109 = arith.constant 0 : index
    %c0_110 = arith.constant 0 : index
    %99 = vector.load %arg6[%c8_108, %c0_109, %c0_110] : memref<9x128x128xbf16, #tpu.memory_space<vmem>>, vector<1x128x128xbf16>
    %100 = vector.shape_cast %99 : vector<1x128x128xbf16> to vector<128x128xbf16>
    %cst_111 = arith.constant dense<0.000000e+00> : vector<128x16xf32>
    %101 = tpu.matmul %100, %74, %cst_111 {dimension_numbers = #tpu.dot_dimension_numbers<[1], [0], [0], [1], [0, 0, 1, 1], [], []>} : vector<128x128xbf16>, vector<128x16xbf16>, vector<128x16xf32> -> vector<128x16xf32>
    %102 = tpu.concatenate %77, %80, %83, %86, %89, %92, %95, %98, %101 in 1 : vector<128x16xf32>, vector<128x16xf32>, vector<128x16xf32>, vector<128x16xf32>, vector<128x16xf32>, vector<128x16xf32>, vector<128x16xf32>, vector<128x16xf32>, vector<128x16xf32> -> vector<128x144xf32>
    %103 = arith.truncf %102 : vector<128x144xf32> to vector<128x144xbf16>
    %c0_112 = arith.constant 0 : index
    %c0_113 = arith.constant 0 : index
    %104 = vector.load %arg13[%c0_112, %c0_113] : memref<144x16xbf16, #tpu.memory_space<vmem>>, vector<144x16xbf16>
    %cst_114 = arith.constant dense<0.000000e+00> : vector<128x16xf32>
    %105 = tpu.matmul %103, %104, %cst_114 {dimension_numbers = #tpu.dot_dimension_numbers<[1], [0], [0], [1], [0, 0, 1, 1], [], []>} : vector<128x144xbf16>, vector<144x16xbf16>, vector<128x16xf32> -> vector<128x16xf32>
    %c0_115 = arith.constant 0 : index
    %c0_116 = arith.constant 0 : index
    %106 = vector.load %arg14[%c0_115, %c0_116] : memref<1x16xf32, #tpu.memory_space<vmem>>, vector<1x16xf32>
    %107 = vector.broadcast %106 : vector<1x16xf32> to vector<128x16xf32>
    %108 = arith.addf %105, %107 : vector<128x16xf32>
    %109 = arith.addf %108, %36 : vector<128x16xf32>
    %cst_117 = arith.constant 0.000000e+00 : f32
    %110 = vector.broadcast %cst_117 : f32 to vector<128x16xf32>
    %111 = arith.maximumf %109, %110 : vector<128x16xf32>
    %112 = arith.truncf %111 : vector<128x16xf32> to vector<128x16xbf16>
    %c0_118 = arith.constant 0 : index
    %c0_119 = arith.constant 0 : index
    %c0_120 = arith.constant 0 : index
    %113 = vector.load %arg7[%c0_118, %c0_119, %c0_120] : memref<9x32x128xbf16, #tpu.memory_space<vmem>>, vector<1x32x128xbf16>
    %114 = vector.shape_cast %113 : vector<1x32x128xbf16> to vector<32x128xbf16>
    %cst_121 = arith.constant dense<0.000000e+00> : vector<32x16xf32>
    %115 = tpu.matmul %114, %112, %cst_121 {dimension_numbers = #tpu.dot_dimension_numbers<[1], [0], [0], [1], [0, 0, 1, 1], [], []>} : vector<32x128xbf16>, vector<128x16xbf16>, vector<32x16xf32> -> vector<32x16xf32>
    %c1_122 = arith.constant 1 : index
    %c0_123 = arith.constant 0 : index
    %c0_124 = arith.constant 0 : index
    %116 = vector.load %arg7[%c1_122, %c0_123, %c0_124] : memref<9x32x128xbf16, #tpu.memory_space<vmem>>, vector<1x32x128xbf16>
    %117 = vector.shape_cast %116 : vector<1x32x128xbf16> to vector<32x128xbf16>
    %cst_125 = arith.constant dense<0.000000e+00> : vector<32x16xf32>
    %118 = tpu.matmul %117, %112, %cst_125 {dimension_numbers = #tpu.dot_dimension_numbers<[1], [0], [0], [1], [0, 0, 1, 1], [], []>} : vector<32x128xbf16>, vector<128x16xbf16>, vector<32x16xf32> -> vector<32x16xf32>
    %c2_126 = arith.constant 2 : index
    %c0_127 = arith.constant 0 : index
    %c0_128 = arith.constant 0 : index
    %119 = vector.load %arg7[%c2_126, %c0_127, %c0_128] : memref<9x32x128xbf16, #tpu.memory_space<vmem>>, vector<1x32x128xbf16>
    %120 = vector.shape_cast %119 : vector<1x32x128xbf16> to vector<32x128xbf16>
    %cst_129 = arith.constant dense<0.000000e+00> : vector<32x16xf32>
    %121 = tpu.matmul %120, %112, %cst_129 {dimension_numbers = #tpu.dot_dimension_numbers<[1], [0], [0], [1], [0, 0, 1, 1], [], []>} : vector<32x128xbf16>, vector<128x16xbf16>, vector<32x16xf32> -> vector<32x16xf32>
    %c3_130 = arith.constant 3 : index
    %c0_131 = arith.constant 0 : index
    %c0_132 = arith.constant 0 : index
    %122 = vector.load %arg7[%c3_130, %c0_131, %c0_132] : memref<9x32x128xbf16, #tpu.memory_space<vmem>>, vector<1x32x128xbf16>
    %123 = vector.shape_cast %122 : vector<1x32x128xbf16> to vector<32x128xbf16>
    %cst_133 = arith.constant dense<0.000000e+00> : vector<32x16xf32>
    %124 = tpu.matmul %123, %112, %cst_133 {dimension_numbers = #tpu.dot_dimension_numbers<[1], [0], [0], [1], [0, 0, 1, 1], [], []>} : vector<32x128xbf16>, vector<128x16xbf16>, vector<32x16xf32> -> vector<32x16xf32>
    %c4_134 = arith.constant 4 : index
    %c0_135 = arith.constant 0 : index
    %c0_136 = arith.constant 0 : index
    %125 = vector.load %arg7[%c4_134, %c0_135, %c0_136] : memref<9x32x128xbf16, #tpu.memory_space<vmem>>, vector<1x32x128xbf16>
    %126 = vector.shape_cast %125 : vector<1x32x128xbf16> to vector<32x128xbf16>
    %cst_137 = arith.constant dense<0.000000e+00> : vector<32x16xf32>
    %127 = tpu.matmul %126, %112, %cst_137 {dimension_numbers = #tpu.dot_dimension_numbers<[1], [0], [0], [1], [0, 0, 1, 1], [], []>} : vector<32x128xbf16>, vector<128x16xbf16>, vector<32x16xf32> -> vector<32x16xf32>
    %c5_138 = arith.constant 5 : index
    %c0_139 = arith.constant 0 : index
    %c0_140 = arith.constant 0 : index
    %128 = vector.load %arg7[%c5_138, %c0_139, %c0_140] : memref<9x32x128xbf16, #tpu.memory_space<vmem>>, vector<1x32x128xbf16>
    %129 = vector.shape_cast %128 : vector<1x32x128xbf16> to vector<32x128xbf16>
    %cst_141 = arith.constant dense<0.000000e+00> : vector<32x16xf32>
    %130 = tpu.matmul %129, %112, %cst_141 {dimension_numbers = #tpu.dot_dimension_numbers<[1], [0], [0], [1], [0, 0, 1, 1], [], []>} : vector<32x128xbf16>, vector<128x16xbf16>, vector<32x16xf32> -> vector<32x16xf32>
    %c6_142 = arith.constant 6 : index
    %c0_143 = arith.constant 0 : index
    %c0_144 = arith.constant 0 : index
    %131 = vector.load %arg7[%c6_142, %c0_143, %c0_144] : memref<9x32x128xbf16, #tpu.memory_space<vmem>>, vector<1x32x128xbf16>
    %132 = vector.shape_cast %131 : vector<1x32x128xbf16> to vector<32x128xbf16>
    %cst_145 = arith.constant dense<0.000000e+00> : vector<32x16xf32>
    %133 = tpu.matmul %132, %112, %cst_145 {dimension_numbers = #tpu.dot_dimension_numbers<[1], [0], [0], [1], [0, 0, 1, 1], [], []>} : vector<32x128xbf16>, vector<128x16xbf16>, vector<32x16xf32> -> vector<32x16xf32>
    %c7_146 = arith.constant 7 : index
    %c0_147 = arith.constant 0 : index
    %c0_148 = arith.constant 0 : index
    %134 = vector.load %arg7[%c7_146, %c0_147, %c0_148] : memref<9x32x128xbf16, #tpu.memory_space<vmem>>, vector<1x32x128xbf16>
    %135 = vector.shape_cast %134 : vector<1x32x128xbf16> to vector<32x128xbf16>
    %cst_149 = arith.constant dense<0.000000e+00> : vector<32x16xf32>
    %136 = tpu.matmul %135, %112, %cst_149 {dimension_numbers = #tpu.dot_dimension_numbers<[1], [0], [0], [1], [0, 0, 1, 1], [], []>} : vector<32x128xbf16>, vector<128x16xbf16>, vector<32x16xf32> -> vector<32x16xf32>
    %c8_150 = arith.constant 8 : index
    %c0_151 = arith.constant 0 : index
    %c0_152 = arith.constant 0 : index
    %137 = vector.load %arg7[%c8_150, %c0_151, %c0_152] : memref<9x32x128xbf16, #tpu.memory_space<vmem>>, vector<1x32x128xbf16>
    %138 = vector.shape_cast %137 : vector<1x32x128xbf16> to vector<32x128xbf16>
    %cst_153 = arith.constant dense<0.000000e+00> : vector<32x16xf32>
    %139 = tpu.matmul %138, %112, %cst_153 {dimension_numbers = #tpu.dot_dimension_numbers<[1], [0], [0], [1], [0, 0, 1, 1], [], []>} : vector<32x128xbf16>, vector<128x16xbf16>, vector<32x16xf32> -> vector<32x16xf32>
    %140 = tpu.concatenate %115, %118, %121, %124, %127, %130, %133, %136, %139 in 1 : vector<32x16xf32>, vector<32x16xf32>, vector<32x16xf32>, vector<32x16xf32>, vector<32x16xf32>, vector<32x16xf32>, vector<32x16xf32>, vector<32x16xf32>, vector<32x16xf32> -> vector<32x144xf32>
    %141 = arith.truncf %140 : vector<32x144xf32> to vector<32x144xbf16>
    %c0_154 = arith.constant 0 : index
    %c0_155 = arith.constant 0 : index
    %142 = vector.load %arg15[%c0_154, %c0_155] : memref<144x32xbf16, #tpu.memory_space<vmem>>, vector<144x32xbf16>
    %cst_156 = arith.constant dense<0.000000e+00> : vector<32x32xf32>
    %143 = tpu.matmul %141, %142, %cst_156 {dimension_numbers = #tpu.dot_dimension_numbers<[1], [0], [0], [1], [0, 0, 1, 1], [], []>} : vector<32x144xbf16>, vector<144x32xbf16>, vector<32x32xf32> -> vector<32x32xf32>
    %c0_157 = arith.constant 0 : index
    %c0_158 = arith.constant 0 : index
    %144 = vector.load %arg16[%c0_157, %c0_158] : memref<1x32xf32, #tpu.memory_space<vmem>>, vector<1x32xf32>
    %145 = vector.broadcast %144 : vector<1x32xf32> to vector<32x32xf32>
    %146 = arith.addf %143, %145 : vector<32x32xf32>
    %cst_159 = arith.constant 0.000000e+00 : f32
    %147 = vector.broadcast %cst_159 : f32 to vector<32x32xf32>
    %148 = arith.maximumf %146, %147 : vector<32x32xf32>
    %c0_160 = arith.constant 0 : index
    %c0_161 = arith.constant 0 : index
    %149 = vector.load %arg8[%c0_160, %c0_161] : memref<8x32xbf16, #tpu.memory_space<vmem>>, vector<8x32xbf16>
    %150 = arith.truncf %148 : vector<32x32xf32> to vector<32x32xbf16>
    %cst_162 = arith.constant dense<0.000000e+00> : vector<8x32xf32>
    %151 = tpu.matmul %149, %150, %cst_162 {dimension_numbers = #tpu.dot_dimension_numbers<[1], [0], [0], [1], [0, 0, 1, 1], [], []>} : vector<8x32xbf16>, vector<32x32xbf16>, vector<8x32xf32> -> vector<8x32xf32>
    %152 = arith.truncf %151 : vector<8x32xf32> to vector<8x32xbf16>
    %c0_163 = arith.constant 0 : index
    %c0_164 = arith.constant 0 : index
    %153 = vector.load %arg17[%c0_163, %c0_164] : memref<32x1280xbf16, #tpu.memory_space<vmem>>, vector<32x1280xbf16>
    %cst_165 = arith.constant dense<0.000000e+00> : vector<8x1280xf32>
    %154 = tpu.matmul %152, %153, %cst_165 {dimension_numbers = #tpu.dot_dimension_numbers<[1], [0], [0], [1], [0, 0, 1, 1], [], []>} : vector<8x32xbf16>, vector<32x1280xbf16>, vector<8x1280xf32> -> vector<8x1280xf32>
    %c0_166 = arith.constant 0 : index
    %c0_167 = arith.constant 0 : index
    %155 = vector.load %arg18[%c0_166, %c0_167] : memref<1x1280xf32, #tpu.memory_space<vmem>>, vector<1x1280xf32>
    %156 = vector.broadcast %155 : vector<1x1280xf32> to vector<8x1280xf32>
    %157 = arith.addf %154, %156 : vector<8x1280xf32>
    %cst_168 = arith.constant 0.000000e+00 : f32
    %158 = vector.broadcast %cst_168 : f32 to vector<8x1280xf32>
    %159 = arith.maximumf %157, %158 : vector<8x1280xf32>
    %c0_169 = arith.constant 0 : index
    %c0_170 = arith.constant 0 : index
    %160 = vector.load %arg3[%c0_169, %c0_170] : memref<8x128xf32, #tpu.memory_space<vmem>>, vector<8x128xf32>
    %161 = arith.truncf %160 : vector<8x128xf32> to vector<8x128xbf16>
    %c0_171 = arith.constant 0 : index
    %c0_172 = arith.constant 0 : index
    %162 = vector.load %arg19[%c0_171, %c0_172] : memref<128x128xbf16, #tpu.memory_space<vmem>>, vector<128x128xbf16>
    %cst_173 = arith.constant dense<0.000000e+00> : vector<8x128xf32>
    %163 = tpu.matmul %161, %162, %cst_173 {dimension_numbers = #tpu.dot_dimension_numbers<[1], [0], [0], [1], [0, 0, 1, 1], [], []>} : vector<8x128xbf16>, vector<128x128xbf16>, vector<8x128xf32> -> vector<8x128xf32>
    %c0_174 = arith.constant 0 : index
    %c0_175 = arith.constant 0 : index
    %164 = vector.load %arg20[%c0_174, %c0_175] : memref<1x128xf32, #tpu.memory_space<vmem>>, vector<1x128xf32>
    %165 = vector.broadcast %164 : vector<1x128xf32> to vector<8x128xf32>
    %166 = arith.addf %163, %165 : vector<8x128xf32>
    %cst_176 = arith.constant 0.000000e+00 : f32
    %167 = vector.broadcast %cst_176 : f32 to vector<8x128xf32>
    %168 = arith.cmpf ogt, %166, %167 : vector<8x128xf32>
    %cst_177 = arith.constant 0.000000e+00 : f32
    %169 = vector.broadcast %cst_177 : f32 to vector<8x128xf32>
    %170 = arith.minimumf %166, %169 : vector<8x128xf32>
    %171 = math.exp %170 : vector<8x128xf32>
    %cst_178 = arith.constant 1.000000e+00 : f32
    %172 = vector.broadcast %cst_178 : f32 to vector<8x128xf32>
    %173 = arith.subf %171, %172 : vector<8x128xf32>
    %174 = arith.select %168, %166, %173 : vector<8x128xi1>, vector<8x128xf32>
    %c0_179 = arith.constant 0 : index
    %c0_180 = arith.constant 0 : index
    %175 = vector.load %arg4[%c0_179, %c0_180] : memref<8x128xf32, #tpu.memory_space<vmem>>, vector<8x128xf32>
    %176 = arith.truncf %174 : vector<8x128xf32> to vector<8x128xbf16>
    %c0_181 = arith.constant 0 : index
    %c0_182 = arith.constant 0 : index
    %177 = vector.load %arg21[%c0_181, %c0_182] : memref<128x384xbf16, #tpu.memory_space<vmem>>, vector<128x384xbf16>
    %cst_183 = arith.constant dense<0.000000e+00> : vector<8x384xf32>
    %178 = tpu.matmul %176, %177, %cst_183 {dimension_numbers = #tpu.dot_dimension_numbers<[1], [0], [0], [1], [0, 0, 1, 1], [], []>} : vector<8x128xbf16>, vector<128x384xbf16>, vector<8x384xf32> -> vector<8x384xf32>
    %c0_184 = arith.constant 0 : index
    %c0_185 = arith.constant 0 : index
    %179 = vector.load %arg22[%c0_184, %c0_185] : memref<1x384xf32, #tpu.memory_space<vmem>>, vector<1x384xf32>
    %180 = vector.broadcast %179 : vector<1x384xf32> to vector<8x384xf32>
    %181 = arith.addf %178, %180 : vector<8x384xf32>
    %182 = arith.truncf %175 : vector<8x128xf32> to vector<8x128xbf16>
    %c0_186 = arith.constant 0 : index
    %c0_187 = arith.constant 0 : index
    %183 = vector.load %arg23[%c0_186, %c0_187] : memref<128x384xbf16, #tpu.memory_space<vmem>>, vector<128x384xbf16>
    %cst_188 = arith.constant dense<0.000000e+00> : vector<8x384xf32>
    %184 = tpu.matmul %182, %183, %cst_188 {dimension_numbers = #tpu.dot_dimension_numbers<[1], [0], [0], [1], [0, 0, 1, 1], [], []>} : vector<8x128xbf16>, vector<128x384xbf16>, vector<8x384xf32> -> vector<8x384xf32>
    %c0_189 = arith.constant 0 : index
    %c0_190 = arith.constant 0 : index
    %185 = vector.load %arg24[%c0_189, %c0_190] : memref<1x384xf32, #tpu.memory_space<vmem>>, vector<1x384xf32>
    %186 = vector.broadcast %185 : vector<1x384xf32> to vector<8x384xf32>
    %187 = arith.addf %184, %186 : vector<8x384xf32>
    %188 = vector.extract_strided_slice %181 {offsets = [0, 0], sizes = [8, 128], strides = [1, 1]} : vector<8x384xf32> to vector<8x128xf32>
    %189 = vector.extract_strided_slice %187 {offsets = [0, 0], sizes = [8, 128], strides = [1, 1]} : vector<8x384xf32> to vector<8x128xf32>
    %190 = arith.addf %188, %189 : vector<8x128xf32>
    %191 = arith.negf %190 : vector<8x128xf32>
    %192 = math.exp %191 : vector<8x128xf32>
    %cst_191 = arith.constant 1.000000e+00 : f32
    %193 = vector.broadcast %cst_191 : f32 to vector<8x128xf32>
    %194 = arith.addf %193, %192 : vector<8x128xf32>
    %195 = arith.divf %193, %194 : vector<8x128xf32>
    %196 = vector.extract_strided_slice %181 {offsets = [0, 128], sizes = [8, 128], strides = [1, 1]} : vector<8x384xf32> to vector<8x128xf32>
    %197 = vector.extract_strided_slice %187 {offsets = [0, 128], sizes = [8, 128], strides = [1, 1]} : vector<8x384xf32> to vector<8x128xf32>
    %198 = arith.addf %196, %197 : vector<8x128xf32>
    %199 = arith.negf %198 : vector<8x128xf32>
    %200 = math.exp %199 : vector<8x128xf32>
    %cst_192 = arith.constant 1.000000e+00 : f32
    %201 = vector.broadcast %cst_192 : f32 to vector<8x128xf32>
    %202 = arith.addf %201, %200 : vector<8x128xf32>
    %203 = arith.divf %201, %202 : vector<8x128xf32>
    %204 = vector.extract_strided_slice %181 {offsets = [0, 256], sizes = [8, 128], strides = [1, 1]} : vector<8x384xf32> to vector<8x128xf32>
    %205 = vector.extract_strided_slice %187 {offsets = [0, 256], sizes = [8, 128], strides = [1, 1]} : vector<8x384xf32> to vector<8x128xf32>
    %206 = arith.mulf %195, %205 : vector<8x128xf32>
    %207 = arith.addf %204, %206 : vector<8x128xf32>
    %208 = math.tanh %207 : vector<8x128xf32>
    %cst_193 = arith.constant 1.000000e+00 : f32
    %209 = vector.broadcast %cst_193 : f32 to vector<8x128xf32>
    %210 = arith.subf %209, %203 : vector<8x128xf32>
    %211 = arith.mulf %210, %208 : vector<8x128xf32>
    %212 = arith.mulf %203, %175 : vector<8x128xf32>
    %213 = arith.addf %211, %212 : vector<8x128xf32>
    %214 = arith.truncf %213 : vector<8x128xf32> to vector<8x128xbf16>
    %c0_194 = arith.constant 0 : index
    %c0_195 = arith.constant 0 : index
    %215 = vector.load %arg25[%c0_194, %c0_195] : memref<128x128xbf16, #tpu.memory_space<vmem>>, vector<128x128xbf16>
    %cst_196 = arith.constant dense<0.000000e+00> : vector<8x128xf32>
    %216 = tpu.matmul %214, %215, %cst_196 {dimension_numbers = #tpu.dot_dimension_numbers<[1], [0], [0], [1], [0, 0, 1, 1], [], []>} : vector<8x128xbf16>, vector<128x128xbf16>, vector<8x128xf32> -> vector<8x128xf32>
    %217 = arith.truncf %159 : vector<8x1280xf32> to vector<8x1280xbf16>
    %c0_197 = arith.constant 0 : index
    %c0_198 = arith.constant 0 : index
    %218 = vector.load %arg26[%c0_197, %c0_198] : memref<1280x128xbf16, #tpu.memory_space<vmem>>, vector<1280x128xbf16>
    %cst_199 = arith.constant dense<0.000000e+00> : vector<8x128xf32>
    %219 = tpu.matmul %217, %218, %cst_199 {dimension_numbers = #tpu.dot_dimension_numbers<[1], [0], [0], [1], [0, 0, 1, 1], [], []>} : vector<8x1280xbf16>, vector<1280x128xbf16>, vector<8x128xf32> -> vector<8x128xf32>
    %220 = arith.addf %216, %219 : vector<8x128xf32>
    %c0_200 = arith.constant 0 : index
    %c0_201 = arith.constant 0 : index
    %221 = vector.load %arg27[%c0_200, %c0_201] : memref<1x128xf32, #tpu.memory_space<vmem>>, vector<1x128xf32>
    %222 = vector.broadcast %221 : vector<1x128xf32> to vector<8x128xf32>
    %223 = arith.addf %220, %222 : vector<8x128xf32>
    %cst_202 = arith.constant 0.000000e+00 : f32
    %224 = vector.broadcast %cst_202 : f32 to vector<8x128xf32>
    %225 = arith.cmpf ogt, %223, %224 : vector<8x128xf32>
    %cst_203 = arith.constant 0.000000e+00 : f32
    %226 = vector.broadcast %cst_203 : f32 to vector<8x128xf32>
    %227 = arith.minimumf %223, %226 : vector<8x128xf32>
    %228 = math.exp %227 : vector<8x128xf32>
    %cst_204 = arith.constant 1.000000e+00 : f32
    %229 = vector.broadcast %cst_204 : f32 to vector<8x128xf32>
    %230 = arith.subf %228, %229 : vector<8x128xf32>
    %231 = arith.select %225, %223, %230 : vector<8x128xi1>, vector<8x128xf32>
    %232 = arith.truncf %231 : vector<8x128xf32> to vector<8x128xbf16>
    %c0_205 = arith.constant 0 : index
    %c0_206 = arith.constant 0 : index
    %233 = vector.load %arg28[%c0_205, %c0_206] : memref<128x32xbf16, #tpu.memory_space<vmem>>, vector<128x32xbf16>
    %cst_207 = arith.constant dense<0.000000e+00> : vector<8x32xf32>
    %234 = tpu.matmul %232, %233, %cst_207 {dimension_numbers = #tpu.dot_dimension_numbers<[1], [0], [0], [1], [0, 0, 1, 1], [], []>} : vector<8x128xbf16>, vector<128x32xbf16>, vector<8x32xf32> -> vector<8x32xf32>
    %c0_208 = arith.constant 0 : index
    %c0_209 = arith.constant 0 : index
    %235 = vector.load %arg29[%c0_208, %c0_209] : memref<1x32xf32, #tpu.memory_space<vmem>>, vector<1x32xf32>
    %236 = vector.broadcast %235 : vector<1x32xf32> to vector<8x32xf32>
    %237 = arith.addf %234, %236 : vector<8x32xf32>
    %238 = vector.extract_strided_slice %237 {offsets = [0, 0], sizes = [8, 16], strides = [1, 1]} : vector<8x32xf32> to vector<8x16xf32>
    %239 = vector.extract_strided_slice %237 {offsets = [0, 16], sizes = [8, 16], strides = [1, 1]} : vector<8x32xf32> to vector<8x16xf32>
    %cst_210 = arith.constant 0.000000e+00 : f32
    %240 = vector.broadcast %cst_210 : f32 to vector<8x16xf32>
    %241 = arith.maximumf %239, %240 : vector<8x16xf32>
    %242 = math.absf %239 : vector<8x16xf32>
    %cst_211 = arith.constant 0.000000e+00 : f32
    %243 = vector.broadcast %cst_211 : f32 to vector<8x16xf32>
    %244 = arith.subf %243, %242 : vector<8x16xf32>
    %245 = math.exp %244 : vector<8x16xf32>
    %cst_212 = arith.constant 1.000000e+00 : f32
    %246 = vector.broadcast %cst_212 : f32 to vector<8x16xf32>
    %247 = arith.addf %246, %245 : vector<8x16xf32>
    %248 = math.log %247 : vector<8x16xf32>
    %249 = arith.addf %241, %248 : vector<8x16xf32>
    %cst_213 = arith.constant 1.000000e-01 : f32
    %250 = vector.broadcast %cst_213 : f32 to vector<8x16xf32>
    %251 = arith.addf %249, %250 : vector<8x16xf32>
    %c0_214 = arith.constant 0 : index
    %c0_215 = arith.constant 0 : index
    %252 = vector.load %arg1[%c0_214, %c0_215] : memref<8x16xf32, #tpu.memory_space<vmem>>, vector<8x16xf32>
    %253 = arith.mulf %251, %252 : vector<8x16xf32>
    %254 = arith.addf %238, %253 : vector<8x16xf32>
    %255 = tpu.concatenate %254, %213 in 1 : vector<8x16xf32>, vector<8x128xf32> -> vector<8x144xf32>
    %256 = arith.truncf %255 : vector<8x144xf32> to vector<8x144xbf16>
    %c0_216 = arith.constant 0 : index
    %c0_217 = arith.constant 0 : index
    %257 = vector.load %arg30[%c0_216, %c0_217] : memref<144x384xbf16, #tpu.memory_space<vmem>>, vector<144x384xbf16>
    %cst_218 = arith.constant dense<0.000000e+00> : vector<8x384xf32>
    %258 = tpu.matmul %256, %257, %cst_218 {dimension_numbers = #tpu.dot_dimension_numbers<[1], [0], [0], [1], [0, 0, 1, 1], [], []>} : vector<8x144xbf16>, vector<144x384xbf16>, vector<8x384xf32> -> vector<8x384xf32>
    %c0_219 = arith.constant 0 : index
    %c0_220 = arith.constant 0 : index
    %259 = vector.load %arg31[%c0_219, %c0_220] : memref<1x384xf32, #tpu.memory_space<vmem>>, vector<1x384xf32>
    %260 = vector.broadcast %259 : vector<1x384xf32> to vector<8x384xf32>
    %261 = arith.addf %258, %260 : vector<8x384xf32>
    %cst_221 = arith.constant 0.000000e+00 : f32
    %262 = vector.broadcast %cst_221 : f32 to vector<8x384xf32>
    %263 = arith.cmpf ogt, %261, %262 : vector<8x384xf32>
    %cst_222 = arith.constant 0.000000e+00 : f32
    %264 = vector.broadcast %cst_222 : f32 to vector<8x384xf32>
    %265 = arith.minimumf %261, %264 : vector<8x384xf32>
    %266 = math.exp %265 : vector<8x384xf32>
    %cst_223 = arith.constant 1.000000e+00 : f32
    %267 = vector.broadcast %cst_223 : f32 to vector<8x384xf32>
    %268 = arith.subf %266, %267 : vector<8x384xf32>
    %269 = arith.select %263, %261, %268 : vector<8x384xi1>, vector<8x384xf32>
    %270 = arith.truncf %269 : vector<8x384xf32> to vector<8x384xbf16>
    %c0_224 = arith.constant 0 : index
    %c0_225 = arith.constant 0 : index
    %271 = vector.load %arg32[%c0_224, %c0_225] : memref<384x384xbf16, #tpu.memory_space<vmem>>, vector<384x384xbf16>
    %cst_226 = arith.constant dense<0.000000e+00> : vector<8x384xf32>
    %272 = tpu.matmul %270, %271, %cst_226 {dimension_numbers = #tpu.dot_dimension_numbers<[1], [0], [0], [1], [0, 0, 1, 1], [], []>} : vector<8x384xbf16>, vector<384x384xbf16>, vector<8x384xf32> -> vector<8x384xf32>
    %c0_227 = arith.constant 0 : index
    %c0_228 = arith.constant 0 : index
    %273 = vector.load %arg33[%c0_227, %c0_228] : memref<1x384xf32, #tpu.memory_space<vmem>>, vector<1x384xf32>
    %274 = vector.broadcast %273 : vector<1x384xf32> to vector<8x384xf32>
    %275 = arith.addf %272, %274 : vector<8x384xf32>
    %cst_229 = arith.constant 0.000000e+00 : f32
    %276 = vector.broadcast %cst_229 : f32 to vector<8x384xf32>
    %277 = arith.cmpf ogt, %275, %276 : vector<8x384xf32>
    %cst_230 = arith.constant 0.000000e+00 : f32
    %278 = vector.broadcast %cst_230 : f32 to vector<8x384xf32>
    %279 = arith.minimumf %275, %278 : vector<8x384xf32>
    %280 = math.exp %279 : vector<8x384xf32>
    %cst_231 = arith.constant 1.000000e+00 : f32
    %281 = vector.broadcast %cst_231 : f32 to vector<8x384xf32>
    %282 = arith.subf %280, %281 : vector<8x384xf32>
    %283 = arith.select %277, %275, %282 : vector<8x384xi1>, vector<8x384xf32>
    %284 = arith.truncf %283 : vector<8x384xf32> to vector<8x384xbf16>
    %c0_232 = arith.constant 0 : index
    %c0_233 = arith.constant 0 : index
    %285 = vector.load %arg34[%c0_232, %c0_233] : memref<384x256xbf16, #tpu.memory_space<vmem>>, vector<384x256xbf16>
    %cst_234 = arith.constant dense<0.000000e+00> : vector<8x256xf32>
    %286 = tpu.matmul %284, %285, %cst_234 {dimension_numbers = #tpu.dot_dimension_numbers<[1], [0], [0], [1], [0, 0, 1, 1], [], []>} : vector<8x384xbf16>, vector<384x256xbf16>, vector<8x256xf32> -> vector<8x256xf32>
    %c0_235 = arith.constant 0 : index
    %c0_236 = arith.constant 0 : index
    %287 = vector.load %arg35[%c0_235, %c0_236] : memref<1x256xf32, #tpu.memory_space<vmem>>, vector<1x256xf32>
    %288 = vector.broadcast %287 : vector<1x256xf32> to vector<8x256xf32>
    %289 = arith.addf %286, %288 : vector<8x256xf32>
    %290 = vector.extract_strided_slice %289 {offsets = [0, 0], sizes = [8, 128], strides = [1, 1]} : vector<8x256xf32> to vector<8x128xf32>
    %cst_237 = arith.constant 0.000000e+00 : f32
    %291 = vector.broadcast %cst_237 : f32 to vector<8x128xf32>
    %292 = arith.cmpf ogt, %290, %291 : vector<8x128xf32>
    %cst_238 = arith.constant 0.000000e+00 : f32
    %293 = vector.broadcast %cst_238 : f32 to vector<8x128xf32>
    %294 = arith.minimumf %290, %293 : vector<8x128xf32>
    %295 = math.exp %294 : vector<8x128xf32>
    %cst_239 = arith.constant 1.000000e+00 : f32
    %296 = vector.broadcast %cst_239 : f32 to vector<8x128xf32>
    %297 = arith.subf %295, %296 : vector<8x128xf32>
    %298 = arith.select %292, %290, %297 : vector<8x128xi1>, vector<8x128xf32>
    %299 = vector.extract_strided_slice %289 {offsets = [0, 128], sizes = [8, 2], strides = [1, 1]} : vector<8x256xf32> to vector<8x2xf32>
    %300 = arith.truncf %298 : vector<8x128xf32> to vector<8x128xbf16>
    %c0_240 = arith.constant 0 : index
    %c0_241 = arith.constant 0 : index
    %301 = vector.load %arg36[%c0_240, %c0_241] : memref<128x8xbf16, #tpu.memory_space<vmem>>, vector<128x8xbf16>
    %cst_242 = arith.constant dense<0.000000e+00> : vector<8x8xf32>
    %302 = tpu.matmul %300, %301, %cst_242 {dimension_numbers = #tpu.dot_dimension_numbers<[1], [0], [0], [1], [0, 0, 1, 1], [], []>} : vector<8x128xbf16>, vector<128x8xbf16>, vector<8x8xf32> -> vector<8x8xf32>
    %c0_243 = arith.constant 0 : index
    %c0_244 = arith.constant 0 : index
    %303 = vector.load %arg37[%c0_243, %c0_244] : memref<1x8xf32, #tpu.memory_space<vmem>>, vector<1x8xf32>
    %304 = vector.broadcast %303 : vector<1x8xf32> to vector<8x8xf32>
    %305 = arith.addf %302, %304 : vector<8x8xf32>
    %cst_245 = arith.constant dense<0xFF800000> : vector<8xf32>
    %306 = vector.multi_reduction <maximumf>, %305, %cst_245 [1] : vector<8x8xf32> to vector<8xf32>
    %307 = vector.shape_cast %306 : vector<8xf32> to vector<8x1xf32>
    %308 = vector.broadcast %307 : vector<8x1xf32> to vector<8x8xf32>
    %309 = arith.subf %305, %308 : vector<8x8xf32>
    %310 = math.exp %309 : vector<8x8xf32>
    %cst_246 = arith.constant dense<0.000000e+00> : vector<8xf32>
    %311 = vector.multi_reduction <add>, %310, %cst_246 [1] : vector<8x8xf32> to vector<8xf32>
    %312 = vector.shape_cast %311 : vector<8xf32> to vector<8x1xf32>
    %313 = vector.broadcast %312 : vector<8x1xf32> to vector<8x8xf32>
    %314 = arith.divf %310, %313 : vector<8x8xf32>
    %c0_247 = arith.constant 0 : index
    %c0_248 = arith.constant 0 : index
    %315 = vector.load %arg2[%c0_247, %c0_248] : memref<8x8xf32, #tpu.memory_space<vmem>>, vector<8x8xf32>
    %316 = arith.addf %305, %315 : vector<8x8xf32>
    %cst_249 = arith.constant dense<0xFF800000> : vector<8xf32>
    %317 = vector.multi_reduction <maximumf>, %316, %cst_249 [1] : vector<8x8xf32> to vector<8xf32>
    %318 = vector.shape_cast %317 : vector<8xf32> to vector<8x1xf32>
    %319 = vector.broadcast %318 : vector<8x1xf32> to vector<8x8xf32>
    %320 = arith.cmpf oge, %316, %319 : vector<8x8xf32>
    %cst_250 = arith.constant 1.000000e+00 : f32
    %cst_251 = arith.constant 0.000000e+00 : f32
    %321 = vector.broadcast %cst_250 : f32 to vector<8x8xf32>
    %322 = vector.broadcast %cst_251 : f32 to vector<8x8xf32>
    %323 = arith.select %320, %321, %322 : vector<8x8xi1>, vector<8x8xf32>
    %cst_252 = arith.constant 0.000000e+00 : f32
    %324 = vector.broadcast %cst_252 : f32 to vector<8x54xf32>
    %325 = tpu.concatenate %213, %254, %238, %251, %305, %314, %323, %299, %324 in 1 : vector<8x128xf32>, vector<8x16xf32>, vector<8x16xf32>, vector<8x16xf32>, vector<8x8xf32>, vector<8x8xf32>, vector<8x8xf32>, vector<8x2xf32>, vector<8x54xf32> -> vector<8x256xf32>
    %c0_253 = arith.constant 0 : index
    %c0_254 = arith.constant 0 : index
    %326 = vector.load %arg38[%c0_253, %c0_254] : memref<8x256xf32, #tpu.memory_space<vmem>>, vector<8x256xf32>
    tpu.vector_store %arg38[%c0_253, %c0_254], %325 {strides = array<i32>} : memref<8x256xf32, #tpu.memory_space<vmem>>, vector<8x256xf32>,
    return
  }
}

</mosaic_0001>

<bundles_post_ra>
// kernel: trading_model_forward.3
= control target key start
LH: loop header
LB: loop body
LE: loop exit
PB: predicated region body
PF: predicated region fallthrough
CT: control target
= control target key end

     0   :  { %s19979_s6 = smov 1   ;;  %s19980_s10 = smov 2   ;;  %s23501_s0 = inlined_call_operand.smem [shape: u32[39], index: -1, kind: input, shape index: {}] }
   0x1   :  { %s20075_s5 = sld [smem:[%s23501_s0]]   ;;  %s19981_s14 = smov 3  }
   0x2   :  { %s20080_s9 = sld [smem:[%s23501_s0 + %s19979_s6]]   ;;  %s19982_s18 = smov 4  }
   0x3   :  { %s20085_s13 = sld [smem:[%s23501_s0 + %s19980_s10]]   ;;  %s19983_s22 = smov 5  }
   0x4   :  { %s20090_s17 = sld [smem:[%s23501_s0 + %s19981_s14]]   ;;  %s19984_s26 = smov 6  }
   0x5   :  { %s20095_s21 = sld [smem:[%s23501_s0 + %s19982_s18]]   ;;  %s19985_s30 = smov 7  }
   0x6   :  { %s20100_s25 = sld [smem:[%s23501_s0 + %s19983_s22]]   ;;  %s19986_s4 = smov 8  }
   0x7   :  { %23545 = sst [smem:[#allocation57_spill]] %s20075_s5  ;;  %s19987_s10 = smov 9  }
   0x8   :  { %23546 = sst [smem:[#allocation58_spill]] %s20080_s9  ;;  %s19988_s15 = smov 10  }
   0x9   :  { %23547 = sst [smem:[#allocation59_spill]] %s20085_s13  ;;  %s19989_s20 = smov 11  }
   0xa   :  { %23548 = sst [smem:[#allocation60_spill]] %s20090_s17  ;;  %s19991_s1 = smov 13  }
   0xb   :  { %23549 = sst [smem:[#allocation61_spill]] %s20095_s21  ;;  %s19992_s7 = smov 14  }
   0xc   :  { %s20105_s29 = sld [smem:[%s23501_s0 + %s19984_s26]]   ;;  %s19990_s26 = smov 12  }
   0xd   :  { %s20110_s3 = sld [smem:[%s23501_s0 + %s19985_s30]]   ;;  %s19994_s22 = smov 16  }
   0xe   :  { %s20115_s8 = sld [smem:[%s23501_s0 + %s19986_s4]]   ;;  %s19995_s28 = smov 17  }
   0xf   :  { %s20120_s14 = sld [smem:[%s23501_s0 + %s19987_s10]]  }
  0x10   :  { %s20125_s19 = sld [smem:[%s23501_s0 + %s19988_s15]]   ;;  %s19993_s15 = smov 15  }
  0x11   :  { %s20130_s24 = sld [smem:[%s23501_s0 + %s19989_s20]]  }
  0x12   :  { %s20135_s30 = sld [smem:[%s23501_s0 + %s19990_s26]]  }
  0x13   :  { %s20140_s6 = sld [smem:[%s23501_s0 + %s19991_s1]]  }
  0x14   :  { %s20145_s12 = sld [smem:[%s23501_s0 + %s19992_s7]]   ;;  %s19996_s7 = smov 18  }
  0x15   :  { %23550 = sst [smem:[#allocation62_spill]] %s20120_s14 }
  0x16   :  { %23551 = sst [smem:[#allocation63_spill]] %s20125_s19 }
  0x17   :  { %23552 = sst [smem:[#allocation64_spill]] %s20130_s24 }
  0x18   :  { %s20150_s20 = sld [smem:[%s23501_s0 + %s19993_s15]]   ;;  %s19997_s15 = smov 19  }
  0x19   :  { %23553 = sst [smem:[#allocation65_spill]] %s20140_s6 }
  0x1a   :  { %23554 = sst [smem:[#allocation66_spill]] %s20145_s12 }
  0x1b   :  { %s20155_s27 = sld [smem:[%s23501_s0 + %s19994_s22]]   ;;  %s19998_s22 = smov 20  }
  0x1c   :  { %s20160_s4 = sld [smem:[%s23501_s0 + %s19995_s28]]   ;;  %s19999_s28 = smov 21  }
  0x1d   :  { %s20165_s13 = sld [smem:[%s23501_s0 + %s19996_s7]]   ;;  %s20000_s7 = smov 22  }
  0x1e   :  { %23555 = sst [smem:[#allocation67_spill]] %s20150_s20 }
  0x1f   :  { %s20170_s9 = sld [smem:[%s23501_s0 + %s19997_s15]]   ;;  %s20001_s15 = smov 23  }
  0x20   :  { %s20175_s21 = sld [smem:[%s23501_s0 + %s19998_s22]]   ;;  %s20002_s22 = smov 24  }
  0x21   :  { %s20180_s17 = sld [smem:[%s23501_s0 + %s19999_s28]]   ;;  %s20003_s28 = smov 25  }
  0x22   :  { %23556 = sst [smem:[#allocation68_spill]] %s20160_s4 }
  0x23   :  { %s20185_s20 = sld [smem:[%s23501_s0 + %s20000_s7]]   ;;  %s20004_s7 = smov 26  }
  0x24   :  { %s20190_s6 = sld [smem:[%s23501_s0 + %s20001_s15]]   ;;  %s20005_s15 = smov 27  }
  0x25   :  { %23557 = sst [smem:[#allocation69_spill]] %s20170_s9 }
  0x26   :  { %s20195_s24 = sld [smem:[%s23501_s0 + %s20002_s22]]   ;;  %s20006_s22 = smov 28  }
  0x27   :  { %23558 = sst [smem:[#allocation70_spill]] %s20180_s17 }
  0x28   :  { %s20200_s14 = sld [smem:[%s23501_s0 + %s20003_s28]]   ;;  %s20007_s28 = smov 29  }
  0x29   :  { %s20205_s5 = sld [smem:[%s23501_s0 + %s20004_s7]]   ;;  %s20008_s7 = smov 30  }
  0x2a   :  { %23559 = sst [smem:[#allocation71_spill]] %s20190_s6 }
  0x2b   :  { %s20210_s6 = sld [smem:[%s23501_s0 + %s20005_s15]]   ;;  %s20009_s15 = smov 31  }
  0x2c   :  { %s20215_s17 = sld [smem:[%s23501_s0 + %s20006_s22]]   ;;  %s20010_s22 = smov 32  }
  0x2d   :  { %s20225_s9 = sld [smem:[%s23501_s0 + %s20008_s7]]   ;;  %s20012_s7 = smov 34  }
  0x2e   :  { %23560 = sst [smem:[#allocation72_spill]] %s20200_s14 }
  0x2f   :  { %s20220_s14 = sld [smem:[%s23501_s0 + %s20007_s28]]   ;;  %s20011_s28 = smov 33  }
  0x30   :  { %s20240_s4 = sld [smem:[%s23501_s0 + %s20011_s28]]   ;;  %s20015_s28 = smov 37  }
  0x31   :  { %23561 = sst [smem:[#allocation73_spill]] %s20210_s6 }
  0x32   :  { %23562 = sst [smem:[#allocation74_spill]] %s20215_s17 }
  0x33   :  { %23563 = sst [smem:[#allocation75_spill]] %s20225_s9 }
  0x34   :  { %s20230_s6 = sld [smem:[%s23501_s0 + %s20009_s15]]   ;;  %s20013_s15 = smov 35  }
  0x35   :  { %s20235_s17 = sld [smem:[%s23501_s0 + %s20010_s22]]   ;;  %s20014_s22 = smov 36  }
  0x36   :  { %s20245_s9 = sld [smem:[%s23501_s0 + %s20012_s7]]   ;;  %s20016_s7 = smov 38  }
  0x37   :  { %s20250_s12 = sld [smem:[%s23501_s0 + %s20013_s15]]  }
  0x38   :  { %s20260_s19 = sld [smem:[%s23501_s0 + %s20015_s28]]  }
  0x3b   :  { %23564 = sst [smem:[#allocation76_spill]] %s20235_s17 }
  0x3c   :  { %23565 = sst [smem:[#allocation77_spill]] %s20245_s9 }
  0x3d   :  { %s20255_s17 = sld [smem:[%s23501_s0 + %s20014_s22]]  }
  0x3e   :  { %s20265_s9 = sld [smem:[%s23501_s0 + %s20016_s7]]  }
  0x3f   :  { %82 = vsyncpa [#allocation3], 0 }
  0x40   :  { %83 = vsyncpa [#allocation5], 0 }
  0x41   :  { %84 = vsyncpa [#allocation8], 0 }
  0x42   :  { %85 = vsyncpa [#allocation11], 0 }
  0x43   :  { %86 = vsyncpa [#allocation14], 0 }
  0x44   :  { %87 = vsyncpa [#allocation17], 0 }
  0x45   :  { %88 = vsyncpa [#allocation20], 0 }
  0x46   :  { %89 = vsyncpa [#allocation23], 0 }
  0x47   :  { %90 = vsyncpa [#allocation26], 0 }
  0x48   :  { %91 = vsyncpa [#allocation29], 0 }
  0x49   :  { %92 = vsyncpa [#allocation32], 0 }
  0x4a   :  { %93 = vsyncpa [#allocation35], 0 }
  0x4b   :  { %94 = vsyncpa [#allocation38], 0 }
  0x4c   :  { %95 = vsyncpa [#allocation41], 0  ;;  %s20017_s15 = smov [#allocation4]  }
  0x4d   :  { %s123_s16 = sshll.u32 %s20017_s15, 4  ;;  %s124_s16 = int_to_ptr.vmem [resolvable:$true] %s123_s16 }
  0x4e   :  { %s19419_s18 = scalar_lea.vmem %s124_s16, 9216  ;;  %p19424_p1 = scmp.lt.s32.totalorder %s124_s16, %s124_s16 }
  0x4f   :  { %p19420_p0 = scmp.ne.s32.totalorder %s124_s16, %s19419_s18  ;;  %p19425_p2 = scmp.lt.s32.totalorder %s19419_s18, %s19419_s18 }
  0x51   :  { %p19426_p3 = por %p19425_p2, %p19424_p1 }
  0x53   :  { %p19427_p4 = pnand %p19426_p3, %p19420_p0 }
  0x55   :  { %19430 = shalt.err (!%p19427_p4)
}
  0x56   :  { %s20018_s0 = smov 64   ;;  %s20019_s22 = smov 4  }
  0x57   :  { %129 = dma.hbm_to_vmem [thread:$0]  %s20105_s29, 9216, %s124_s16, [#allocation5], %s20018_s0, %s20018_s0, %s20019_s22  }
  0x58   :  { %s20020_s23 = smov [#allocation7]   ;;  %s20021_s28 = smov [#allocation10]  }
  0x59   :  { %s148_s26 = sshll.u32 %s20020_s23, 4  ;;  %s172_s1 = sshll.u32 %s20021_s28, 4  ;;  %s149_s26 = int_to_ptr.vmem [resolvable:$true] %s148_s26  ;;  %s173_s1 = int_to_ptr.vmem [resolvable:$true] %s172_s1 }
  0x5a   :  { %s19439_s2 = scalar_lea.vmem %s149_s26, 64  ;;  %p19444_p6 = scmp.lt.s32.totalorder %s149_s26, %s149_s26 }
  0x5b   :  { %p19440_p5 = scmp.ne.s32.totalorder %s149_s26, %s19439_s2  ;;  %p19445_p7 = scmp.lt.s32.totalorder %s19439_s2, %s19439_s2 }
  0x5d   :  { %p19446_p8 = por %p19445_p7, %p19444_p6 }
  0x5f   :  { %p19447_p9 = pnand %p19446_p8, %p19440_p5 }
  0x61   :  { %19450 = shalt.err (!%p19447_p9)
}
  0x62   :  { %151 = dma.hbm_to_vmem [thread:$0]  %s20115_s8, 64, %s149_s26, [#allocation8]  }
  0x63   :  { %s19459_s7 = scalar_lea.vmem %s173_s1, 16  ;;  %s19463_s10 = scalar_lea.vmem %s173_s1, 32 }
  0x64   :  { %p19460_p10 = scmp.ne.s32.totalorder %s173_s1, %s19459_s7  ;;  %p19464_p11 = scmp.lt.s32.totalorder %s173_s1, %s173_s1 }
  0x65   :  { %p19465_p12 = scmp.lt.s32.totalorder %s19463_s10, %s19459_s7 }
  0x67   :  { %p19466_p13 = por %p19465_p12, %p19464_p11 }
  0x69   :  { %p19467_p0 = pnand %p19466_p13, %p19460_p10 }
  0x6b   :  { %19470 = shalt.err (!%p19467_p0)
}
  0x6c   :  { %175 = dma.hbm_to_vmem [thread:$0]  %s20135_s30, 16, %s173_s1, [#allocation11]  }
  0x6d   :  { %s20022_s29 = smov [#allocation13]   ;;  %s20023_s15 = smov [#allocation16]  }
  0x6e   :  { %s196_s11 = sshll.u32 %s20022_s29, 4  ;;  %s218_s16 = sshll.u32 %s20023_s15, 4  ;;  %s197_s11 = int_to_ptr.vmem [resolvable:$true] %s196_s11  ;;  %s219_s16 = int_to_ptr.vmem [resolvable:$true] %s218_s16 }
  0x6f   :  { %s19479_s18 = scalar_lea.vmem %s197_s11, 16  ;;  %s19483_s23 = scalar_lea.vmem %s197_s11, 32 }
  0x70   :  { %p19480_p1 = scmp.ne.s32.totalorder %s197_s11, %s19479_s18  ;;  %p19484_p2 = scmp.lt.s32.totalorder %s197_s11, %s197_s11 }
  0x71   :  { %p19485_p3 = scmp.lt.s32.totalorder %s19483_s23, %s19479_s18 }
  0x73   :  { %p19486_p4 = por %p19485_p3, %p19484_p2 }
  0x75   :  { %p19487_p5 = pnand %p19486_p4, %p19480_p1 }
  0x77   :  { %19490 = shalt.err (!%p19487_p5)
}
  0x78   :  { %199 = dma.hbm_to_vmem [thread:$0]  %s20155_s27, 16, %s197_s11, [#allocation14]  }
  0x79   :  { %s19499_s8 = scalar_lea.vmem %s219_s16, 160  ;;  %p19504_p7 = scmp.lt.s32.totalorder %s219_s16, %s219_s16 }
  0x7a   :  { %p19500_p6 = scmp.ne.s32.totalorder %s219_s16, %s19499_s8  ;;  %p19505_p8 = scmp.lt.s32.totalorder %s19499_s8, %s19499_s8 }
  0x7c   :  { %p19506_p9 = por %p19505_p8, %p19504_p7 }
  0x7e   :  { %p19507_p10 = pnand %p19506_p9, %p19500_p6 }
  0x80   :  { %19510 = shalt.err (!%p19507_p10)
}
  0x81   :  { %221 = dma.hbm_to_vmem [thread:$0]  %s20165_s13, 160, %s219_s16, [#allocation17]  }
  0x82   :  { %s20024_s30 = smov [#allocation19]   ;;  %s20025_s28 = smov [#allocation22]  }
  0x83   :  { %s240_s26 = sshll.u32 %s20024_s30, 4  ;;  %s262_s1 = sshll.u32 %s20025_s28, 4  ;;  %s241_s26 = int_to_ptr.vmem [resolvable:$true] %s240_s26  ;;  %s263_s1 = int_to_ptr.vmem [resolvable:$true] %s262_s1 }
  0x84   :  { %s19519_s2 = scalar_lea.vmem %s241_s26, 16  ;;  %s19523_s7 = scalar_lea.vmem %s241_s26, 32 }
  0x85   :  { %p19520_p11 = scmp.ne.s32.totalorder %s241_s26, %s19519_s2  ;;  %p19524_p12 = scmp.lt.s32.totalorder %s241_s26, %s241_s26 }
  0x86   :  { %p19525_p13 = scmp.lt.s32.totalorder %s19523_s7, %s19519_s2 }
  0x88   :  { %p19526_p0 = por %p19525_p13, %p19524_p12 }
  0x8a   :  { %p19527_p1 = pnand %p19526_p0, %p19520_p11 }
  0x8c   :  { %19530 = shalt.err (!%p19527_p1)
}
  0x8d   :  { %243 = dma.hbm_to_vmem [thread:$0]  %s20175_s21, 16, %s241_s26, [#allocation20]  }
  0x8e   :  { %s19539_s27 = scalar_lea.vmem %s263_s1, 48  ;;  %s19543_s10 = scalar_lea.vmem %s263_s1, 64 }
  0x8f   :  { %p19540_p2 = scmp.ne.s32.totalorder %s263_s1, %s19539_s27  ;;  %p19544_p3 = scmp.lt.s32.totalorder %s263_s1, %s263_s1 }
  0x90   :  { %p19545_p4 = scmp.lt.s32.totalorder %s19543_s10, %s19539_s27 }
  0x92   :  { %p19546_p5 = por %p19545_p4, %p19544_p3 }
  0x94   :  { %p19547_p6 = pnand %p19546_p5, %p19540_p2 }
  0x96   :  { %19550 = shalt.err (!%p19547_p6)
}
  0x97   :  { %265 = dma.hbm_to_vmem [thread:$0]  %s20185_s20, 48, %s263_s1, [#allocation23]  }
  0x98   :  { %s20026_s13 = smov [#allocation25]   ;;  %s20027_s11 = smov [#allocation28]  }
  0x99   :  { %s284_s29 = sshll.u32 %s20026_s13, 4  ;;  %s305_s15 = sshll.u32 %s20027_s11, 4  ;;  %s285_s29 = int_to_ptr.vmem [resolvable:$true] %s284_s29  ;;  %s306_s15 = int_to_ptr.vmem [resolvable:$true] %s305_s15 }
  0x9a   :  { %s19559_s16 = scalar_lea.vmem %s285_s29, 48  ;;  %s19563_s18 = scalar_lea.vmem %s285_s29, 64 }
  0x9b   :  { %p19560_p7 = scmp.ne.s32.totalorder %s285_s29, %s19559_s16  ;;  %p19564_p8 = scmp.lt.s32.totalorder %s285_s29, %s285_s29 }
  0x9c   :  { %p19565_p9 = scmp.lt.s32.totalorder %s19563_s18, %s19559_s16 }
  0x9e   :  { %p19566_p10 = por %p19565_p9, %p19564_p8 }
  0xa0   :  { %p19567_p11 = pnand %p19566_p10, %p19560_p7 }
  0xa2   :  { %19570 = shalt.err (!%p19567_p11)
}
  0xa3   :  { %287 = dma.hbm_to_vmem [thread:$0]  %s20195_s24, 48, %s285_s29, [#allocation26]  }
  0xa4   :  { %s19579_s21 = scalar_lea.vmem %s306_s15, 10240  ;;  %p19584_p13 = scmp.lt.s32.totalorder %s306_s15, %s306_s15 }
  0xa5   :  { %p19580_p12 = scmp.ne.s32.totalorder %s306_s15, %s19579_s21  ;;  %p19585_p0 = scmp.lt.s32.totalorder %s19579_s21, %s19579_s21 }
  0xa7   :  { %p19586_p1 = por %p19585_p0, %p19584_p13 }
  0xa9   :  { %p19587_p2 = pnand %p19586_p1, %p19580_p12 }
  0xab   :  { %19590 = shalt.err (!%p19587_p2)
}
  0xac   :  { %311 = dma.hbm_to_vmem [thread:$0]  %s20205_s5, 10240, %s306_s15, [#allocation29], %s20018_s0, %s20018_s0, %s20019_s22  }
  0xad   :  { %s20028_s20 = smov [#allocation31]   ;;  %s20029_s8 = smov [#allocation34]  }
  0xae   :  { %s330_s23 = sshll.u32 %s20028_s20, 4  ;;  %s352_s30 = sshll.u32 %s20029_s8, 4  ;;  %s331_s23 = int_to_ptr.vmem [resolvable:$true] %s330_s23  ;;  %s353_s30 = int_to_ptr.vmem [resolvable:$true] %s352_s30 }
  0xaf   :  { %s19599_s26 = scalar_lea.vmem %s331_s23, 16  ;;  %s19603_s24 = scalar_lea.vmem %s331_s23, 32 }
  0xb0   :  { %p19600_p3 = scmp.ne.s32.totalorder %s331_s23, %s19599_s26  ;;  %p19604_p4 = scmp.lt.s32.totalorder %s331_s23, %s331_s23 }
  0xb1   :  { %p19605_p5 = scmp.lt.s32.totalorder %s19603_s24, %s19599_s26 }
  0xb3   :  { %p19606_p6 = por %p19605_p5, %p19604_p4 }
  0xb5   :  { %p19607_p7 = pnand %p19606_p6, %p19600_p3 }
  0xb7   :  { %19610 = shalt.err (!%p19607_p7)
}
  0xb8   :  { %333 = dma.hbm_to_vmem [thread:$0]  %s20220_s14, 16, %s331_s23, [#allocation32]  }
  0xb9   :  { %s19619_s28 = scalar_lea.vmem %s353_s30, 48  ;;  %s19623_s1 = scalar_lea.vmem %s353_s30, 64 }
  0xba   :  { %p19620_p8 = scmp.ne.s32.totalorder %s353_s30, %s19619_s28  ;;  %p19624_p9 = scmp.lt.s32.totalorder %s353_s30, %s353_s30 }
  0xbb   :  { %p19625_p10 = scmp.lt.s32.totalorder %s19623_s1, %s19619_s28 }
  0xbd   :  { %p19626_p11 = por %p19625_p10, %p19624_p9 }
  0xbf   :  { %p19627_p12 = pnand %p19626_p11, %p19620_p8 }
  0xc1   :  { %19630 = shalt.err (!%p19627_p12)
}
  0xc2   :  { %355 = dma.hbm_to_vmem [thread:$0]  %s20230_s6, 48, %s353_s30, [#allocation35]  }
  0xc3   :  { %s20030_s5 = smov [#allocation37]   ;;  %s20031_s7 = smov [#allocation40]  }
  0xc4   :  { %s374_s2 = sshll.u32 %s20030_s5, 4  ;;  %s396_s27 = sshll.u32 %s20031_s7, 4  ;;  %s375_s2 = int_to_ptr.vmem [resolvable:$true] %s374_s2  ;;  %s397_s27 = int_to_ptr.vmem [resolvable:$true] %s396_s27 }
  0xc5   :  { %s19639_s10 = scalar_lea.vmem %s375_s2, 48  ;;  %s19643_s13 = scalar_lea.vmem %s375_s2, 64 }
  0xc6   :  { %p19640_p13 = scmp.ne.s32.totalorder %s375_s2, %s19639_s10  ;;  %p19644_p0 = scmp.lt.s32.totalorder %s375_s2, %s375_s2 }
  0xc7   :  { %p19645_p1 = scmp.lt.s32.totalorder %s19643_s13, %s19639_s10 }
  0xc9   :  { %p19646_p2 = por %p19645_p1, %p19644_p0 }
  0xcb   :  { %p19647_p3 = pnand %p19646_p2, %p19640_p13 }
  0xcd   :  { %19650 = shalt.err (!%p19647_p3)
}
  0xce   :  { %377 = dma.hbm_to_vmem [thread:$0]  %s20240_s4, 48, %s375_s2, [#allocation38]  }
  0xcf   :  { %s19659_s14 = scalar_lea.vmem %s397_s27, 32  ;;  %p19664_p5 = scmp.lt.s32.totalorder %s397_s27, %s397_s27 }
  0xd0   :  { %p19660_p4 = scmp.ne.s32.totalorder %s397_s27, %s19659_s14  ;;  %p19665_p6 = scmp.lt.s32.totalorder %s19659_s14, %s19659_s14 }
  0xd2   :  { %p19666_p7 = por %p19665_p6, %p19664_p5 }
  0xd4   :  { %p19667_p8 = pnand %p19666_p7, %p19660_p4 }
  0xd6   :  { %19670 = shalt.err (!%p19667_p8)
}
  0xd7   :  { %399 = dma.hbm_to_vmem [thread:$0]  %s20250_s12, 32, %s397_s27, [#allocation41]  }
  0xd8   :  { %s20032_s6 = smov [#allocation2]  }
  0xd9   :  { %s111_s29 = sshll.u32 %s20032_s6, 4  ;;  %s112_s29 = int_to_ptr.vmem [resolvable:$true] %s111_s29 }
  0xda   :  { %s19679_s11 = scalar_lea.vmem %s112_s29, 36864  ;;  %p19684_p10 = scmp.lt.s32.totalorder %s112_s29, %s112_s29 }
  0xdb   :  { %p19680_p9 = scmp.ne.s32.totalorder %s112_s29, %s19679_s11  ;;  %p19685_p11 = scmp.lt.s32.totalorder %s19679_s11, %s19679_s11 }
  0xdd   :  { %p19686_p12 = por %p19685_p11, %p19684_p10 }
  0xdf   :  { %p19687_p13 = pnand %p19686_p12, %p19680_p9 }
  0xe1   :  { %19690 = shalt.err (!%p19687_p13)
}
  0xe2   :  { %s20033_s4 = smov 256   ;;  %s20034_s15 = smov 16  }
  0xe3   :  { %117 = dma.hbm_to_vmem [thread:$0]  %s20100_s25, 36864, %s112_s29, [#allocation3], %s20033_s4, %s20033_s4, %s20034_s15  }
  0xe4   :  { %s20035_s16 = smov [#allocation6]   ;;  %s20036_s21 = smov [#allocation9]  }
  0xe5   :  { %s135_s18 = sshll.u32 %s20035_s16, 4  ;;  %s160_s20 = sshll.u32 %s20036_s21, 4  ;;  %s136_s18 = int_to_ptr.vmem [resolvable:$true] %s135_s18  ;;  %s161_s20 = int_to_ptr.vmem [resolvable:$true] %s160_s20 }
  0xe6   :  { %s19699_s12 = scalar_lea.vmem %s136_s18, 2304  ;;  %p19704_p1 = scmp.lt.s32.totalorder %s136_s18, %s136_s18 }
  0xe7   :  { %p19700_p0 = scmp.ne.s32.totalorder %s136_s18, %s19699_s12  ;;  %p19705_p2 = scmp.lt.s32.totalorder %s19699_s12, %s19699_s12 }
  0xe9   :  { %p19706_p3 = por %p19705_p2, %p19704_p1 }
  0xeb   :  { %p19707_p4 = pnand %p19706_p3, %p19700_p0 }
  0xed   :  { %19710 = shalt.err (!%p19707_p4)
}
  0xee   :  { %141 = dma.hbm_to_vmem [thread:$0]  %s20110_s3, 2304, %s136_s18, [#allocation5], %s20018_s0, %s20018_s0, %s20019_s22  }
  0xef   :  { %s19719_s23 = scalar_lea.vmem %s161_s20, 16  ;;  %s19723_s25 = scalar_lea.vmem %s161_s20, 32 }
  0xf0   :  { %p19720_p5 = scmp.ne.s32.totalorder %s161_s20, %s19719_s23  ;;  %p19724_p6 = scmp.lt.s32.totalorder %s161_s20, %s161_s20 }
  0xf1   :  { %p19725_p7 = scmp.lt.s32.totalorder %s19723_s25, %s19719_s23 }
  0xf3   :  { %p19726_p8 = por %p19725_p7, %p19724_p6 }
  0xf5   :  { %p19727_p9 = pnand %p19726_p8, %p19720_p5 }
  0xf7   :  { %19730 = shalt.err (!%p19727_p9)
}
  0xf8   :  { %s23566_s8 = sld [smem:[#allocation63_spill]]  ;;  %s20037_s30 = smov [#allocation12]  }
  0xf9   :  { %s184_s26 = sshll.u32 %s20037_s30, 4  ;;  %s20038_s24 = smov [#allocation15]   ;;  %s185_s26 = int_to_ptr.vmem [resolvable:$true] %s184_s26 }
  0xfa   :  { %s205_s28 = sshll.u32 %s20038_s24, 4  ;;  %s19739_s1 = scalar_lea.vmem %s185_s26, 16  ;;  %s206_s28 = int_to_ptr.vmem [resolvable:$true] %s205_s28 }
  0xfb   :  { %p19740_p10 = scmp.ne.s32.totalorder %s185_s26, %s19739_s1  ;;  %s19743_s5 = scalar_lea.vmem %s185_s26, 32 }
  0xfc   :  { %p19744_p11 = scmp.lt.s32.totalorder %s185_s26, %s185_s26  ;;  %p19745_p12 = scmp.lt.s32.totalorder %s19743_s5, %s19739_s1 }
  0xfe   :  { %163 = dma.hbm_to_vmem [thread:$0]  %s23566_s8, 16, %s161_s20, [#allocation8]  }
  0xff   :  { %p19746_p13 = por %p19745_p12, %p19744_p11 }
 0x101   :  { %p19747_p0 = pnand %p19746_p13, %p19740_p10 }
 0x103   :  { %19750 = shalt.err (!%p19747_p0)
}
 0x104   :  { %s23567_s3 = sld [smem:[#allocation66_spill]]  ;;  %s19759_s2 = scalar_lea.vmem %s206_s28, 2560 }
 0x105   :  { %p19760_p1 = scmp.ne.s32.totalorder %s206_s28, %s19759_s2  ;;  %p19764_p2 = scmp.lt.s32.totalorder %s206_s28, %s206_s28 }
 0x106   :  { %p19765_p3 = scmp.lt.s32.totalorder %s19759_s2, %s19759_s2 }
 0x108   :  { %p19766_p4 = por %p19765_p3, %p19764_p2 }
 0x10a   :  { %187 = dma.hbm_to_vmem [thread:$0]  %s23567_s3, 16, %s185_s26, [#allocation11]  }
 0x10b   :  { %p19767_p5 = pnand %p19766_p4, %p19760_p1 }
 0x10d   :  { %19770 = shalt.err (!%p19767_p5)
}
 0x10e   :  { %s20039_s7 = smov 640   ;;  %s23568_s27 = sld [smem:[#allocation68_spill]] }
 0x10f   :  { %s20040_s10 = smov 40   ;;  %s20041_s13 = smov [#allocation18]  }
 0x110   :  { %s227_s14 = sshll.u32 %s20041_s13, 4  ;;  %s20042_s6 = smov [#allocation21]   ;;  %s228_s14 = int_to_ptr.vmem [resolvable:$true] %s227_s14 }
 0x111   :  { %s249_s29 = sshll.u32 %s20042_s6, 4  ;;  %s19779_s11 = scalar_lea.vmem %s228_s14, 1024  ;;  %s250_s29 = int_to_ptr.vmem [resolvable:$true] %s249_s29 }
 0x112   :  { %p19780_p6 = scmp.ne.s32.totalorder %s228_s14, %s19779_s11  ;;  %p19784_p7 = scmp.lt.s32.totalorder %s228_s14, %s228_s14 }
 0x113   :  { %p19785_p8 = scmp.lt.s32.totalorder %s19779_s11, %s19779_s11 }
 0x114   :  { %211 = dma.hbm_to_vmem [thread:$0]  %s23568_s27, 2560, %s206_s28, [#allocation14], %s20039_s7, %s20039_s7, %s20040_s10  }
 0x115   :  { %p19786_p9 = por %p19785_p8, %p19784_p7 }
 0x117   :  { %p19787_p10 = pnand %p19786_p9, %p19780_p6 }
 0x119   :  { %19790 = shalt.err (!%p19787_p10)
}
 0x11a   :  { %s23569_s4 = sld [smem:[#allocation69_spill]]  ;;  %s19799_s16 = scalar_lea.vmem %s250_s29, 3072 }
 0x11b   :  { %p19800_p11 = scmp.ne.s32.totalorder %s250_s29, %s19799_s16  ;;  %p19804_p12 = scmp.lt.s32.totalorder %s250_s29, %s250_s29 }
 0x11c   :  { %p19805_p13 = scmp.lt.s32.totalorder %s19799_s16, %s19799_s16 }
 0x11e   :  { %p19806_p0 = por %p19805_p13, %p19804_p12 }
 0x120   :  { %233 = dma.hbm_to_vmem [thread:$0]  %s23569_s4, 1024, %s228_s14, [#allocation17], %s20018_s0, %s20018_s0, %s20019_s22  }
 0x121   :  { %p19807_p1 = pnand %p19806_p0, %p19800_p11 }
 0x123   :  { %19810 = shalt.err (!%p19807_p1)
}
 0x124   :  { %s20043_s18 = smov 192   ;;  %s23570_s21 = sld [smem:[#allocation70_spill]] }
 0x125   :  { %s20044_s20 = smov 12   ;;  %s20045_s12 = smov [#allocation24]  }
 0x126   :  { %s271_s23 = sshll.u32 %s20045_s12, 4  ;;  %s20046_s25 = smov [#allocation27]   ;;  %s272_s23 = int_to_ptr.vmem [resolvable:$true] %s271_s23 }
 0x127   :  { %s293_s8 = sshll.u32 %s20046_s25, 4  ;;  %s19819_s30 = scalar_lea.vmem %s272_s23, 3072  ;;  %s294_s8 = int_to_ptr.vmem [resolvable:$true] %s293_s8 }
 0x128   :  { %p19820_p2 = scmp.ne.s32.totalorder %s272_s23, %s19819_s30  ;;  %p19824_p3 = scmp.lt.s32.totalorder %s272_s23, %s272_s23 }
 0x129   :  { %p19825_p4 = scmp.lt.s32.totalorder %s19819_s30, %s19819_s30 }
 0x12a   :  { %255 = dma.hbm_to_vmem [thread:$0]  %s23570_s21, 3072, %s250_s29, [#allocation20], %s20043_s18, %s20043_s18, %s20044_s20  }
 0x12b   :  { %p19826_p5 = por %p19825_p4, %p19824_p3 }
 0x12d   :  { %p19827_p6 = pnand %p19826_p5, %p19820_p2 }
 0x12f   :  { %19830 = shalt.err (!%p19827_p6)
}
 0x130   :  { %s23571_s26 = sld [smem:[#allocation71_spill]]  ;;  %s19839_s24 = scalar_lea.vmem %s294_s8, 1024 }
 0x131   :  { %p19840_p7 = scmp.ne.s32.totalorder %s294_s8, %s19839_s24  ;;  %p19844_p8 = scmp.lt.s32.totalorder %s294_s8, %s294_s8 }
 0x132   :  { %p19845_p9 = scmp.lt.s32.totalorder %s19839_s24, %s19839_s24 }
 0x134   :  { %p19846_p10 = por %p19845_p9, %p19844_p8 }
 0x136   :  { %277 = dma.hbm_to_vmem [thread:$0]  %s23571_s26, 3072, %s272_s23, [#allocation23], %s20043_s18, %s20043_s18, %s20044_s20  }
 0x137   :  { %p19847_p11 = pnand %p19846_p10, %p19840_p7 }
 0x139   :  { %19850 = shalt.err (!%p19847_p11)
}
 0x13a   :  { %s23572_s28 = sld [smem:[#allocation72_spill]]  ;;  %s20047_s1 = smov [#allocation30]  }
 0x13b   :  { %s318_s5 = sshll.u32 %s20047_s1, 4  ;;  %s20048_s3 = smov [#allocation33]   ;;  %s319_s5 = int_to_ptr.vmem [resolvable:$true] %s318_s5 }
 0x13c   :  { %s339_s2 = sshll.u32 %s20048_s3, 4  ;;  %s19859_s7 = scalar_lea.vmem %s319_s5, 16  ;;  %s340_s2 = int_to_ptr.vmem [resolvable:$true] %s339_s2 }
 0x13d   :  { %p19860_p12 = scmp.ne.s32.totalorder %s319_s5, %s19859_s7  ;;  %s19863_s27 = scalar_lea.vmem %s319_s5, 32 }
 0x13e   :  { %p19864_p13 = scmp.lt.s32.totalorder %s319_s5, %s319_s5  ;;  %p19865_p0 = scmp.lt.s32.totalorder %s19863_s27, %s19859_s7 }
 0x140   :  { %299 = dma.hbm_to_vmem [thread:$0]  %s23572_s28, 1024, %s294_s8, [#allocation26], %s20018_s0, %s20018_s0, %s20019_s22  }
 0x141   :  { %p19866_p1 = por %p19865_p0, %p19864_p13 }
 0x143   :  { %p19867_p2 = pnand %p19866_p1, %p19860_p12 }
 0x145   :  { %19870 = shalt.err (!%p19867_p2)
}
 0x146   :  { %s23573_s10 = sld [smem:[#allocation73_spill]]  ;;  %s19879_s13 = scalar_lea.vmem %s340_s2, 3456 }
 0x147   :  { %p19880_p3 = scmp.ne.s32.totalorder %s340_s2, %s19879_s13  ;;  %p19884_p4 = scmp.lt.s32.totalorder %s340_s2, %s340_s2 }
 0x148   :  { %p19885_p5 = scmp.lt.s32.totalorder %s19879_s13, %s19879_s13 }
 0x14a   :  { %p19886_p6 = por %p19885_p5, %p19884_p4 }
 0x14c   :  { %321 = dma.hbm_to_vmem [thread:$0]  %s23573_s10, 16, %s319_s5, [#allocation29]  }
 0x14d   :  { %p19887_p7 = pnand %p19886_p6, %p19880_p3 }
 0x14f   :  { %19890 = shalt.err (!%p19887_p7)
}
 0x150   :  { %s23574_s14 = sld [smem:[#allocation75_spill]]  ;;  %s20049_s6 = smov [#allocation36]  }
 0x151   :  { %s361_s29 = sshll.u32 %s20049_s6, 4  ;;  %s20050_s11 = smov [#allocation39]   ;;  %s362_s29 = int_to_ptr.vmem [resolvable:$true] %s361_s29 }
 0x152   :  { %s383_s4 = sshll.u32 %s20050_s11, 4  ;;  %s19899_s16 = scalar_lea.vmem %s362_s29, 9216  ;;  %s384_s4 = int_to_ptr.vmem [resolvable:$true] %s383_s4 }
 0x153   :  { %p19900_p8 = scmp.ne.s32.totalorder %s362_s29, %s19899_s16  ;;  %p19904_p9 = scmp.lt.s32.totalorder %s362_s29, %s362_s29 }
 0x154   :  { %p19905_p10 = scmp.lt.s32.totalorder %s19899_s16, %s19899_s16 }
 0x156   :  { %345 = dma.hbm_to_vmem [thread:$0]  %s23574_s14, 3456, %s340_s2, [#allocation32], %s20043_s18, %s20043_s18, %s20044_s20  }
 0x157   :  { %p19906_p11 = por %p19905_p10, %p19904_p9 }
 0x159   :  { %p19907_p12 = pnand %p19906_p11, %p19900_p8 }
 0x15b   :  { %19910 = shalt.err (!%p19907_p12)
}
 0x15c   :  { %s23575_s21 = sld [smem:[#allocation76_spill]]  ;;  %s19919_s12 = scalar_lea.vmem %s384_s4, 6144 }
 0x15d   :  { %p19920_p13 = scmp.ne.s32.totalorder %s384_s4, %s19919_s12  ;;  %p19924_p0 = scmp.lt.s32.totalorder %s384_s4, %s384_s4 }
 0x15e   :  { %p19925_p1 = scmp.lt.s32.totalorder %s19919_s12, %s19919_s12 }
 0x160   :  { %p19926_p2 = por %p19925_p1, %p19924_p0 }
 0x162   :  { %367 = dma.hbm_to_vmem [thread:$0]  %s23575_s21, 9216, %s362_s29, [#allocation35], %s20043_s18, %s20043_s18, %s20044_s20  }
 0x163   :  { %p19927_p3 = pnand %p19926_p2, %p19920_p13 }
 0x165   :  { %19930 = shalt.err (!%p19927_p3)
}
 0x166   :  { %s20051_s23 = smov 128   ;;  %s23576_s25 = sld [smem:[#allocation77_spill]] }
 0x167   :  { %s20052_s8 = smov 8   ;;  %s20053_s30 = smov [#allocation42]  }
 0x168   :  { %s408_s26 = sshll.u32 %s20053_s30, 4  ;;  %s409_s26 = int_to_ptr.vmem [resolvable:$true] %s408_s26 }
 0x169   :  { %s19939_s24 = scalar_lea.vmem %s409_s26, 16  ;;  %s19943_s28 = scalar_lea.vmem %s409_s26, 32 }
 0x16a   :  { %p19940_p4 = scmp.ne.s32.totalorder %s409_s26, %s19939_s24  ;;  %p19944_p5 = scmp.lt.s32.totalorder %s409_s26, %s409_s26 }
 0x16b   :  { %p19945_p6 = scmp.lt.s32.totalorder %s19943_s28, %s19939_s24 }
 0x16c   :  { %389 = dma.hbm_to_vmem [thread:$0]  %s23576_s25, 6144, %s384_s4, [#allocation38], %s20051_s23, %s20051_s23, %s20052_s8  }
 0x16d   :  { %p19946_p7 = por %p19945_p6, %p19944_p5 }
 0x16f   :  { %p19947_p8 = pnand %p19946_p7, %p19940_p4 }
 0x171   :  { %19950 = shalt.err (!%p19947_p8)
}
 0x172   :  { %411 = dma.hbm_to_vmem [thread:$0]  %s20260_s19, 16, %s409_s26, [#allocation41]  }
 0x173   :  { %19951 = dma.done.wait [#allocation3], 36864  }
 0x174   :  { %19952 = vsyncadd [#allocation3], 4294930432 }
 0x175   :  { %19953 = dma.done.wait [#allocation5], 11520  }
 0x176   :  { %19954 = vsyncadd [#allocation5], 4294955776 }
 0x177   :  { %19955 = dma.done.wait [#allocation8], 80  }
 0x178   :  { %19956 = vsyncadd [#allocation8], 4294967216 }
 0x179   :  { %19957 = dma.done.wait [#allocation11], 32  }
 0x17a   :  { %19958 = vsyncadd [#allocation11], 4294967264 }
 0x17b   :  { %19959 = dma.done.wait [#allocation14], 2576  }
 0x17c   :  { %19960 = vsyncadd [#allocation14], 4294964720 }
 0x17d   :  { %19961 = dma.done.wait [#allocation17], 1184  }
 0x17e   :  { %19962 = vsyncadd [#allocation17], 4294966112 }
 0x17f   :  { %19963 = dma.done.wait [#allocation20], 3088  }
 0x180   :  { %19964 = vsyncadd [#allocation20], 4294964208 }
 0x181   :  { %19965 = dma.done.wait [#allocation23], 3120  }
 0x182   :  { %19966 = vsyncadd [#allocation23], 4294964176 }
 0x183   :  { %19967 = dma.done.wait [#allocation26], 1072  }
 0x184   :  { %19968 = vsyncadd [#allocation26], 4294966224 }
 0x185   :  { %19969 = dma.done.wait [#allocation29], 10256  }
 0x186   :  { %19970 = vsyncadd [#allocation29], 4294957040 }
 0x187   :  { %19971 = dma.done.wait [#allocation32], 3472  }
 0x188   :  { %19972 = vsyncadd [#allocation32], 4294963824 }
 0x189   :  { %19973 = dma.done.wait [#allocation35], 9264  }
 0x18a   :  { %19974 = vsyncadd [#allocation35], 4294958032 }
 0x18b   :  { %19975 = dma.done.wait [#allocation38], 6192  }
 0x18c   :  { %19976 = vsyncadd [#allocation38], 4294961104 }
 0x18d   :  { %19977 = dma.done.wait [#allocation41], 48  }
 0x18e   :  { %19978 = vsyncadd [#allocation41], 4294967248  ;;  %s23577_s19 = sld [smem:[#allocation57_spill]]  ;;  %v18246_v32 = vld [vmem:[#allocation2] ss:$16 sps:$4 sm:$0xff]   ;;  %s20055_s18 = smov 24  }
 0x18f   :  { %v18248_v33 = vld [vmem:[#allocation2 + $0x4] ss:$16 sps:$4 sm:$0xff]   ;;  %v18249_v34 = vld [vmem:[#allocation2 + $0x8] ss:$16 sps:$4 sm:$0xff]   ;;  %v18251_v35 = vld [vmem:[#allocation2 + $0xc] ss:$16 sps:$4 sm:$0xff]  }
 0x190   :  { %974 = vmatprep.mubr.bf16.mxu0 %v18248_v33  ;;  %v18252_v36 = vld [vmem:[#allocation2 + $0x24] ss:$16 sps:$4 sm:$0xff]   ;;  %1071 = vmatprep.mubr.bf16.mxu1 %v18251_v35  ;;  %v18254_v37 = vld [vmem:[#allocation2 + $0x2c] ss:$16 sps:$4 sm:$0xff]   ;;  %v18256_v38 = vld [vmem:[#allocation2 + $0x20] ss:$16 sps:$4 sm:$0xff]  }
 0x191   :  { %v18257_v39 = vld [vmem:[#allocation2 + $0x28] ss:$16 sps:$4 sm:$0xff]   ;;  %v18258_v40 = vld [vmem:[#allocation2 + $0x44] ss:$16 sps:$4 sm:$0xff]   ;;  %v18260_v41 = vld [vmem:[#allocation2 + $0x4c] ss:$16 sps:$4 sm:$0xff]  }
 0x192   :  { %v18262_v42 = vld [vmem:[#allocation2 + $0x40] ss:$16 sps:$4 sm:$0xff]   ;;  %v18263_v43 = vld [vmem:[#allocation2 + $0x48] ss:$16 sps:$4 sm:$0xff]   ;;  %v18264_v44 = vld [vmem:[#allocation2 + $0x64] ss:$16 sps:$4 sm:$0xff]  }
 0x193   :  { %v18266_v45 = vld [vmem:[#allocation2 + $0x6c] ss:$16 sps:$4 sm:$0xff]   ;;  %v18268_v46 = vld [vmem:[#allocation2 + $0x60] ss:$16 sps:$4 sm:$0xff]   ;;  %v18269_v47 = vld [vmem:[#allocation2 + $0x68] ss:$16 sps:$4 sm:$0xff]  }
 0x194   :  { %v20324_v0 = vld [vmem:[%s23577_s19 + $0x78] sm:$0xff]   ;;  %v20339_v4 = vld [vmem:[%s23577_s19 + $0x70] sm:$0xff]   ;;  %v20355_v8 = vld [vmem:[%s23577_s19 + $0x68] sm:$0xff]   ;;  %s23587_s1 = sld [smem:[#allocation62_spill]]  ;;  %vm4940_vm0 = vcmask 1041408   ;;  %s20057_s5 = smov 32  }
 0x195   :  { %v20327_v1 = vld [vmem:[%s23577_s19 + $0xf8] sm:$0xff]   ;;  %14510 = vmatprep.subr.bf16.mxu0 %v20324_v0  ;;  %v20343_v5 = vld [vmem:[%s23577_s19 + $0xf0] sm:$0xff]   ;;  %v20359_v9 = vld [vmem:[%s23577_s19 + $0xe8] sm:$0xff]   ;;  %vm4744_vm1 = vcmask 31744   ;;  %vm4761_vm2 = vcmask 64512   ;;  %vm4778_vm3 = vcmask 97280  }
 0x196   :  { %v20331_v2 = vld [vmem:[%s23577_s19 + $0x38] sm:$0xff]   ;;  %14574 = vmatprep.subr.bf16.mxu1 %v20327_v1  ;;  %v20347_v6 = vld [vmem:[%s23577_s19 + $0x30] sm:$0xff]   ;;  %v20363_v10 = vld [vmem:[%s23577_s19 + $0x28] sm:$0xff]   ;;  %vm4795_vm4 = vcmask 130048   ;;  %vm4812_vm5 = vcmask 162816   ;;  %vm4829_vm6 = vcmask 195584  }
 0x197   :  { %v20335_v3 = vld [vmem:[%s23577_s19 + $0xb8] sm:$0xff]   ;;  %14511 = vmatpush3.bf16.msra.mxu0 %v20331_v2  ;;  %v20351_v7 = vld [vmem:[%s23577_s19 + $0xb0] sm:$0xff]   ;;  %v20367_v11 = vld [vmem:[%s23577_s19 + $0xa8] sm:$0xff]   ;;  %vm4846_vm7 = vcmask 228352   ;;  %vm4863_vm8 = vcmask 261120   ;;  %vm4915_vm9 = vcmask 293888  }
 0x198   :  { %14575 = vmatpush3.bf16.msra.mxu1 %v20335_v3  ;;  %14512 = vmatprep.subr.bf16.mxu0 %v20339_v4  ;;  %v20371_v12 = vld [vmem:[%s23577_s19 + $0x60] sm:$0xff]   ;;  %v20387_v16 = vld [vmem:[%s23577_s19 + $0x58] sm:$0xff]   ;;  %v20403_v20 = vld [vmem:[%s23577_s19 + $0x50] sm:$0xff]   ;;  %s20058_s3 = smov 48   ;;  %s23619_s2 = sld [smem:[#allocation64_spill]]  ;;  %vm7002_vm10 = vcmask 392192  }
 0x199   :  { %14576 = vmatprep.subr.bf16.mxu1 %v20343_v5  ;;  %v20375_v13 = vld [vmem:[%s23577_s19 + $0xe0] sm:$0xff]   ;;  %v20391_v17 = vld [vmem:[%s23577_s19 + $0xd8] sm:$0xff]   ;;  %v20407_v21 = vld [vmem:[%s23577_s19 + $0xd0] sm:$0xff]   ;;  %s20060_s7 = smov 80   ;;  %s20061_s27 = smov 112   ;;  %vm7019_vm11 = vcmask 523264  }
 0x19a   :  { %v20379_v14 = vld [vmem:[%s23577_s19 + $0x20] sm:$0xff]   ;;  %v20395_v18 = vld [vmem:[%s23577_s19 + $0x18] sm:$0xff]   ;;  %v20411_v22 = vld [vmem:[%s23577_s19 + $0x10] sm:$0xff]   ;;  %s20062_s10 = smov 96   ;;  %vm7036_vm12 = vcmask 654336   ;;  %vm7053_vm13 = vcmask 785408  }
 0x19b   :  { %14513 = vmatpush3.bf16.msra.mxu0 %v20347_v6  ;;  %v20383_v15 = vld [vmem:[%s23577_s19 + $0xa0] sm:$0xff]   ;;  %v20399_v19 = vld [vmem:[%s23577_s19 + $0x98] sm:$0xff]   ;;  %v20415_v23 = vld [vmem:[%s23577_s19 + $0x90] sm:$0xff]   ;;  %vm7070_vm14 = vcmask 916480   ;;  %s23635_s13 = sld [smem:[#allocation65_spill]]  ;;  %vm20064_vm15 = vmmov 0  }
 0x19c   :  { %14577 = vmatpush3.bf16.msra.mxu1 %v20351_v7  ;;  %14514 = vmatprep.subr.bf16.mxu0 %v20355_v8  ;;  %v20419_v24 = vld [vmem:[%s23577_s19 + $0x48] sm:$0xff]   ;;  %v20435_v28 = vld [vmem:[%s23577_s19 + $0x40] sm:$0xff]   ;;  %s23682_s14 = sld [smem:[#allocation67_spill]]  ;;  %s20065_s16 = smov 56  }
 0x19d   :  { %14578 = vmatprep.subr.bf16.mxu1 %v20359_v9  ;;  %v20423_v25 = vld [vmem:[%s23577_s19 + $0xc8] sm:$0xff]   ;;  %v20439_v29 = vld [vmem:[%s23577_s19 + $0xc0] sm:$0xff]   ;;  %s23683_s6 = sld [smem:[#allocation60_spill]]  ;;  %s20066_s21 = smov 72  }
 0x19e   :  { %v20427_v26 = vld [vmem:[%s23577_s19 + $0x8] sm:$0xff]   ;;  %v20443_v30 = vld [vmem:[%s23577_s19] sm:$0xff]   ;;  %s23684_s29 = sld [smem:[#allocation61_spill]] }
 0x19f   :  { %14515 = vmatpush3.bf16.msra.mxu0 %v20363_v10  ;;  %v20431_v27 = vld [vmem:[%s23577_s19 + $0x88] sm:$0xff]   ;;  %v20447_v31 = vld [vmem:[%s23577_s19 + $0x80] sm:$0xff]   ;;  %s23685_s11 = sld [smem:[#allocation58_spill]] }
 0x1a0   :  { %14579 = vmatpush3.bf16.msra.mxu1 %v20367_v11  ;;  %14516 = vmatprep.subr.bf16.mxu0 %v20371_v12  ;;  %v18270_v48 = vld [vmem:[#allocation2 + $0x84] ss:$16 sps:$4 sm:$0xff]   ;;  %v18272_v49 = vld [vmem:[#allocation2 + $0x8c] ss:$16 sps:$4 sm:$0xff]   ;;  %v18274_v50 = vld [vmem:[#allocation2 + $0x80] ss:$16 sps:$4 sm:$0xff]  }
 0x1a1   :  { %14580 = vmatprep.subr.bf16.mxu1 %v20375_v13  ;;  %v18275_v51 = vld [vmem:[#allocation2 + $0x88] ss:$16 sps:$4 sm:$0xff]   ;;  %v18276_v52 = vld [vmem:[#allocation2 + $0xa4] ss:$16 sps:$4 sm:$0xff]   ;;  %v18278_v53 = vld [vmem:[#allocation2 + $0xac] ss:$16 sps:$4 sm:$0xff]  }
 0x1a2   :  { %v18280_v54 = vld [vmem:[#allocation2 + $0xa0] ss:$16 sps:$4 sm:$0xff]   ;;  %v18281_v55 = vld [vmem:[#allocation2 + $0xa8] ss:$16 sps:$4 sm:$0xff]   ;;  %v18282_v56 = vld [vmem:[#allocation2 + $0xc4] ss:$16 sps:$4 sm:$0xff]  }
 0x1a3   :  { %14517 = vmatpush3.bf16.msra.mxu0 %v20379_v14  ;;  %v18284_v57 = vld [vmem:[#allocation2 + $0xcc] ss:$16 sps:$4 sm:$0xff]   ;;  %v18286_v58 = vld [vmem:[#allocation2 + $0xc0] ss:$16 sps:$4 sm:$0xff]   ;;  %v18287_v59 = vld [vmem:[#allocation2 + $0xc8] ss:$16 sps:$4 sm:$0xff]  }
 0x1a4   :  { %14581 = vmatpush3.bf16.msra.mxu1 %v20383_v15  ;;  %14518 = vmatprep.subr.bf16.mxu0 %v20387_v16  ;;  %v18288_v60 = vld [vmem:[#allocation2 + $0xe4] ss:$16 sps:$4 sm:$0xff]   ;;  %v18290_v61 = vld [vmem:[#allocation2 + $0xec] ss:$16 sps:$4 sm:$0xff]   ;;  %v18292_v62 = vld [vmem:[#allocation2 + $0xe0] ss:$16 sps:$4 sm:$0xff]  }
 0x1a5   :  { %14582 = vmatprep.subr.bf16.mxu1 %v20391_v17  ;;  %v18293_v63 = vld [vmem:[#allocation2 + $0xe8] ss:$16 sps:$4 sm:$0xff]   ;;  %v18299_v33 = vld [vmem:[#allocation2 + $0x10c] ss:$16 sps:$4 sm:$0xff]   ;;  %s23686_s4 = sld [smem:[#allocation74_spill]] }
 0x1a6   :  { %v18297_v35 = vld [vmem:[#allocation2 + $0x108] ss:$16 sps:$4 sm:$0xff]  }
 0x1a7   :  { %14519 = vmatpush3.bf16.msra.mxu0 %v20395_v18 }
 0x1a8   :  { %14583 = vmatpush3.bf16.msra.mxu1 %v20399_v19  ;;  %14520 = vmatprep.subr.bf16.mxu0 %v20403_v20 }
 0x1a9   :  { %14584 = vmatprep.subr.bf16.mxu1 %v20407_v21 }
 0x1ab   :  { %14521 = vmatpush3.bf16.msra.mxu0 %v20411_v22 }
 0x1ac   :  { %14585 = vmatpush3.bf16.msra.mxu1 %v20415_v23  ;;  %14522 = vmatprep.subr.bf16.mxu0 %v20419_v24 }
 0x1ad   :  { %14586 = vmatprep.subr.bf16.mxu1 %v20423_v25 }
 0x1af   :  { %14523 = vmatpush3.bf16.msra.mxu0 %v20427_v26 }
 0x1b0   :  { %14587 = vmatpush3.bf16.msra.mxu1 %v20431_v27  ;;  %14524 = vmatprep.subr.bf16.mxu0 %v20435_v28 }
 0x1b1   :  { %14588 = vmatprep.subr.bf16.mxu1 %v20439_v29 }
 0x1b3   :  { %14525 = vmatpush3.bf16.msra.mxu0 %v20443_v30 }
 0x1b4   :  { %14589 = vmatpush3.bf16.msra.mxu1 %v20447_v31  ;;  %14638 = vmatprep.subr.bf16.mxu0 %v20324_v0 }
 0x1b5   :  { %14702 = vmatprep.subr.bf16.mxu1 %v20327_v1 }
 0x1b6   :  { %975 = vmatmul.mubr.bf16.vlgmr.msra.gmra.mxu0 %v18246_v32  ;;  %v18296_v32 = vld [vmem:[#allocation2 + $0x104] ss:$16 sps:$4 sm:$0xff]  }
 0x1b7   :  { %1072 = vmatmul.mubr.bf16.vlgmr.msra.gmra.mxu1 %v18249_v34  ;;  %982 = vmatprep.mubr.bf16.mxu0 %v18252_v36  ;;  %v18294_v34 = vld [vmem:[#allocation2 + $0x100] ss:$16 sps:$4 sm:$0xff]   ;;  %v18300_v36 = vld [vmem:[#allocation2 + $0x124] ss:$16 sps:$4 sm:$0xff]  }
 0x1b8   :  { %1079 = vmatprep.mubr.bf16.mxu1 %v18254_v37  ;;  %14639 = vmatpush3.bf16.msra.mxu0 %v20331_v2  ;;  %v18302_v37 = vld [vmem:[#allocation2 + $0x12c] ss:$16 sps:$4 sm:$0xff]  }
 0x1b9   :  { %14703 = vmatpush3.bf16.msra.mxu1 %v20335_v3  ;;  %14640 = vmatprep.subr.bf16.mxu0 %v20339_v4 }
 0x1ba   :  { %14704 = vmatprep.subr.bf16.mxu1 %v20343_v5 }
 0x1bc   :  { %14641 = vmatpush3.bf16.msra.mxu0 %v20347_v6 }
 0x1bd   :  { %14705 = vmatpush3.bf16.msra.mxu1 %v20351_v7  ;;  %14642 = vmatprep.subr.bf16.mxu0 %v20355_v8 }
 0x1be   :  { %983 = vmatmul.mubr.bf16.gmra.mxu0 %v18256_v38  ;;  %14706 = vmatprep.subr.bf16.mxu1 %v20359_v9  ;;  %v18304_v38 = vld [vmem:[#allocation2 + $0x120] ss:$16 sps:$4 sm:$0xff]  }
 0x1bf   :  { %1080 = vmatmul.mubr.bf16.gmra.mxu1 %v18257_v39  ;;  %990 = vmatprep.mubr.bf16.mxu0 %v18258_v40  ;;  %v18305_v39 = vld [vmem:[#allocation2 + $0x128] ss:$16 sps:$4 sm:$0xff]   ;;  %v18306_v40 = vld [vmem:[#allocation2 + $0x144] ss:$16 sps:$4 sm:$0xff]  }
 0x1c0   :  { %1087 = vmatprep.mubr.bf16.mxu1 %v18260_v41  ;;  %14643 = vmatpush3.bf16.msra.mxu0 %v20363_v10  ;;  %v18308_v41 = vld [vmem:[#allocation2 + $0x14c] ss:$16 sps:$4 sm:$0xff]  }
 0x1c1   :  { %14707 = vmatpush3.bf16.msra.mxu1 %v20367_v11  ;;  %14644 = vmatprep.subr.bf16.mxu0 %v20371_v12 }
 0x1c2   :  { %14708 = vmatprep.subr.bf16.mxu1 %v20375_v13 }
 0x1c4   :  { %14645 = vmatpush3.bf16.msra.mxu0 %v20379_v14 }
 0x1c5   :  { %14709 = vmatpush3.bf16.msra.mxu1 %v20383_v15  ;;  %14646 = vmatprep.subr.bf16.mxu0 %v20387_v16 }
 0x1c6   :  { %991 = vmatmul.mubr.bf16.gmra.mxu0 %v18262_v42  ;;  %14710 = vmatprep.subr.bf16.mxu1 %v20391_v17  ;;  %v20522_v42 = vld [vmem:[%s23577_s19 + $0xb8] sm:$0xff]  }
 0x1c7   :  { %1088 = vmatmul.mubr.bf16.gmra.mxu1 %v18263_v43  ;;  %998 = vmatprep.mubr.bf16.mxu0 %v18264_v44  ;;  %v20526_v43 = vld [vmem:[%s23577_s19 + $0x70] sm:$0xff]  }
 0x1c8   :  { %1095 = vmatprep.mubr.bf16.mxu1 %v18266_v45  ;;  %14647 = vmatpush3.bf16.msra.mxu0 %v20395_v18  ;;  %v20530_v44 = vld [vmem:[%s23577_s19 + $0xf0] sm:$0xff]   ;;  %v18356_v45 = vld [vmem:[#allocation2 + $0x24c] ss:$16 sps:$4 sm:$0xff]  }
 0x1c9   :  { %14711 = vmatpush3.bf16.msra.mxu1 %v20399_v19  ;;  %14648 = vmatprep.subr.bf16.mxu0 %v20403_v20 }
 0x1ca   :  { %14712 = vmatprep.subr.bf16.mxu1 %v20407_v21 }
 0x1cc   :  { %14649 = vmatpush3.bf16.msra.mxu0 %v20411_v22 }
 0x1cd   :  { %14713 = vmatpush3.bf16.msra.mxu1 %v20415_v23  ;;  %14650 = vmatprep.subr.bf16.mxu0 %v20419_v24 }
 0x1ce   :  { %999 = vmatmul.mubr.bf16.gmra.mxu0 %v18268_v46  ;;  %14714 = vmatprep.subr.bf16.mxu1 %v20423_v25  ;;  %v20534_v46 = vld [vmem:[%s23577_s19 + $0x30] sm:$0xff]  }
 0x1cf   :  { %1096 = vmatmul.mubr.bf16.gmra.mxu1 %v18269_v47  ;;  %1006 = vmatprep.mubr.bf16.mxu0 %v18270_v48  ;;  %v20538_v47 = vld [vmem:[%s23577_s19 + $0xb0] sm:$0xff]   ;;  %v20542_v48 = vld [vmem:[%s23577_s19 + $0x68] sm:$0xff]  }
 0x1d0   :  { %1103 = vmatprep.mubr.bf16.mxu1 %v18272_v49  ;;  %14651 = vmatpush3.bf16.msra.mxu0 %v20427_v26  ;;  %v20546_v49 = vld [vmem:[%s23577_s19 + $0xe8] sm:$0xff]  }
 0x1d1   :  { %14715 = vmatpush3.bf16.msra.mxu1 %v20431_v27  ;;  %14652 = vmatprep.subr.bf16.mxu0 %v20435_v28 }
 0x1d2   :  { %14716 = vmatprep.subr.bf16.mxu1 %v20439_v29 }
 0x1d4   :  { %14653 = vmatpush3.bf16.msra.mxu0 %v20443_v30 }
 0x1d5   :  { %14717 = vmatpush3.bf16.msra.mxu1 %v20447_v31  ;;  %14766 = vmatprep.subr.bf16.mxu0 %v20324_v0 }
 0x1d6   :  { %1007 = vmatmul.mubr.bf16.gmra.mxu0 %v18274_v50  ;;  %14830 = vmatprep.subr.bf16.mxu1 %v20327_v1  ;;  %v18358_v50 = vld [vmem:[#allocation2 + $0x240] ss:$16 sps:$4 sm:$0xff]  }
 0x1d7   :  { %1104 = vmatmul.mubr.bf16.gmra.mxu1 %v18275_v51  ;;  %1014 = vmatprep.mubr.bf16.mxu0 %v18276_v52  ;;  %v20550_v51 = vld [vmem:[%s23577_s19 + $0x28] sm:$0xff]  }
 0x1d8   :  { %1111 = vmatprep.mubr.bf16.mxu1 %v18278_v53  ;;  %v18359_v52 = vld [vmem:[#allocation2 + $0x248] ss:$16 sps:$4 sm:$0xff]   ;;  %v18360_v53 = vld [vmem:[#allocation2 + $0x264] ss:$16 sps:$4 sm:$0xff]  }
 0x1de   :  { %1015 = vmatmul.mubr.bf16.gmra.mxu0 %v18280_v54  ;;  %v20554_v54 = vld [vmem:[%s23577_s19 + $0xa8] sm:$0xff]  }
 0x1df   :  { %1112 = vmatmul.mubr.bf16.gmra.mxu1 %v18281_v55  ;;  %1022 = vmatprep.mubr.bf16.mxu0 %v18282_v56  ;;  %v20558_v55 = vld [vmem:[%s23577_s19 + $0x60] sm:$0xff]  }
 0x1e0   :  { %1119 = vmatprep.mubr.bf16.mxu1 %v18284_v57  ;;  %v20562_v56 = vld [vmem:[%s23577_s19 + $0xe0] sm:$0xff]   ;;  %v18362_v57 = vld [vmem:[#allocation2 + $0x26c] ss:$16 sps:$4 sm:$0xff]  }
 0x1e6   :  { %1023 = vmatmul.mubr.bf16.gmra.mxu0 %v18286_v58  ;;  %v20566_v58 = vld [vmem:[%s23577_s19 + $0x20] sm:$0xff]  }
 0x1e7   :  { %1120 = vmatmul.mubr.bf16.gmra.mxu1 %v18287_v59  ;;  %1030 = vmatprep.mubr.bf16.mxu0 %v18288_v60  ;;  %v20570_v59 = vld [vmem:[%s23577_s19 + $0xa0] sm:$0xff]   ;;  %v20574_v60 = vld [vmem:[%s23577_s19 + $0x58] sm:$0xff]  }
 0x1e8   :  { %1127 = vmatprep.mubr.bf16.mxu1 %v18290_v61  ;;  %v20578_v61 = vld [vmem:[%s23577_s19 + $0xd8] sm:$0xff]  }
 0x1ee   :  { %1031 = vmatmul.mubr.bf16.gmra.mxu0 %v18292_v62  ;;  %v18364_v62 = vld [vmem:[#allocation2 + $0x260] ss:$16 sps:$4 sm:$0xff]  }
 0x1ef   :  { %1128 = vmatmul.mubr.bf16.gmra.mxu1 %v18293_v63  ;;  %1361 = vmatprep.mubr.bf16.mxu0 %v18296_v32  ;;  %v20582_v63 = vld [vmem:[%s23577_s19 + $0x18] sm:$0xff]  }
 0x1f0   :  { %1458 = vmatprep.mubr.bf16.mxu1 %v18299_v33  ;;  %v18365_v32 = vld [vmem:[#allocation2 + $0x268] ss:$16 sps:$4 sm:$0xff]   ;;  %v18366_v33 = vld [vmem:[#allocation2 + $0x284] ss:$16 sps:$4 sm:$0xff]  }
 0x1f6   :  { %1362 = vmatmul.mubr.bf16.vlgmr.msra.gmra.mxu0 %v18294_v34  ;;  %v20586_v34 = vld [vmem:[%s23577_s19 + $0x98] sm:$0xff]  }
 0x1f7   :  { %1459 = vmatmul.mubr.bf16.vlgmr.msra.gmra.mxu1 %v18297_v35  ;;  %1369 = vmatprep.mubr.bf16.mxu0 %v18300_v36  ;;  %v20590_v35 = vld [vmem:[%s23577_s19 + $0x50] sm:$0xff]  }
 0x1f8   :  { %1466 = vmatprep.mubr.bf16.mxu1 %v18302_v37  ;;  %14767 = vmatpush3.bf16.msra.mxu0 %v20331_v2  ;;  %v18310_v2 = vld [vmem:[#allocation2 + $0x140] ss:$16 sps:$4 sm:$0xff]   ;;  %v18368_v37 = vld [vmem:[#allocation2 + $0x28c] ss:$16 sps:$4 sm:$0xff]  }
 0x1f9   :  { %14831 = vmatpush3.bf16.msra.mxu1 %v20335_v3  ;;  %14768 = vmatprep.subr.bf16.mxu0 %v20339_v4  ;;  %v18311_v3 = vld [vmem:[#allocation2 + $0x148] ss:$16 sps:$4 sm:$0xff]   ;;  %v18312_v4 = vld [vmem:[#allocation2 + $0x164] ss:$16 sps:$4 sm:$0xff]  }
 0x1fa   :  { %14832 = vmatprep.subr.bf16.mxu1 %v20343_v5  ;;  %v18314_v5 = vld [vmem:[#allocation2 + $0x16c] ss:$16 sps:$4 sm:$0xff]   ;;  %v20594_v36 = vld [vmem:[%s23577_s19 + $0xd0] sm:$0xff]  }
 0x1fc   :  { %14769 = vmatpush3.bf16.msra.mxu0 %v20347_v6  ;;  %v18316_v6 = vld [vmem:[#allocation2 + $0x160] ss:$16 sps:$4 sm:$0xff]  }
 0x1fd   :  { %14833 = vmatpush3.bf16.msra.mxu1 %v20351_v7  ;;  %14770 = vmatprep.subr.bf16.mxu0 %v20355_v8  ;;  %v18317_v7 = vld [vmem:[#allocation2 + $0x168] ss:$16 sps:$4 sm:$0xff]   ;;  %v18318_v8 = vld [vmem:[#allocation2 + $0x184] ss:$16 sps:$4 sm:$0xff]  }
 0x1fe   :  { %1370 = vmatmul.mubr.bf16.gmra.mxu0 %v18304_v38  ;;  %14834 = vmatprep.subr.bf16.mxu1 %v20359_v9  ;;  %v18320_v9 = vld [vmem:[#allocation2 + $0x18c] ss:$16 sps:$4 sm:$0xff]   ;;  %v20598_v38 = vld [vmem:[%s23577_s19 + $0x10] sm:$0xff]  }
 0x1ff   :  { %1467 = vmatmul.mubr.bf16.gmra.mxu1 %v18305_v39  ;;  %1377 = vmatprep.mubr.bf16.mxu0 %v18306_v40  ;;  %v20602_v39 = vld [vmem:[%s23577_s19 + $0x90] sm:$0xff]   ;;  %v20606_v40 = vld [vmem:[%s23577_s19 + $0x48] sm:$0xff]  }
 0x200   :  { %1474 = vmatprep.mubr.bf16.mxu1 %v18308_v41  ;;  %14771 = vmatpush3.bf16.msra.mxu0 %v20363_v10  ;;  %v18322_v10 = vld [vmem:[#allocation2 + $0x180] ss:$16 sps:$4 sm:$0xff]   ;;  %v20610_v41 = vld [vmem:[%s23577_s19 + $0xc8] sm:$0xff]  }
 0x201   :  { %14835 = vmatpush3.bf16.msra.mxu1 %v20367_v11  ;;  %14772 = vmatprep.subr.bf16.mxu0 %v20371_v12  ;;  %v18323_v11 = vld [vmem:[#allocation2 + $0x188] ss:$16 sps:$4 sm:$0xff]   ;;  %v18324_v12 = vld [vmem:[#allocation2 + $0x1a4] ss:$16 sps:$4 sm:$0xff]  }
 0x202   :  { %14836 = vmatprep.subr.bf16.mxu1 %v20375_v13  ;;  %v18326_v13 = vld [vmem:[#allocation2 + $0x1ac] ss:$16 sps:$4 sm:$0xff]  }
 0x204   :  { %14773 = vmatpush3.bf16.msra.mxu0 %v20379_v14  ;;  %v18328_v14 = vld [vmem:[#allocation2 + $0x1a0] ss:$16 sps:$4 sm:$0xff]  }
 0x205   :  { %14837 = vmatpush3.bf16.msra.mxu1 %v20383_v15  ;;  %14774 = vmatprep.subr.bf16.mxu0 %v20387_v16  ;;  %v18329_v15 = vld [vmem:[#allocation2 + $0x1a8] ss:$16 sps:$4 sm:$0xff]   ;;  %v18330_v16 = vld [vmem:[#allocation2 + $0x1c4] ss:$16 sps:$4 sm:$0xff]  }
 0x206   :  { %1378 = vmatmul.mubr.bf16.gmra.mxu0 %v18310_v2  ;;  %14838 = vmatprep.subr.bf16.mxu1 %v20391_v17  ;;  %v18332_v17 = vld [vmem:[#allocation2 + $0x1cc] ss:$16 sps:$4 sm:$0xff]   ;;  %v18370_v2 = vld [vmem:[#allocation2 + $0x280] ss:$16 sps:$4 sm:$0xff]  }
 0x207   :  { %1475 = vmatmul.mubr.bf16.gmra.mxu1 %v18311_v3  ;;  %1385 = vmatprep.mubr.bf16.mxu0 %v18312_v4  ;;  %v20614_v3 = vld [vmem:[%s23577_s19 + $0x8] sm:$0xff]  }
 0x208   :  { %1482 = vmatprep.mubr.bf16.mxu1 %v18314_v5  ;;  %14775 = vmatpush3.bf16.msra.mxu0 %v20395_v18  ;;  %v18334_v18 = vld [vmem:[#allocation2 + $0x1c0] ss:$16 sps:$4 sm:$0xff]   ;;  %v18371_v4 = vld [vmem:[#allocation2 + $0x288] ss:$16 sps:$4 sm:$0xff]   ;;  %v18372_v5 = vld [vmem:[#allocation2 + $0x2a4] ss:$16 sps:$4 sm:$0xff]  }
 0x209   :  { %14839 = vmatpush3.bf16.msra.mxu1 %v20399_v19  ;;  %14776 = vmatprep.subr.bf16.mxu0 %v20403_v20  ;;  %v18335_v19 = vld [vmem:[#allocation2 + $0x1c8] ss:$16 sps:$4 sm:$0xff]   ;;  %v18336_v20 = vld [vmem:[#allocation2 + $0x1e4] ss:$16 sps:$4 sm:$0xff]  }
 0x20a   :  { %14840 = vmatprep.subr.bf16.mxu1 %v20407_v21  ;;  %v18338_v21 = vld [vmem:[#allocation2 + $0x1ec] ss:$16 sps:$4 sm:$0xff]  }
 0x20c   :  { %14777 = vmatpush3.bf16.msra.mxu0 %v20411_v22  ;;  %v18344_v22 = vld [vmem:[#allocation2 + $0x204] ss:$16 sps:$4 sm:$0xff]  }
 0x20d   :  { %14841 = vmatpush3.bf16.msra.mxu1 %v20415_v23  ;;  %14778 = vmatprep.subr.bf16.mxu0 %v20419_v24  ;;  %v18347_v23 = vld [vmem:[#allocation2 + $0x20c] ss:$16 sps:$4 sm:$0xff]   ;;  %v18342_v24 = vld [vmem:[#allocation2 + $0x200] ss:$16 sps:$4 sm:$0xff]  }
 0x20e   :  { %1386 = vmatmul.mubr.bf16.gmra.mxu0 %v18316_v6  ;;  %14842 = vmatprep.subr.bf16.mxu1 %v20423_v25  ;;  %v18345_v25 = vld [vmem:[#allocation2 + $0x208] ss:$16 sps:$4 sm:$0xff]  }
 0x20f   :  { %1483 = vmatmul.mubr.bf16.gmra.mxu1 %v18317_v7  ;;  %1393 = vmatprep.mubr.bf16.mxu0 %v18318_v8  ;;  %v20618_v6 = vld [vmem:[%s23577_s19 + $0x88] sm:$0xff]   ;;  %v20622_v7 = vld [vmem:[%s23577_s19 + $0x40] sm:$0xff]  }
 0x210   :  { %1490 = vmatprep.mubr.bf16.mxu1 %v18320_v9  ;;  %14779 = vmatpush3.bf16.msra.mxu0 %v20427_v26  ;;  %v18348_v26 = vld [vmem:[#allocation2 + $0x224] ss:$16 sps:$4 sm:$0xff]   ;;  %v18374_v9 = vld [vmem:[#allocation2 + $0x2ac] ss:$16 sps:$4 sm:$0xff]  }
 0x211   :  { %14843 = vmatpush3.bf16.msra.mxu1 %v20431_v27  ;;  %14780 = vmatprep.subr.bf16.mxu0 %v20435_v28  ;;  %v18350_v27 = vld [vmem:[#allocation2 + $0x22c] ss:$16 sps:$4 sm:$0xff]   ;;  %v18352_v28 = vld [vmem:[#allocation2 + $0x220] ss:$16 sps:$4 sm:$0xff]  }
 0x212   :  { %14844 = vmatprep.subr.bf16.mxu1 %v20439_v29  ;;  %v20518_v29 = vld [vmem:[%s23577_s19 + $0x38] sm:$0xff]   ;;  %v20626_v8 = vld [vmem:[%s23577_s19 + $0xc0] sm:$0xff]  }
 0x214   :  { %14781 = vmatpush3.bf16.msra.mxu0 %v20443_v30  ;;  %v18353_v30 = vld [vmem:[#allocation2 + $0x228] ss:$16 sps:$4 sm:$0xff]  }
 0x215   :  { %14845 = vmatpush3.bf16.msra.mxu1 %v20447_v31  ;;  %14894 = vmatprep.subr.bf16.mxu0 %v20324_v0  ;;  %v18340_v0 = vld [vmem:[#allocation2 + $0x1e0] ss:$16 sps:$4 sm:$0xff]   ;;  %v18354_v31 = vld [vmem:[#allocation2 + $0x244] ss:$16 sps:$4 sm:$0xff]  }
 0x216   :  { %1394 = vmatmul.mubr.bf16.gmra.mxu0 %v18322_v10  ;;  %14958 = vmatprep.subr.bf16.mxu1 %v20327_v1  ;;  %v18341_v1 = vld [vmem:[#allocation2 + $0x1e8] ss:$16 sps:$4 sm:$0xff]   ;;  %v20630_v10 = vld [vmem:[%s23577_s19] sm:$0xff]  }
 0x217   :  { %1491 = vmatmul.mubr.bf16.gmra.mxu1 %v18323_v11  ;;  %1401 = vmatprep.mubr.bf16.mxu0 %v18324_v12  ;;  %v20634_v11 = vld [vmem:[%s23577_s19 + $0x80] sm:$0xff]   ;;  %v20638_v12 = vld [vmem:[%s23577_s19 + $0x78] sm:$0xff]  }
 0x218   :  { %1498 = vmatprep.mubr.bf16.mxu1 %v18326_v13  ;;  %v20642_v13 = vld [vmem:[%s23577_s19 + $0xf8] sm:$0xff]  }
 0x21e   :  { %1402 = vmatmul.mubr.bf16.gmra.mxu0 %v18328_v14  ;;  %v18376_v14 = vld [vmem:[#allocation2 + $0x2a0] ss:$16 sps:$4 sm:$0xff]  }
 0x21f   :  { %1499 = vmatmul.mubr.bf16.gmra.mxu1 %v18329_v15  ;;  %1409 = vmatprep.mubr.bf16.mxu0 %v18330_v16  ;;  %v18377_v15 = vld [vmem:[#allocation2 + $0x2a8] ss:$16 sps:$4 sm:$0xff]   ;;  %v18378_v16 = vld [vmem:[#allocation2 + $0x2c4] ss:$16 sps:$4 sm:$0xff]  }
 0x220   :  { %1506 = vmatprep.mubr.bf16.mxu1 %v18332_v17  ;;  %v18380_v17 = vld [vmem:[#allocation2 + $0x2cc] ss:$16 sps:$4 sm:$0xff]  }
 0x226   :  { %1410 = vmatmul.mubr.bf16.gmra.mxu0 %v18334_v18  ;;  %v18382_v18 = vld [vmem:[#allocation2 + $0x2c0] ss:$16 sps:$4 sm:$0xff]  }
 0x227   :  { %1507 = vmatmul.mubr.bf16.gmra.mxu1 %v18335_v19  ;;  %1417 = vmatprep.mubr.bf16.mxu0 %v18336_v20  ;;  %v18383_v19 = vld [vmem:[#allocation2 + $0x2c8] ss:$16 sps:$4 sm:$0xff]   ;;  %v18384_v20 = vld [vmem:[#allocation2 + $0x2e4] ss:$16 sps:$4 sm:$0xff]  }
 0x228   :  { %1514 = vmatprep.mubr.bf16.mxu1 %v18338_v21  ;;  %v18386_v21 = vld [vmem:[#allocation2 + $0x2ec] ss:$16 sps:$4 sm:$0xff]  }
 0x22e   :  { %1418 = vmatmul.mubr.bf16.gmra.mxu0 %v18340_v0  ;;  %v18388_v0 = vld [vmem:[#allocation2 + $0x2e0] ss:$16 sps:$4 sm:$0xff]  }
 0x22f   :  { %1515 = vmatmul.mubr.bf16.gmra.mxu1 %v18341_v1  ;;  %1748 = vmatprep.mubr.bf16.mxu0 %v18344_v22  ;;  %v18389_v1 = vld [vmem:[#allocation2 + $0x2e8] ss:$16 sps:$4 sm:$0xff]   ;;  %v18392_v22 = vld [vmem:[#allocation2 + $0x304] ss:$16 sps:$4 sm:$0xff]  }
 0x230   :  { %1845 = vmatprep.mubr.bf16.mxu1 %v18347_v23  ;;  %v18395_v23 = vld [vmem:[#allocation2 + $0x30c] ss:$16 sps:$4 sm:$0xff]  }
 0x236   :  { %1749 = vmatmul.mubr.bf16.vlgmr.msra.gmra.mxu0 %v18342_v24  ;;  %v18390_v24 = vld [vmem:[#allocation2 + $0x300] ss:$16 sps:$4 sm:$0xff]  }
 0x237   :  { %1846 = vmatmul.mubr.bf16.vlgmr.msra.gmra.mxu1 %v18345_v25  ;;  %1756 = vmatprep.mubr.bf16.mxu0 %v18348_v26  ;;  %v18393_v25 = vld [vmem:[#allocation2 + $0x308] ss:$16 sps:$4 sm:$0xff]   ;;  %v18396_v26 = vld [vmem:[#allocation2 + $0x324] ss:$16 sps:$4 sm:$0xff]  }
 0x238   :  { %1853 = vmatprep.mubr.bf16.mxu1 %v18350_v27  ;;  %14895 = vmatpush3.bf16.msra.mxu0 %v20518_v29  ;;  %v18398_v27 = vld [vmem:[#allocation2 + $0x32c] ss:$16 sps:$4 sm:$0xff]  }
 0x239   :  { %14959 = vmatpush3.bf16.msra.mxu1 %v20522_v42  ;;  %14896 = vmatprep.subr.bf16.mxu0 %v20526_v43 }
 0x23a   :  { %14960 = vmatprep.subr.bf16.mxu1 %v20530_v44 }
 0x23c   :  { %14897 = vmatpush3.bf16.msra.mxu0 %v20534_v46 }
 0x23d   :  { %14961 = vmatpush3.bf16.msra.mxu1 %v20538_v47  ;;  %14898 = vmatprep.subr.bf16.mxu0 %v20542_v48 }
 0x23e   :  { %1757 = vmatmul.mubr.bf16.gmra.mxu0 %v18352_v28  ;;  %14962 = vmatprep.subr.bf16.mxu1 %v20546_v49 }
 0x23f   :  { %1854 = vmatmul.mubr.bf16.gmra.mxu1 %v18353_v30  ;;  %1764 = vmatprep.mubr.bf16.mxu0 %v18354_v31 }
 0x240   :  { %1861 = vmatprep.mubr.bf16.mxu1 %v18356_v45  ;;  %14899 = vmatpush3.bf16.msra.mxu0 %v20550_v51  ;;  %v18400_v45 = vld [vmem:[#allocation2 + $0x320] ss:$16 sps:$4 sm:$0xff]  }
 0x241   :  { %14963 = vmatpush3.bf16.msra.mxu1 %v20554_v54  ;;  %14900 = vmatprep.subr.bf16.mxu0 %v20558_v55 }
 0x242   :  { %14964 = vmatprep.subr.bf16.mxu1 %v20562_v56 }
 0x244   :  { %14901 = vmatpush3.bf16.msra.mxu0 %v20566_v58 }
 0x245   :  { %14965 = vmatpush3.bf16.msra.mxu1 %v20570_v59  ;;  %14902 = vmatprep.subr.bf16.mxu0 %v20574_v60 }
 0x246   :  { %1765 = vmatmul.mubr.bf16.gmra.mxu0 %v18358_v50  ;;  %14966 = vmatprep.subr.bf16.mxu1 %v20578_v61 }
 0x247   :  { %1862 = vmatmul.mubr.bf16.gmra.mxu1 %v18359_v52  ;;  %1772 = vmatprep.mubr.bf16.mxu0 %v18360_v53  ;;  %v18401_v53 = vld [vmem:[#allocation2 + $0x328] ss:$16 sps:$4 sm:$0xff]  }
 0x248   :  { %1869 = vmatprep.mubr.bf16.mxu1 %v18362_v57  ;;  %14903 = vmatpush3.bf16.msra.mxu0 %v20582_v63  ;;  %v18402_v57 = vld [vmem:[#allocation2 + $0x344] ss:$16 sps:$4 sm:$0xff]  }
 0x249   :  { %14967 = vmatpush3.bf16.msra.mxu1 %v20586_v34  ;;  %14904 = vmatprep.subr.bf16.mxu0 %v20590_v35 }
 0x24a   :  { %14968 = vmatprep.subr.bf16.mxu1 %v20594_v36 }
 0x24c   :  { %14905 = vmatpush3.bf16.msra.mxu0 %v20598_v38 }
 0x24d   :  { %14969 = vmatpush3.bf16.msra.mxu1 %v20602_v39  ;;  %14906 = vmatprep.subr.bf16.mxu0 %v20606_v40 }
 0x24e   :  { %1773 = vmatmul.mubr.bf16.gmra.mxu0 %v18364_v62  ;;  %14970 = vmatprep.subr.bf16.mxu1 %v20610_v41 }
 0x24f   :  { %1870 = vmatmul.mubr.bf16.gmra.mxu1 %v18365_v32  ;;  %1780 = vmatprep.mubr.bf16.mxu0 %v18366_v33 }
 0x250   :  { %1877 = vmatprep.mubr.bf16.mxu1 %v18368_v37  ;;  %14907 = vmatpush3.bf16.msra.mxu0 %v20614_v3 }
 0x251   :  { %14971 = vmatpush3.bf16.msra.mxu1 %v20618_v6  ;;  %14908 = vmatprep.subr.bf16.mxu0 %v20622_v7 }
 0x252   :  { %14972 = vmatprep.subr.bf16.mxu1 %v20626_v8 }
 0x254   :  { %14909 = vmatpush3.bf16.msra.mxu0 %v20630_v10 }
 0x255   :  { %14973 = vmatpush3.bf16.msra.mxu1 %v20634_v11  ;;  %15022 = vmatprep.subr.bf16.mxu0 %v20638_v12 }
 0x256   :  { %1781 = vmatmul.mubr.bf16.gmra.mxu0 %v18370_v2  ;;  %15086 = vmatprep.subr.bf16.mxu1 %v20642_v13 }
 0x257   :  { %1878 = vmatmul.mubr.bf16.gmra.mxu1 %v18371_v4  ;;  %1788 = vmatprep.mubr.bf16.mxu0 %v18372_v5  ;;  %v18404_v4 = vld [vmem:[#allocation2 + $0x34c] ss:$16 sps:$4 sm:$0xff]  }
 0x258   :  { %1885 = vmatprep.mubr.bf16.mxu1 %v18374_v9 }
 0x25e   :  { %1789 = vmatmul.mubr.bf16.gmra.mxu0 %v18376_v14 }
 0x25f   :  { %1886 = vmatmul.mubr.bf16.gmra.mxu1 %v18377_v15  ;;  %1796 = vmatprep.mubr.bf16.mxu0 %v18378_v16  ;;  %v18406_v15 = vld [vmem:[#allocation2 + $0x340] ss:$16 sps:$4 sm:$0xff]  }
 0x260   :  { %1893 = vmatprep.mubr.bf16.mxu1 %v18380_v17  ;;  %v18408_v17 = vld [vmem:[#allocation2 + $0x364] ss:$16 sps:$4 sm:$0xff]  }
 0x266   :  { %1797 = vmatmul.mubr.bf16.gmra.mxu0 %v18382_v18 }
 0x267   :  { %1894 = vmatmul.mubr.bf16.gmra.mxu1 %v18383_v19  ;;  %1804 = vmatprep.mubr.bf16.mxu0 %v18384_v20 }
 0x268   :  { %1901 = vmatprep.mubr.bf16.mxu1 %v18386_v21  ;;  %v18410_v21 = vld [vmem:[#allocation2 + $0x36c] ss:$16 sps:$4 sm:$0xff]  }
 0x26e   :  { %1805 = vmatmul.mubr.bf16.gmra.mxu0 %v18388_v0 }
 0x26f   :  { %1902 = vmatmul.mubr.bf16.gmra.mxu1 %v18389_v1  ;;  %2135 = vmatprep.mubr.bf16.mxu0 %v18392_v22 }
 0x270   :  { %2232 = vmatprep.mubr.bf16.mxu1 %v18395_v23  ;;  %v18412_v23 = vld [vmem:[#allocation2 + $0x360] ss:$16 sps:$4 sm:$0xff]  }
 0x276   :  { %v14526_v28 = vpop.f32.mrf.mxu0  ;;  %2136 = vmatmul.mubr.bf16.vlgmr.msra.gmra.mxu0 %v18390_v24 }
 0x277   :  { %v14590_v30 = vpop.f32.mrf.mxu1  ;;  %2233 = vmatmul.mubr.bf16.vlgmr.msra.gmra.mxu1 %v18393_v25  ;;  %2143 = vmatprep.mubr.bf16.mxu0 %v18396_v26  ;;  %v18416_v25 = vld [vmem:[#allocation2 + $0x384] ss:$16 sps:$4 sm:$0xff]  }
 0x278   :  { %v14527_v31 = vpop.f32.mrf.mxu0  ;;  %2240 = vmatprep.mubr.bf16.mxu1 %v18398_v27  ;;  %15023 = vmatpush3.bf16.msra.mxu0 %v20518_v29 }
 0x279   :  { %v14528_v50 = vadd.f32 %v14527_v31, %v14526_v28  ;;  %v14591_v52 = vpop.f32.mrf.mxu1  ;;  %15087 = vmatpush3.bf16.msra.mxu1 %v20522_v42  ;;  %15024 = vmatprep.subr.bf16.mxu0 %v20526_v43 }
 0x27a   :  { %v14592_v62 = vadd.f32 %v14591_v52, %v14590_v30  ;;  %v14529_v32 = vpop.f32.mrf.mxu0  ;;  %15088 = vmatprep.subr.bf16.mxu1 %v20530_v44  ;;  %v18419_v30 = vld [vmem:[#allocation2 + $0x38c] ss:$16 sps:$4 sm:$0xff]   ;;  %v18414_v52 = vld [vmem:[#allocation2 + $0x380] ss:$16 sps:$4 sm:$0xff]  }
 0x27b   :  { %v14593_v33 = vpop.f32.mrf.mxu1 }
 0x27c   :  { %v20649_v37 = vadd.f32 %v14592_v62, %v14528_v50  ;;  %v14530_v2 = vpop.f32.mrf.mxu0  ;;  %15025 = vmatpush3.bf16.msra.mxu0 %v20534_v46 }
 0x27d   :  { %v14531_v29 = vadd.f32 %v14530_v2, %v14529_v32  ;;  %v14594_v5 = vpop.f32.mrf.mxu1  ;;  %15089 = vmatpush3.bf16.msra.mxu1 %v20538_v47  ;;  %15026 = vmatprep.subr.bf16.mxu0 %v20542_v48  ;;  %v18407_v47 = vld [vmem:[#allocation2 + $0x348] ss:$16 sps:$4 sm:$0xff]   ;;  %v18425_v2 = vld [vmem:[#allocation2 + $0x3ac] ss:$16 sps:$4 sm:$0xff]  }
 0x27e   :  { %v14595_v42 = vadd.f32 %v14594_v5, %v14593_v33  ;;  %v14532_v9 = vpop.f32.mrf.mxu0  ;;  %2144 = vmatmul.mubr.bf16.gmra.mxu0 %v18400_v45  ;;  %15090 = vmatprep.subr.bf16.mxu1 %v20546_v49 }
 0x27f   :  { %v14596_v43 = vpop.f32.mrf.mxu1  ;;  %2241 = vmatmul.mubr.bf16.gmra.mxu1 %v18401_v53  ;;  %2151 = vmatprep.mubr.bf16.mxu0 %v18402_v57  ;;  %v18422_v57 = vld [vmem:[#allocation2 + $0x3a4] ss:$16 sps:$4 sm:$0xff]  }
 0x280   :  { %v20655_v44 = vadd.f32 %v14595_v42, %v14531_v29  ;;  %v14533_v14 = vpop.f32.mrf.mxu0  ;;  %2248 = vmatprep.mubr.bf16.mxu1 %v18404_v4  ;;  %15027 = vmatpush3.bf16.msra.mxu0 %v20550_v51  ;;  %v18420_v42 = vld [vmem:[#allocation2 + $0x3a0] ss:$16 sps:$4 sm:$0xff]  }
 0x281   :  { %v14534_v46 = vadd.f32 %v14533_v14, %v14532_v9  ;;  %v14597_v16 = vpop.f32.mrf.mxu1  ;;  %15091 = vmatpush3.bf16.msra.mxu1 %v20554_v54  ;;  %15028 = vmatprep.subr.bf16.mxu0 %v20558_v55  ;;  %v18428_v14 = vld [vmem:[#allocation2 + $0x3c4] ss:$16 sps:$4 sm:$0xff]  }
 0x282   :  { %v14598_v48 = vadd.f32 %v14597_v16, %v14596_v43  ;;  %v14535_v49 = vpop.f32.mrf.mxu0  ;;  %15092 = vmatprep.subr.bf16.mxu1 %v20562_v56  ;;  %v18423_v43 = vld [vmem:[#allocation2 + $0x3a8] ss:$16 sps:$4 sm:$0xff]  }
 0x283   :  { %v14599_v18 = vpop.f32.mrf.mxu1 }
 0x284   :  { %v20661_v19 = vadd.f32 %v14598_v48, %v14534_v46  ;;  %v14536_v20 = vpop.f32.mrf.mxu0  ;;  %15029 = vmatpush3.bf16.msra.mxu0 %v20566_v58 }
 0x285   :  { %v14537_v51 = vadd.f32 %v14536_v20, %v14535_v49  ;;  %v14600_v0 = vpop.f32.mrf.mxu1  ;;  %15093 = vmatpush3.bf16.msra.mxu1 %v20570_v59  ;;  %15030 = vmatprep.subr.bf16.mxu0 %v20574_v60  ;;  %v18413_v59 = vld [vmem:[#allocation2 + $0x368] ss:$16 sps:$4 sm:$0xff]  }
 0x286   :  { %v14601_v54 = vadd.f32 %v14600_v0, %v14599_v18  ;;  %v14538_v1 = vpop.f32.mrf.mxu0  ;;  %2152 = vmatmul.mubr.bf16.gmra.mxu0 %v18406_v15  ;;  %15094 = vmatprep.subr.bf16.mxu1 %v20578_v61 }
 0x287   :  { %v14602_v55 = vpop.f32.mrf.mxu1  ;;  %2249 = vmatmul.mubr.bf16.gmra.mxu1 %v18407_v47  ;;  %2159 = vmatprep.mubr.bf16.mxu0 %v18408_v17  ;;  %v18431_v47 = vld [vmem:[#allocation2 + $0x3cc] ss:$16 sps:$4 sm:$0xff]  }
 0x288   :  { %v20667_v56 = vadd.f32 %v14601_v54, %v14537_v51  ;;  %v14539_v22 = vpop.f32.mrf.mxu0  ;;  %2256 = vmatprep.mubr.bf16.mxu1 %v18410_v21  ;;  %15031 = vmatpush3.bf16.msra.mxu0 %v20582_v63  ;;  %v18426_v51 = vld [vmem:[#allocation2 + $0x3c0] ss:$16 sps:$4 sm:$0xff]  }
 0x289   :  { %v14540_v58 = vadd.f32 %v14539_v22, %v14538_v1  ;;  %v14603_v24 = vpop.f32.mrf.mxu1  ;;  %15095 = vmatpush3.bf16.msra.mxu1 %v20586_v34  ;;  %15032 = vmatprep.subr.bf16.mxu0 %v20590_v35  ;;  %v18429_v1 = vld [vmem:[#allocation2 + $0x3c8] ss:$16 sps:$4 sm:$0xff]  }
 0x28a   :  { %v14604_v60 = vadd.f32 %v14603_v24, %v14602_v55  ;;  %v14541_v61 = vpop.f32.mrf.mxu0  ;;  %15096 = vmatprep.subr.bf16.mxu1 %v20594_v36  ;;  %v18434_v55 = vld [vmem:[#allocation2 + $0x3e4] ss:$16 sps:$4 sm:$0xff]  }
 0x28b   :  { %v14605_v26 = vpop.f32.mrf.mxu1 }
 0x28c   :  { %v20673_v27 = vadd.f32 %v14604_v60, %v14540_v58  ;;  %v14542_v28 = vpop.f32.mrf.mxu0  ;;  %15033 = vmatpush3.bf16.msra.mxu0 %v20598_v38 }
 0x28d   :  { %v14543_v63 = vadd.f32 %v14542_v28, %v14541_v61  ;;  %v14606_v31 = vpop.f32.mrf.mxu1  ;;  %15097 = vmatpush3.bf16.msra.mxu1 %v20602_v39  ;;  %15034 = vmatprep.subr.bf16.mxu0 %v20606_v40  ;;  %v18417_v39 = vld [vmem:[#allocation2 + $0x388] ss:$16 sps:$4 sm:$0xff]  }
 0x28e   :  { %v14607_v34 = vadd.f32 %v14606_v31, %v14605_v26  ;;  %v14544_v45 = vpop.f32.mrf.mxu0  ;;  %2160 = vmatmul.mubr.bf16.gmra.mxu0 %v18412_v23  ;;  %15098 = vmatprep.subr.bf16.mxu1 %v20610_v41 }
 0x28f   :  { %v14608_v35 = vpop.f32.mrf.mxu1  ;;  %2257 = vmatmul.mubr.bf16.gmra.mxu1 %v18413_v59  ;;  %2167 = vmatprep.mubr.bf16.mxu0 %v18416_v25  ;;  %v18437_v25 = vld [vmem:[#allocation2 + $0x3ec] ss:$16 sps:$4 sm:$0xff]  }
 0x290   :  { %v20679_v36 = vadd.f32 %v14607_v34, %v14543_v63  ;;  %v14545_v50 = vpop.f32.mrf.mxu0  ;;  %2264 = vmatprep.mubr.bf16.mxu1 %v18419_v30  ;;  %15035 = vmatpush3.bf16.msra.mxu0 %v20614_v3  ;;  %v18432_v34 = vld [vmem:[#allocation2 + $0x3e0] ss:$16 sps:$4 sm:$0xff]  }
 0x291   :  { %v14546_v38 = vadd.f32 %v14545_v50, %v14544_v45  ;;  %v14609_v53 = vpop.f32.mrf.mxu1  ;;  %15099 = vmatpush3.bf16.msra.mxu1 %v20618_v6  ;;  %15036 = vmatprep.subr.bf16.mxu0 %v20622_v7  ;;  %v18435_v50 = vld [vmem:[#allocation2 + $0x3e8] ss:$16 sps:$4 sm:$0xff]  }
 0x292   :  { %v14610_v40 = vadd.f32 %v14609_v53, %v14608_v35  ;;  %v14547_v41 = vpop.f32.mrf.mxu0  ;;  %15100 = vmatprep.subr.bf16.mxu1 %v20626_v8 }
 0x293   :  { %v14611_v62 = vpop.f32.mrf.mxu1 }
 0x294   :  { %v20685_v32 = vadd.f32 %v14610_v40, %v14546_v38  ;;  %v14548_v33 = vpop.f32.mrf.mxu0  ;;  %15037 = vmatpush3.bf16.msra.mxu0 %v20630_v10 }
 0x295   :  { %v14549_v3 = vadd.f32 %v14548_v33, %v14547_v41  ;;  %v14612_v4 = vpop.f32.mrf.mxu1  ;;  %15101 = vmatpush3.bf16.msra.mxu1 %v20634_v11  ;;  %15150 = vmatprep.subr.bf16.mxu0 %v20638_v12  ;;  %v18443_v41 = vld [vmem:[#allocation2 + $0x40c] ss:$16 sps:$4 sm:$0xff]  }
 0x296   :  { %v14613_v6 = vadd.f32 %v14612_v4, %v14611_v62  ;;  %v14550_v29 = vpop.f32.mrf.mxu0  ;;  %2168 = vmatmul.mubr.bf16.gmra.mxu0 %v18414_v52  ;;  %15214 = vmatprep.subr.bf16.mxu1 %v20642_v13  ;;  %v18440_v52 = vld [vmem:[#allocation2 + $0x404] ss:$16 sps:$4 sm:$0xff]  }
 0x297   :  { %v14614_v7 = vpop.f32.mrf.mxu1  ;;  %2265 = vmatmul.mubr.bf16.gmra.mxu1 %v18417_v39  ;;  %2175 = vmatprep.mubr.bf16.mxu0 %v18422_v57 }
 0x298   :  { %v20691_v8 = vadd.f32 %v14613_v6, %v14549_v3  ;;  %v14551_v5 = vpop.f32.mrf.mxu0  ;;  %2272 = vmatprep.mubr.bf16.mxu1 %v18425_v2 }
 0x299   :  { %v14552_v10 = vadd.f32 %v14551_v5, %v14550_v29  ;;  %v14615_v9 = vpop.f32.mrf.mxu1 }
 0x29a   :  { %23578 = vst [vmem:[#allocation78_spill] sm:$0xff] %v20691_v8  ;;  %v14616_v11 = vadd.f32 %v14615_v9, %v14614_v7  ;;  %v14553_v15 = vpop.f32.mrf.mxu0  ;;  %v18438_v7 = vld [vmem:[#allocation2 + $0x400] ss:$16 sps:$4 sm:$0xff]   ;;  %v18446_v9 = vld [vmem:[#allocation2 + $0x424] ss:$16 sps:$4 sm:$0xff]  }
 0x29b   :  { %v14617_v12 = vpop.f32.mrf.mxu1  ;;  %v18474_v8 = vld [vmem:[#allocation2 + $0x4c0] ss:$16 sps:$4 sm:$0xff]  }
 0x29c   :  { %v20693_v46 = vadd.f32 %v14616_v11, %v14552_v10  ;;  %v14554_v16 = vpop.f32.mrf.mxu0  ;;  %v18441_v10 = vld [vmem:[#allocation2 + $0x408] ss:$16 sps:$4 sm:$0xff]  }
 0x29d   :  { %v14555_v13 = vadd.f32 %v14554_v16, %v14553_v15  ;;  %v14618_v17 = vpop.f32.mrf.mxu1  ;;  %v18449_v16 = vld [vmem:[#allocation2 + $0x42c] ss:$16 sps:$4 sm:$0xff]  }
 0x29e   :  { %23579 = vst [vmem:[#allocation79_spill] sm:$0xff] %v20693_v46  ;;  %v14619_v48 = vadd.f32 %v14618_v17, %v14617_v12  ;;  %v14556_v49 = vpop.f32.mrf.mxu0  ;;  %2176 = vmatmul.mubr.bf16.gmra.mxu0 %v18420_v42 }
 0x29f   :  { %v14620_v18 = vpop.f32.mrf.mxu1  ;;  %2273 = vmatmul.mubr.bf16.gmra.mxu1 %v18423_v43  ;;  %2183 = vmatprep.mubr.bf16.mxu0 %v18428_v14 }
 0x2a0   :  { %v20695_v20 = vadd.f32 %v14619_v48, %v14555_v13  ;;  %v14557_v21 = vpop.f32.mrf.mxu0  ;;  %2280 = vmatprep.mubr.bf16.mxu1 %v18431_v47 }
 0x2a1   :  { %v14558_v0 = vadd.f32 %v14557_v21, %v14556_v49  ;;  %v14621_v54 = vpop.f32.mrf.mxu1 }
 0x2a2   :  { %23580 = vst [vmem:[#allocation80_spill] sm:$0xff] %v20695_v20  ;;  %v14622_v22 = vadd.f32 %v14621_v54, %v14620_v18  ;;  %v14559_v23 = vpop.f32.mrf.mxu0  ;;  %v18479_v20 = vld [vmem:[#allocation2 + $0x4cc] ss:$16 sps:$4 sm:$0xff]  }
 0x2a3   :  { %v14623_v58 = vpop.f32.mrf.mxu1 }
 0x2a4   :  { %v20697_v24 = vadd.f32 %v14622_v22, %v14558_v0  ;;  %v14560_v59 = vpop.f32.mrf.mxu0  ;;  %v20710_v0 = vld [vmem:[%s23577_s19 + $0x38] sm:$0xff]  }
 0x2a5   :  { %v14561_v60 = vadd.f32 %v14560_v59, %v14559_v23  ;;  %v14624_v61 = vpop.f32.mrf.mxu1  ;;  %v20714_v22 = vld [vmem:[%s23577_s19 + $0xb8] sm:$0xff]   ;;  %v20718_v23 = vld [vmem:[%s23577_s19 + $0x70] sm:$0xff]  }
 0x2a6   :  { %23581 = vst [vmem:[#allocation81_spill] sm:$0xff] %v20697_v24  ;;  %v14625_v26 = vadd.f32 %v14624_v61, %v14623_v58  ;;  %v14562_v28 = vpop.f32.mrf.mxu0  ;;  %2184 = vmatmul.mubr.bf16.gmra.mxu0 %v18426_v51  ;;  %v18444_v51 = vld [vmem:[#allocation2 + $0x420] ss:$16 sps:$4 sm:$0xff]  }
 0x2a7   :  { %v14626_v30 = vpop.f32.mrf.mxu1  ;;  %2281 = vmatmul.mubr.bf16.gmra.mxu1 %v18429_v1  ;;  %2191 = vmatprep.mubr.bf16.mxu0 %v18434_v55  ;;  %v18447_v1 = vld [vmem:[#allocation2 + $0x428] ss:$16 sps:$4 sm:$0xff]   ;;  %v18452_v55 = vld [vmem:[#allocation2 + $0x444] ss:$16 sps:$4 sm:$0xff]  }
 0x2a8   :  { %v20699_v63 = vadd.f32 %v14625_v26, %v14561_v60  ;;  %v14563_v31 = vpop.f32.mrf.mxu0  ;;  %2288 = vmatprep.mubr.bf16.mxu1 %v18437_v25  ;;  %v20722_v59 = vld [vmem:[%s23577_s19 + $0xf0] sm:$0xff]  }
 0x2a9   :  { %v14564_v45 = vadd.f32 %v14563_v31, %v14562_v28  ;;  %v14627_v35 = vpop.f32.mrf.mxu1  ;;  %v18455_v28 = vld [vmem:[#allocation2 + $0x44c] ss:$16 sps:$4 sm:$0xff]  }
 0x2aa   :  { %23582 = vst [vmem:[#allocation82_spill] sm:$0xff] %v20699_v63  ;;  %v14628_v38 = vadd.f32 %v14627_v35, %v14626_v30  ;;  %v14565_v53 = vpop.f32.mrf.mxu0  ;;  %v20726_v30 = vld [vmem:[%s23577_s19 + $0x30] sm:$0xff]   ;;  %v20734_v35 = vld [vmem:[%s23577_s19 + $0x68] sm:$0xff]  }
 0x2ab   :  { %v14629_v39 = vpop.f32.mrf.mxu1 }
 0x2ac   :  { %v20701_v57 = vadd.f32 %v14628_v38, %v14564_v45  ;;  %v14566_v40 = vpop.f32.mrf.mxu0  ;;  %v20730_v45 = vld [vmem:[%s23577_s19 + $0xb0] sm:$0xff]   ;;  %v20738_v38 = vld [vmem:[%s23577_s19 + $0xe8] sm:$0xff]  }
 0x2ad   :  { %v14567_v62 = vadd.f32 %v14566_v40, %v14565_v53  ;;  %v14630_v33 = vpop.f32.mrf.mxu1 }
 0x2ae   :  { %23583 = vst [vmem:[#allocation83_spill] sm:$0xff] %v20701_v57  ;;  %v14631_v2 = vadd.f32 %v14630_v33, %v14629_v39  ;;  %v14568_v3 = vpop.f32.mrf.mxu0  ;;  %2192 = vmatmul.mubr.bf16.gmra.mxu0 %v18432_v34  ;;  %v20742_v33 = vld [vmem:[%s23577_s19 + $0x28] sm:$0xff]  }
 0x2af   :  { %v14632_v4 = vpop.f32.mrf.mxu1  ;;  %2289 = vmatmul.mubr.bf16.gmra.mxu1 %v18435_v50  ;;  %2522 = vmatprep.mubr.bf16.mxu0 %v18440_v52 }
 0x2b0   :  { %v20703_v6 = vadd.f32 %v14631_v2, %v14567_v62  ;;  %v14569_v29 = vpop.f32.mrf.mxu0  ;;  %2619 = vmatprep.mubr.bf16.mxu1 %v18443_v41  ;;  %v18450_v62 = vld [vmem:[#allocation2 + $0x440] ss:$16 sps:$4 sm:$0xff]  }
 0x2b1   :  { %v14570_v5 = vadd.f32 %v14569_v29, %v14568_v3  ;;  %v14633_v42 = vpop.f32.mrf.mxu1  ;;  %v18453_v3 = vld [vmem:[#allocation2 + $0x448] ss:$16 sps:$4 sm:$0xff]  }
 0x2b2   :  { %23584 = vst [vmem:[#allocation84_spill] sm:$0xff] %v20703_v6  ;;  %v14634_v43 = vadd.f32 %v14633_v42, %v14632_v4  ;;  %v14571_v14 = vpop.f32.mrf.mxu0  ;;  %v18458_v4 = vld [vmem:[#allocation2 + $0x464] ss:$16 sps:$4 sm:$0xff]   ;;  %v20746_v29 = vld [vmem:[%s23577_s19 + $0xa8] sm:$0xff]  }
 0x2b3   :  { %v14635_v11 = vpop.f32.mrf.mxu1  ;;  %v18476_v6 = vld [vmem:[#allocation2 + $0x4c4] ss:$16 sps:$4 sm:$0xff]  }
 0x2b4   :  { %v20705_v15 = vadd.f32 %v14634_v43, %v14570_v5  ;;  %v14572_v12 = vpop.f32.mrf.mxu0 }
 0x2b5   :  { %v14573_v47 = vadd.f32 %v14572_v12, %v14571_v14  ;;  %v14636_v13 = vpop.f32.mrf.mxu1  ;;  %v18461_v12 = vld [vmem:[#allocation2 + $0x46c] ss:$16 sps:$4 sm:$0xff]  }
 0x2b6   :  { %23585 = vst [vmem:[#allocation85_spill] sm:$0xff] %v20705_v15  ;;  %v14637_v17 = vadd.f32 %v14636_v13, %v14635_v11  ;;  %v14654_v48 = vpop.f32.mrf.mxu0  ;;  %2523 = vmatmul.mubr.bf16.vlgmr.msra.gmra.mxu0 %v18438_v7  ;;  %v20750_v7 = vld [vmem:[%s23577_s19 + $0x60] sm:$0xff]   ;;  %v18471_v15 = vld [vmem:[#allocation2 + $0x4a8] ss:$16 sps:$4 sm:$0xff]  }
 0x2b7   :  { %v14718_v49 = vpop.f32.mrf.mxu1  ;;  %2620 = vmatmul.mubr.bf16.vlgmr.msra.gmra.mxu1 %v18441_v10  ;;  %2530 = vmatprep.mubr.bf16.mxu0 %v18446_v9  ;;  %v20754_v10 = vld [vmem:[%s23577_s19 + $0xe0] sm:$0xff]  }
 0x2b8   :  { %v20707_v18 = vadd.f32 %v14637_v17, %v14573_v47  ;;  %v14655_v21 = vpop.f32.mrf.mxu0  ;;  %2627 = vmatprep.mubr.bf16.mxu1 %v18449_v16  ;;  %15151 = vmatpush3.bf16.msra.mxu0 %v20710_v0  ;;  %v20759_v16 = vld [vmem:[%s23577_s19 + $0x20] sm:$0xff]  }
 0x2b9   :  { %v14719_v54 = vpop.f32.mrf.mxu1  ;;  %15215 = vmatpush3.bf16.msra.mxu1 %v20714_v22  ;;  %15152 = vmatprep.subr.bf16.mxu0 %v20718_v23  ;;  %v14656_v60 = vadd.f32 %v14655_v21, %v14654_v48  ;;  %v20763_v17 = vld [vmem:[%s23577_s19 + $0xa0] sm:$0xff]   ;;  %v20767_v48 = vld [vmem:[%s23577_s19 + $0x58] sm:$0xff]  }
 0x2ba   :  { %23586 = vst [vmem:[#allocation86_spill] sm:$0xff] %v20707_v18  ;;  %v14657_v58 = vpop.f32.mrf.mxu0  ;;  %15216 = vmatprep.subr.bf16.mxu1 %v20722_v59  ;;  %v14720_v61 = vadd.f32 %v14719_v54, %v14718_v49 }
 0x2bb   :  { %v14721_v25 = vpop.f32.mrf.mxu1 }
 0x2bc   :  { %v14658_v26 = vpop.f32.mrf.mxu0  ;;  %15153 = vmatpush3.bf16.msra.mxu0 %v20726_v30  ;;  %v1461_v40 = vadd.f32 %v14720_v61, %v14656_v60  ;;  %v20775_v60 = vld [vmem:[%s23577_s19 + $0x18] sm:$0xff]  }
 0x2bd   :  { %v14659_v31 = vadd.f32 %v14658_v26, %v14657_v58  ;;  %v14722_v34 = vpop.f32.mrf.mxu1  ;;  %15217 = vmatpush3.bf16.msra.mxu1 %v20730_v45  ;;  %15154 = vmatprep.subr.bf16.mxu0 %v20734_v35  ;;  %v18459_v26 = vld [vmem:[#allocation2 + $0x468] ss:$16 sps:$4 sm:$0xff]  }
 0x2be   :  { %v14723_v50 = vadd.f32 %v14722_v34, %v14721_v25  ;;  %v14660_v52 = vpop.f32.mrf.mxu0  ;;  %2531 = vmatmul.mubr.bf16.gmra.mxu0 %v18444_v51  ;;  %15218 = vmatprep.subr.bf16.mxu1 %v20738_v38  ;;  %v20771_v51 = vld [vmem:[%s23577_s19 + $0xd8] sm:$0xff]   ;;  %v18456_v25 = vld [vmem:[#allocation2 + $0x460] ss:$16 sps:$4 sm:$0xff]  }
 0x2bf   :  { %v14724_v53 = vpop.f32.mrf.mxu1  ;;  %2628 = vmatmul.mubr.bf16.gmra.mxu1 %v18447_v1  ;;  %2538 = vmatprep.mubr.bf16.mxu0 %v18452_v55  ;;  %v20783_v34 = vld [vmem:[%s23577_s19 + $0x50] sm:$0xff]  }
 0x2c0   :  { %v14661_v39 = vpop.f32.mrf.mxu0  ;;  %v1464_v41 = vadd.f32 %v14723_v50, %v14659_v31  ;;  %2635 = vmatprep.mubr.bf16.mxu1 %v18455_v28  ;;  %15155 = vmatpush3.bf16.msra.mxu0 %v20742_v33  ;;  %v18464_v28 = vld [vmem:[#allocation2 + $0x484] ss:$16 sps:$4 sm:$0xff]   ;;  %v20779_v31 = vld [vmem:[%s23577_s19 + $0x98] sm:$0xff]  }
 0x2c1   :  { %v14725_v2 = vpop.f32.mrf.mxu1  ;;  %15219 = vmatpush3.bf16.msra.mxu1 %v20746_v29  ;;  %15156 = vmatprep.subr.bf16.mxu0 %v20750_v7  ;;  %v14662_v43 = vadd.f32 %v14661_v39, %v14660_v52 }
 0x2c2   :  { %v14663_v5 = vpop.f32.mrf.mxu0  ;;  %v17264_v42 = vpack.i.bf16 %v1464_v41, %v1461_v40  ;;  %15220 = vmatprep.subr.bf16.mxu1 %v20754_v10  ;;  %v14726_v14 = vadd.f32 %v14725_v2, %v14724_v53  ;;  %v20787_v53 = vld [vmem:[%s23577_s19 + $0xd0] sm:$0xff]   ;;  %v18467_v2 = vld [vmem:[#allocation2 + $0x48c] ss:$16 sps:$4 sm:$0xff]  }
 0x2c3   :  { %v14727_v9 = vpop.f32.mrf.mxu1 }
 0x2c4   :  { %17265 = vrot.lane.b32.xlu0 %v17264_v42, %s20019_s22  ;;  %v14664_v11 = vpop.f32.mrf.mxu0  ;;  %15157 = vmatpush3.bf16.msra.mxu0 %v20759_v16  ;;  %v1469_v1 = vadd.f32 %v14726_v14, %v14662_v43  ;;  %v20796_v42 = vld [vmem:[%s23577_s19 + $0x90] sm:$0xff]  }
 0x2c5   :  { %v14665_v47 = vadd.f32 %v14664_v11, %v14663_v5  ;;  %v14728_v13 = vpop.f32.mrf.mxu1  ;;  %15221 = vmatpush3.bf16.msra.mxu1 %v20763_v17  ;;  %15158 = vmatprep.subr.bf16.mxu0 %v20767_v48  ;;  %v20804_v11 = vld [vmem:[%s23577_s19 + $0xc8] sm:$0xff]  }
 0x2c6   :  { %v14729_v49 = vadd.f32 %v14728_v13, %v14727_v9  ;;  %v14666_v21 = vpop.f32.mrf.mxu0  ;;  %2539 = vmatmul.mubr.bf16.gmra.mxu0 %v18450_v62  ;;  %15222 = vmatprep.subr.bf16.mxu1 %v20771_v51  ;;  %v20800_v9 = vld [vmem:[%s23577_s19 + $0x48] sm:$0xff]  }
 0x2c7   :  { %v14730_v54 = vpop.f32.mrf.mxu1  ;;  %2636 = vmatmul.mubr.bf16.gmra.mxu1 %v18453_v3  ;;  %2546 = vmatprep.mubr.bf16.mxu0 %v18458_v4  ;;  %v20792_v3 = vld [vmem:[%s23577_s19 + $0x10] sm:$0xff]  }
 0x2c8   :  { %v14667_v55 = vpop.f32.mrf.mxu0  ;;  %v1472_v58 = vadd.f32 %v14729_v49, %v14665_v47  ;;  %2643 = vmatprep.mubr.bf16.mxu1 %v18461_v12  ;;  %15159 = vmatpush3.bf16.msra.mxu0 %v20775_v60 }
 0x2c9   :  { %v14731_v61 = vpop.f32.mrf.mxu1  ;;  %15223 = vmatpush3.bf16.msra.mxu1 %v20779_v31  ;;  %15160 = vmatprep.subr.bf16.mxu0 %v20783_v34  ;;  %v14668_v40 = vadd.f32 %v14667_v55, %v14666_v21  ;;  %v18462_v21 = vld [vmem:[#allocation2 + $0x480] ss:$16 sps:$4 sm:$0xff]   ;;  %v18465_v55 = vld [vmem:[#allocation2 + $0x488] ss:$16 sps:$4 sm:$0xff]  }
 0x2ca   :  { %v14669_v50 = vpop.f32.mrf.mxu0  ;;  %v17269_v52 = vpack.i.bf16 %v1472_v58, %v1469_v1  ;;  %15224 = vmatprep.subr.bf16.mxu1 %v20787_v53  ;;  %v14732_v41 = vadd.f32 %v14731_v61, %v14730_v54  ;;  %v20808_v54 = vld [vmem:[%s23577_s19 + $0x8] sm:$0xff]   ;;  %v18470_v58 = vld [vmem:[#allocation2 + $0x4a4] ss:$16 sps:$4 sm:$0xff]  }
 0x2cb   :  { %v14733_v39 = vpop.f32.mrf.mxu1  ;;  %v20816_v61 = vld [vmem:[%s23577_s19 + $0x40] sm:$0xff]  }
 0x2cc   :  { %17270 = vrot.lane.b32.xlu0 %v17269_v52, %s20019_s22  ;;  %v14670_v62 = vpop.f32.mrf.mxu0  ;;  %15161 = vmatpush3.bf16.msra.mxu0 %v20792_v3  ;;  %v1477_v13 = vadd.f32 %v14732_v41, %v14668_v40 }
 0x2cd   :  { %v14671_v4 = vadd.f32 %v14670_v62, %v14669_v50  ;;  %v14734_v5 = vpop.f32.mrf.mxu1  ;;  %15225 = vmatpush3.bf16.msra.mxu1 %v20796_v42  ;;  %15162 = vmatprep.subr.bf16.mxu0 %v20800_v9  ;;  %v20820_v50 = vld [vmem:[%s23577_s19 + $0xc0] sm:$0xff]   ;;  %v18473_v62 = vld [vmem:[#allocation2 + $0x4ac] ss:$16 sps:$4 sm:$0xff]  }
 0x2ce   :  { %v14735_v43 = vadd.f32 %v14734_v5, %v14733_v39  ;;  %v14672_v14 = vpop.f32.mrf.mxu0  ;;  %2547 = vmatmul.mubr.bf16.gmra.mxu0 %v18456_v25  ;;  %15226 = vmatprep.subr.bf16.mxu1 %v20804_v11  ;;  %v20812_v25 = vld [vmem:[%s23577_s19 + $0x88] sm:$0xff]  }
 0x2cf   :  { %v14736_v12 = vpop.f32.mrf.mxu1  ;;  %2644 = vmatmul.mubr.bf16.gmra.mxu1 %v18459_v26  ;;  %2554 = vmatprep.mubr.bf16.mxu0 %v18464_v28 }
 0x2d0   :  { %v14673_v47 = vpop.f32.mrf.mxu0  ;;  %v1480_v49 = vadd.f32 %v14735_v43, %v14671_v4  ;;  %2651 = vmatprep.mubr.bf16.mxu1 %v18467_v2  ;;  %15163 = vmatpush3.bf16.msra.mxu0 %v20808_v54  ;;  %v20825_v2 = vld [vmem:[%s23577_s19] sm:$0xff]  }
 0x2d1   :  { %v14737_v1 = vpop.f32.mrf.mxu1  ;;  %15227 = vmatpush3.bf16.msra.mxu1 %v20812_v25  ;;  %15164 = vmatprep.subr.bf16.mxu0 %v20816_v61  ;;  %v14674_v39 = vadd.f32 %v14673_v47, %v14672_v14  ;;  %v20829_v43 = vld [vmem:[%s23577_s19 + $0x80] sm:$0xff]   ;;  %v20837_v47 = vld [vmem:[%s23577_s19 + $0xf8] sm:$0xff]  }
 0x2d2   :  { %v14675_v26 = vpop.f32.mrf.mxu0  ;;  %v17274_v28 = vpack.i.bf16 %v1480_v49, %v1477_v13  ;;  %15228 = vmatprep.subr.bf16.mxu1 %v20820_v50  ;;  %v14738_v40 = vadd.f32 %v14737_v1, %v14736_v12  ;;  %v20833_v13 = vld [vmem:[%s23577_s19 + $0x78] sm:$0xff]  }
 0x2d3   :  { %v14739_v52 = vpop.f32.mrf.mxu1 }
 0x2d4   :  { %17275 = vrot.lane.b32.xlu1 %v17274_v28, %s20019_s22  ;;  %v14676_v41 = vpop.f32.mrf.mxu0  ;;  %15165 = vmatpush3.bf16.msra.mxu0 %v20825_v2  ;;  %v1485_v1 = vadd.f32 %v14738_v40, %v14674_v39 }
 0x2d5   :  { %v14677_v4 = vadd.f32 %v14676_v41, %v14675_v26  ;;  %v14740_v5 = vpop.f32.mrf.mxu1  ;;  %15229 = vmatpush3.bf16.msra.mxu1 %v20829_v43  ;;  %15278 = vmatprep.subr.bf16.mxu0 %v20833_v13  ;;  %v18468_v41 = vld [vmem:[#allocation2 + $0x4a0] ss:$16 sps:$4 sm:$0xff]  }
 0x2d6   :  { %v14741_v14 = vadd.f32 %v14740_v5, %v14739_v52  ;;  %v14678_v12 = vpop.f32.mrf.mxu0  ;;  %2555 = vmatmul.mubr.bf16.gmra.mxu0 %v18462_v21  ;;  %15342 = vmatprep.subr.bf16.mxu1 %v20837_v47 }
 0x2d7   :  { %v14742_v49 = vpop.f32.mrf.mxu1  ;;  %2652 = vmatmul.mubr.bf16.gmra.mxu1 %v18465_v55  ;;  %2562 = vmatprep.mubr.bf16.mxu0 %v18470_v58 }
 0x2d8   :  { %v14679_v26 = vpop.f32.mrf.mxu0  ;;  %v1488_v28 = vadd.f32 %v14741_v14, %v14677_v4  ;;  %2659 = vmatprep.mubr.bf16.mxu1 %v18473_v62 }
 0x2d9   :  { %v14743_v18 = vpop.f32.mrf.mxu1  ;;  %v14680_v5 = vadd.f32 %v14679_v26, %v14678_v12  ;;  %v18477_v12 = vld [vmem:[#allocation2 + $0x4c8] ss:$16 sps:$4 sm:$0xff]  }
 0x2da   :  { %v14681_v57 = vpop.f32.mrf.mxu0  ;;  %v17279_v63 = vpack.i.bf16 %v1488_v28, %v1485_v1  ;;  %v14744_v21 = vadd.f32 %v14743_v18, %v14742_v49  ;;  %v18482_v18 = vld [vmem:[#allocation2 + $0x4e4] ss:$16 sps:$4 sm:$0xff]  }
 0x2db   :  { %v14745_v52 = vpop.f32.mrf.mxu1 }
 0x2dc   :  { %17280 = vrot.lane.b32.xlu1 %v17279_v63, %s20019_s22  ;;  %v14682_v24 = vpop.f32.mrf.mxu0  ;;  %v1493_v62 = vadd.f32 %v14744_v21, %v14680_v5 }
 0x2dd   :  { %v14683_v46 = vadd.f32 %v14682_v24, %v14681_v57  ;;  %v14746_v55 = vpop.f32.mrf.mxu1 }
 0x2de   :  { %v14747_v58 = vadd.f32 %v14746_v55, %v14745_v52  ;;  %v14684_v39 = vpop.f32.mrf.mxu0  ;;  %2563 = vmatmul.mubr.bf16.gmra.mxu0 %v18468_v41  ;;  %v18485_v41 = vld [vmem:[#allocation2 + $0x4ec] ss:$16 sps:$4 sm:$0xff]  }
 0x2df   :  { %v14748_v40 = vpop.f32.mrf.mxu1  ;;  %2660 = vmatmul.mubr.bf16.gmra.mxu1 %v18471_v15  ;;  %2570 = vmatprep.mubr.bf16.mxu0 %v18476_v6 }
 0x2e0   :  { %v14685_v4 = vpop.f32.mrf.mxu0  ;;  %v1496_v14 = vadd.f32 %v14747_v58, %v14683_v46  ;;  %2667 = vmatprep.mubr.bf16.mxu1 %v18479_v20  ;;  %v18480_v58 = vld [vmem:[#allocation2 + $0x4e0] ss:$16 sps:$4 sm:$0xff]  }
 0x2e1   :  { %v14749_v1 = vpop.f32.mrf.mxu1  ;;  %v14686_v28 = vadd.f32 %v14685_v4, %v14684_v39  ;;  %v18483_v39 = vld [vmem:[#allocation2 + $0x4e8] ss:$16 sps:$4 sm:$0xff]  }
 0x2e2   :  { %v14687_v49 = vpop.f32.mrf.mxu0  ;;  %v17284_v63 = vpack.i.bf16 %v1496_v14, %v1493_v62  ;;  %v14750_v24 = vadd.f32 %v14749_v1, %v14748_v40  ;;  %v18488_v40 = vld [vmem:[#allocation2 + $0x504] ss:$16 sps:$4 sm:$0xff]  }
 0x2e3   :  { %v14751_v26 = vpop.f32.mrf.mxu1 }
 0x2e4   :  { %17285 = vrot.lane.b32.xlu1 %v17284_v63, %s20019_s22  ;;  %v14688_v57 = vpop.f32.mrf.mxu0  ;;  %v1501_v20 = vadd.f32 %v14750_v24, %v14686_v28 }
 0x2e5   :  { %v14689_v52 = vadd.f32 %v14688_v57, %v14687_v49  ;;  %v14752_v15 = vpop.f32.mrf.mxu1 }
 0x2e6   :  { %v14753_v6 = vadd.f32 %v14752_v15, %v14751_v26  ;;  %v14690_v5 = vpop.f32.mrf.mxu0  ;;  %2571 = vmatmul.mubr.bf16.gmra.mxu0 %v18474_v8  ;;  %v18491_v8 = vld [vmem:[#allocation2 + $0x50c] ss:$16 sps:$4 sm:$0xff]  }
 0x2e7   :  { %v14754_v46 = vpop.f32.mrf.mxu1  ;;  %2668 = vmatmul.mubr.bf16.gmra.mxu1 %v18477_v12  ;;  %2578 = vmatprep.mubr.bf16.mxu0 %v18482_v18 }
 0x2e8   :  { %v14691_v21 = vpop.f32.mrf.mxu0  ;;  %v1504_v55 = vadd.f32 %v14753_v6, %v14689_v52  ;;  %2675 = vmatprep.mubr.bf16.mxu1 %v18485_v41  ;;  %v18486_v6 = vld [vmem:[#allocation2 + $0x500] ss:$16 sps:$4 sm:$0xff]  }
 0x2e9   :  { %v14755_v62 = vpop.f32.mrf.mxu1  ;;  %v14692_v63 = vadd.f32 %v14691_v21, %v14690_v5  ;;  %v18489_v5 = vld [vmem:[#allocation2 + $0x508] ss:$16 sps:$4 sm:$0xff]  }
 0x2ea   :  { %v14693_v4 = vpop.f32.mrf.mxu0  ;;  %v17289_v14 = vpack.i.bf16 %v1504_v55, %v1501_v20  ;;  %v14756_v49 = vadd.f32 %v14755_v62, %v14754_v46  ;;  %v18494_v46 = vld [vmem:[#allocation2 + $0x524] ss:$16 sps:$4 sm:$0xff]  }
 0x2eb   :  { %v14757_v1 = vpop.f32.mrf.mxu1 }
 0x2ec   :  { %17290 = vrot.lane.b32.xlu1 %v17289_v14, %s20019_s22  ;;  %v14694_v26 = vpop.f32.mrf.mxu0  ;;  %v1509_v41 = vadd.f32 %v14756_v49, %v14692_v63 }
 0x2ed   :  { %v14695_v57 = vadd.f32 %v14694_v26, %v14693_v4  ;;  %v14758_v12 = vpop.f32.mrf.mxu1 }
 0x2ee   :  { %v14759_v18 = vadd.f32 %v14758_v12, %v14757_v1  ;;  %v14696_v28 = vpop.f32.mrf.mxu0  ;;  %2579 = vmatmul.mubr.bf16.gmra.mxu0 %v18480_v58  ;;  %v18497_v58 = vld [vmem:[#allocation2 + $0x52c] ss:$16 sps:$4 sm:$0xff]  }
 0x2ef   :  { %v14760_v24 = vpop.f32.mrf.mxu1  ;;  %2676 = vmatmul.mubr.bf16.gmra.mxu1 %v18483_v39  ;;  %2909 = vmatprep.mubr.bf16.mxu0 %v18488_v40 }
 0x2f0   :  { %v14697_v52 = vpop.f32.mrf.mxu0  ;;  %v1512_v15 = vadd.f32 %v14759_v18, %v14695_v57  ;;  %3006 = vmatprep.mubr.bf16.mxu1 %v18491_v8  ;;  %v18492_v18 = vld [vmem:[#allocation2 + $0x520] ss:$16 sps:$4 sm:$0xff]  }
 0x2f1   :  { %v14761_v20 = vpop.f32.mrf.mxu1  ;;  %v14698_v14 = vadd.f32 %v14697_v52, %v14696_v28 }
 0x2f2   :  { %v14699_v21 = vpop.f32.mrf.mxu0  ;;  %v17294_v55 = vpack.i.bf16 %v1512_v15, %v1509_v41  ;;  %v14762_v4 = vadd.f32 %v14761_v20, %v14760_v24  ;;  %v18495_v24 = vld [vmem:[#allocation2 + $0x528] ss:$16 sps:$4 sm:$0xff]   ;;  %v18500_v41 = vld [vmem:[#allocation2 + $0x544] ss:$16 sps:$4 sm:$0xff]  }
 0x2f3   :  { %v14763_v62 = vpop.f32.mrf.mxu1 }
 0x2f4   :  { %17295 = vrot.lane.b32.xlu1 %v17294_v55, %s20019_s22  ;;  %v14700_v1 = vpop.f32.mrf.mxu0  ;;  %v1517_v8 = vadd.f32 %v14762_v4, %v14698_v14 }
 0x2f5   :  { %v14701_v26 = vadd.f32 %v14700_v1, %v14699_v21  ;;  %v14764_v39 = vpop.f32.mrf.mxu1  ;;  %v18503_v21 = vld [vmem:[#allocation2 + $0x54c] ss:$16 sps:$4 sm:$0xff]   ;;  %v18498_v1 = vld [vmem:[#allocation2 + $0x540] ss:$16 sps:$4 sm:$0xff]  }
 0x2f6   :  { %v14765_v40 = vadd.f32 %v14764_v39, %v14763_v62  ;;  %v14782_v63 = vpop.f32.mrf.mxu0  ;;  %2910 = vmatmul.mubr.bf16.vlgmr.msra.gmra.mxu0 %v18486_v6 }
 0x2f7   :  { %v14846_v49 = vpop.f32.mrf.mxu1  ;;  %3007 = vmatmul.mubr.bf16.vlgmr.msra.gmra.mxu1 %v18489_v5  ;;  %2917 = vmatprep.mubr.bf16.mxu0 %v18494_v46 }
 0x2f8   :  { %v14783_v57 = vpop.f32.mrf.mxu0  ;;  %v1520_v12 = vadd.f32 %v14765_v40, %v14701_v26  ;;  %3014 = vmatprep.mubr.bf16.mxu1 %v18497_v58  ;;  %15279 = vmatpush3.bf16.msra.mxu0 %v20710_v0  ;;  %v18501_v58 = vld [vmem:[#allocation2 + $0x548] ss:$16 sps:$4 sm:$0xff]  }
 0x2f9   :  { %v14847_v28 = vpop.f32.mrf.mxu1  ;;  %15343 = vmatpush3.bf16.msra.mxu1 %v20714_v22  ;;  %15280 = vmatprep.subr.bf16.mxu0 %v20718_v23  ;;  %v14784_v20 = vadd.f32 %v14783_v57, %v14782_v63 }
 0x2fa   :  { %v14785_v52 = vpop.f32.mrf.mxu0  ;;  %v17299_v15 = vpack.i.bf16 %v1520_v12, %v1517_v8  ;;  %15344 = vmatprep.subr.bf16.mxu1 %v20722_v59  ;;  %v14848_v5 = vadd.f32 %v14847_v28, %v14846_v49  ;;  %v18509_v49 = vld [vmem:[#allocation2 + $0x56c] ss:$16 sps:$4 sm:$0xff]   ;;  %v18504_v28 = vld [vmem:[#allocation2 + $0x560] ss:$16 sps:$4 sm:$0xff]  }
 0x2fb   :  { %v14849_v6 = vpop.f32.mrf.mxu1 }
 0x2fc   :  { %17300 = vrot.lane.b32.xlu1 %v17299_v15, %s20019_s22  ;;  %v14786_v46 = vpop.f32.mrf.mxu0  ;;  %15281 = vmatpush3.bf16.msra.mxu0 %v20726_v30  ;;  %v1848_v62 = vadd.f32 %v14848_v5, %v14784_v20  ;;  %v18515_v20 = vld [vmem:[#allocation2 + $0x58c] ss:$16 sps:$4 sm:$0xff]   ;;  %s20054_s22 = smov 20  }
 0x2fd   :  { %v14787_v0 = vadd.f32 %v14786_v46, %v14785_v52  ;;  %v14850_v55 = vpop.f32.mrf.mxu1  ;;  %15345 = vmatpush3.bf16.msra.mxu1 %v20730_v45  ;;  %15282 = vmatprep.subr.bf16.mxu0 %v20734_v35  ;;  %v18506_v45 = vld [vmem:[#allocation2 + $0x564] ss:$16 sps:$4 sm:$0xff]  }
 0x2fe   :  { %v14851_v22 = vadd.f32 %v14850_v55, %v14849_v6  ;;  %v14788_v23 = vpop.f32.mrf.mxu0  ;;  %2918 = vmatmul.mubr.bf16.gmra.mxu0 %v18492_v18  ;;  %15346 = vmatprep.subr.bf16.mxu1 %v20738_v38  ;;  %v18510_v55 = vld [vmem:[#allocation2 + $0x580] ss:$16 sps:$4 sm:$0xff]  }
 0x2ff   :  { %v14852_v59 = vpop.f32.mrf.mxu1  ;;  %3015 = vmatmul.mubr.bf16.gmra.mxu1 %v18495_v24  ;;  %2925 = vmatprep.mubr.bf16.mxu0 %v18500_v41  ;;  %v18507_v24 = vld [vmem:[#allocation2 + $0x568] ss:$16 sps:$4 sm:$0xff]  }
 0x300   :  { %v14789_v14 = vpop.f32.mrf.mxu0  ;;  %v1851_v4 = vadd.f32 %v14851_v22, %v14787_v0  ;;  %3022 = vmatprep.mubr.bf16.mxu1 %v18503_v21  ;;  %15283 = vmatpush3.bf16.msra.mxu0 %v20742_v33  ;;  %v18513_v22 = vld [vmem:[#allocation2 + $0x588] ss:$16 sps:$4 sm:$0xff]  }
 0x301   :  { %v14853_v30 = vpop.f32.mrf.mxu1  ;;  %15347 = vmatpush3.bf16.msra.mxu1 %v20746_v29  ;;  %15284 = vmatprep.subr.bf16.mxu0 %v20750_v7  ;;  %v14790_v39 = vadd.f32 %v14789_v14, %v14788_v23 }
 0x302   :  { %v14791_v35 = vpop.f32.mrf.mxu0  ;;  %v17304_v26 = vpack.i.bf16 %v1851_v4, %v1848_v62  ;;  %15348 = vmatprep.subr.bf16.mxu1 %v20754_v10  ;;  %v14854_v40 = vadd.f32 %v14853_v30, %v14852_v59  ;;  %v18521_v4 = vld [vmem:[#allocation2 + $0x5ac] ss:$16 sps:$4 sm:$0xff]  }
 0x303   :  { %v14855_v38 = vpop.f32.mrf.mxu1 }
 0x304   :  { %17305 = vrot.lane.b32.xlu1 %v17304_v26, %s20052_s8  ;;  %v14792_v63 = vpop.f32.mrf.mxu0  ;;  %15285 = vmatpush3.bf16.msra.mxu0 %v20759_v16  ;;  %v1856_v57 = vadd.f32 %v14854_v40, %v14790_v39  ;;  %v18519_v26 = vld [vmem:[#allocation2 + $0x5a8] ss:$16 sps:$4 sm:$0xff]  }
 0x305   :  { %v14793_v33 = vadd.f32 %v14792_v63, %v14791_v35  ;;  %v14856_v8 = vpop.f32.mrf.mxu1  ;;  %15349 = vmatpush3.bf16.msra.mxu1 %v20763_v17  ;;  %15286 = vmatprep.subr.bf16.mxu0 %v20767_v48  ;;  %v18512_v17 = vld [vmem:[#allocation2 + $0x584] ss:$16 sps:$4 sm:$0xff]   ;;  %v18516_v35 = vld [vmem:[#allocation2 + $0x5a0] ss:$16 sps:$4 sm:$0xff]  }
 0x306   :  { %v14857_v29 = vadd.f32 %v14856_v8, %v14855_v38  ;;  %v14794_v7 = vpop.f32.mrf.mxu0  ;;  %2926 = vmatmul.mubr.bf16.gmra.mxu0 %v18498_v1  ;;  %15350 = vmatprep.subr.bf16.mxu1 %v20771_v51  ;;  %v18524_v38 = vld [vmem:[#allocation2 + $0x5c4] ss:$16 sps:$4 sm:$0xff]  }
 0x307   :  { %v14858_v10 = vpop.f32.mrf.mxu1  ;;  %3023 = vmatmul.mubr.bf16.gmra.mxu1 %v18501_v58  ;;  %2933 = vmatprep.mubr.bf16.mxu0 %v18506_v45 }
 0x308   :  { %v14795_v12 = vpop.f32.mrf.mxu0  ;;  %v1859_v18 = vadd.f32 %v14857_v29, %v14793_v33  ;;  %3030 = vmatprep.mubr.bf16.mxu1 %v18509_v49  ;;  %15287 = vmatpush3.bf16.msra.mxu0 %v20775_v60 }
 0x309   :  { %v14859_v16 = vpop.f32.mrf.mxu1  ;;  %15351 = vmatpush3.bf16.msra.mxu1 %v20779_v31  ;;  %15288 = vmatprep.subr.bf16.mxu0 %v20783_v34  ;;  %v14796_v52 = vadd.f32 %v14795_v12, %v14794_v7 }
 0x30a   :  { %v14797_v48 = vpop.f32.mrf.mxu0  ;;  %v17309_v41 = vpack.i.bf16 %v1859_v18, %v1856_v57  ;;  %15352 = vmatprep.subr.bf16.mxu1 %v20787_v53  ;;  %v14860_v15 = vadd.f32 %v14859_v16, %v14858_v10 }
 0x30b   :  { %v14861_v51 = vpop.f32.mrf.mxu1 }
 0x30c   :  { %17310 = vrot.lane.b32.xlu1 %v17309_v41, %s20052_s8  ;;  %v14798_v6 = vpop.f32.mrf.mxu0  ;;  %15289 = vmatpush3.bf16.msra.mxu0 %v20792_v3  ;;  %v1864_v46 = vadd.f32 %v14860_v15, %v14796_v52 }
 0x30d   :  { %v14799_v60 = vadd.f32 %v14798_v6, %v14797_v48  ;;  %v14862_v5 = vpop.f32.mrf.mxu1  ;;  %15353 = vmatpush3.bf16.msra.mxu1 %v20796_v42  ;;  %15290 = vmatprep.subr.bf16.mxu0 %v20800_v9  ;;  %v18518_v42 = vld [vmem:[#allocation2 + $0x5a4] ss:$16 sps:$4 sm:$0xff]  }
 0x30e   :  { %v14863_v31 = vadd.f32 %v14862_v5, %v14861_v51  ;;  %v14800_v34 = vpop.f32.mrf.mxu0  ;;  %2934 = vmatmul.mubr.bf16.gmra.mxu0 %v18504_v28  ;;  %15354 = vmatprep.subr.bf16.mxu1 %v20804_v11  ;;  %v18522_v28 = vld [vmem:[#allocation2 + $0x5c0] ss:$16 sps:$4 sm:$0xff]  }
 0x30f   :  { %v14864_v53 = vpop.f32.mrf.mxu1  ;;  %3031 = vmatmul.mubr.bf16.gmra.mxu1 %v18507_v24  ;;  %2941 = vmatprep.mubr.bf16.mxu0 %v18512_v17  ;;  %v18525_v24 = vld [vmem:[#allocation2 + $0x5c8] ss:$16 sps:$4 sm:$0xff]   ;;  %v18530_v17 = vld [vmem:[#allocation2 + $0x5e4] ss:$16 sps:$4 sm:$0xff]  }
 0x310   :  { %v14801_v21 = vpop.f32.mrf.mxu0  ;;  %v1867_v0 = vadd.f32 %v14863_v31, %v14799_v60  ;;  %3038 = vmatprep.mubr.bf16.mxu1 %v18515_v20  ;;  %15291 = vmatpush3.bf16.msra.mxu0 %v20808_v54  ;;  %v18533_v20 = vld [vmem:[#allocation2 + $0x5ec] ss:$16 sps:$4 sm:$0xff]  }
 0x311   :  { %v14865_v3 = vpop.f32.mrf.mxu1  ;;  %15355 = vmatpush3.bf16.msra.mxu1 %v20812_v25  ;;  %15292 = vmatprep.subr.bf16.mxu0 %v20816_v61  ;;  %v14802_v59 = vadd.f32 %v14801_v21, %v14800_v34 }
 0x312   :  { %v14803_v9 = vpop.f32.mrf.mxu0  ;;  %v17314_v23 = vpack.i.bf16 %v1867_v0, %v1864_v46  ;;  %15356 = vmatprep.subr.bf16.mxu1 %v20820_v50  ;;  %v14866_v62 = vadd.f32 %v14865_v3, %v14864_v53 }
 0x313   :  { %v14867_v11 = vpop.f32.mrf.mxu1 }
 0x314   :  { %17315 = vrot.lane.b32.xlu0 %v17314_v23, %s20052_s8  ;;  %v14804_v14 = vpop.f32.mrf.mxu0  ;;  %15293 = vmatpush3.bf16.msra.mxu0 %v20825_v2  ;;  %v1872_v30 = vadd.f32 %v14866_v62, %v14802_v59 }
 0x315   :  { %v14805_v54 = vadd.f32 %v14804_v14, %v14803_v9  ;;  %v14868_v1 = vpop.f32.mrf.mxu1  ;;  %15357 = vmatpush3.bf16.msra.mxu1 %v20829_v43  ;;  %15406 = vmatprep.subr.bf16.mxu0 %v20833_v13 }
 0x316   :  { %v14869_v25 = vadd.f32 %v14868_v1, %v14867_v11  ;;  %v14806_v61 = vpop.f32.mrf.mxu0  ;;  %2942 = vmatmul.mubr.bf16.gmra.mxu0 %v18510_v55  ;;  %15470 = vmatprep.subr.bf16.mxu1 %v20837_v47  ;;  %v18527_v47 = vld [vmem:[#allocation2 + $0x5cc] ss:$16 sps:$4 sm:$0xff]   ;;  %v18528_v55 = vld [vmem:[#allocation2 + $0x5e0] ss:$16 sps:$4 sm:$0xff]  }
 0x317   :  { %v14870_v50 = vpop.f32.mrf.mxu1  ;;  %3039 = vmatmul.mubr.bf16.gmra.mxu1 %v18513_v22  ;;  %2949 = vmatprep.mubr.bf16.mxu0 %v18518_v42  ;;  %v18531_v22 = vld [vmem:[#allocation2 + $0x5e8] ss:$16 sps:$4 sm:$0xff]   ;;  %v18536_v42 = vld [vmem:[#allocation2 + $0x604] ss:$16 sps:$4 sm:$0xff]  }
 0x318   :  { %v14807_v58 = vpop.f32.mrf.mxu0  ;;  %v1875_v45 = vadd.f32 %v14869_v25, %v14805_v54  ;;  %3046 = vmatprep.mubr.bf16.mxu1 %v18521_v4  ;;  %v18539_v4 = vld [vmem:[#allocation2 + $0x60c] ss:$16 sps:$4 sm:$0xff]  }
 0x319   :  { %v14871_v2 = vpop.f32.mrf.mxu1  ;;  %v14808_v13 = vadd.f32 %v14807_v58, %v14806_v61 }
 0x31a   :  { %v14809_v39 = vpop.f32.mrf.mxu0  ;;  %v17319_v43 = vpack.i.bf16 %v1875_v45, %v1872_v30  ;;  %v14872_v63 = vadd.f32 %v14871_v2, %v14870_v50 }
 0x31b   :  { %v14873_v40 = vpop.f32.mrf.mxu1 }
 0x31c   :  { %17320 = vrot.lane.b32.xlu1 %v17319_v43, %s20052_s8  ;;  %v14810_v49 = vpop.f32.mrf.mxu0  ;;  %v1880_v57 = vadd.f32 %v14872_v63, %v14808_v13 }
 0x31d   :  { %v14811_v33 = vadd.f32 %v14810_v49, %v14809_v39  ;;  %v14874_v8 = vpop.f32.mrf.mxu1 }
 0x31e   :  { %v14875_v29 = vadd.f32 %v14874_v8, %v14873_v40  ;;  %v14812_v7 = vpop.f32.mrf.mxu0  ;;  %2950 = vmatmul.mubr.bf16.gmra.mxu0 %v18516_v35  ;;  %v18534_v35 = vld [vmem:[#allocation2 + $0x600] ss:$16 sps:$4 sm:$0xff]  }
 0x31f   :  { %v14876_v10 = vpop.f32.mrf.mxu1  ;;  %3047 = vmatmul.mubr.bf16.gmra.mxu1 %v18519_v26  ;;  %2957 = vmatprep.mubr.bf16.mxu0 %v18524_v38  ;;  %v18537_v26 = vld [vmem:[#allocation2 + $0x608] ss:$16 sps:$4 sm:$0xff]   ;;  %v18542_v38 = vld [vmem:[#allocation2 + $0x624] ss:$16 sps:$4 sm:$0xff]  }
 0x320   :  { %v14813_v12 = vpop.f32.mrf.mxu0  ;;  %v1883_v18 = vadd.f32 %v14875_v29, %v14811_v33  ;;  %3054 = vmatprep.mubr.bf16.mxu1 %v18527_v47  ;;  %v18545_v47 = vld [vmem:[#allocation2 + $0x62c] ss:$16 sps:$4 sm:$0xff]  }
 0x321   :  { %v14877_v16 = vpop.f32.mrf.mxu1  ;;  %v14814_v52 = vadd.f32 %v14813_v12, %v14812_v7 }
 0x322   :  { %v14815_v48 = vpop.f32.mrf.mxu0  ;;  %v17324_v41 = vpack.i.bf16 %v1883_v18, %v1880_v57  ;;  %v14878_v15 = vadd.f32 %v14877_v16, %v14876_v10  ;;  %v20885_v16 = vld [vmem:[%s23577_s19 + $0x38] sm:$0xff]  }
 0x323   :  { %v14879_v51 = vpop.f32.mrf.mxu1 }
 0x324   :  { %17325 = vrot.lane.b32.xlu0 %v17324_v41, %s20052_s8  ;;  %v14816_v6 = vpop.f32.mrf.mxu0  ;;  %v1888_v46 = vadd.f32 %v14878_v15, %v14814_v52  ;;  %v20889_v41 = vld [vmem:[%s23577_s19 + $0xb8] sm:$0xff]  }
 0x325   :  { %v14817_v60 = vadd.f32 %v14816_v6, %v14815_v48  ;;  %v14880_v5 = vpop.f32.mrf.mxu1  ;;  %v18548_v48 = vld [vmem:[#allocation2 + $0x644] ss:$16 sps:$4 sm:$0xff]  }
 0x326   :  { %v14881_v31 = vadd.f32 %v14880_v5, %v14879_v51  ;;  %v14818_v34 = vpop.f32.mrf.mxu0  ;;  %2958 = vmatmul.mubr.bf16.gmra.mxu0 %v18522_v28  ;;  %v18540_v28 = vld [vmem:[#allocation2 + $0x620] ss:$16 sps:$4 sm:$0xff]  }
 0x327   :  { %v14882_v53 = vpop.f32.mrf.mxu1  ;;  %3055 = vmatmul.mubr.bf16.gmra.mxu1 %v18525_v24  ;;  %2965 = vmatprep.mubr.bf16.mxu0 %v18530_v17  ;;  %v18543_v17 = vld [vmem:[#allocation2 + $0x628] ss:$16 sps:$4 sm:$0xff]   ;;  %v20893_v51 = vld [vmem:[%s23577_s19 + $0x70] sm:$0xff]  }
 0x328   :  { %v14819_v21 = vpop.f32.mrf.mxu0  ;;  %v1891_v0 = vadd.f32 %v14881_v31, %v14817_v60  ;;  %3062 = vmatprep.mubr.bf16.mxu1 %v18533_v20  ;;  %v20897_v6 = vld [vmem:[%s23577_s19 + $0xf0] sm:$0xff]  }
 0x329   :  { %v14883_v3 = vpop.f32.mrf.mxu1  ;;  %v14820_v59 = vadd.f32 %v14819_v21, %v14818_v34  ;;  %v18551_v34 = vld [vmem:[#allocation2 + $0x64c] ss:$16 sps:$4 sm:$0xff]  }
 0x32a   :  { %v14821_v9 = vpop.f32.mrf.mxu0  ;;  %v17329_v23 = vpack.i.bf16 %v1891_v0, %v1888_v46  ;;  %v14884_v62 = vadd.f32 %v14883_v3, %v14882_v53  ;;  %v20902_v53 = vld [vmem:[%s23577_s19 + $0x30] sm:$0xff]  }
 0x32b   :  { %v14885_v11 = vpop.f32.mrf.mxu1  ;;  %v20906_v0 = vld [vmem:[%s23577_s19 + $0xb0] sm:$0xff]  }
 0x32c   :  { %17330 = vrot.lane.b32.xlu1 %v17329_v23, %s20052_s8  ;;  %v14822_v14 = vpop.f32.mrf.mxu0  ;;  %v1896_v30 = vadd.f32 %v14884_v62, %v14820_v59  ;;  %v18546_v62 = vld [vmem:[#allocation2 + $0x640] ss:$16 sps:$4 sm:$0xff]  }
 0x32d   :  { %v14823_v54 = vadd.f32 %v14822_v14, %v14821_v9  ;;  %v14886_v1 = vpop.f32.mrf.mxu1  ;;  %v20918_v14 = vld [vmem:[%s23577_s19 + $0x28] sm:$0xff]  }
 0x32e   :  { %v14887_v25 = vadd.f32 %v14886_v1, %v14885_v11  ;;  %v14824_v61 = vpop.f32.mrf.mxu0  ;;  %2966 = vmatmul.mubr.bf16.gmra.mxu0 %v18528_v55  ;;  %v20910_v55 = vld [vmem:[%s23577_s19 + $0x68] sm:$0xff]   ;;  %v18554_v1 = vld [vmem:[#allocation2 + $0x664] ss:$16 sps:$4 sm:$0xff]  }
 0x32f   :  { %v14888_v50 = vpop.f32.mrf.mxu1  ;;  %3063 = vmatmul.mubr.bf16.gmra.mxu1 %v18531_v22  ;;  %3296 = vmatprep.mubr.bf16.mxu0 %v18536_v42  ;;  %v20914_v42 = vld [vmem:[%s23577_s19 + $0xe8] sm:$0xff]  }
 0x330   :  { %v14825_v58 = vpop.f32.mrf.mxu0  ;;  %v1899_v45 = vadd.f32 %v14887_v25, %v14823_v54  ;;  %3393 = vmatprep.mubr.bf16.mxu1 %v18539_v4  ;;  %v18549_v54 = vld [vmem:[#allocation2 + $0x648] ss:$16 sps:$4 sm:$0xff]  }
 0x331   :  { %v14889_v2 = vpop.f32.mrf.mxu1  ;;  %v14826_v13 = vadd.f32 %v14825_v58, %v14824_v61  ;;  %v20922_v25 = vld [vmem:[%s23577_s19 + $0xa8] sm:$0xff]   ;;  %v20926_v61 = vld [vmem:[%s23577_s19 + $0x60] sm:$0xff]  }
 0x332   :  { %v14827_v39 = vpop.f32.mrf.mxu0  ;;  %v17334_v43 = vpack.i.bf16 %v1899_v45, %v1896_v30  ;;  %v14890_v63 = vadd.f32 %v14889_v2, %v14888_v50  ;;  %v20930_v58 = vld [vmem:[%s23577_s19 + $0xe0] sm:$0xff]  }
 0x333   :  { %v14891_v40 = vpop.f32.mrf.mxu1 }
 0x334   :  { %17335 = vrot.lane.b32.xlu0 %v17334_v43, %s20052_s8  ;;  %v14828_v49 = vpop.f32.mrf.mxu0  ;;  %v1904_v57 = vadd.f32 %v14890_v63, %v14826_v13  ;;  %v20939_v13 = vld [vmem:[%s23577_s19 + $0xa0] sm:$0xff]   ;;  %v20943_v63 = vld [vmem:[%s23577_s19 + $0x58] sm:$0xff]  }
 0x335   :  { %v14829_v33 = vadd.f32 %v14828_v49, %v14827_v39  ;;  %v14892_v8 = vpop.f32.mrf.mxu1  ;;  %v20935_v39 = vld [vmem:[%s23577_s19 + $0x20] sm:$0xff]  }
 0x336   :  { %v14893_v29 = vadd.f32 %v14892_v8, %v14891_v40  ;;  %v14910_v7 = vpop.f32.mrf.mxu0  ;;  %3297 = vmatmul.mubr.bf16.vlgmr.msra.gmra.mxu0 %v18534_v35 }
 0x337   :  { %v14974_v10 = vpop.f32.mrf.mxu1  ;;  %3394 = vmatmul.mubr.bf16.vlgmr.msra.gmra.mxu1 %v18537_v26  ;;  %3304 = vmatprep.mubr.bf16.mxu0 %v18542_v38  ;;  %v18557_v38 = vld [vmem:[#allocation2 + $0x66c] ss:$16 sps:$4 sm:$0xff]  }
 0x338   :  { %v14911_v12 = vpop.f32.mrf.mxu0  ;;  %v1907_v18 = vadd.f32 %v14893_v29, %v14829_v33  ;;  %3401 = vmatprep.mubr.bf16.mxu1 %v18545_v47  ;;  %15407 = vmatpush3.bf16.msra.mxu0 %v20885_v16  ;;  %v20947_v33 = vld [vmem:[%s23577_s19 + $0xd8] sm:$0xff]  }
 0x339   :  { %v14975_v24 = vpop.f32.mrf.mxu1  ;;  %15471 = vmatpush3.bf16.msra.mxu1 %v20889_v41  ;;  %15408 = vmatprep.subr.bf16.mxu0 %v20893_v51  ;;  %v14912_v60 = vadd.f32 %v14911_v12, %v14910_v7  ;;  %v20951_v12 = vld [vmem:[%s23577_s19 + $0x18] sm:$0xff]  }
 0x33a   :  { %v14913_v52 = vpop.f32.mrf.mxu0  ;;  %v17339_v15 = vpack.i.bf16 %v1907_v18, %v1904_v57  ;;  %15472 = vmatprep.subr.bf16.mxu1 %v20897_v6  ;;  %v14976_v5 = vadd.f32 %v14975_v24, %v14974_v10  ;;  %v18552_v57 = vld [vmem:[#allocation2 + $0x660] ss:$16 sps:$4 sm:$0xff]   ;;  %v18560_v24 = vld [vmem:[#allocation2 + $0x684] ss:$16 sps:$4 sm:$0xff]  }
 0x33b   :  { %v14977_v20 = vpop.f32.mrf.mxu1 }
 0x33c   :  { %17340 = vrot.lane.b32.xlu1 %v17339_v15, %s20052_s8  ;;  %v14914_v31 = vpop.f32.mrf.mxu0  ;;  %15409 = vmatpush3.bf16.msra.mxu0 %v20902_v53  ;;  %v2235_v23 = vadd.f32 %v14976_v5, %v14912_v60 }
 0x33d   :  { %v14915_v46 = vadd.f32 %v14914_v31, %v14913_v52  ;;  %v14978_v21 = vpop.f32.mrf.mxu1  ;;  %15473 = vmatpush3.bf16.msra.mxu1 %v20906_v0  ;;  %15410 = vmatprep.subr.bf16.mxu0 %v20910_v55 }
 0x33e   :  { %v14979_v3 = vadd.f32 %v14978_v21, %v14977_v20  ;;  %v14916_v22 = vpop.f32.mrf.mxu0  ;;  %3305 = vmatmul.mubr.bf16.gmra.mxu0 %v18540_v28  ;;  %15474 = vmatprep.subr.bf16.mxu1 %v20914_v42  ;;  %v18555_v28 = vld [vmem:[#allocation2 + $0x668] ss:$16 sps:$4 sm:$0xff]   ;;  %v20963_v20 = vld [vmem:[%s23577_s19 + $0xd0] sm:$0xff]  }
 0x33f   :  { %v14980_v9 = vpop.f32.mrf.mxu1  ;;  %3402 = vmatmul.mubr.bf16.gmra.mxu1 %v18543_v17  ;;  %3312 = vmatprep.mubr.bf16.mxu0 %v18548_v48  ;;  %v20955_v17 = vld [vmem:[%s23577_s19 + $0x98] sm:$0xff]   ;;  %v20959_v48 = vld [vmem:[%s23577_s19 + $0x50] sm:$0xff]  }
 0x340   :  { %v14917_v11 = vpop.f32.mrf.mxu0  ;;  %v2238_v59 = vadd.f32 %v14979_v3, %v14915_v46  ;;  %3409 = vmatprep.mubr.bf16.mxu1 %v18551_v34  ;;  %15411 = vmatpush3.bf16.msra.mxu0 %v20918_v14  ;;  %v18563_v46 = vld [vmem:[#allocation2 + $0x68c] ss:$16 sps:$4 sm:$0xff]   ;;  %v20968_v21 = vld [vmem:[%s23577_s19 + $0x10] sm:$0xff]  }
 0x341   :  { %v14981_v4 = vpop.f32.mrf.mxu1  ;;  %15475 = vmatpush3.bf16.msra.mxu1 %v20922_v25  ;;  %15412 = vmatprep.subr.bf16.mxu0 %v20926_v61  ;;  %v14918_v35 = vadd.f32 %v14917_v11, %v14916_v22 }
 0x342   :  { %v14919_v50 = vpop.f32.mrf.mxu0  ;;  %v17344_v30 = vpack.i.bf16 %v2238_v59, %v2235_v23  ;;  %15476 = vmatprep.subr.bf16.mxu1 %v20930_v58  ;;  %v14982_v2 = vadd.f32 %v14981_v4, %v14980_v9  ;;  %v20972_v9 = vld [vmem:[%s23577_s19 + $0x90] sm:$0xff]   ;;  %v20976_v23 = vld [vmem:[%s23577_s19 + $0x48] sm:$0xff]  }
 0x343   :  { %v14983_v45 = vpop.f32.mrf.mxu1 }
 0x344   :  { %17345 = vrot.lane.b32.xlu0 %v17344_v30, %s20044_s20  ;;  %v14920_v26 = vpop.f32.mrf.mxu0  ;;  %15413 = vmatpush3.bf16.msra.mxu0 %v20935_v39  ;;  %v2243_v29 = vadd.f32 %v14982_v2, %v14918_v35  ;;  %v18558_v30 = vld [vmem:[#allocation2 + $0x680] ss:$16 sps:$4 sm:$0xff]   ;;  %v18561_v2 = vld [vmem:[#allocation2 + $0x688] ss:$16 sps:$4 sm:$0xff]  }
 0x345   :  { %v14921_v43 = vadd.f32 %v14920_v26, %v14919_v50  ;;  %v14984_v40 = vpop.f32.mrf.mxu1  ;;  %15477 = vmatpush3.bf16.msra.mxu1 %v20939_v13  ;;  %15414 = vmatprep.subr.bf16.mxu0 %v20943_v63  ;;  %v18566_v26 = vld [vmem:[#allocation2 + $0x6a4] ss:$16 sps:$4 sm:$0xff]  }
 0x346   :  { %v14985_v49 = vadd.f32 %v14984_v40, %v14983_v45  ;;  %v14922_v47 = vpop.f32.mrf.mxu0  ;;  %3313 = vmatmul.mubr.bf16.gmra.mxu0 %v18546_v62  ;;  %15478 = vmatprep.subr.bf16.mxu1 %v20947_v33  ;;  %v20980_v62 = vld [vmem:[%s23577_s19 + $0xc8] sm:$0xff]  }
 0x347   :  { %v14986_v8 = vpop.f32.mrf.mxu1  ;;  %3410 = vmatmul.mubr.bf16.gmra.mxu1 %v18549_v54  ;;  %3320 = vmatprep.mubr.bf16.mxu0 %v18554_v1  ;;  %v20984_v45 = vld [vmem:[%s23577_s19 + $0x8] sm:$0xff]  }
 0x348   :  { %v14923_v7 = vpop.f32.mrf.mxu0  ;;  %v2246_v10 = vadd.f32 %v14985_v49, %v14921_v43  ;;  %3417 = vmatprep.mubr.bf16.mxu1 %v18557_v38  ;;  %15415 = vmatpush3.bf16.msra.mxu0 %v20951_v12  ;;  %v20988_v38 = vld [vmem:[%s23577_s19 + $0x88] sm:$0xff]   ;;  %v20992_v43 = vld [vmem:[%s23577_s19 + $0x40] sm:$0xff]  }
 0x349   :  { %v14987_v18 = vpop.f32.mrf.mxu1  ;;  %15479 = vmatpush3.bf16.msra.mxu1 %v20955_v17  ;;  %15416 = vmatprep.subr.bf16.mxu0 %v20959_v48  ;;  %v14924_v5 = vadd.f32 %v14923_v7, %v14922_v47  ;;  %v20996_v47 = vld [vmem:[%s23577_s19 + $0xc0] sm:$0xff]  }
 0x34a   :  { %v14925_v52 = vpop.f32.mrf.mxu0  ;;  %v17349_v15 = vpack.i.bf16 %v2246_v10, %v2243_v29  ;;  %15480 = vmatprep.subr.bf16.mxu1 %v20963_v20  ;;  %v14988_v31 = vadd.f32 %v14987_v18, %v14986_v8  ;;  %v21001_v18 = vld [vmem:[%s23577_s19] sm:$0xff]  }
 0x34b   :  { %v14989_v60 = vpop.f32.mrf.mxu1 }
 0x34c   :  { %17350 = vrot.lane.b32.xlu1 %v17349_v15, %s20044_s20  ;;  %v14926_v34 = vpop.f32.mrf.mxu0  ;;  %15417 = vmatpush3.bf16.msra.mxu0 %v20968_v21  ;;  %v2251_v54 = vadd.f32 %v14988_v31, %v14924_v5  ;;  %v19338_v15 = vld [vmem:[%s23577_s19 + $0x78] sm:$0xff]  }
 0x34d   :  { %v14927_v3 = vadd.f32 %v14926_v34, %v14925_v52  ;;  %v14990_v22 = vpop.f32.mrf.mxu1  ;;  %15481 = vmatpush3.bf16.msra.mxu1 %v20972_v9  ;;  %15418 = vmatprep.subr.bf16.mxu0 %v20976_v23  ;;  %v21005_v52 = vld [vmem:[%s23577_s19 + $0x80] sm:$0xff]   ;;  %v19339_v31 = vld [vmem:[%s23577_s19 + $0xf8] sm:$0xff]  }
 0x34e   :  { %v14991_v11 = vadd.f32 %v14990_v22, %v14989_v60  ;;  %v14928_v59 = vpop.f32.mrf.mxu0  ;;  %3321 = vmatmul.mubr.bf16.gmra.mxu0 %v18552_v57  ;;  %15482 = vmatprep.subr.bf16.mxu1 %v20980_v62  ;;  %v18569_v57 = vld [vmem:[#allocation2 + $0x6ac] ss:$16 sps:$4 sm:$0xff]  }
 0x34f   :  { %v14992_v4 = vpop.f32.mrf.mxu1  ;;  %3418 = vmatmul.mubr.bf16.gmra.mxu1 %v18555_v28  ;;  %3328 = vmatprep.mubr.bf16.mxu0 %v18560_v24 }
 0x350   :  { %v14929_v1 = vpop.f32.mrf.mxu0  ;;  %v2254_v50 = vadd.f32 %v14991_v11, %v14927_v3  ;;  %3425 = vmatprep.mubr.bf16.mxu1 %v18563_v46  ;;  %15419 = vmatpush3.bf16.msra.mxu0 %v20984_v45  ;;  %v18564_v11 = vld [vmem:[#allocation2 + $0x6a0] ss:$16 sps:$4 sm:$0xff]  }
 0x351   :  { %v14993_v35 = vpop.f32.mrf.mxu1  ;;  %15483 = vmatpush3.bf16.msra.mxu1 %v20988_v38  ;;  %15420 = vmatprep.subr.bf16.mxu0 %v20992_v43  ;;  %v14930_v29 = vadd.f32 %v14929_v1, %v14928_v59 }
 0x352   :  { %v14931_v40 = vpop.f32.mrf.mxu0  ;;  %v17354_v49 = vpack.i.bf16 %v2254_v50, %v2251_v54  ;;  %15484 = vmatprep.subr.bf16.mxu1 %v20996_v47  ;;  %v14994_v7 = vadd.f32 %v14993_v35, %v14992_v4  ;;  %v18567_v4 = vld [vmem:[#allocation2 + $0x6a8] ss:$16 sps:$4 sm:$0xff]   ;;  %v18572_v54 = vld [vmem:[#allocation2 + $0x6c4] ss:$16 sps:$4 sm:$0xff]  }
 0x353   :  { %v14995_v8 = vpop.f32.mrf.mxu1 }
 0x354   :  { %17355 = vrot.lane.b32.xlu0 %v17354_v49, %s20044_s20  ;;  %v14932_v10 = vpop.f32.mrf.mxu0  ;;  %15421 = vmatpush3.bf16.msra.mxu0 %v21001_v18  ;;  %v2259_v46 = vadd.f32 %v14994_v7, %v14930_v29 }
 0x355   :  { %v14933_v28 = vadd.f32 %v14932_v10, %v14931_v40  ;;  %v14996_v24 = vpop.f32.mrf.mxu1  ;;  %15485 = vmatpush3.bf16.msra.mxu1 %v21005_v52  ;;  %15534 = vmatprep.subr.bf16.mxu0 %v19338_v15 }
 0x356   :  { %v14997_v60 = vadd.f32 %v14996_v24, %v14995_v8  ;;  %v14934_v5 = vpop.f32.mrf.mxu0  ;;  %3329 = vmatmul.mubr.bf16.gmra.mxu0 %v18558_v30  ;;  %15598 = vmatprep.subr.bf16.mxu1 %v19339_v31  ;;  %v18575_v8 = vld [vmem:[#allocation2 + $0x6cc] ss:$16 sps:$4 sm:$0xff]   ;;  %v18570_v31 = vld [vmem:[#allocation2 + $0x6c0] ss:$16 sps:$4 sm:$0xff]  }
 0x357   :  { %v14998_v34 = vpop.f32.mrf.mxu1  ;;  %3426 = vmatmul.mubr.bf16.gmra.mxu1 %v18561_v2  ;;  %3336 = vmatprep.mubr.bf16.mxu0 %v18566_v26 }
 0x358   :  { %v14935_v3 = vpop.f32.mrf.mxu0  ;;  %v2262_v22 = vadd.f32 %v14997_v60, %v14933_v28  ;;  %3433 = vmatprep.mubr.bf16.mxu1 %v18569_v57 }
 0x359   :  { %v14999_v59 = vpop.f32.mrf.mxu1  ;;  %v14936_v40 = vadd.f32 %v14935_v3, %v14934_v5  ;;  %v18578_v3 = vld [vmem:[#allocation2 + $0x6e4] ss:$16 sps:$4 sm:$0xff]  }
 0x35a   :  { %v14937_v1 = vpop.f32.mrf.mxu0  ;;  %v17359_v50 = vpack.i.bf16 %v2262_v22, %v2259_v46  ;;  %v15000_v49 = vadd.f32 %v14999_v59, %v14998_v34  ;;  %v18573_v46 = vld [vmem:[#allocation2 + $0x6c8] ss:$16 sps:$4 sm:$0xff]  }
 0x35b   :  { %v15001_v35 = vpop.f32.mrf.mxu1 }
 0x35c   :  { %17360 = vrot.lane.b32.xlu1 %v17359_v50, %s20044_s20  ;;  %v14938_v30 = vpop.f32.mrf.mxu0  ;;  %v2267_v57 = vadd.f32 %v15000_v49, %v14936_v40 }
 0x35d   :  { %v14939_v10 = vadd.f32 %v14938_v30, %v14937_v1  ;;  %v15002_v2 = vpop.f32.mrf.mxu1 }
 0x35e   :  { %v15003_v26 = vadd.f32 %v15002_v2, %v15001_v35  ;;  %v14940_v29 = vpop.f32.mrf.mxu0  ;;  %3337 = vmatmul.mubr.bf16.gmra.mxu0 %v18564_v11  ;;  %v18581_v11 = vld [vmem:[#allocation2 + $0x6ec] ss:$16 sps:$4 sm:$0xff]  }
 0x35f   :  { %v15004_v7 = vpop.f32.mrf.mxu1  ;;  %3434 = vmatmul.mubr.bf16.gmra.mxu1 %v18567_v4  ;;  %3344 = vmatprep.mubr.bf16.mxu0 %v18572_v54 }
 0x360   :  { %v14941_v28 = vpop.f32.mrf.mxu0  ;;  %v2270_v24 = vadd.f32 %v15003_v26, %v14939_v10  ;;  %3441 = vmatprep.mubr.bf16.mxu1 %v18575_v8 }
 0x361   :  { %v15005_v15 = vpop.f32.mrf.mxu1  ;;  %v14942_v22 = vadd.f32 %v14941_v28, %v14940_v29  ;;  %v18576_v29 = vld [vmem:[#allocation2 + $0x6e0] ss:$16 sps:$4 sm:$0xff]   ;;  %v18584_v28 = vld [vmem:[#allocation2 + $0x704] ss:$16 sps:$4 sm:$0xff]  }
 0x362   :  { %v14943_v60 = vpop.f32.mrf.mxu0  ;;  %v17364_v5 = vpack.i.bf16 %v2270_v24, %v2267_v57  ;;  %v15006_v59 = vadd.f32 %v15005_v15, %v15004_v7  ;;  %v18579_v57 = vld [vmem:[#allocation2 + $0x6e8] ss:$16 sps:$4 sm:$0xff]  }
 0x363   :  { %v15007_v34 = vpop.f32.mrf.mxu1 }
 0x364   :  { %17365 = vrot.lane.b32.xlu0 %v17364_v5, %s20044_s20  ;;  %v14944_v1 = vpop.f32.mrf.mxu0  ;;  %v2275_v49 = vadd.f32 %v15006_v59, %v14942_v22  ;;  %v18587_v5 = vld [vmem:[#allocation2 + $0x70c] ss:$16 sps:$4 sm:$0xff]  }
 0x365   :  { %v14945_v50 = vadd.f32 %v14944_v1, %v14943_v60  ;;  %v15008_v4 = vpop.f32.mrf.mxu1 }
 0x366   :  { %v15009_v54 = vadd.f32 %v15008_v4, %v15007_v34  ;;  %v14946_v35 = vpop.f32.mrf.mxu0  ;;  %3345 = vmatmul.mubr.bf16.gmra.mxu0 %v18570_v31 }
 0x367   :  { %v15010_v40 = vpop.f32.mrf.mxu1  ;;  %3442 = vmatmul.mubr.bf16.gmra.mxu1 %v18573_v46  ;;  %3352 = vmatprep.mubr.bf16.mxu0 %v18578_v3 }
 0x368   :  { %v14947_v30 = vpop.f32.mrf.mxu0  ;;  %v2278_v8 = vadd.f32 %v15009_v54, %v14945_v50  ;;  %3449 = vmatprep.mubr.bf16.mxu1 %v18581_v11 }
 0x369   :  { %v15011_v10 = vpop.f32.mrf.mxu1  ;;  %v14948_v24 = vadd.f32 %v14947_v30, %v14946_v35  ;;  %v18582_v35 = vld [vmem:[#allocation2 + $0x700] ss:$16 sps:$4 sm:$0xff]   ;;  %v18590_v30 = vld [vmem:[#allocation2 + $0x724] ss:$16 sps:$4 sm:$0xff]  }
 0x36a   :  { %v14949_v2 = vpop.f32.mrf.mxu0  ;;  %v17369_v26 = vpack.i.bf16 %v2278_v8, %v2275_v49  ;;  %v15012_v15 = vadd.f32 %v15011_v10, %v15010_v40  ;;  %v18585_v49 = vld [vmem:[#allocation2 + $0x708] ss:$16 sps:$4 sm:$0xff]  }
 0x36b   :  { %v15013_v7 = vpop.f32.mrf.mxu1 }
 0x36c   :  { %17370 = vrot.lane.b32.xlu1 %v17369_v26, %s20044_s20  ;;  %v14950_v60 = vpop.f32.mrf.mxu0  ;;  %v2283_v59 = vadd.f32 %v15012_v15, %v14948_v24  ;;  %v18593_v26 = vld [vmem:[#allocation2 + $0x72c] ss:$16 sps:$4 sm:$0xff]  }
 0x36d   :  { %v14951_v31 = vadd.f32 %v14950_v60, %v14949_v2  ;;  %v15014_v34 = vpop.f32.mrf.mxu1 }
 0x36e   :  { %v15015_v46 = vadd.f32 %v15014_v34, %v15013_v7  ;;  %v14952_v3 = vpop.f32.mrf.mxu0  ;;  %3353 = vmatmul.mubr.bf16.gmra.mxu0 %v18576_v29 }
 0x36f   :  { %v15016_v22 = vpop.f32.mrf.mxu1  ;;  %3450 = vmatmul.mubr.bf16.gmra.mxu1 %v18579_v57  ;;  %3683 = vmatprep.mubr.bf16.mxu0 %v18584_v28 }
 0x370   :  { %v14953_v1 = vpop.f32.mrf.mxu0  ;;  %v2286_v11 = vadd.f32 %v15015_v46, %v14951_v31  ;;  %3780 = vmatprep.mubr.bf16.mxu1 %v18587_v5 }
 0x371   :  { %v15017_v50 = vpop.f32.mrf.mxu1  ;;  %v14954_v8 = vadd.f32 %v14953_v1, %v14952_v3  ;;  %v18588_v3 = vld [vmem:[#allocation2 + $0x720] ss:$16 sps:$4 sm:$0xff]   ;;  %v18596_v1 = vld [vmem:[#allocation2 + $0x744] ss:$16 sps:$4 sm:$0xff]  }
 0x372   :  { %v14955_v4 = vpop.f32.mrf.mxu0  ;;  %v17374_v54 = vpack.i.bf16 %v2286_v11, %v2283_v59  ;;  %v15018_v10 = vadd.f32 %v15017_v50, %v15016_v22  ;;  %v18591_v59 = vld [vmem:[#allocation2 + $0x728] ss:$16 sps:$4 sm:$0xff]  }
 0x373   :  { %v15019_v40 = vpop.f32.mrf.mxu1 }
 0x374   :  { %17375 = vrot.lane.b32.xlu0 %v17374_v54, %s20044_s20  ;;  %v14956_v2 = vpop.f32.mrf.mxu0  ;;  %v2291_v15 = vadd.f32 %v15018_v10, %v14954_v8  ;;  %v18599_v54 = vld [vmem:[#allocation2 + $0x74c] ss:$16 sps:$4 sm:$0xff]   ;;  %v18594_v8 = vld [vmem:[#allocation2 + $0x740] ss:$16 sps:$4 sm:$0xff]   ;;  %v18597_v10 = vld [vmem:[#allocation2 + $0x748] ss:$16 sps:$4 sm:$0xff]  }
 0x375   :  { %v14957_v29 = vadd.f32 %v14956_v2, %v14955_v4  ;;  %v15020_v7 = vpop.f32.mrf.mxu1  ;;  %v18602_v2 = vld [vmem:[#allocation2 + $0x764] ss:$16 sps:$4 sm:$0xff]  }
 0x376   :  { %v15021_v57 = vadd.f32 %v15020_v7, %v15019_v40  ;;  %v15038_v28 = vpop.f32.mrf.mxu0  ;;  %3684 = vmatmul.mubr.bf16.vlgmr.msra.gmra.mxu0 %v18582_v35 }
 0x377   :  { %v15102_v24 = vpop.f32.mrf.mxu1  ;;  %3781 = vmatmul.mubr.bf16.vlgmr.msra.gmra.mxu1 %v18585_v49  ;;  %3691 = vmatprep.mubr.bf16.mxu0 %v18590_v30 }
 0x378   :  { %v15039_v60 = vpop.f32.mrf.mxu0  ;;  %v2294_v5 = vadd.f32 %v15021_v57, %v14957_v29  ;;  %3788 = vmatprep.mubr.bf16.mxu1 %v18593_v26  ;;  %15535 = vmatpush3.bf16.msra.mxu0 %v20885_v16  ;;  %v18605_v57 = vld [vmem:[#allocation2 + $0x76c] ss:$16 sps:$4 sm:$0xff]  }
 0x379   :  { %v15103_v31 = vpop.f32.mrf.mxu1  ;;  %15599 = vmatpush3.bf16.msra.mxu1 %v20889_v41  ;;  %15536 = vmatprep.subr.bf16.mxu0 %v20893_v51  ;;  %v15040_v11 = vadd.f32 %v15039_v60, %v15038_v28 }
 0x37a   :  { %v15041_v34 = vpop.f32.mrf.mxu0  ;;  %v17379_v46 = vpack.i.bf16 %v2294_v5, %v2291_v15  ;;  %15600 = vmatprep.subr.bf16.mxu1 %v20897_v6  ;;  %v15104_v50 = vadd.f32 %v15103_v31, %v15102_v24  ;;  %v18600_v5 = vld [vmem:[#allocation2 + $0x760] ss:$16 sps:$4 sm:$0xff]   ;;  %v18603_v31 = vld [vmem:[#allocation2 + $0x768] ss:$16 sps:$4 sm:$0xff]  }
 0x37b   :  { %v15105_v22 = vpop.f32.mrf.mxu1 }
 0x37c   :  { %17380 = vrot.lane.b32.xlu1 %v17379_v46, %s20044_s20  ;;  %v15042_v4 = vpop.f32.mrf.mxu0  ;;  %15537 = vmatpush3.bf16.msra.mxu0 %v20902_v53  ;;  %v2622_v40 = vadd.f32 %v15104_v50, %v15040_v11  ;;  %s20056_s20 = smov 28  }
 0x37d   :  { %v15043_v16 = vadd.f32 %v15042_v4, %v15041_v34  ;;  %v15106_v41 = vpop.f32.mrf.mxu1  ;;  %15601 = vmatpush3.bf16.msra.mxu1 %v20906_v0  ;;  %15538 = vmatprep.subr.bf16.mxu0 %v20910_v55  ;;  %v18608_v34 = vld [vmem:[#allocation2 + $0x784] ss:$16 sps:$4 sm:$0xff]  }
 0x37e   :  { %v15107_v51 = vadd.f32 %v15106_v41, %v15105_v22  ;;  %v15044_v35 = vpop.f32.mrf.mxu0  ;;  %3692 = vmatmul.mubr.bf16.gmra.mxu0 %v18588_v3  ;;  %15602 = vmatprep.subr.bf16.mxu1 %v20914_v42  ;;  %v18614_v41 = vld [vmem:[#allocation2 + $0x7a4] ss:$16 sps:$4 sm:$0xff]  }
 0x37f   :  { %v15108_v6 = vpop.f32.mrf.mxu1  ;;  %3789 = vmatmul.mubr.bf16.gmra.mxu1 %v18591_v59  ;;  %3699 = vmatprep.mubr.bf16.mxu0 %v18596_v1  ;;  %v18611_v59 = vld [vmem:[#allocation2 + $0x78c] ss:$16 sps:$4 sm:$0xff]  }
 0x380   :  { %v15045_v49 = vpop.f32.mrf.mxu0  ;;  %v2625_v30 = vadd.f32 %v15107_v51, %v15043_v16  ;;  %3796 = vmatprep.mubr.bf16.mxu1 %v18599_v54  ;;  %15539 = vmatpush3.bf16.msra.mxu0 %v20918_v14  ;;  %v18606_v54 = vld [vmem:[#allocation2 + $0x780] ss:$16 sps:$4 sm:$0xff]   ;;  %v18609_v16 = vld [vmem:[#allocation2 + $0x788] ss:$16 sps:$4 sm:$0xff]  }
 0x381   :  { %v15109_v53 = vpop.f32.mrf.mxu1  ;;  %15603 = vmatpush3.bf16.msra.mxu1 %v20922_v25  ;;  %15540 = vmatprep.subr.bf16.mxu0 %v20926_v61  ;;  %v15046_v26 = vadd.f32 %v15045_v49, %v15044_v35 }
 0x382   :  { %v15047_v0 = vpop.f32.mrf.mxu0  ;;  %v17384_v55 = vpack.i.bf16 %v2625_v30, %v2622_v40  ;;  %15604 = vmatprep.subr.bf16.mxu1 %v20930_v58  ;;  %v15110_v29 = vadd.f32 %v15109_v53, %v15108_v6  ;;  %v18617_v40 = vld [vmem:[#allocation2 + $0x7ac] ss:$16 sps:$4 sm:$0xff]  }
 0x383   :  { %v15111_v42 = vpop.f32.mrf.mxu1 }
 0x384   :  { %17385 = vrot.lane.b32.xlu0 %v17384_v55, %s20034_s15  ;;  %v15048_v7 = vpop.f32.mrf.mxu0  ;;  %15541 = vmatpush3.bf16.msra.mxu0 %v20935_v39  ;;  %v2630_v24 = vadd.f32 %v15110_v29, %v15046_v26  ;;  %v18620_v26 = vld [vmem:[#allocation2 + $0x7c4] ss:$16 sps:$4 sm:$0xff]  }
 0x385   :  { %v15049_v14 = vadd.f32 %v15048_v7, %v15047_v0  ;;  %v15112_v25 = vpop.f32.mrf.mxu1  ;;  %15605 = vmatpush3.bf16.msra.mxu1 %v20939_v13  ;;  %15542 = vmatprep.subr.bf16.mxu0 %v20943_v63 }
 0x386   :  { %v15113_v61 = vadd.f32 %v15112_v25, %v15111_v42  ;;  %v15050_v28 = vpop.f32.mrf.mxu0  ;;  %3700 = vmatmul.mubr.bf16.gmra.mxu0 %v18594_v8  ;;  %15606 = vmatprep.subr.bf16.mxu1 %v20947_v33 }
 0x387   :  { %v15114_v58 = vpop.f32.mrf.mxu1  ;;  %3797 = vmatmul.mubr.bf16.gmra.mxu1 %v18597_v10  ;;  %3707 = vmatprep.mubr.bf16.mxu0 %v18602_v2  ;;  %v18612_v10 = vld [vmem:[#allocation2 + $0x7a0] ss:$16 sps:$4 sm:$0xff]  }
 0x388   :  { %v15051_v15 = vpop.f32.mrf.mxu0  ;;  %v2633_v60 = vadd.f32 %v15113_v61, %v15049_v14  ;;  %3804 = vmatprep.mubr.bf16.mxu1 %v18605_v57  ;;  %15543 = vmatpush3.bf16.msra.mxu0 %v20951_v12  ;;  %v18623_v57 = vld [vmem:[#allocation2 + $0x7cc] ss:$16 sps:$4 sm:$0xff]  }
 0x389   :  { %v15115_v39 = vpop.f32.mrf.mxu1  ;;  %15607 = vmatpush3.bf16.msra.mxu1 %v20955_v17  ;;  %15544 = vmatprep.subr.bf16.mxu0 %v20959_v48  ;;  %v15052_v46 = vadd.f32 %v15051_v15, %v15050_v28 }
 0x38a   :  { %v15053_v13 = vpop.f32.mrf.mxu0  ;;  %v17389_v63 = vpack.i.bf16 %v2633_v60, %v2630_v24  ;;  %15608 = vmatprep.subr.bf16.mxu1 %v20963_v20  ;;  %v15116_v3 = vadd.f32 %v15115_v39, %v15114_v58 }
 0x38b   :  { %v15117_v33 = vpop.f32.mrf.mxu1 }
 0x38c   :  { %17390 = vrot.lane.b32.xlu1 %v17389_v63, %s20034_s15  ;;  %v15054_v22 = vpop.f32.mrf.mxu0  ;;  %15545 = vmatpush3.bf16.msra.mxu0 %v20968_v21  ;;  %v2638_v11 = vadd.f32 %v15116_v3, %v15052_v46 }
 0x38d   :  { %v15055_v12 = vadd.f32 %v15054_v22, %v15053_v13  ;;  %v15118_v17 = vpop.f32.mrf.mxu1  ;;  %15609 = vmatpush3.bf16.msra.mxu1 %v20972_v9  ;;  %15546 = vmatprep.subr.bf16.mxu0 %v20976_v23 }
 0x38e   :  { %v15119_v48 = vadd.f32 %v15118_v17, %v15117_v33  ;;  %v15056_v1 = vpop.f32.mrf.mxu0  ;;  %3708 = vmatmul.mubr.bf16.gmra.mxu0 %v18600_v5  ;;  %15610 = vmatprep.subr.bf16.mxu1 %v20980_v62  ;;  %v18618_v5 = vld [vmem:[#allocation2 + $0x7c0] ss:$16 sps:$4 sm:$0xff]  }
 0x38f   :  { %v15120_v20 = vpop.f32.mrf.mxu1  ;;  %3805 = vmatmul.mubr.bf16.gmra.mxu1 %v18603_v31  ;;  %3715 = vmatprep.mubr.bf16.mxu0 %v18608_v34  ;;  %v18621_v31 = vld [vmem:[#allocation2 + $0x7c8] ss:$16 sps:$4 sm:$0xff]   ;;  %v18626_v34 = vld [vmem:[#allocation2 + $0x7e4] ss:$16 sps:$4 sm:$0xff]  }
 0x390   :  { %v15057_v50 = vpop.f32.mrf.mxu0  ;;  %v2641_v4 = vadd.f32 %v15119_v48, %v15055_v12  ;;  %3812 = vmatprep.mubr.bf16.mxu1 %v18611_v59  ;;  %15547 = vmatpush3.bf16.msra.mxu0 %v20984_v45  ;;  %v18629_v59 = vld [vmem:[#allocation2 + $0x7ec] ss:$16 sps:$4 sm:$0xff]  }
 0x391   :  { %v15121_v21 = vpop.f32.mrf.mxu1  ;;  %15611 = vmatpush3.bf16.msra.mxu1 %v20988_v38  ;;  %15548 = vmatprep.subr.bf16.mxu0 %v20992_v43  ;;  %v15058_v51 = vadd.f32 %v15057_v50, %v15056_v1 }
 0x392   :  { %v15059_v9 = vpop.f32.mrf.mxu0  ;;  %v17394_v23 = vpack.i.bf16 %v2641_v4, %v2638_v11  ;;  %15612 = vmatprep.subr.bf16.mxu1 %v20996_v47  ;;  %v15122_v35 = vadd.f32 %v15121_v21, %v15120_v20 }
 0x393   :  { %v15123_v62 = vpop.f32.mrf.mxu1 }
 0x394   :  { %17395 = vrot.lane.b32.xlu0 %v17394_v23, %s20034_s15  ;;  %v15060_v6 = vpop.f32.mrf.mxu0  ;;  %15549 = vmatpush3.bf16.msra.mxu0 %v21001_v18  ;;  %v2646_v47 = vadd.f32 %v15122_v35, %v15058_v51  ;;  %v18615_v18 = vld [vmem:[#allocation2 + $0x7a8] ss:$16 sps:$4 sm:$0xff]  }
 0x395   :  { %v15061_v45 = vadd.f32 %v15060_v6, %v15059_v9  ;;  %v15124_v38 = vpop.f32.mrf.mxu1  ;;  %15613 = vmatpush3.bf16.msra.mxu1 %v21005_v52 }
 0x396   :  { %v15125_v43 = vadd.f32 %v15124_v38, %v15123_v62  ;;  %v15062_v49 = vpop.f32.mrf.mxu0  ;;  %3716 = vmatmul.mubr.bf16.gmra.mxu0 %v18606_v54  ;;  %v18624_v54 = vld [vmem:[#allocation2 + $0x7e0] ss:$16 sps:$4 sm:$0xff]  }
 0x397   :  { %v15126_v30 = vpop.f32.mrf.mxu1  ;;  %3813 = vmatmul.mubr.bf16.gmra.mxu1 %v18609_v16  ;;  %3723 = vmatprep.mubr.bf16.mxu0 %v18614_v41  ;;  %v18627_v16 = vld [vmem:[#allocation2 + $0x7e8] ss:$16 sps:$4 sm:$0xff]   ;;  %v18632_v41 = vld [vmem:[#allocation2 + $0x804] ss:$16 sps:$4 sm:$0xff]  }
 0x398   :  { %v15063_v53 = vpop.f32.mrf.mxu0  ;;  %v2649_v0 = vadd.f32 %v15125_v43, %v15061_v45  ;;  %3820 = vmatprep.mubr.bf16.mxu1 %v18617_v40  ;;  %v18635_v40 = vld [vmem:[#allocation2 + $0x80c] ss:$16 sps:$4 sm:$0xff]  }
 0x399   :  { %v15127_v55 = vpop.f32.mrf.mxu1  ;;  %v15064_v29 = vadd.f32 %v15063_v53, %v15062_v49 }
 0x39a   :  { %v15065_v8 = vpop.f32.mrf.mxu0  ;;  %v17399_v42 = vpack.i.bf16 %v2649_v0, %v2646_v47  ;;  %v15128_v7 = vadd.f32 %v15127_v55, %v15126_v30 }
 0x39b   :  { %v15129_v2 = vpop.f32.mrf.mxu1 }
 0x39c   :  { %17400 = vrot.lane.b32.xlu1 %v17399_v42, %s20034_s15  ;;  %v15066_v52 = vpop.f32.mrf.mxu0  ;;  %v2654_v24 = vadd.f32 %v15128_v7, %v15064_v29  ;;  %v18633_v29 = vld [vmem:[#allocation2 + $0x808] ss:$16 sps:$4 sm:$0xff]   ;;  %v18638_v7 = vld [vmem:[#allocation2 + $0x824] ss:$16 sps:$4 sm:$0xff]  }
 0x39d   :  { %v15067_v14 = vadd.f32 %v15066_v52, %v15065_v8  ;;  %v15130_v25 = vpop.f32.mrf.mxu1 }
 0x39e   :  { %v15131_v61 = vadd.f32 %v15130_v25, %v15129_v2  ;;  %v15068_v28 = vpop.f32.mrf.mxu0  ;;  %3724 = vmatmul.mubr.bf16.gmra.mxu0 %v18612_v10 }
 0x39f   :  { %v15132_v58 = vpop.f32.mrf.mxu1  ;;  %3821 = vmatmul.mubr.bf16.gmra.mxu1 %v18615_v18  ;;  %3731 = vmatprep.mubr.bf16.mxu0 %v18620_v26  ;;  %v18630_v18 = vld [vmem:[#allocation2 + $0x800] ss:$16 sps:$4 sm:$0xff]  }
 0x3a0   :  { %v15069_v15 = vpop.f32.mrf.mxu0  ;;  %v2657_v60 = vadd.f32 %v15131_v61, %v15067_v14  ;;  %3828 = vmatprep.mubr.bf16.mxu1 %v18623_v57  ;;  %v18641_v14 = vld [vmem:[#allocation2 + $0x82c] ss:$16 sps:$4 sm:$0xff]  }
 0x3a1   :  { %v15133_v39 = vpop.f32.mrf.mxu1  ;;  %v15070_v46 = vadd.f32 %v15069_v15, %v15068_v28 }
 0x3a2   :  { %v15071_v13 = vpop.f32.mrf.mxu0  ;;  %v17404_v63 = vpack.i.bf16 %v2657_v60, %v2654_v24  ;;  %v15134_v3 = vadd.f32 %v15133_v39, %v15132_v58 }
 0x3a3   :  { %v15135_v33 = vpop.f32.mrf.mxu1 }
 0x3a4   :  { %17405 = vrot.lane.b32.xlu0 %v17404_v63, %s20034_s15  ;;  %v15072_v22 = vpop.f32.mrf.mxu0  ;;  %v2662_v11 = vadd.f32 %v15134_v3, %v15070_v46  ;;  %v18636_v63 = vld [vmem:[#allocation2 + $0x820] ss:$16 sps:$4 sm:$0xff]  }
 0x3a5   :  { %v15073_v12 = vadd.f32 %v15072_v22, %v15071_v13  ;;  %v15136_v17 = vpop.f32.mrf.mxu1 }
 0x3a6   :  { %v15137_v48 = vadd.f32 %v15136_v17, %v15135_v33  ;;  %v15074_v1 = vpop.f32.mrf.mxu0  ;;  %3732 = vmatmul.mubr.bf16.gmra.mxu0 %v18618_v5 }
 0x3a7   :  { %v15138_v20 = vpop.f32.mrf.mxu1  ;;  %3829 = vmatmul.mubr.bf16.gmra.mxu1 %v18621_v31  ;;  %3739 = vmatprep.mubr.bf16.mxu0 %v18626_v34  ;;  %v18639_v31 = vld [vmem:[#allocation2 + $0x828] ss:$16 sps:$4 sm:$0xff]   ;;  %v18644_v34 = vld [vmem:[#allocation2 + $0x844] ss:$16 sps:$4 sm:$0xff]  }
 0x3a8   :  { %v15075_v50 = vpop.f32.mrf.mxu0  ;;  %v2665_v4 = vadd.f32 %v15137_v48, %v15073_v12  ;;  %3836 = vmatprep.mubr.bf16.mxu1 %v18629_v59  ;;  %v18647_v59 = vld [vmem:[#allocation2 + $0x84c] ss:$16 sps:$4 sm:$0xff]  }
 0x3a9   :  { %v15139_v21 = vpop.f32.mrf.mxu1  ;;  %v15076_v51 = vadd.f32 %v15075_v50, %v15074_v1 }
 0x3aa   :  { %v15077_v9 = vpop.f32.mrf.mxu0  ;;  %v17409_v23 = vpack.i.bf16 %v2665_v4, %v2662_v11  ;;  %v15140_v35 = vadd.f32 %v15139_v21, %v15138_v20 }
 0x3ab   :  { %v15141_v62 = vpop.f32.mrf.mxu1 }
 0x3ac   :  { %17410 = vrot.lane.b32.xlu1 %v17409_v23, %s20034_s15  ;;  %v15078_v6 = vpop.f32.mrf.mxu0  ;;  %v2670_v47 = vadd.f32 %v15140_v35, %v15076_v51 }
 0x3ad   :  { %v15079_v45 = vadd.f32 %v15078_v6, %v15077_v9  ;;  %v15142_v38 = vpop.f32.mrf.mxu1 }
 0x3ae   :  { %v15143_v43 = vadd.f32 %v15142_v38, %v15141_v62  ;;  %v15080_v49 = vpop.f32.mrf.mxu0  ;;  %3740 = vmatmul.mubr.bf16.gmra.mxu0 %v18624_v54  ;;  %v18642_v54 = vld [vmem:[#allocation2 + $0x840] ss:$16 sps:$4 sm:$0xff]  }
 0x3af   :  { %v15144_v30 = vpop.f32.mrf.mxu1  ;;  %3837 = vmatmul.mubr.bf16.gmra.mxu1 %v18627_v16  ;;  %4070 = vmatprep.mubr.bf16.mxu0 %v18632_v41  ;;  %v18645_v16 = vld [vmem:[#allocation2 + $0x848] ss:$16 sps:$4 sm:$0xff]   ;;  %v18650_v41 = vld [vmem:[#allocation2 + $0x864] ss:$16 sps:$4 sm:$0xff]  }
 0x3b0   :  { %v15081_v53 = vpop.f32.mrf.mxu0  ;;  %v2673_v0 = vadd.f32 %v15143_v43, %v15079_v45  ;;  %4167 = vmatprep.mubr.bf16.mxu1 %v18635_v40  ;;  %v18653_v40 = vld [vmem:[#allocation2 + $0x86c] ss:$16 sps:$4 sm:$0xff]  }
 0x3b1   :  { %v15082_v55 = vadd.f32 %v15081_v53, %v15080_v49  ;;  %v15145_v8 = vpop.f32.mrf.mxu1 }
 0x3b2   :  { %v15146_v42 = vadd.f32 %v15145_v8, %v15144_v30  ;;  %v15083_v10 = vpop.f32.mrf.mxu0  ;;  %v17414_v2 = vpack.i.bf16 %v2673_v0, %v2670_v47 }
 0x3b3   :  { %v15147_v26 = vpop.f32.mrf.mxu1 }
 0x3b4   :  { %v21051_v52 = vadd.f32 %v15146_v42, %v15082_v55  ;;  %17415 = vrot.lane.b32.xlu0 %v17414_v2, %s20034_s15  ;;  %v15084_v57 = vpop.f32.mrf.mxu0 }
 0x3b5   :  { %v15085_v25 = vadd.f32 %v15084_v57, %v15083_v10  ;;  %v15148_v61 = vpop.f32.mrf.mxu1  ;;  %v18648_v10 = vld [vmem:[#allocation2 + $0x860] ss:$16 sps:$4 sm:$0xff]  }
 0x3b6   :  { %v15149_v28 = vadd.f32 %v15148_v61, %v15147_v26  ;;  %v15166_v58 = vpop.f32.mrf.mxu0  ;;  %4071 = vmatmul.mubr.bf16.vlgmr.msra.gmra.mxu0 %v18630_v18  ;;  %v18651_v18 = vld [vmem:[#allocation2 + $0x868] ss:$16 sps:$4 sm:$0xff]   ;;  %v18656_v26 = vld [vmem:[#allocation2 + $0x884] ss:$16 sps:$4 sm:$0xff]  }
 0x3b7   :  { %v15230_v24 = vpop.f32.mrf.mxu1  ;;  %4168 = vmatmul.mubr.bf16.vlgmr.msra.gmra.mxu1 %v18633_v29  ;;  %4078 = vmatprep.mubr.bf16.mxu0 %v18638_v7 }
 0x3b8   :  { %v15167_v15 = vpop.f32.mrf.mxu0  ;;  %4175 = vmatprep.mubr.bf16.mxu1 %v18641_v14  ;;  %v21054_v60 = vadd.f32 %v15149_v28, %v15085_v25  ;;  %v18659_v14 = vld [vmem:[#allocation2 + $0x88c] ss:$16 sps:$4 sm:$0xff]  }
 0x3b9   :  { %v15231_v39 = vpop.f32.mrf.mxu1  ;;  %v15168_v46 = vadd.f32 %v15167_v15, %v15166_v58 }
 0x3ba   :  { %v15169_v13 = vpop.f32.mrf.mxu0  ;;  %v17489_v5 = vpack.i.bf16 %v21054_v60, %v21051_v52  ;;  %v15232_v3 = vadd.f32 %v15231_v39, %v15230_v24 }
 0x3bb   :  { %v15233_v33 = vpop.f32.mrf.mxu1 }
 0x3bc   :  { %v15170_v22 = vpop.f32.mrf.mxu0  ;;  %v3009_v11 = vadd.f32 %v15232_v3, %v15168_v46  ;;  %v18657_v3 = vld [vmem:[#allocation2 + $0x888] ss:$16 sps:$4 sm:$0xff]  }
 0x3bd   :  { %v15171_v12 = vadd.f32 %v15170_v22, %v15169_v13  ;;  %v15234_v17 = vpop.f32.mrf.mxu1  ;;  %v18662_v22 = vld [vmem:[#allocation2 + $0x8a4] ss:$16 sps:$4 sm:$0xff]  }
 0x3be   :  { %v15235_v48 = vadd.f32 %v15234_v17, %v15233_v33  ;;  %v15172_v1 = vpop.f32.mrf.mxu0  ;;  %4079 = vmatmul.mubr.bf16.gmra.mxu0 %v18636_v63 }
 0x3bf   :  { %v15236_v20 = vpop.f32.mrf.mxu1  ;;  %4176 = vmatmul.mubr.bf16.gmra.mxu1 %v18639_v31  ;;  %4086 = vmatprep.mubr.bf16.mxu0 %v18644_v34  ;;  %v18654_v34 = vld [vmem:[#allocation2 + $0x880] ss:$16 sps:$4 sm:$0xff]  }
 0x3c0   :  { %v3012_v50 = vadd.f32 %v15235_v48, %v15171_v12  ;;  %v15173_v4 = vpop.f32.mrf.mxu0  ;;  %4183 = vmatprep.mubr.bf16.mxu1 %v18647_v59  ;;  %v18665_v48 = vld [vmem:[#allocation2 + $0x8ac] ss:$16 sps:$4 sm:$0xff]  }
 0x3c1   :  { %v15237_v21 = vpop.f32.mrf.mxu1  ;;  %v15174_v51 = vadd.f32 %v15173_v4, %v15172_v1 }
 0x3c2   :  { %v15175_v9 = vpop.f32.mrf.mxu0  ;;  %v17419_v23 = vpack.i.bf16 %v3012_v50, %v3009_v11  ;;  %v15238_v35 = vadd.f32 %v15237_v21, %v15236_v20 }
 0x3c3   :  { %v15239_v62 = vpop.f32.mrf.mxu1 }
 0x3c4   :  { %17420 = vrot.lane.b32.xlu0 %v17419_v23, %s20054_s22  ;;  %v15176_v6 = vpop.f32.mrf.mxu0  ;;  %v3017_v47 = vadd.f32 %v15238_v35, %v15174_v51  ;;  %v18663_v35 = vld [vmem:[#allocation2 + $0x8a8] ss:$16 sps:$4 sm:$0xff]  }
 0x3c5   :  { %v15177_v45 = vadd.f32 %v15176_v6, %v15175_v9  ;;  %v15240_v38 = vpop.f32.mrf.mxu1  ;;  %v18668_v6 = vld [vmem:[#allocation2 + $0x8c4] ss:$16 sps:$4 sm:$0xff]  }
 0x3c6   :  { %v15241_v43 = vadd.f32 %v15240_v38, %v15239_v62  ;;  %v15178_v49 = vpop.f32.mrf.mxu0  ;;  %4087 = vmatmul.mubr.bf16.gmra.mxu0 %v18642_v54 }
 0x3c7   :  { %v15242_v30 = vpop.f32.mrf.mxu1  ;;  %4184 = vmatmul.mubr.bf16.gmra.mxu1 %v18645_v16  ;;  %4094 = vmatprep.mubr.bf16.mxu0 %v18650_v41  ;;  %v18660_v41 = vld [vmem:[#allocation2 + $0x8a0] ss:$16 sps:$4 sm:$0xff]  }
 0x3c8   :  { %v3020_v53 = vadd.f32 %v15241_v43, %v15177_v45  ;;  %v15179_v0 = vpop.f32.mrf.mxu0  ;;  %4191 = vmatprep.mubr.bf16.mxu1 %v18653_v40  ;;  %v18671_v43 = vld [vmem:[#allocation2 + $0x8cc] ss:$16 sps:$4 sm:$0xff]  }
 0x3c9   :  { %v15243_v55 = vpop.f32.mrf.mxu1  ;;  %v15180_v29 = vadd.f32 %v15179_v0, %v15178_v49 }
 0x3ca   :  { %v15181_v8 = vpop.f32.mrf.mxu0  ;;  %v17424_v42 = vpack.i.bf16 %v3020_v53, %v3017_v47  ;;  %v15244_v7 = vadd.f32 %v15243_v55, %v15242_v30 }
 0x3cb   :  { %v15245_v2 = vpop.f32.mrf.mxu1 }
 0x3cc   :  { %17425 = vrot.lane.b32.xlu1 %v17424_v42, %s20054_s22  ;;  %v15182_v57 = vpop.f32.mrf.mxu0  ;;  %v3025_v15 = vadd.f32 %v15244_v7, %v15180_v29  ;;  %v18669_v7 = vld [vmem:[#allocation2 + $0x8c8] ss:$16 sps:$4 sm:$0xff]  }
 0x3cd   :  { %v15183_v25 = vadd.f32 %v15182_v57, %v15181_v8  ;;  %v15246_v61 = vpop.f32.mrf.mxu1  ;;  %v18674_v57 = vld [vmem:[#allocation2 + $0x8e4] ss:$16 sps:$4 sm:$0xff]  }
 0x3ce   :  { %v15247_v28 = vadd.f32 %v15246_v61, %v15245_v2  ;;  %v15184_v58 = vpop.f32.mrf.mxu0  ;;  %4095 = vmatmul.mubr.bf16.gmra.mxu0 %v18648_v10 }
 0x3cf   :  { %v15248_v24 = vpop.f32.mrf.mxu1  ;;  %4192 = vmatmul.mubr.bf16.gmra.mxu1 %v18651_v18  ;;  %4102 = vmatprep.mubr.bf16.mxu0 %v18656_v26  ;;  %v18666_v26 = vld [vmem:[#allocation2 + $0x8c0] ss:$16 sps:$4 sm:$0xff]  }
 0x3d0   :  { %v3028_v39 = vadd.f32 %v15247_v28, %v15183_v25  ;;  %v15185_v13 = vpop.f32.mrf.mxu0  ;;  %4199 = vmatprep.mubr.bf16.mxu1 %v18659_v14  ;;  %v18677_v28 = vld [vmem:[#allocation2 + $0x8ec] ss:$16 sps:$4 sm:$0xff]  }
 0x3d1   :  { %v15249_v63 = vpop.f32.mrf.mxu1  ;;  %v15186_v59 = vadd.f32 %v15185_v13, %v15184_v58 }
 0x3d2   :  { %v15187_v33 = vpop.f32.mrf.mxu0  ;;  %v17429_v31 = vpack.i.bf16 %v3028_v39, %v3025_v15  ;;  %v15250_v12 = vadd.f32 %v15249_v63, %v15248_v24 }
 0x3d3   :  { %v15251_v46 = vpop.f32.mrf.mxu1 }
 0x3d4   :  { %17430 = vrot.lane.b32.xlu0 %v17429_v31, %s20054_s22  ;;  %v15188_v17 = vpop.f32.mrf.mxu0  ;;  %v3033_v21 = vadd.f32 %v15250_v12, %v15186_v59  ;;  %v18672_v12 = vld [vmem:[#allocation2 + $0x8e0] ss:$16 sps:$4 sm:$0xff]  }
 0x3d5   :  { %v15189_v1 = vadd.f32 %v15188_v17, %v15187_v33  ;;  %v15252_v20 = vpop.f32.mrf.mxu1 }
 0x3d6   :  { %v15253_v11 = vadd.f32 %v15252_v20, %v15251_v46  ;;  %v15190_v50 = vpop.f32.mrf.mxu0  ;;  %4103 = vmatmul.mubr.bf16.gmra.mxu0 %v18654_v34 }
 0x3d7   :  { %v15254_v4 = vpop.f32.mrf.mxu1  ;;  %4200 = vmatmul.mubr.bf16.gmra.mxu1 %v18657_v3  ;;  %4110 = vmatprep.mubr.bf16.mxu0 %v18662_v22 }
 0x3d8   :  { %v3036_v9 = vadd.f32 %v15253_v11, %v15189_v1  ;;  %v15191_v23 = vpop.f32.mrf.mxu0  ;;  %4207 = vmatprep.mubr.bf16.mxu1 %v18665_v48  ;;  %v18675_v48 = vld [vmem:[#allocation2 + $0x8e8] ss:$16 sps:$4 sm:$0xff]  }
 0x3d9   :  { %v15255_v54 = vpop.f32.mrf.mxu1  ;;  %v15192_v40 = vadd.f32 %v15191_v23, %v15190_v50 }
 0x3da   :  { %v15193_v62 = vpop.f32.mrf.mxu0  ;;  %v17434_v16 = vpack.i.bf16 %v3036_v9, %v3033_v21  ;;  %v15256_v45 = vadd.f32 %v15255_v54, %v15254_v4 }
 0x3db   :  { %v15257_v51 = vpop.f32.mrf.mxu1 }
 0x3dc   :  { %17435 = vrot.lane.b32.xlu1 %v17434_v16, %s20054_s22  ;;  %v15194_v38 = vpop.f32.mrf.mxu0  ;;  %v3041_v55 = vadd.f32 %v15256_v45, %v15192_v40 }
 0x3dd   :  { %v15195_v49 = vadd.f32 %v15194_v38, %v15193_v62  ;;  %v15258_v30 = vpop.f32.mrf.mxu1 }
 0x3de   :  { %v15259_v47 = vadd.f32 %v15258_v30, %v15257_v51  ;;  %v15196_v53 = vpop.f32.mrf.mxu0  ;;  %4111 = vmatmul.mubr.bf16.gmra.mxu0 %v18660_v41 }
 0x3df   :  { %v15260_v0 = vpop.f32.mrf.mxu1  ;;  %4208 = vmatmul.mubr.bf16.gmra.mxu1 %v18663_v35  ;;  %4118 = vmatprep.mubr.bf16.mxu0 %v18668_v6 }
 0x3e0   :  { %v3044_v8 = vadd.f32 %v15259_v47, %v15195_v49  ;;  %v15197_v42 = vpop.f32.mrf.mxu0  ;;  %4215 = vmatprep.mubr.bf16.mxu1 %v18671_v43 }
 0x3e1   :  { %v15261_v10 = vpop.f32.mrf.mxu1  ;;  %v15198_v14 = vadd.f32 %v15197_v42, %v15196_v53 }
 0x3e2   :  { %v15199_v2 = vpop.f32.mrf.mxu0  ;;  %v17439_v18 = vpack.i.bf16 %v3044_v8, %v3041_v55  ;;  %v15262_v25 = vadd.f32 %v15261_v10, %v15260_v0 }
 0x3e3   :  { %v15263_v29 = vpop.f32.mrf.mxu1 }
 0x3e4   :  { %17440 = vrot.lane.b32.xlu0 %v17439_v18, %s20054_s22  ;;  %v15200_v61 = vpop.f32.mrf.mxu0  ;;  %v3049_v63 = vadd.f32 %v15262_v25, %v15198_v14 }
 0x3e5   :  { %v15201_v58 = vadd.f32 %v15200_v61, %v15199_v2  ;;  %v15264_v24 = vpop.f32.mrf.mxu1 }
 0x3e6   :  { %v15265_v15 = vadd.f32 %v15264_v24, %v15263_v29  ;;  %v15202_v39 = vpop.f32.mrf.mxu0  ;;  %4119 = vmatmul.mubr.bf16.gmra.mxu0 %v18666_v26 }
 0x3e7   :  { %v15266_v13 = vpop.f32.mrf.mxu1  ;;  %4216 = vmatmul.mubr.bf16.gmra.mxu1 %v18669_v7  ;;  %4126 = vmatprep.mubr.bf16.mxu0 %v18674_v57 }
 0x3e8   :  { %v3052_v33 = vadd.f32 %v15265_v15, %v15201_v58  ;;  %v15203_v31 = vpop.f32.mrf.mxu0  ;;  %4223 = vmatprep.mubr.bf16.mxu1 %v18677_v28 }
 0x3e9   :  { %v15204_v34 = vadd.f32 %v15203_v31, %v15202_v39  ;;  %v15267_v46 = vpop.f32.mrf.mxu1 }
 0x3ea   :  { %v15268_v3 = vadd.f32 %v15267_v46, %v15266_v13  ;;  %v15205_v22 = vpop.f32.mrf.mxu0  ;;  %v17444_v59 = vpack.i.bf16 %v3052_v33, %v3049_v63 }
 0x3eb   :  { %v15269_v17 = vpop.f32.mrf.mxu1 }
 0x3ec   :  { %v21063_v1 = vadd.f32 %v15268_v3, %v15204_v34  ;;  %17445 = vrot.lane.b32.xlu1 %v17444_v59, %s20054_s22  ;;  %v15206_v20 = vpop.f32.mrf.mxu0 }
 0x3ed   :  { %v15207_v11 = vadd.f32 %v15206_v20, %v15205_v22  ;;  %v15270_v50 = vpop.f32.mrf.mxu1 }
 0x3ee   :  { %v15271_v4 = vadd.f32 %v15270_v50, %v15269_v17  ;;  %v15208_v21 = vpop.f32.mrf.mxu0  ;;  %4127 = vmatmul.mubr.bf16.gmra.mxu0 %v18672_v12 }
 0x3ef   :  { %v15272_v9 = vpop.f32.mrf.mxu1  ;;  %4224 = vmatmul.mubr.bf16.gmra.mxu1 %v18675_v48 }
 0x3f0   :  { %v21066_v23 = vadd.f32 %v15271_v4, %v15207_v11  ;;  %v15209_v54 = vpop.f32.mrf.mxu0 }
 0x3f1   :  { %v15210_v62 = vadd.f32 %v15209_v54, %v15208_v21  ;;  %v15273_v16 = vpop.f32.mrf.mxu1 }
 0x3f2   :  { %v15274_v41 = vadd.f32 %v15273_v16, %v15272_v9  ;;  %v15211_v51 = vpop.f32.mrf.mxu0  ;;  %v17494_v35 = vpack.i.bf16 %v21066_v23, %v21063_v1 }
 0x3f3   :  { %v15275_v6 = vpop.f32.mrf.mxu1 }
 0x3f4   :  { %v21070_v40 = vadd.f32 %v15274_v41, %v15210_v62  ;;  %v15212_v45 = vpop.f32.mrf.mxu0 }
 0x3f5   :  { %v15213_v38 = vadd.f32 %v15212_v45, %v15211_v51  ;;  %v15276_v43 = vpop.f32.mrf.mxu1 }
 0x3f6   :  { %v15277_v49 = vadd.f32 %v15276_v43, %v15275_v6  ;;  %v15294_v30 = vpop.f32.mrf.mxu0 }
 0x3f7   :  { %v15358_v47 = vpop.f32.mrf.mxu1 }
 0x3f8   :  { %v21072_v53 = vadd.f32 %v15277_v49, %v15213_v38  ;;  %v15295_v0 = vpop.f32.mrf.mxu0 }
 0x3f9   :  { %v15359_v55 = vpop.f32.mrf.mxu1  ;;  %v15296_v2 = vadd.f32 %v15295_v0, %v15294_v30 }
 0x3fa   :  { %v15297_v8 = vpop.f32.mrf.mxu0  ;;  %v17509_v42 = vpack.i.bf16 %v21072_v53, %v21070_v40  ;;  %v15360_v18 = vadd.f32 %v15359_v55, %v15358_v47 }
 0x3fb   :  { %v15361_v10 = vpop.f32.mrf.mxu1 }
 0x3fc   :  { %v15298_v26 = vpop.f32.mrf.mxu0  ;;  %v3396_v61 = vadd.f32 %v15360_v18, %v15296_v2 }
 0x3fd   :  { %v15299_v29 = vadd.f32 %v15298_v26, %v15297_v8  ;;  %v15362_v7 = vpop.f32.mrf.mxu1 }
 0x3fe   :  { %v15363_v57 = vadd.f32 %v15362_v7, %v15361_v10  ;;  %v15300_v14 = vpop.f32.mrf.mxu0 }
 0x3ff   :  { %v15364_v25 = vpop.f32.mrf.mxu1 }
 0x400   :  { %v3399_v28 = vadd.f32 %v15363_v57, %v15299_v29  ;;  %v15301_v58 = vpop.f32.mrf.mxu0 }
 0x401   :  { %v15365_v24 = vpop.f32.mrf.mxu1  ;;  %v15302_v63 = vadd.f32 %v15301_v58, %v15300_v14 }
 0x402   :  { %v15303_v15 = vpop.f32.mrf.mxu0  ;;  %v17449_v39 = vpack.i.bf16 %v3399_v28, %v3396_v61  ;;  %v15366_v33 = vadd.f32 %v15365_v24, %v15364_v25 }
 0x403   :  { %v15367_v13 = vpop.f32.mrf.mxu1 }
 0x404   :  { %17450 = vrot.lane.b32.xlu0 %v17449_v39, %s20055_s18  ;;  %v15304_v31 = vpop.f32.mrf.mxu0  ;;  %v3404_v12 = vadd.f32 %v15366_v33, %v15302_v63 }
 0x405   :  { %v15305_v34 = vadd.f32 %v15304_v31, %v15303_v15  ;;  %v15368_v46 = vpop.f32.mrf.mxu1 }
 0x406   :  { %v15369_v3 = vadd.f32 %v15368_v46, %v15367_v13  ;;  %v15306_v22 = vpop.f32.mrf.mxu0 }
 0x407   :  { %v15370_v59 = vpop.f32.mrf.mxu1 }
 0x408   :  { %v3407_v17 = vadd.f32 %v15369_v3, %v15305_v34  ;;  %v15307_v48 = vpop.f32.mrf.mxu0 }
 0x409   :  { %v15371_v20 = vpop.f32.mrf.mxu1  ;;  %v15308_v21 = vadd.f32 %v15307_v48, %v15306_v22 }
 0x40a   :  { %v15309_v11 = vpop.f32.mrf.mxu0  ;;  %v17454_v50 = vpack.i.bf16 %v3407_v17, %v3404_v12  ;;  %v15372_v9 = vadd.f32 %v15371_v20, %v15370_v59 }
 0x40b   :  { %v15373_v4 = vpop.f32.mrf.mxu1 }
 0x40c   :  { %17455 = vrot.lane.b32.xlu1 %v17454_v50, %s20055_s18  ;;  %v15310_v54 = vpop.f32.mrf.mxu0  ;;  %v3412_v45 = vadd.f32 %v15372_v9, %v15308_v21 }
 0x40d   :  { %v15311_v62 = vadd.f32 %v15310_v54, %v15309_v11  ;;  %v15374_v16 = vpop.f32.mrf.mxu1 }
 0x40e   :  { %v15375_v41 = vadd.f32 %v15374_v16, %v15373_v4  ;;  %v15312_v51 = vpop.f32.mrf.mxu0 }
 0x40f   :  { %v15376_v6 = vpop.f32.mrf.mxu1 }
 0x410   :  { %v3415_v38 = vadd.f32 %v15375_v41, %v15311_v62  ;;  %v15313_v43 = vpop.f32.mrf.mxu0 }
 0x411   :  { %v15377_v49 = vpop.f32.mrf.mxu1  ;;  %v15314_v55 = vadd.f32 %v15313_v43, %v15312_v51 }
 0x412   :  { %v15315_v30 = vpop.f32.mrf.mxu0  ;;  %v17459_v47 = vpack.i.bf16 %v3415_v38, %v3412_v45  ;;  %v15378_v8 = vadd.f32 %v15377_v49, %v15376_v6 }
 0x413   :  { %v15379_v0 = vpop.f32.mrf.mxu1 }
 0x414   :  { %17460 = vrot.lane.b32.xlu0 %v17459_v47, %s20055_s18  ;;  %v15316_v10 = vpop.f32.mrf.mxu0  ;;  %v3420_v57 = vadd.f32 %v15378_v8, %v15314_v55 }
 0x415   :  { %v15317_v2 = vadd.f32 %v15316_v10, %v15315_v30  ;;  %v15380_v18 = vpop.f32.mrf.mxu1 }
 0x416   :  { %v15381_v26 = vadd.f32 %v15380_v18, %v15379_v0  ;;  %v15318_v29 = vpop.f32.mrf.mxu0 }
 0x417   :  { %v15382_v7 = vpop.f32.mrf.mxu1 }
 0x418   :  { %v3423_v14 = vadd.f32 %v15381_v26, %v15317_v2  ;;  %v15319_v25 = vpop.f32.mrf.mxu0 }
 0x419   :  { %v15383_v61 = vpop.f32.mrf.mxu1  ;;  %v15320_v15 = vadd.f32 %v15319_v25, %v15318_v29 }
 0x41a   :  { %v15321_v28 = vpop.f32.mrf.mxu0  ;;  %v17464_v58 = vpack.i.bf16 %v3423_v14, %v3420_v57  ;;  %v15384_v39 = vadd.f32 %v15383_v61, %v15382_v7 }
 0x41b   :  { %v15385_v24 = vpop.f32.mrf.mxu1 }
 0x41c   :  { %17465 = vrot.lane.b32.xlu1 %v17464_v58, %s20055_s18  ;;  %v15322_v13 = vpop.f32.mrf.mxu0  ;;  %v3428_v3 = vadd.f32 %v15384_v39, %v15320_v15 }
 0x41d   :  { %v15323_v63 = vadd.f32 %v15322_v13, %v15321_v28  ;;  %v15386_v33 = vpop.f32.mrf.mxu1 }
 0x41e   :  { %v15387_v31 = vadd.f32 %v15386_v33, %v15385_v24  ;;  %v15324_v34 = vpop.f32.mrf.mxu0 }
 0x41f   :  { %v15388_v46 = vpop.f32.mrf.mxu1 }
 0x420   :  { %v3431_v22 = vadd.f32 %v15387_v31, %v15323_v63  ;;  %v15325_v59 = vpop.f32.mrf.mxu0 }
 0x421   :  { %v15389_v12 = vpop.f32.mrf.mxu1  ;;  %v15326_v11 = vadd.f32 %v15325_v59, %v15324_v34 }
 0x422   :  { %v15327_v17 = vpop.f32.mrf.mxu0  ;;  %v17469_v48 = vpack.i.bf16 %v3431_v22, %v3428_v3  ;;  %v15390_v50 = vadd.f32 %v15389_v12, %v15388_v46 }
 0x423   :  { %v15391_v20 = vpop.f32.mrf.mxu1 }
 0x424   :  { %17470 = vrot.lane.b32.xlu0 %v17469_v48, %s20055_s18  ;;  %v15328_v4 = vpop.f32.mrf.mxu0  ;;  %v3436_v41 = vadd.f32 %v15390_v50, %v15326_v11 }
 0x425   :  { %v15329_v21 = vadd.f32 %v15328_v4, %v15327_v17  ;;  %v15392_v9 = vpop.f32.mrf.mxu1 }
 0x426   :  { %v15393_v54 = vadd.f32 %v15392_v9, %v15391_v20  ;;  %v21081_v62 = vpop.f32.mrf.mxu0 }
 0x427   :  { %v21083_v16 = vpop.f32.mrf.mxu1 }
 0x428   :  { %v3439_v51 = vadd.f32 %v15393_v54, %v15329_v21  ;;  %v21085_v6 = vpop.f32.mrf.mxu0 }
 0x429   :  { %v21087_v45 = vpop.f32.mrf.mxu1  ;;  %v15332_v1 = vadd.f32 %v21085_v6, %v21081_v62 }
 0x42a   :  { %v15333_v38 = vpop.f32.mrf.mxu0  ;;  %v17474_v43 = vpack.i.bf16 %v3439_v51, %v3436_v41  ;;  %v15396_v23 = vadd.f32 %v21087_v45, %v21083_v16 }
 0x42b   :  { %v15397_v49 = vpop.f32.mrf.mxu1 }
 0x42c   :  { %17475 = vrot.lane.b32.xlu1 %v17474_v43, %s20055_s18  ;;  %v15334_v30 = vpop.f32.mrf.mxu0 }
 0x42d   :  { %v15398_v47 = vpop.f32.mrf.mxu1 }
 0x42e   :  { %v21090_v0 = vpop.f32.mrf.mxu0 }
 0x42f   :  { %v21092_v55 = vpop.f32.mrf.mxu1 }
 0x430   :  { %v21094_v8 = vpop.f32.mrf.mxu0 }
 0x431   :  { %v21096_v10 = vpop.f32.mrf.mxu1 }
 0x432   :  { %v21098_v2 = vpop.f32.mrf.mxu0 }
 0x433   :  { %v21100_v18 = vpop.f32.mrf.mxu1 }
 0x434   :  { %v21102_v26 = vpop.f32.mrf.mxu0 }
 0x435   :  { %v21104_v29 = vpop.f32.mrf.mxu1 }
 0x436   :  { %v15422_v7 = vpop.f32.mrf.mxu0 }
 0x437   :  { %v15486_v57 = vpop.f32.mrf.mxu1 }
 0x438   :  { %v15423_v14 = vpop.f32.mrf.mxu0 }
 0x439   :  { %v15487_v25 = vpop.f32.mrf.mxu1  ;;  %v15424_v58 = vadd.f32 %v15423_v14, %v15422_v7 }
 0x43a   :  { %v15425_v61 = vpop.f32.mrf.mxu0  ;;  %v15488_v24 = vadd.f32 %v15487_v25, %v15486_v57 }
 0x43b   :  { %v15489_v28 = vpop.f32.mrf.mxu1 }
 0x43c   :  { %v15426_v15 = vpop.f32.mrf.mxu0  ;;  %v3783_v34 = vadd.f32 %v15488_v24, %v15424_v58 }
 0x43d   :  { %v15427_v39 = vadd.f32 %v15426_v15, %v15425_v61  ;;  %v15490_v13 = vpop.f32.mrf.mxu1 }
 0x43e   :  { %v15491_v63 = vadd.f32 %v15490_v13, %v15489_v28  ;;  %v15428_v33 = vpop.f32.mrf.mxu0  ;;  %v15399_v13 = vadd.f32 %v15398_v47, %v15397_v49 }
 0x43f   :  { %v15492_v31 = vpop.f32.mrf.mxu1 }
 0x440   :  { %v3786_v46 = vadd.f32 %v15491_v63, %v15427_v39  ;;  %v15429_v3 = vpop.f32.mrf.mxu0  ;;  %v15335_v39 = vadd.f32 %v15334_v30, %v15333_v38 }
 0x441   :  { %v15493_v22 = vpop.f32.mrf.mxu1  ;;  %v15430_v48 = vadd.f32 %v15429_v3, %v15428_v33 }
 0x442   :  { %v15431_v59 = vpop.f32.mrf.mxu0  ;;  %v17479_v12 = vpack.i.bf16 %v3786_v46, %v3783_v34  ;;  %v15494_v20 = vadd.f32 %v15493_v22, %v15492_v31  ;;  %v3447_v38 = vadd.f32 %v15399_v13, %v15335_v39  ;;  %v3444_v22 = vadd.f32 %v15396_v23, %v15332_v1 }
 0x443   :  { %v15495_v17 = vpop.f32.mrf.mxu1  ;;  %v15341_v23 = vadd.f32 %v21102_v26, %v21098_v2 }
 0x444   :  { %17480 = vrot.lane.b32.xlu0 %v17479_v12, %s20056_s20  ;;  %v15432_v11 = vpop.f32.mrf.mxu0  ;;  %v3791_v41 = vadd.f32 %v15494_v20, %v15430_v48  ;;  %v17514_v48 = vpack.i.bf16 %v3447_v38, %v3444_v22 }
 0x445   :  { %v15433_v50 = vadd.f32 %v15432_v11, %v15431_v59  ;;  %v15496_v4 = vpop.f32.mrf.mxu1 }
 0x446   :  { %v15497_v21 = vadd.f32 %v15496_v4, %v15495_v17  ;;  %v15434_v9 = vpop.f32.mrf.mxu0 }
 0x447   :  { %v15498_v54 = vpop.f32.mrf.mxu1 }
 0x448   :  { %v3794_v51 = vadd.f32 %v15497_v21, %v15433_v50  ;;  %17495 = vrot.lane.b32.xlu0 %v17494_v35, %s20054_s22  ;;  %v15435_v43 = vpop.f32.mrf.mxu0 }
 0x449   :  { %v15499_v7 = vpop.f32.mrf.mxu1  ;;  %v15436_v61 = vadd.f32 %v15435_v43, %v15434_v9 }
 0x44a   :  { %v15437_v57 = vpop.f32.mrf.mxu0  ;;  %v17484_v14 = vpack.i.bf16 %v3794_v51, %v3791_v41  ;;  %v15500_v28 = vadd.f32 %v15499_v7, %v15498_v54 }
 0x44b   :  { %v15501_v25 = vpop.f32.mrf.mxu1 }
 0x44c   :  { %17485 = vrot.lane.b32.xlu1 %v17484_v14, %s20056_s20  ;;  %v15438_v58 = vpop.f32.mrf.mxu0  ;;  %v3799_v35 = vadd.f32 %v15500_v28, %v15436_v61 }
 0x44d   :  { %v15439_v24 = vadd.f32 %v15438_v58, %v15437_v57  ;;  %v15502_v15 = vpop.f32.mrf.mxu1 }
 0x44e   :  { %v15503_v63 = vadd.f32 %v15502_v15, %v15501_v25  ;;  %v15440_v33 = vpop.f32.mrf.mxu0 }
 0x44f   :  { %v15504_v31 = vpop.f32.mrf.mxu1 }
 0x450   :  { %v3802_v34 = vadd.f32 %v15503_v63, %v15439_v24  ;;  %17490 = vrot.lane.b32.xlu1 %v17489_v5, %s20034_s15  ;;  %v15441_v46 = vpop.f32.mrf.mxu0 }
 0x451   :  { %v15505_v3 = vpop.f32.mrf.mxu1  ;;  %v15442_v59 = vadd.f32 %v15441_v46, %v15440_v33  ;;  %v15402_v46 = vadd.f32 %v21096_v10, %v21092_v55 }
 0x452   :  { %v15443_v49 = vpop.f32.mrf.mxu0  ;;  %v17499_v30 = vpack.i.bf16 %v3802_v34, %v3799_v35  ;;  %v15506_v12 = vadd.f32 %v15505_v3, %v15504_v31  ;;  %v15405_v35 = vadd.f32 %v21104_v29, %v21100_v18  ;;  %v15338_v34 = vadd.f32 %v21094_v8, %v21090_v0 }
 0x453   :  { %v15507_v47 = vpop.f32.mrf.mxu1 }
 0x454   :  { %17500 = vrot.lane.b32.xlu0 %v17499_v30, %s20056_s20  ;;  %v15444_v62 = vpop.f32.mrf.mxu0  ;;  %v3807_v52 = vadd.f32 %v15506_v12, %v15442_v59  ;;  %v3455_v22 = vadd.f32 %v15405_v35, %v15341_v23  ;;  %v3452_v29 = vadd.f32 %v15402_v46, %v15338_v34 }
 0x455   :  { %v15445_v16 = vadd.f32 %v15444_v62, %v15443_v49  ;;  %v15508_v6 = vpop.f32.mrf.mxu1 }
 0x456   :  { %v15509_v45 = vadd.f32 %v15508_v6, %v15507_v47  ;;  %v15446_v17 = vpop.f32.mrf.mxu0  ;;  %v17529_v10 = vpack.i.bf16 %v3455_v22, %v3452_v29 }
 0x457   :  { %v15510_v20 = vpop.f32.mrf.mxu1 }
 0x458   :  { %v3810_v60 = vadd.f32 %v15509_v45, %v15445_v16  ;;  %17515 = vrot.lane.b32.xlu0 %v17514_v48, %s20055_s18  ;;  %v15447_v5 = vpop.f32.mrf.mxu0 }
 0x459   :  { %v15511_v11 = vpop.f32.mrf.mxu1  ;;  %v15448_v9 = vadd.f32 %v15447_v5, %v15446_v17 }
 0x45a   :  { %v15449_v50 = vpop.f32.mrf.mxu0  ;;  %v17504_v4 = vpack.i.bf16 %v3810_v60, %v3807_v52  ;;  %v15512_v54 = vadd.f32 %v15511_v11, %v15510_v20 }
 0x45b   :  { %v15513_v21 = vpop.f32.mrf.mxu1 }
 0x45c   :  { %17505 = vrot.lane.b32.xlu1 %v17504_v4, %s20056_s20  ;;  %v15450_v41 = vpop.f32.mrf.mxu0  ;;  %v3815_v25 = vadd.f32 %v15512_v54, %v15448_v9  ;;  %v18678_v4 = vld [vmem:[%s23587_s1 + $0x10] ss:$0 sps:$4 sm:$0x33]  }
 0x45d   :  { %v15451_v51 = vadd.f32 %v15450_v41, %v15449_v50  ;;  %v15514_v43 = vpop.f32.mrf.mxu1  ;;  %17175 = vmatprep.subr.msk.bf16.mxu0 %vm4940_vm0, %v18678_v4 }
 0x45e   :  { %v15515_v7 = vadd.f32 %v15514_v43, %v15513_v21  ;;  %v15452_v57 = vpop.f32.mrf.mxu0 }
 0x45f   :  { %v15516_v14 = vpop.f32.mrf.mxu1 }
 0x460   :  { %v3818_v61 = vadd.f32 %v15515_v7, %v15451_v51  ;;  %17510 = vrot.lane.b32.xlu1 %v17509_v42, %s20054_s22  ;;  %v15453_v28 = vpop.f32.mrf.mxu0  ;;  %v4942_v51 = vsel %vm4940_vm0, %v18678_v4, 0  ;;  %v18679_v7 = vld [vmem:[%s23587_s1 + $0x8] sm:$0xff]  }
 0x461   :  { %v15517_v58 = vpop.f32.mrf.mxu1  ;;  %v15454_v13 = vadd.f32 %v15453_v28, %v15452_v57  ;;  %16250 = vmatpush3.bf16.msra.mxu0 %v4942_v51 }
 0x462   :  { %v15455_v24 = vpop.f32.mrf.mxu0  ;;  %v17519_v15 = vpack.i.bf16 %v3818_v61, %v3815_v25  ;;  %v15518_v63 = vadd.f32 %v15517_v58, %v15516_v14  ;;  %16251 = vmatprep.subr.bf16.mxu0 %v18679_v7 }
 0x463   :  { %v15519_v39 = vpop.f32.mrf.mxu1 }
 0x464   :  { %17520 = vrot.lane.b32.xlu0 %v17519_v15, %s20056_s20  ;;  %v15456_v33 = vpop.f32.mrf.mxu0  ;;  %v3823_v3 = vadd.f32 %v15518_v63, %v15454_v13  ;;  %v18680_v63 = vld [vmem:[%s23587_s1] sm:$0xff]  }
 0x465   :  { %v15457_v31 = vadd.f32 %v15456_v33, %v15455_v24  ;;  %v15520_v1 = vpop.f32.mrf.mxu1  ;;  %16252 = vmatpush3.bf16.msra.mxu0 %v18679_v7 }
 0x466   :  { %v15521_v40 = vadd.f32 %v15520_v1, %v15519_v39  ;;  %v15458_v53 = vpop.f32.mrf.mxu0  ;;  %16253 = vmatprep.subr.bf16.mxu0 %v18680_v63 }
 0x467   :  { %v15522_v42 = vpop.f32.mrf.mxu1 }
 0x468   :  { %v3826_v38 = vadd.f32 %v15521_v40, %v15457_v31  ;;  %v15459_v49 = vpop.f32.mrf.mxu0 }
 0x469   :  { %v15460_v30 = vadd.f32 %v15459_v49, %v15458_v53  ;;  %v15523_v47 = vpop.f32.mrf.mxu1  ;;  %16254 = vmatpush3.bf16.msra.mxu0 %v18680_v63  ;;  %v21159_v63 = vpop.permute.xlu1 %17275 }
 0x46a   :  { %v15524_v59 = vadd.f32 %v15523_v47, %v15522_v42  ;;  %v21136_v2 = vpop.f32.mrf.mxu0  ;;  %v17524_v26 = vpack.i.bf16 %v3826_v38, %v3823_v3 }
 0x46b   :  { %v21138_v18 = vpop.f32.mrf.mxu1 }
 0x46c   :  { %v21140_v12 = vadd.f32 %v15524_v59, %v15460_v30  ;;  %17525 = vrot.lane.b32.xlu1 %v17524_v26, %s20056_s20  ;;  %v21143_v0 = vpop.f32.mrf.mxu0 }
 0x46d   :  { %v21145_v55 = vpop.f32.mrf.mxu1 }
 0x46e   :  { %v15464_v8 = vpop.f32.mrf.mxu0 }
 0x46f   :  { %v15528_v62 = vpop.f32.mrf.mxu1 }
 0x470   :  { %17530 = vrot.lane.b32.xlu1 %v17529_v10, %s20055_s18  ;;  %v15465_v16 = vpop.f32.mrf.mxu0 }
 0x471   :  { %v15529_v6 = vpop.f32.mrf.mxu1  ;;  %v15466_v48 = vadd.f32 %v15465_v16, %v15464_v8 }
 0x472   :  { %v15467_v45 = vpop.f32.mrf.mxu0  ;;  %v15530_v20 = vadd.f32 %v15529_v6, %v15528_v62 }
 0x473   :  { %v15531_v17 = vpop.f32.mrf.mxu1 }
 0x474   :  { %v15468_v52 = vpop.f32.mrf.mxu0  ;;  %v3839_v9 = vadd.f32 %v15530_v20, %v15466_v48 }
 0x475   :  { %v15469_v60 = vadd.f32 %v15468_v52, %v15467_v45  ;;  %v15532_v5 = vpop.f32.mrf.mxu1 }
 0x476   :  { %v15533_v11 = vadd.f32 %v15532_v5, %v15531_v17  ;;  %v15550_v50 = vpop.f32.mrf.mxu0 }
 0x477   :  { %v15614_v21 = vpop.f32.mrf.mxu1 }
 0x478   :  { %v3842_v54 = vadd.f32 %v15533_v11, %v15469_v60  ;;  %v15551_v41 = vpop.f32.mrf.mxu0 }
 0x479   :  { %v15615_v43 = vpop.f32.mrf.mxu1  ;;  %v15552_v61 = vadd.f32 %v15551_v41, %v15550_v50 }
 0x47a   :  { %v15553_v57 = vpop.f32.mrf.mxu0  ;;  %v17569_v14 = vpack.i.bf16 %v3842_v54, %v3839_v9  ;;  %v15616_v28 = vadd.f32 %v15615_v43, %v15614_v21  ;;  %v21154_v9 = vpop.permute.xlu0 %17265 }
 0x47b   :  { %v15617_v25 = vpop.f32.mrf.mxu1 }
 0x47c   :  { %17570 = vrot.lane.b32.xlu1 %v17569_v14, %s20056_s20  ;;  %v15554_v58 = vpop.f32.mrf.mxu0  ;;  %v4170_v31 = vadd.f32 %v15616_v28, %v15552_v61 }
 0x47d   :  { %v15555_v24 = vadd.f32 %v15554_v58, %v15553_v57  ;;  %v15618_v15 = vpop.f32.mrf.mxu1 }
 0x47e   :  { %v15619_v39 = vadd.f32 %v15618_v15, %v15617_v25  ;;  %v15556_v13 = vpop.f32.mrf.mxu0  ;;  %v21157_v61 = vpop.permute.xlu0 %17270 }
 0x47f   :  { %v15620_v33 = vpop.f32.mrf.mxu1 }
 0x480   :  { %v4173_v1 = vadd.f32 %v15619_v39, %v15555_v24  ;;  %v15557_v23 = vpop.f32.mrf.mxu0 }
 0x481   :  { %v15621_v35 = vpop.f32.mrf.mxu1  ;;  %v15558_v34 = vadd.f32 %v15557_v23, %v15556_v13 }
 0x482   :  { %v15559_v40 = vpop.f32.mrf.mxu0  ;;  %v17534_v53 = vpack.i.bf16 %v4173_v1, %v4170_v31  ;;  %v15622_v46 = vadd.f32 %v15621_v35, %v15620_v33  ;;  %v21161_v31 = vpop.permute.xlu0 %17315 }
 0x483   :  { %v15623_v42 = vpop.f32.mrf.mxu1 }
 0x484   :  { %17535 = vrot.lane.b32.xlu0 %v17534_v53, %s20057_s5  ;;  %v15560_v3 = vpop.f32.mrf.mxu0  ;;  %v4178_v59 = vadd.f32 %v15622_v46, %v15558_v34  ;;  %v21164_v34 = vpop.permute.xlu1 %17280 }
 0x485   :  { %v15561_v38 = vadd.f32 %v15560_v3, %v15559_v40  ;;  %v15624_v49 = vpop.f32.mrf.mxu1 }
 0x486   :  { %v15625_v30 = vadd.f32 %v15624_v49, %v15623_v42  ;;  %v15562_v47 = vpop.f32.mrf.mxu0 }
 0x487   :  { %v15626_v22 = vpop.f32.mrf.mxu1 }
 0x488   :  { %v4181_v26 = vadd.f32 %v15625_v30, %v15561_v38  ;;  %v15563_v29 = vpop.f32.mrf.mxu0  ;;  %v21166_v38 = vpop.permute.xlu0 %17325 }
 0x489   :  { %v15627_v8 = vpop.f32.mrf.mxu1  ;;  %v15564_v6 = vadd.f32 %v15563_v29, %v15562_v47  ;;  %v21168_v29 = vpop.permute.xlu1 %17285 }
 0x48a   :  { %v15565_v10 = vpop.f32.mrf.mxu0  ;;  %v17539_v62 = vpack.i.bf16 %v4181_v26, %v4178_v59  ;;  %v15628_v45 = vadd.f32 %v15627_v8, %v15626_v22 }
 0x48b   :  { %v15629_v16 = vpop.f32.mrf.mxu1 }
 0x48c   :  { %17540 = vrot.lane.b32.xlu0 %v17539_v62, %s20057_s5  ;;  %v15566_v17 = vpop.f32.mrf.mxu0  ;;  %v4186_v11 = vadd.f32 %v15628_v45, %v15564_v6 }
 0x48d   :  { %v15567_v48 = vadd.f32 %v15566_v17, %v15565_v10  ;;  %v15630_v20 = vpop.f32.mrf.mxu1  ;;  %v21170_v10 = vpop.permute.xlu0 %17335 }
 0x48e   :  { %v15631_v52 = vadd.f32 %v15630_v20, %v15629_v16  ;;  %v15568_v60 = vpop.f32.mrf.mxu0  ;;  %v21173_v20 = vpop.permute.xlu1 %17290 }
 0x48f   :  { %v15632_v5 = vpop.f32.mrf.mxu1 }
 0x490   :  { %v4189_v50 = vadd.f32 %v15631_v52, %v15567_v48  ;;  %v15569_v4 = vpop.f32.mrf.mxu0 }
 0x491   :  { %v15633_v21 = vpop.f32.mrf.mxu1  ;;  %v15570_v43 = vadd.f32 %v15569_v4, %v15568_v60 }
 0x492   :  { %v15571_v54 = vpop.f32.mrf.mxu0  ;;  %v17544_v41 = vpack.i.bf16 %v4189_v50, %v4186_v11  ;;  %v15634_v7 = vadd.f32 %v15633_v21, %v15632_v5  ;;  %v21175_v5 = vpop.permute.xlu0 %17345  ;;  %v15463_v11 = vadd.f32 %v21143_v0, %v21136_v2  ;;  %v15527_v50 = vadd.f32 %v21145_v55, %v21138_v18 }
 0x493   :  { %v15635_v51 = vpop.f32.mrf.mxu1 }
 0x494   :  { %17545 = vrot.lane.b32.xlu0 %v17544_v41, %s20057_s5  ;;  %v15572_v57 = vpop.f32.mrf.mxu0  ;;  %v4194_v15 = vadd.f32 %v15634_v7, %v15570_v43  ;;  %v21181_v7 = vpop.permute.xlu1 %17295 }
 0x495   :  { %v15573_v14 = vadd.f32 %v15572_v57, %v15571_v54  ;;  %v15636_v25 = vpop.f32.mrf.mxu1 }
 0x496   :  { %v15637_v28 = vadd.f32 %v15636_v25, %v15635_v51  ;;  %v15574_v58 = vpop.f32.mrf.mxu0  ;;  %v3834_v25 = vadd.f32 %v15527_v50, %v15463_v11 }
 0x497   :  { %v15638_v24 = vpop.f32.mrf.mxu1 }
 0x498   :  { %v4197_v39 = vadd.f32 %v15637_v28, %v15573_v14  ;;  %v15575_v13 = vpop.f32.mrf.mxu0  ;;  %v21183_v14 = vpop.permute.xlu0 %17355 }
 0x499   :  { %v15639_v33 = vpop.f32.mrf.mxu1  ;;  %v15576_v40 = vadd.f32 %v15575_v13, %v15574_v58  ;;  %v21186_v0 = vpop.permute.xlu1 %17300 }
 0x49a   :  { %v15577_v1 = vpop.f32.mrf.mxu0  ;;  %v17549_v23 = vpack.i.bf16 %v4197_v39, %v4194_v15  ;;  %v15640_v53 = vadd.f32 %v15639_v33, %v15638_v24 }
 0x49b   :  { %v15641_v35 = vpop.f32.mrf.mxu1 }
 0x49c   :  { %17550 = vrot.lane.b32.xlu0 %v17549_v23, %s20057_s5  ;;  %v15578_v42 = vpop.f32.mrf.mxu0  ;;  %v4202_v22 = vadd.f32 %v15640_v53, %v15576_v40  ;;  %v21188_v13 = vpop.permute.xlu0 %17365  ;;  %v17564_v23 = vpack.i.bf16 %v3834_v25, %v21140_v12 }
 0x49d   :  { %v15579_v46 = vadd.f32 %v15578_v42, %v15577_v1  ;;  %v15642_v3 = vpop.f32.mrf.mxu1 }
 0x49e   :  { %v15643_v49 = vadd.f32 %v15642_v3, %v15641_v35  ;;  %v15580_v30 = vpop.f32.mrf.mxu0 }
 0x49f   :  { %v15644_v47 = vpop.f32.mrf.mxu1 }
 0x4a0   :  { %v4205_v59 = vadd.f32 %v15643_v49, %v15579_v46  ;;  %v15581_v26 = vpop.f32.mrf.mxu0  ;;  %v21192_v46 = vpop.permute.xlu1 %17305 }
 0x4a1   :  { %v15645_v8 = vpop.f32.mrf.mxu1  ;;  %v15582_v45 = vadd.f32 %v15581_v26, %v15580_v30  ;;  %v21194_v49 = vpop.permute.xlu0 %17375 }
 0x4a2   :  { %v15583_v62 = vpop.f32.mrf.mxu0  ;;  %v17554_v16 = vpack.i.bf16 %v4205_v59, %v4202_v22  ;;  %v15646_v17 = vadd.f32 %v15645_v8, %v15644_v47 }
 0x4a3   :  { %v15647_v6 = vpop.f32.mrf.mxu1 }
 0x4a4   :  { %17555 = vrot.lane.b32.xlu0 %v17554_v16, %s20057_s5  ;;  %v15584_v48 = vpop.f32.mrf.mxu0  ;;  %v4210_v41 = vadd.f32 %v15646_v17, %v15582_v45  ;;  %v21197_v12 = vpop.permute.xlu1 %17310 }
 0x4a5   :  { %v15585_v52 = vadd.f32 %v15584_v48, %v15583_v62  ;;  %v15648_v60 = vpop.f32.mrf.mxu1 }
 0x4a6   :  { %v15649_v4 = vadd.f32 %v15648_v60, %v15647_v6  ;;  %v15586_v21 = vpop.f32.mrf.mxu0  ;;  %v21199_v6 = vpop.permute.xlu0 %17385 }
 0x4a7   :  { %v15650_v54 = vpop.f32.mrf.mxu1 }
 0x4a8   :  { %v4213_v51 = vadd.f32 %v15649_v4, %v15585_v52  ;;  %v15587_v43 = vpop.f32.mrf.mxu0  ;;  %v21201_v52 = vpop.permute.xlu1 %17320 }
 0x4a9   :  { %v15651_v57 = vpop.f32.mrf.mxu1  ;;  %v15588_v15 = vadd.f32 %v15587_v43, %v15586_v21 }
 0x4aa   :  { %v15589_v28 = vpop.f32.mrf.mxu0  ;;  %v17559_v58 = vpack.i.bf16 %v4213_v51, %v4210_v41  ;;  %v15652_v2 = vadd.f32 %v15651_v57, %v15650_v54  ;;  %v21203_v60 = vpop.permute.xlu0 %17395 }
 0x4ab   :  { %v15653_v24 = vpop.f32.mrf.mxu1 }
 0x4ac   :  { %17560 = vrot.lane.b32.xlu0 %v17559_v58, %s20057_s5  ;;  %v15590_v18 = vpop.f32.mrf.mxu0  ;;  %v4218_v40 = vadd.f32 %v15652_v2, %v15588_v15  ;;  %v21206_v50 = vpop.permute.xlu1 %17330 }
 0x4ad   :  { %v15591_v55 = vadd.f32 %v15590_v18, %v15589_v28  ;;  %v15654_v39 = vpop.f32.mrf.mxu1 }
 0x4ae   :  { %v15655_v33 = vadd.f32 %v15654_v39, %v15653_v24  ;;  %v15592_v1 = vpop.f32.mrf.mxu0  ;;  %v21208_v4 = vpop.permute.xlu0 %17405 }
 0x4af   :  { %v15656_v35 = vpop.f32.mrf.mxu1 }
 0x4b0   :  { %v4221_v53 = vadd.f32 %v15655_v33, %v15591_v55  ;;  %17565 = vrot.lane.b32.xlu0 %v17564_v23, %s20056_s20  ;;  %v15593_v42 = vpop.f32.mrf.mxu0  ;;  %v21210_v21 = vpop.permute.xlu1 %17340 }
 0x4b1   :  { %v15657_v3 = vpop.f32.mrf.mxu1  ;;  %v15594_v59 = vadd.f32 %v15593_v42, %v15592_v1  ;;  %23588 = vst [vmem:[#allocation87_spill] sm:$0xff] %v21210_v21  ;;  %v17267_v42 = vunpack.i.l.bf16 %v21154_v9 }
 0x4b2   :  { %v15595_v30 = vpop.f32.mrf.mxu0  ;;  %v17574_v47 = vpack.i.bf16 %v4221_v53, %v4218_v40  ;;  %v15658_v26 = vadd.f32 %v15657_v3, %v15656_v35  ;;  %v21212_v54 = vpop.permute.xlu0 %17415  ;;  %v17268_v3 = vunpack.i.h.bf16 %v21154_v9 }
 0x4b3   :  { %v15659_v22 = vpop.f32.mrf.mxu1 }
 0x4b4   :  { %17575 = vrot.lane.b32.xlu0 %v17574_v47, %s20057_s5  ;;  %v15596_v8 = vpop.f32.mrf.mxu0  ;;  %v4226_v17 = vadd.f32 %v15658_v26, %v15594_v59  ;;  %v21214_v41 = vpop.permute.xlu1 %17350  ;;  %v17272_v47 = vunpack.i.l.bf16 %v21157_v61  ;;  %v17277_v59 = vunpack.i.l.bf16 %v21159_v63  ;;  %v17307_v26 = vunpack.i.l.bf16 %v21192_v46 }
 0x4b5   :  { %v15597_v62 = vadd.f32 %v15596_v8, %v15595_v30  ;;  %v15660_v16 = vpop.f32.mrf.mxu1  ;;  %v17273_v30 = vunpack.i.h.bf16 %v21157_v61  ;;  %v4746_v61 = vsel %vm4744_vm1, %v20655_v44, %v17268_v3  ;;  %v17348_v44 = vunpack.i.h.bf16 %v21175_v5 }
 0x4b6   :  { %v15661_v45 = vadd.f32 %v15660_v16, %v15659_v22  ;;  %v21216_v51 = vpop.permute.xlu0 %17420  ;;  %v17278_v22 = vunpack.i.h.bf16 %v21159_v63  ;;  %v17308_v16 = vunpack.i.h.bf16 %v21192_v46  ;;  %v17313_v3 = vunpack.i.h.bf16 %v21197_v12 }
 0x4b7   :  { %v4748_v63 = vsel %vm4744_vm1, %v20667_v56, %v17273_v30  ;;  %v17387_v56 = vunpack.i.l.bf16 %v21199_v6  ;;  %v17422_v30 = vunpack.i.l.bf16 %v21216_v51 }
 0x4b8   :  { %v4229_v48 = vadd.f32 %v15661_v45, %v15597_v62  ;;  %v21218_v43 = vpop.permute.xlu1 %17360  ;;  %v4745_v62 = vsel %vm4744_vm1, %v20649_v37, %v17267_v42  ;;  %v4747_v45 = vsel %vm4744_vm1, %v20661_v19, %v17272_v47  ;;  %v21275_v37 = vsel %vm4744_vm1, %v20673_v27, %v17277_v59 }
 0x4b9   :  { %v21279_v46 = vsel %vm4744_vm1, %v20679_v36, %v17278_v22  ;;  %v17388_v19 = vunpack.i.h.bf16 %v21199_v6  ;;  %v4763_v27 = vsel %vm4761_vm2, %v4746_v61, %v17308_v16  ;;  %v17423_v36 = vunpack.i.h.bf16 %v21216_v51 }
 0x4ba   :  { %v17579_v11 = vpack.i.bf16 %v4229_v48, %v4226_v17  ;;  %v21220_v57 = vpop.permute.xlu0 %17430  ;;  %v17347_v17 = vunpack.i.l.bf16 %v21175_v5  ;;  %v17282_v48 = vunpack.i.l.bf16 %v21164_v34  ;;  %v4780_v6 = vsel %vm4778_vm3, %v4763_v27, %v17348_v44 }
 0x4bb   :  { %v17312_v16 = vunpack.i.l.bf16 %v21197_v12  ;;  %v4797_v61 = vsel %vm4795_vm4, %v4780_v6, %v17388_v19 }
 0x4bc   :  { %17580 = vrot.lane.b32.xlu1 %v17579_v11, %s20057_s5  ;;  %v21222_v25 = vpop.permute.xlu1 %17370  ;;  %v4762_v11 = vsel %vm4761_vm2, %v4745_v62, %v17307_v26  ;;  %v4814_v44 = vsel %vm4812_vm5, %v4797_v61, %v17423_v36 }
 0x4bd   :  { %v4779_v5 = vsel %vm4778_vm3, %v4762_v11, %v17347_v17  ;;  %v17353_v17 = vunpack.i.h.bf16 %v21214_v41 }
 0x4be   :  { %v21224_v28 = vpop.permute.xlu0 %17440  ;;  %v4796_v51 = vsel %vm4795_vm4, %v4779_v5, %v17387_v56  ;;  %v17352_v56 = vunpack.i.l.bf16 %v21214_v41 }
 0x4c0   :  { %v21226_v58 = vpop.permute.xlu1 %17380 }
 0x4c1   :  { %23589 = vst [vmem:[#allocation88_spill] sm:$0xff] %v21226_v58 }
 0x4c2   :  { %v21228_v24 = vpop.permute.xlu0 %17450 }
 0x4c3   :  { %v17453_v22 = vunpack.i.h.bf16 %v21228_v24  ;;  %v17452_v59 = vunpack.i.l.bf16 %v21228_v24  ;;  %v4813_v24 = vsel %vm4812_vm5, %v4796_v51, %v17422_v30 }
 0x4c4   :  { %v21230_v15 = vpop.permute.xlu1 %17390 }
 0x4c5   :  { %v4830_v27 = vsel %vm4829_vm6, %v4813_v24, %v17452_v59  ;;  %v17393_v19 = vunpack.i.h.bf16 %v21230_v15  ;;  %v17392_v30 = vunpack.i.l.bf16 %v21230_v15 }
 0x4c6   :  { %v21232_v2 = vpop.permute.xlu0 %17460 }
 0x4c8   :  { %v21234_v18 = vpop.permute.xlu1 %17400 }
 0x4ca   :  { %v21236_v55 = vpop.permute.xlu0 %17470 }
 0x4cc   :  { %v21238_v39 = vpop.permute.xlu1 %17410 }
 0x4ce   :  { %v21240_v33 = vpop.permute.xlu0 %17480 }
 0x4cf   :  { %v17483_v26 = vunpack.i.h.bf16 %v21240_v33  ;;  %v17482_v62 = vunpack.i.l.bf16 %v21240_v33  ;;  %v4831_v33 = vsel %vm4829_vm6, %v4814_v44, %v17453_v22  ;;  %v17283_v22 = vunpack.i.h.bf16 %v21164_v34 }
 0x4d0   :  { %v21242_v1 = vpop.permute.xlu1 %17425  ;;  %v4764_v44 = vsel %vm4761_vm2, %v4747_v45, %v17312_v16  ;;  %v4751_v34 = vsel %vm4744_vm1, %v20685_v32, %v17282_v48 }
 0x4d1   :  { %v4847_v5 = vsel %vm4846_vm7, %v4830_v27, %v17482_v62  ;;  %v4848_v6 = vsel %vm4846_vm7, %v4831_v33, %v17483_v26  ;;  %v17428_v59 = vunpack.i.h.bf16 %v21242_v1  ;;  %v17427_v41 = vunpack.i.l.bf16 %v21242_v1 }
 0x4d2   :  { %v21244_v23 = vpop.permute.xlu0 %17495  ;;  %v4765_v62 = vsel %vm4761_vm2, %v4748_v63, %v17313_v3  ;;  %v17287_v1 = vunpack.i.l.bf16 %v21168_v29  ;;  %v17318_v3 = vunpack.i.h.bf16 %v21161_v31 }
 0x4d4   :  { %v21246_v35 = vpop.permute.xlu1 %17435 }
 0x4d6   :  { %v21248_v40 = vpop.permute.xlu0 %17500 }
 0x4d8   :  { %v21250_v53 = vpop.permute.xlu1 %17445 }
 0x4da   :  { %v21264_v9 = vpop.permute.xlu0 %17515 }
 0x4dc   :  { %v21259_v8 = vpop.permute.xlu1 %17455 }
 0x4dd   :  { %v17458_v26 = vunpack.i.h.bf16 %v21259_v8  ;;  %v17457_v15 = vunpack.i.l.bf16 %v21259_v8  ;;  %v17317_v8 = vunpack.i.l.bf16 %v21161_v31  ;;  %v17398_v31 = vunpack.i.h.bf16 %v21203_v60 }
 0x4de   :  { %v21292_v47 = vpop.permute.xlu0 %17520 }
 0x4e0   :  { %v21286_v42 = vpop.permute.xlu1 %17465 }
 0x4e4   :  { %v21303_v58 = vpop.permute.xlu1 %17475 }
 0x4e8   :  { %v17486_v51 = vpop.permute.xlu1 %17485 }
 0x4e9   :  { %v17488_v27 = vunpack.i.h.bf16 %v17486_v51  ;;  %v17487_v33 = vunpack.i.l.bf16 %v17486_v51 }
 0x4f6   :  { %v17536_v11 = vpop.permute.xlu0 %17535 }
 0x4f7   :  { %v17538_v12 = vunpack.i.h.bf16 %v17536_v11  ;;  %v17537_v21 = vunpack.i.l.bf16 %v17536_v11  ;;  %v4782_v11 = vsel %vm4778_vm3, %v4765_v62, %v17353_v17  ;;  %v17432_v62 = vunpack.i.l.bf16 %v21220_v57 }
 0x4f8   :  { %v4799_v63 = vsel %vm4795_vm4, %v4782_v11, %v17393_v19 }
 0x4f9   :  { %v4864_v36 = vsel %vm4863_vm8, %v4847_v5, %v17537_v21  ;;  %v4865_v61 = vsel %vm4863_vm8, %v4848_v6, %v17538_v12  ;;  %v4781_v21 = vsel %vm4778_vm3, %v4764_v44, %v17352_v56  ;;  %v4816_v17 = vsel %vm4812_vm5, %v4799_v63, %v17428_v59 }
 0x4fa   :  { %v4880_v24 = vpack.c.bf16 %v4865_v61, %v4864_v36  ;;  %v4798_v45 = vsel %vm4795_vm4, %v4781_v21, %v17392_v30  ;;  %v4833_v5 = vsel %vm4829_vm6, %v4816_v17, %v17458_v26  ;;  %v17358_v6 = vunpack.i.h.bf16 %v21183_v14 }
 0x4fb   :  { %v4815_v16 = vsel %vm4812_vm5, %v4798_v45, %v17427_v41  ;;  %v17357_v30 = vunpack.i.l.bf16 %v21183_v14  ;;  %v4850_v51 = vsel %vm4846_vm7, %v4833_v5, %v17488_v27  ;;  %v17397_v36 = vunpack.i.l.bf16 %v21203_v60  ;;  %v23590_v41 = vld [vmem:[#allocation78_spill] sm:$0xff] }
 0x4fc   :  { %16255 = vmatprep.mubr.msk.bf16.mxu0 %vm4915_vm9, %v4880_v24  ;;  %v4832_v56 = vsel %vm4829_vm6, %v4815_v16, %v17457_v15  ;;  %v4752_v24 = vsel %vm4744_vm1, %v23590_v41, %v17283_v22  ;;  %v17433_v44 = vunpack.i.h.bf16 %v21220_v57  ;;  %v4766_v26 = vsel %vm4761_vm2, %v21275_v37, %v17317_v8  ;;  %v23591_v37 = vld [vmem:[#allocation79_spill] sm:$0xff] }
 0x4fd   :  { %v4849_v19 = vsel %vm4846_vm7, %v4832_v56, %v17487_v33  ;;  %v4767_v15 = vsel %vm4761_vm2, %v21279_v46, %v17318_v3  ;;  %v17463_v60 = vunpack.i.h.bf16 %v21232_v2  ;;  %v17462_v21 = vunpack.i.l.bf16 %v21232_v2  ;;  %v21366_v2 = vpop.permute.xlu1 %17490 }
 0x4fe   :  { %v17541_v12 = vpop.permute.xlu0 %17540  ;;  %v4783_v11 = vsel %vm4778_vm3, %v4766_v26, %v17357_v30  ;;  %v4784_v27 = vsel %vm4778_vm3, %v4767_v15, %v17358_v6  ;;  %v17503_v22 = vunpack.i.h.bf16 %v21248_v40  ;;  %v17502_v33 = vunpack.i.l.bf16 %v21248_v40 }
 0x4ff   :  { %v17543_v32 = vunpack.i.h.bf16 %v17541_v12  ;;  %v17542_v48 = vunpack.i.l.bf16 %v17541_v12  ;;  %v17288_v57 = vunpack.i.h.bf16 %v21168_v29  ;;  %v4753_v45 = vsel %vm4744_vm1, %v23591_v37, %v17287_v1 }
 0x500   :  { %v4800_v46 = vsel %vm4795_vm4, %v4783_v11, %v17397_v36  ;;  %v4801_v63 = vsel %vm4795_vm4, %v4784_v27, %v17398_v31  ;;  %v17323_v3 = vunpack.i.h.bf16 %v21201_v52  ;;  %v17322_v8 = vunpack.i.l.bf16 %v21201_v52  ;;  %v23592_v36 = vld [vmem:[#allocation80_spill] sm:$0xff] }
 0x501   :  { %v4866_v61 = vsel %vm4863_vm8, %v4849_v19, %v17542_v48  ;;  %v4867_v59 = vsel %vm4863_vm8, %v4850_v51, %v17543_v32  ;;  %v4817_v16 = vsel %vm4812_vm5, %v4800_v46, %v17432_v62  ;;  %v4818_v40 = vsel %vm4812_vm5, %v4801_v63, %v17433_v44  ;;  %v17506_v19 = vpop.permute.xlu1 %17505 }
 0x502   :  { %v4881_v14 = vpack.c.bf16 %v4867_v59, %v4866_v61  ;;  %v4834_v29 = vsel %vm4829_vm6, %v4817_v16, %v17462_v21  ;;  %v4835_v12 = vsel %vm4829_vm6, %v4818_v40, %v17463_v60  ;;  %v17363_v5 = vunpack.i.h.bf16 %v21218_v43 }
 0x503   :  { %v17362_v32 = vunpack.i.l.bf16 %v21218_v43  ;;  %v4851_v48 = vsel %vm4846_vm7, %v4834_v29, %v17502_v33  ;;  %v4852_v6 = vsel %vm4846_vm7, %v4835_v12, %v17503_v22  ;;  %v17403_v52 = vunpack.i.h.bf16 %v21234_v18 }
 0x504   :  { %16256 = vmatmul.mubr.msk.bf16.vlgmr.msra.gmra.mxu0 %vm4915_vm9, %v4881_v14  ;;  %v17402_v30 = vunpack.i.l.bf16 %v21234_v18  ;;  %v4754_v61 = vsel %vm4744_vm1, %v23592_v36, %v17288_v57  ;;  %v17438_v59 = vunpack.i.h.bf16 %v21246_v35  ;;  %v17437_v43 = vunpack.i.l.bf16 %v21246_v35 }
 0x505   :  { %v4768_v44 = vsel %vm4761_vm2, %v4751_v34, %v17322_v8  ;;  %v4769_v62 = vsel %vm4761_vm2, %v4752_v24, %v17323_v3  ;;  %v17468_v14 = vunpack.i.h.bf16 %v21286_v42  ;;  %v17467_v18 = vunpack.i.l.bf16 %v21286_v42 }
 0x506   :  { %v17546_v17 = vpop.permute.xlu0 %17545  ;;  %v4785_v26 = vsel %vm4778_vm3, %v4768_v44, %v17362_v32  ;;  %v4786_v15 = vsel %vm4778_vm3, %v4769_v62, %v17363_v5  ;;  %v17508_v60 = vunpack.i.h.bf16 %v17506_v19  ;;  %v17507_v21 = vunpack.i.l.bf16 %v17506_v19 }
 0x507   :  { %v17548_v1 = vunpack.i.h.bf16 %v17546_v17  ;;  %v17547_v56 = vunpack.i.l.bf16 %v17546_v17  ;;  %v17293_v11 = vunpack.i.h.bf16 %v21173_v20  ;;  %v17292_v35 = vunpack.i.l.bf16 %v21173_v20 }
 0x508   :  { %v4802_v34 = vsel %vm4795_vm4, %v4785_v26, %v17402_v30  ;;  %v4803_v24 = vsel %vm4795_vm4, %v4786_v15, %v17403_v52  ;;  %v17328_v27 = vunpack.i.h.bf16 %v21166_v38  ;;  %v17327_v42 = vunpack.i.l.bf16 %v21166_v38 }
 0x509   :  { %v4868_v51 = vsel %vm4863_vm8, %v4851_v48, %v17547_v56  ;;  %v4869_v31 = vsel %vm4863_vm8, %v4852_v6, %v17548_v1  ;;  %v4819_v22 = vsel %vm4812_vm5, %v4802_v34, %v17437_v43  ;;  %v4820_v33 = vsel %vm4812_vm5, %v4803_v24, %v17438_v59  ;;  %v23593_v1 = vld [vmem:[#allocation81_spill] sm:$0xff] }
 0x50a   :  { %v4882_v41 = vpack.c.bf16 %v4869_v31, %v4868_v51  ;;  %v4836_v37 = vsel %vm4829_vm6, %v4819_v22, %v17467_v18  ;;  %v4837_v46 = vsel %vm4829_vm6, %v4820_v33, %v17468_v14  ;;  %v17368_v20 = vunpack.i.h.bf16 %v21188_v13 }
 0x50b   :  { %v17367_v8 = vunpack.i.l.bf16 %v21188_v13  ;;  %v4853_v16 = vsel %vm4846_vm7, %v4836_v37, %v17507_v21  ;;  %v4854_v40 = vsel %vm4846_vm7, %v4837_v46, %v17508_v60  ;;  %v17408_v38 = vunpack.i.h.bf16 %v21208_v4 }
 0x50c   :  { %16259 = vmatprep.mubr.msk.bf16.mxu0 %vm4915_vm9, %v4882_v41  ;;  %v17407_v17 = vunpack.i.l.bf16 %v21208_v4  ;;  %v4755_v56 = vsel %vm4744_vm1, %v23593_v1, %v17292_v35  ;;  %v17443_v5 = vunpack.i.h.bf16 %v21224_v28  ;;  %v17442_v32 = vunpack.i.l.bf16 %v21224_v28  ;;  %v23594_v28 = vld [vmem:[#allocation82_spill] sm:$0xff] }
 0x50d   :  { %v4770_v48 = vsel %vm4761_vm2, %v4753_v45, %v17327_v42  ;;  %v4771_v6 = vsel %vm4761_vm2, %v4754_v61, %v17328_v27  ;;  %v17473_v52 = vunpack.i.h.bf16 %v21236_v55  ;;  %v17472_v4 = vunpack.i.l.bf16 %v21236_v55  ;;  %v21429_v55 = vpop.permute.xlu1 %17510 }
 0x50e   :  { %v17551_v57 = vpop.permute.xlu0 %17550  ;;  %v4787_v30 = vsel %vm4778_vm3, %v4770_v48, %v17367_v8  ;;  %v4788_v19 = vsel %vm4778_vm3, %v4771_v6, %v17368_v20  ;;  %v17523_v51 = vunpack.i.h.bf16 %v21292_v47  ;;  %v17522_v31 = vunpack.i.l.bf16 %v21292_v47 }
 0x50f   :  { %v17553_v63 = vunpack.i.h.bf16 %v17551_v57  ;;  %v17552_v3 = vunpack.i.l.bf16 %v17551_v57  ;;  %v4756_v36 = vsel %vm4744_vm1, %v23594_v28, %v17293_v11  ;;  %v17297_v45 = vunpack.i.l.bf16 %v21181_v7  ;;  %v23596_v28 = vld [vmem:[#allocation84_spill] sm:$0xff] }
 0x510   :  { %v4804_v61 = vsel %vm4795_vm4, %v4787_v30, %v17407_v17  ;;  %v4805_v59 = vsel %vm4795_vm4, %v4788_v19, %v17408_v38  ;;  %v17333_v43 = vunpack.i.h.bf16 %v21206_v50  ;;  %v17332_v41 = vunpack.i.l.bf16 %v21206_v50 }
 0x511   :  { %v4870_v29 = vsel %vm4863_vm8, %v4853_v16, %v17552_v3  ;;  %v4871_v12 = vsel %vm4863_vm8, %v4854_v40, %v17553_v63  ;;  %v4821_v44 = vsel %vm4812_vm5, %v4804_v61, %v17442_v32  ;;  %v4822_v47 = vsel %vm4812_vm5, %v4805_v59, %v17443_v5  ;;  %v17526_v24 = vpop.permute.xlu1 %17525 }
 0x512   :  { %v4883_v13 = vpack.c.bf16 %v4871_v12, %v4870_v29  ;;  %v4838_v14 = vsel %vm4829_vm6, %v4821_v44, %v17472_v4  ;;  %v4839_v18 = vsel %vm4829_vm6, %v4822_v47, %v17473_v52  ;;  %v17373_v60 = vunpack.i.h.bf16 %v21222_v25 }
 0x513   :  { %v17372_v21 = vunpack.i.l.bf16 %v21222_v25  ;;  %v4855_v11 = vsel %vm4846_vm7, %v4838_v14, %v17522_v31  ;;  %v4856_v35 = vsel %vm4846_vm7, %v4839_v18, %v17523_v51  ;;  %v17413_v50 = vunpack.i.h.bf16 %v21238_v39 }
 0x514   :  { %16260 = vmatmul.mubr.msk.bf16.gmra.mxu0 %vm4915_vm9, %v4883_v13  ;;  %v17412_v34 = vunpack.i.l.bf16 %v21238_v39  ;;  %v17298_v22 = vunpack.i.h.bf16 %v21181_v7  ;;  %v17448_v33 = vunpack.i.h.bf16 %v21250_v53  ;;  %v17447_v57 = vunpack.i.l.bf16 %v21250_v53  ;;  %v23595_v7 = vld [vmem:[#allocation83_spill] sm:$0xff] }
 0x515   :  { %v4772_v37 = vsel %vm4761_vm2, %v4755_v56, %v17332_v41  ;;  %v4773_v46 = vsel %vm4761_vm2, %v4756_v36, %v17333_v43  ;;  %v17478_v63 = vunpack.i.h.bf16 %v21303_v58  ;;  %v17477_v39 = vunpack.i.l.bf16 %v21303_v58 }
 0x516   :  { %v17556_v62 = vpop.permute.xlu0 %17555  ;;  %v4789_v3 = vsel %vm4778_vm3, %v4772_v37, %v17372_v21  ;;  %v4790_v20 = vsel %vm4778_vm3, %v4773_v46, %v17373_v60  ;;  %v17528_v8 = vunpack.i.h.bf16 %v17526_v24  ;;  %v17527_v16 = vunpack.i.l.bf16 %v17526_v24 }
 0x517   :  { %v17558_v26 = vunpack.i.h.bf16 %v17556_v62  ;;  %v17557_v15 = vunpack.i.l.bf16 %v17556_v62  ;;  %v4757_v53 = vsel %vm4744_vm1, %v23595_v7, %v17297_v45  ;;  %v17302_v40 = vunpack.i.l.bf16 %v21186_v0  ;;  %v23600_v7 = vld [vmem:[#allocation86_spill] sm:$0xff] }
 0x518   :  { %v4806_v38 = vsel %vm4795_vm4, %v4789_v3, %v17412_v34  ;;  %v4807_v17 = vsel %vm4795_vm4, %v4790_v20, %v17413_v50  ;;  %v17338_v29 = vunpack.i.h.bf16 %v21170_v10  ;;  %v17337_v58 = vunpack.i.l.bf16 %v21170_v10 }
 0x519   :  { %v4872_v27 = vsel %vm4863_vm8, %v4855_v11, %v17557_v15  ;;  %v4873_v42 = vsel %vm4863_vm8, %v4856_v35, %v17558_v26  ;;  %v4823_v12 = vsel %vm4812_vm5, %v4806_v38, %v17447_v57  ;;  %v4824_v1 = vsel %vm4812_vm5, %v4807_v17, %v17448_v33  ;;  %v23597_v26 = vld [vmem:[#allocation85_spill] sm:$0xff]  ;;  %v17531_v11 = vpop.permute.xlu1 %17530  ;;  %v23598_v35 = vld [vmem:[#allocation87_spill] sm:$0xff]  ;;  %v23599_v57 = vld [vmem:[#allocation88_spill] sm:$0xff] }
 0x51a   :  { %v4884_v25 = vpack.c.bf16 %v4873_v42, %v4872_v27  ;;  %v4840_v5 = vsel %vm4829_vm6, %v4823_v12, %v17477_v39  ;;  %v4841_v32 = vsel %vm4829_vm6, %v4824_v1, %v17478_v63  ;;  %v17378_v6 = vunpack.i.h.bf16 %v21194_v49 }
 0x51b   :  { %v17377_v52 = vunpack.i.l.bf16 %v21194_v49  ;;  %v4857_v4 = vsel %vm4846_vm7, %v4840_v5, %v17527_v16  ;;  %v4858_v30 = vsel %vm4846_vm7, %v4841_v32, %v17528_v8  ;;  %v17418_v10 = vunpack.i.h.bf16 %v21212_v54 }
 0x51c   :  { %16263 = vmatprep.mubr.msk.bf16.mxu0 %vm4915_vm9, %v4884_v25  ;;  %v17417_v19 = vunpack.i.l.bf16 %v21212_v54  ;;  %v4758_v36 = vsel %vm4744_vm1, %v23596_v28, %v17298_v22  ;;  %v17498_v45 = vunpack.i.h.bf16 %v21244_v23  ;;  %v17497_v61 = vunpack.i.l.bf16 %v21244_v23 }
 0x51d   :  { %v4774_v43 = vsel %vm4761_vm2, %v4757_v53, %v17337_v58  ;;  %v4775_v41 = vsel %vm4761_vm2, %v4758_v36, %v17338_v29  ;;  %v17518_v44 = vunpack.i.h.bf16 %v21264_v9  ;;  %v17517_v54 = vunpack.i.l.bf16 %v21264_v9  ;;  %v17571_v20 = vpop.permute.xlu1 %17570 }
 0x51e   :  { %v17561_v56 = vpop.permute.xlu0 %17560  ;;  %v4791_v47 = vsel %vm4778_vm3, %v4774_v43, %v17377_v52  ;;  %v4792_v62 = vsel %vm4778_vm3, %v4775_v41, %v17378_v6  ;;  %v17303_v23 = vunpack.i.h.bf16 %v21186_v0  ;;  %v4759_v15 = vsel %vm4744_vm1, %v23597_v26, %v17302_v40 }
 0x51f   :  { %v17563_v13 = vunpack.i.h.bf16 %v17561_v56  ;;  %v17562_v48 = vunpack.i.l.bf16 %v17561_v56  ;;  %v4808_v60 = vsel %vm4795_vm4, %v4791_v47, %v17417_v19  ;;  %v4809_v21 = vsel %vm4795_vm4, %v4792_v62, %v17418_v10 }
 0x520   :  { %v17343_v9 = vunpack.i.h.bf16 %v23598_v35  ;;  %v17342_v50 = vunpack.i.l.bf16 %v23598_v35  ;;  %v4825_v34 = vsel %vm4812_vm5, %v4808_v60, %v17497_v61  ;;  %v4826_v24 = vsel %vm4812_vm5, %v4809_v21, %v17498_v45  ;;  %v21524_v61 = vld [vmem:[#allocation4] sm:$0xff]   ;;  %v14010_v21 = vld [vmem:[#allocation9] ss:$0 sm:$0xff] }
 0x521   :  { %v4874_v51 = vsel %vm4863_vm8, %v4857_v4, %v17562_v48  ;;  %v4875_v31 = vsel %vm4863_vm8, %v4858_v30, %v17563_v13  ;;  %v4842_v42 = vsel %vm4829_vm6, %v4825_v34, %v17517_v54  ;;  %v4843_v0 = vsel %vm4829_vm6, %v4826_v24, %v17518_v44  ;;  %16287 = vmatprep.mubr.bf16.mxu1 %v21524_v61 }
 0x522   :  { %v4885_v49 = vpack.c.bf16 %v4875_v31, %v4874_v51  ;;  %v17566_v59 = vpop.permute.xlu0 %17565  ;;  %v17383_v25 = vunpack.i.h.bf16 %v23599_v57  ;;  %v17382_v37 = vunpack.i.l.bf16 %v23599_v57  ;;  %v17493_v39 = vunpack.i.h.bf16 %v21366_v2 }
 0x523   :  { %v17568_v14 = vunpack.i.h.bf16 %v17566_v59  ;;  %v17567_v18 = vunpack.i.l.bf16 %v17566_v59  ;;  %v17492_v3 = vunpack.i.l.bf16 %v21366_v2  ;;  %v4760_v53 = vsel %vm4744_vm1, %v23600_v7, %v17303_v23 }
 0x524   :  { %16264 = vmatmul.mubr.msk.bf16.gmra.mxu0 %vm4915_vm9, %v4885_v49  ;;  %v17513_v40 = vunpack.i.h.bf16 %v21429_v55  ;;  %v17512_v38 = vunpack.i.l.bf16 %v21429_v55  ;;  %v4776_v29 = vsel %vm4761_vm2, %v4759_v15, %v17342_v50  ;;  %v4777_v58 = vsel %vm4761_vm2, %v4760_v53, %v17343_v9  ;;  %v18682_v49 = vld [vmem:[#allocation4 + $0x40] sm:$0xff]  }
 0x525   :  { %v4859_v46 = vsel %vm4846_vm7, %v4842_v42, %v17567_v18  ;;  %v4860_v63 = vsel %vm4846_vm7, %v4843_v0, %v17568_v14  ;;  %v17533_v12 = vunpack.i.h.bf16 %v17531_v11  ;;  %v17532_v1 = vunpack.i.l.bf16 %v17531_v11 }
 0x526   :  { %v17576_v27 = vpop.permute.xlu0 %17575  ;;  %v4793_v2 = vsel %vm4778_vm3, %v4776_v29, %v17382_v37  ;;  %v4794_v56 = vsel %vm4778_vm3, %v4777_v58, %v17383_v25  ;;  %v17573_v5 = vunpack.i.h.bf16 %v17571_v20  ;;  %v17572_v32 = vunpack.i.l.bf16 %v17571_v20 }
 0x527   :  { %v17578_v22 = vunpack.i.h.bf16 %v17576_v27  ;;  %v17577_v33 = vunpack.i.l.bf16 %v17576_v27  ;;  %v4810_v13 = vsel %vm4795_vm4, %v4793_v2, %v17492_v3  ;;  %v4811_v48 = vsel %vm4795_vm4, %v4794_v56, %v17493_v39 }
 0x528   :  { %v4827_v55 = vsel %vm4812_vm5, %v4810_v13, %v17512_v38  ;;  %v4828_v6 = vsel %vm4812_vm5, %v4811_v48, %v17513_v40 }
 0x529   :  { %v4876_v8 = vsel %vm4863_vm8, %v4859_v46, %v17577_v33  ;;  %v4877_v16 = vsel %vm4863_vm8, %v4860_v63, %v17578_v22  ;;  %v4844_v4 = vsel %vm4829_vm6, %v4827_v55, %v17532_v1  ;;  %v4845_v30 = vsel %vm4829_vm6, %v4828_v6, %v17533_v12 }
 0x52a   :  { %v4886_v17 = vpack.c.bf16 %v4877_v16, %v4876_v8  ;;  %v4861_v51 = vsel %vm4846_vm7, %v4844_v4, %v17572_v32  ;;  %v4862_v31 = vsel %vm4846_vm7, %v4845_v30, %v17573_v5 }
 0x52c   :  { %16267 = vmatprep.mubr.msk.bf16.mxu0 %vm4915_vm9, %v4886_v17 }
 0x52e   :  { %v17581_v52 = vpop.permute.xlu1 %17580 }
 0x52f   :  { %v17583_v10 = vunpack.i.h.bf16 %v17581_v52  ;;  %v17582_v19 = vunpack.i.l.bf16 %v17581_v52 }
 0x531   :  { %v4878_v28 = vsel %vm4863_vm8, %v4861_v51, %v17582_v19  ;;  %v4879_v36 = vsel %vm4863_vm8, %v4862_v31, %v17583_v10  ;;  %v18683_v51 = vld [vmem:[#allocation4 + $0x8] sm:$0xff]  }
 0x532   :  { %v4887_v45 = vpack.c.bf16 %v4879_v36, %v4878_v28  ;;  %v18684_v31 = vld [vmem:[#allocation4 + $0x48] sm:$0xff]   ;;  %v18685_v28 = vld [vmem:[#allocation4 + $0x10] sm:$0xff]  }
 0x533   :  { %v18686_v36 = vld [vmem:[#allocation4 + $0x50] sm:$0xff]  }
 0x534   :  { %16268 = vmatmul.mubr.msk.bf16.gmra.mxu0 %vm4915_vm9, %v4887_v45  ;;  %v18687_v45 = vld [vmem:[#allocation4 + $0x18] sm:$0xff]  }
 0x535   :  { %16319 = vmatprep.mubr.bf16.mxu0 %v18682_v49  ;;  %v18688_v49 = vld [vmem:[#allocation4 + $0x58] sm:$0xff]  }
 0x5c4   :  { %v16257_v59 = vpop.f32.mrf.mxu0 }
 0x5c5   :  { %v21614_v5 = vadd.f32 %v16257_v59, %v14010_v21  ;;  %v18689_v59 = vld [vmem:[#allocation4 + $0x20] sm:$0xff]  }
 0x5c6   :  { %v21527_v43 = vpop.f32.mrf.mxu0 }
 0x5c7   :  { %23614 = vst [vmem:[#allocation91_spill] sm:$0xff] %v21614_v5  ;;  %v23523_v6 = vmax.f32 %v21614_v5, 0.0  ;;  %v21633_v52 = vadd.f32 %v14010_v21, %v21527_v43  ;;  %v18690_v43 = vld [vmem:[#allocation4 + $0x60] sm:$0xff]  }
 0x5c8   :  { %v16258_v41 = vpop.f32.mrf.mxu0 }
 0x5c9   :  { %v21603_v1 = vadd.f32 %v16258_v41, %v14010_v21  ;;  %23616 = vst [vmem:[#allocation93_spill] sm:$0xff] %v21633_v52  ;;  %v23525_v10 = vmax.f32 %v21633_v52, 0.0  ;;  %v18691_v41 = vld [vmem:[#allocation4 + $0x28] sm:$0xff]  }
 0x5ca   :  { %v21529_v44 = vpop.f32.mrf.mxu0 }
 0x5cb   :  { %23613 = vst [vmem:[#allocation90_spill] sm:$0xff] %v21603_v1  ;;  %v23522_v13 = vmax.f32 %v21603_v1, 0.0  ;;  %v21621_v48 = vadd.f32 %v14010_v21, %v21529_v44  ;;  %v18692_v44 = vld [vmem:[#allocation4 + $0x68] sm:$0xff]  }
 0x5cd   :  { %23615 = vst [vmem:[#allocation92_spill] sm:$0xff] %v21621_v48  ;;  %v21641_v4 = vpack.c.bf16 %v23522_v13, %v23523_v6  ;;  %v23524_v30 = vmax.f32 %v21621_v48, 0.0  ;;  %v18754_v6 = vld [vmem:[%s23619_s2 + $0x30] sm:$0xff]  }
 0x5cf   :  { %v21653_v19 = vpack.c.bf16 %v23524_v30, %v23525_v10 }
 0x5d4   :  { %v16261_v54 = vpop.f32.mrf.mxu0 }
 0x5d5   :  { %v21582_v53 = vadd.f32 %v16261_v54, %v14010_v21  ;;  %v18693_v54 = vld [vmem:[#allocation4 + $0x30] sm:$0xff]  }
 0x5d6   :  { %v4994_v47 = vpop.f32.mrf.mxu0 }
 0x5d7   :  { %23610 = vst [vmem:[#allocation88_spill] sm:$0xff] %v21582_v53  ;;  %v23512_v58 = vmax.f32 %v21582_v53, 0.0  ;;  %v21599_v12 = vadd.f32 %v14010_v21, %v4994_v47  ;;  %v18694_v47 = vld [vmem:[#allocation4 + $0x70] sm:$0xff]  }
 0x5d8   :  { %v16262_v62 = vpop.f32.mrf.mxu0 }
 0x5d9   :  { %v21571_v8 = vadd.f32 %v16262_v62, %v14010_v21  ;;  %23612 = vst [vmem:[#allocation89_spill] sm:$0xff] %v21599_v12  ;;  %v23510_v32 = vmax.f32 %v21599_v12, 0.0  ;;  %v18695_v62 = vld [vmem:[#allocation4 + $0x38] sm:$0xff]  }
 0x5da   :  { %v4997_v14 = vpop.f32.mrf.mxu0 }
 0x5db   :  { %23609 = vst [vmem:[#allocation87_spill] sm:$0xff] %v21571_v8  ;;  %v23513_v38 = vmax.f32 %v21571_v8, 0.0  ;;  %v21588_v17 = vadd.f32 %v14010_v21, %v4997_v14  ;;  %v18696_v14 = vld [vmem:[#allocation4 + $0x78] sm:$0xff]   ;;  %v18756_v8 = vld [vmem:[%s23619_s2 + $0x20] sm:$0xff]  }
 0x5dd   :  { %23611 = vst [vmem:[#allocation86_spill] sm:$0xff] %v21588_v17  ;;  %v21609_v2 = vpack.c.bf16 %v23513_v38, %v23512_v58  ;;  %v23511_v56 = vmax.f32 %v21588_v17, 0.0 }
 0x5df   :  { %v21627_v55 = vpack.c.bf16 %v23511_v56, %v23510_v32 }
 0x5e4   :  { %v16265_v18 = vpop.f32.mrf.mxu0 }
 0x5e5   :  { %v21543_v33 = vadd.f32 %v16265_v18, %v14010_v21  ;;  %v18697_v18 = vld [vmem:[#allocation4 + $0x80] sm:$0xff]  }
 0x5e6   :  { %v5010_v23 = vpop.f32.mrf.mxu0 }
 0x5e7   :  { %23606 = vst [vmem:[#allocation83_spill] sm:$0xff] %v21543_v33  ;;  %v23516_v3 = vmax.f32 %v21543_v33, 0.0  ;;  %v21567_v20 = vadd.f32 %v14010_v21, %v5010_v23  ;;  %v18698_v23 = vld [vmem:[#allocation4 + $0xc0] sm:$0xff]  }
 0x5e8   :  { %v16266_v26 = vpop.f32.mrf.mxu0  ;;  %v18761_v33 = vld [vmem:[%s23619_s2 + $0x40] sm:$0xff]  }
 0x5e9   :  { %v21537_v27 = vadd.f32 %v16266_v26, %v14010_v21  ;;  %23608 = vst [vmem:[#allocation85_spill] sm:$0xff] %v21567_v20  ;;  %v23514_v40 = vmax.f32 %v21567_v20, 0.0  ;;  %v18699_v26 = vld [vmem:[#allocation4 + $0x88] sm:$0xff]  }
 0x5ea   :  { %v5013_v15 = vpop.f32.mrf.mxu0 }
 0x5eb   :  { %23604 = vst [vmem:[#allocation81_spill] sm:$0xff] %v21537_v27  ;;  %v23517_v46 = vmax.f32 %v21537_v27, 0.0  ;;  %v21554_v63 = vadd.f32 %v14010_v21, %v5013_v15  ;;  %v18700_v15 = vld [vmem:[#allocation4 + $0xc8] sm:$0xff]  }
 0x5ed   :  { %23607 = vst [vmem:[#allocation84_spill] sm:$0xff] %v21554_v63  ;;  %v21577_v16 = vpack.c.bf16 %v23517_v46, %v23516_v3  ;;  %v23515_v7 = vmax.f32 %v21554_v63, 0.0 }
 0x5ef   :  { %v21594_v29 = vpack.c.bf16 %v23515_v7, %v23514_v40 }
 0x5f4   :  { %v16269_v60 = vpop.f32.mrf.mxu0 }
 0x5f5   :  { %v21531_v35 = vadd.f32 %v16269_v60, %v14010_v21  ;;  %v18701_v60 = vld [vmem:[#allocation4 + $0x90] sm:$0xff]  }
 0x5f6   :  { %v5026_v11 = vpop.f32.mrf.mxu0 }
 0x5f7   :  { %23601 = vst [vmem:[#allocation78_spill] sm:$0xff] %v21531_v35  ;;  %v21533_v50 = vadd.f32 %v14010_v21, %v5026_v11  ;;  %v23520_v42 = vmax.f32 %v21531_v35, 0.0  ;;  %v18703_v11 = vld [vmem:[#allocation4 + $0x98] sm:$0xff]  }
 0x5f8   :  { %v16270_v9 = vpop.f32.mrf.mxu0 }
 0x5f9   :  { %23602 = vst [vmem:[#allocation79_spill] sm:$0xff] %v21533_v50  ;;  %v21535_v34 = vadd.f32 %v16270_v9, %v14010_v21  ;;  %v23519_v57 = vmax.f32 %v21533_v50, 0.0  ;;  %v18704_v9 = vld [vmem:[#allocation4 + $0xd8] sm:$0xff]  }
 0x5fa   :  { %v5029_v24 = vpop.f32.mrf.mxu0 }
 0x5fb   :  { %23603 = vst [vmem:[#allocation80_spill] sm:$0xff] %v21535_v34  ;;  %v23518_v0 = vmax.f32 %v21535_v34, 0.0  ;;  %v21541_v22 = vadd.f32 %v14010_v21, %v5029_v24  ;;  %v18702_v21 = vld [vmem:[#allocation4 + $0xd0] sm:$0xff]   ;;  %v18705_v24 = vld [vmem:[#allocation4 + $0xa0] sm:$0xff]  }
 0x5fd   :  { %23605 = vst [vmem:[#allocation82_spill] sm:$0xff] %v21541_v22  ;;  %v21550_v25 = vpack.c.bf16 %v23518_v0, %v23520_v42  ;;  %v23521_v37 = vmax.f32 %v21541_v22, 0.0  ;;  %v23542_v42 = vmov 0  }
 0x5ff   :  { %v21560_v39 = vpack.c.bf16 %v23521_v37, %v23519_v57  ;;  %16271 = vmatprep.subr.bf16.mxu1 %v21550_v25  ;;  %16303 = vmatprep.subr.bf16.mxu0 %v21550_v25 }
 0x600   :  { %16272 = vmatpush3.bf16.msra.mxu1 %v21550_v25  ;;  %16304 = vmatpush3.bf16.msra.mxu0 %v21550_v25 }
 0x601   :  { %16273 = vmatprep.subr.bf16.mxu1 %v21560_v39  ;;  %16305 = vmatprep.subr.bf16.mxu0 %v21560_v39 }
 0x604   :  { %16274 = vmatpush3.bf16.msra.mxu1 %v21560_v39  ;;  %16306 = vmatpush3.bf16.msra.mxu0 %v21560_v39 }
 0x605   :  { %16275 = vmatprep.subr.bf16.mxu1 %v21577_v16  ;;  %16307 = vmatprep.subr.bf16.mxu0 %v21577_v16 }
 0x608   :  { %16276 = vmatpush3.bf16.msra.mxu1 %v21577_v16  ;;  %16308 = vmatpush3.bf16.msra.mxu0 %v21577_v16 }
 0x609   :  { %16277 = vmatprep.subr.bf16.mxu1 %v21594_v29  ;;  %16309 = vmatprep.subr.bf16.mxu0 %v21594_v29 }
 0x60c   :  { %16278 = vmatpush3.bf16.msra.mxu1 %v21594_v29  ;;  %16310 = vmatpush3.bf16.msra.mxu0 %v21594_v29 }
 0x60d   :  { %16279 = vmatprep.subr.bf16.mxu1 %v21609_v2  ;;  %16311 = vmatprep.subr.bf16.mxu0 %v21609_v2 }
 0x610   :  { %16280 = vmatpush3.bf16.msra.mxu1 %v21609_v2  ;;  %16312 = vmatpush3.bf16.msra.mxu0 %v21609_v2 }
 0x611   :  { %16281 = vmatprep.subr.bf16.mxu1 %v21627_v55  ;;  %16313 = vmatprep.subr.bf16.mxu0 %v21627_v55 }
 0x614   :  { %16282 = vmatpush3.bf16.msra.mxu1 %v21627_v55  ;;  %16314 = vmatpush3.bf16.msra.mxu0 %v21627_v55 }
 0x615   :  { %16283 = vmatprep.subr.bf16.mxu1 %v21641_v4  ;;  %16315 = vmatprep.subr.bf16.mxu0 %v21641_v4 }
 0x618   :  { %16284 = vmatpush3.bf16.msra.mxu1 %v21641_v4  ;;  %16316 = vmatpush3.bf16.msra.mxu0 %v21641_v4 }
 0x619   :  { %16285 = vmatprep.subr.bf16.mxu1 %v21653_v19  ;;  %16317 = vmatprep.subr.bf16.mxu0 %v21653_v19 }
 0x61c   :  { %16286 = vmatpush3.bf16.msra.mxu1 %v21653_v19  ;;  %16318 = vmatpush3.bf16.msra.mxu0 %v21653_v19 }
 0x61d   :  { %16335 = vmatprep.subr.bf16.mxu1 %v21550_v25  ;;  %16367 = vmatprep.subr.bf16.mxu0 %v21550_v25 }
 0x61f   :  { %16288 = vmatmul.mubr.bf16.vlgmr.msra.gmra.mxu1 %v18683_v51  ;;  %16320 = vmatmul.mubr.bf16.vlgmr.msra.gmra.mxu0 %v18684_v31  ;;  %v18706_v51 = vld [vmem:[#allocation4 + $0xe0] sm:$0xff]   ;;  %v18707_v31 = vld [vmem:[#allocation4 + $0xa8] sm:$0xff]  }
 0x620   :  { %16336 = vmatpush3.bf16.msra.mxu1 %v21550_v25  ;;  %16368 = vmatpush3.bf16.msra.mxu0 %v21550_v25 }
 0x621   :  { %16337 = vmatprep.subr.bf16.mxu1 %v21560_v39  ;;  %16369 = vmatprep.subr.bf16.mxu0 %v21560_v39 }
 0x622   :  { %16291 = vmatprep.mubr.bf16.mxu1 %v18685_v28  ;;  %16323 = vmatprep.mubr.bf16.mxu0 %v18686_v36  ;;  %v18708_v28 = vld [vmem:[#allocation4 + $0xe8] sm:$0xff]   ;;  %v18709_v36 = vld [vmem:[#allocation4 + $0xb0] sm:$0xff]  }
 0x624   :  { %16338 = vmatpush3.bf16.msra.mxu1 %v21560_v39  ;;  %16370 = vmatpush3.bf16.msra.mxu0 %v21560_v39 }
 0x625   :  { %16339 = vmatprep.subr.bf16.mxu1 %v21577_v16  ;;  %16371 = vmatprep.subr.bf16.mxu0 %v21577_v16 }
 0x627   :  { %16292 = vmatmul.mubr.bf16.gmra.mxu1 %v18687_v45  ;;  %16324 = vmatmul.mubr.bf16.gmra.mxu0 %v18688_v49  ;;  %v18710_v45 = vld [vmem:[#allocation4 + $0xf0] sm:$0xff]   ;;  %v18711_v49 = vld [vmem:[#allocation4 + $0xb8] sm:$0xff]  }
 0x628   :  { %16340 = vmatpush3.bf16.msra.mxu1 %v21577_v16  ;;  %16372 = vmatpush3.bf16.msra.mxu0 %v21577_v16 }
 0x629   :  { %16341 = vmatprep.subr.bf16.mxu1 %v21594_v29  ;;  %16373 = vmatprep.subr.bf16.mxu0 %v21594_v29 }
 0x62a   :  { %16295 = vmatprep.mubr.bf16.mxu1 %v18689_v59  ;;  %16327 = vmatprep.mubr.bf16.mxu0 %v18690_v43  ;;  %v18712_v59 = vld [vmem:[#allocation4 + $0xf8] sm:$0xff]   ;;  %v18713_v43 = vld [vmem:[#allocation4 + $0x100] sm:$0xff]  }
 0x62c   :  { %16342 = vmatpush3.bf16.msra.mxu1 %v21594_v29  ;;  %16374 = vmatpush3.bf16.msra.mxu0 %v21594_v29 }
 0x62d   :  { %16343 = vmatprep.subr.bf16.mxu1 %v21609_v2  ;;  %16375 = vmatprep.subr.bf16.mxu0 %v21609_v2 }
 0x62f   :  { %16296 = vmatmul.mubr.bf16.gmra.mxu1 %v18691_v41  ;;  %16328 = vmatmul.mubr.bf16.gmra.mxu0 %v18692_v44  ;;  %v18714_v41 = vld [vmem:[#allocation4 + $0x140] sm:$0xff]   ;;  %v18715_v44 = vld [vmem:[#allocation4 + $0x108] sm:$0xff]  }
 0x630   :  { %16344 = vmatpush3.bf16.msra.mxu1 %v21609_v2  ;;  %16376 = vmatpush3.bf16.msra.mxu0 %v21609_v2 }
 0x631   :  { %16345 = vmatprep.subr.bf16.mxu1 %v21627_v55  ;;  %16377 = vmatprep.subr.bf16.mxu0 %v21627_v55 }
 0x632   :  { %16299 = vmatprep.mubr.bf16.mxu1 %v18693_v54  ;;  %16331 = vmatprep.mubr.bf16.mxu0 %v18694_v47  ;;  %v18716_v54 = vld [vmem:[#allocation4 + $0x148] sm:$0xff]   ;;  %v18717_v47 = vld [vmem:[#allocation4 + $0x110] sm:$0xff]  }
 0x634   :  { %16346 = vmatpush3.bf16.msra.mxu1 %v21627_v55  ;;  %16378 = vmatpush3.bf16.msra.mxu0 %v21627_v55 }
 0x635   :  { %16347 = vmatprep.subr.bf16.mxu1 %v21641_v4  ;;  %16379 = vmatprep.subr.bf16.mxu0 %v21641_v4 }
 0x637   :  { %16300 = vmatmul.mubr.bf16.gmra.mxu1 %v18695_v62  ;;  %16332 = vmatmul.mubr.bf16.gmra.mxu0 %v18696_v14  ;;  %v18718_v62 = vld [vmem:[#allocation4 + $0x150] sm:$0xff]   ;;  %v18719_v14 = vld [vmem:[#allocation4 + $0x118] sm:$0xff]  }
 0x638   :  { %16348 = vmatpush3.bf16.msra.mxu1 %v21641_v4  ;;  %16380 = vmatpush3.bf16.msra.mxu0 %v21641_v4 }
 0x639   :  { %16349 = vmatprep.subr.bf16.mxu1 %v21653_v19  ;;  %16381 = vmatprep.subr.bf16.mxu0 %v21653_v19 }
 0x63a   :  { %16351 = vmatprep.mubr.bf16.mxu1 %v18697_v18  ;;  %16383 = vmatprep.mubr.bf16.mxu0 %v18698_v23  ;;  %v18720_v18 = vld [vmem:[#allocation4 + $0x158] sm:$0xff]   ;;  %v18721_v23 = vld [vmem:[#allocation4 + $0x120] sm:$0xff]  }
 0x63c   :  { %16350 = vmatpush3.bf16.msra.mxu1 %v21653_v19  ;;  %16382 = vmatpush3.bf16.msra.mxu0 %v21653_v19 }
 0x63d   :  { %16399 = vmatprep.subr.bf16.mxu1 %v21550_v25  ;;  %16431 = vmatprep.subr.bf16.mxu0 %v21550_v25 }
 0x63f   :  { %16352 = vmatmul.mubr.bf16.vlgmr.msra.gmra.mxu1 %v18699_v26  ;;  %16384 = vmatmul.mubr.bf16.vlgmr.msra.gmra.mxu0 %v18700_v15  ;;  %v18722_v26 = vld [vmem:[#allocation4 + $0x160] sm:$0xff]   ;;  %v18723_v15 = vld [vmem:[#allocation4 + $0x128] sm:$0xff]  }
 0x640   :  { %16400 = vmatpush3.bf16.msra.mxu1 %v21550_v25  ;;  %16432 = vmatpush3.bf16.msra.mxu0 %v21550_v25 }
 0x641   :  { %16401 = vmatprep.subr.bf16.mxu1 %v21560_v39  ;;  %16433 = vmatprep.subr.bf16.mxu0 %v21560_v39 }
 0x642   :  { %16355 = vmatprep.mubr.bf16.mxu1 %v18701_v60  ;;  %16387 = vmatprep.mubr.bf16.mxu0 %v18702_v21  ;;  %v18724_v60 = vld [vmem:[#allocation4 + $0x168] sm:$0xff]   ;;  %v18725_v21 = vld [vmem:[#allocation4 + $0x130] sm:$0xff]  }
 0x644   :  { %16402 = vmatpush3.bf16.msra.mxu1 %v21560_v39  ;;  %16434 = vmatpush3.bf16.msra.mxu0 %v21560_v39 }
 0x645   :  { %16403 = vmatprep.subr.bf16.mxu1 %v21577_v16  ;;  %16435 = vmatprep.subr.bf16.mxu0 %v21577_v16 }
 0x647   :  { %16356 = vmatmul.mubr.bf16.gmra.mxu1 %v18703_v11  ;;  %16388 = vmatmul.mubr.bf16.gmra.mxu0 %v18704_v9  ;;  %v18726_v11 = vld [vmem:[#allocation4 + $0x170] sm:$0xff]   ;;  %v18727_v9 = vld [vmem:[#allocation4 + $0x138] sm:$0xff]  }
 0x648   :  { %16404 = vmatpush3.bf16.msra.mxu1 %v21577_v16  ;;  %16436 = vmatpush3.bf16.msra.mxu0 %v21577_v16 }
 0x649   :  { %16405 = vmatprep.subr.bf16.mxu1 %v21594_v29  ;;  %16437 = vmatprep.subr.bf16.mxu0 %v21594_v29 }
 0x64a   :  { %16359 = vmatprep.mubr.bf16.mxu1 %v18705_v24  ;;  %16391 = vmatprep.mubr.bf16.mxu0 %v18706_v51  ;;  %v18728_v24 = vld [vmem:[#allocation4 + $0x178] sm:$0xff]   ;;  %v18729_v51 = vld [vmem:[#allocation4 + $0x180] sm:$0xff]  }
 0x64c   :  { %16406 = vmatpush3.bf16.msra.mxu1 %v21594_v29  ;;  %16438 = vmatpush3.bf16.msra.mxu0 %v21594_v29 }
 0x64d   :  { %16407 = vmatprep.subr.bf16.mxu1 %v21609_v2  ;;  %16439 = vmatprep.subr.bf16.mxu0 %v21609_v2 }
 0x64f   :  { %16360 = vmatmul.mubr.bf16.gmra.mxu1 %v18707_v31  ;;  %16392 = vmatmul.mubr.bf16.gmra.mxu0 %v18708_v28  ;;  %v18730_v31 = vld [vmem:[#allocation4 + $0x1c0] sm:$0xff]   ;;  %v18731_v28 = vld [vmem:[#allocation4 + $0x188] sm:$0xff]  }
 0x650   :  { %16408 = vmatpush3.bf16.msra.mxu1 %v21609_v2  ;;  %16440 = vmatpush3.bf16.msra.mxu0 %v21609_v2 }
 0x651   :  { %16409 = vmatprep.subr.bf16.mxu1 %v21627_v55  ;;  %16441 = vmatprep.subr.bf16.mxu0 %v21627_v55 }
 0x652   :  { %16363 = vmatprep.mubr.bf16.mxu1 %v18709_v36  ;;  %16395 = vmatprep.mubr.bf16.mxu0 %v18710_v45  ;;  %v18732_v36 = vld [vmem:[#allocation4 + $0x1c8] sm:$0xff]   ;;  %v18733_v45 = vld [vmem:[#allocation4 + $0x190] sm:$0xff]  }
 0x654   :  { %16410 = vmatpush3.bf16.msra.mxu1 %v21627_v55  ;;  %16442 = vmatpush3.bf16.msra.mxu0 %v21627_v55 }
 0x655   :  { %16411 = vmatprep.subr.bf16.mxu1 %v21641_v4  ;;  %16443 = vmatprep.subr.bf16.mxu0 %v21641_v4 }
 0x657   :  { %16364 = vmatmul.mubr.bf16.gmra.mxu1 %v18711_v49  ;;  %16396 = vmatmul.mubr.bf16.gmra.mxu0 %v18712_v59  ;;  %v18734_v49 = vld [vmem:[#allocation4 + $0x1d0] sm:$0xff]   ;;  %v18735_v59 = vld [vmem:[#allocation4 + $0x198] sm:$0xff]  }
 0x658   :  { %16412 = vmatpush3.bf16.msra.mxu1 %v21641_v4  ;;  %16444 = vmatpush3.bf16.msra.mxu0 %v21641_v4 }
 0x659   :  { %16413 = vmatprep.subr.bf16.mxu1 %v21653_v19  ;;  %16445 = vmatprep.subr.bf16.mxu0 %v21653_v19 }
 0x65a   :  { %16415 = vmatprep.mubr.bf16.mxu1 %v18713_v43  ;;  %16447 = vmatprep.mubr.bf16.mxu0 %v18714_v41  ;;  %v18736_v43 = vld [vmem:[#allocation4 + $0x1d8] sm:$0xff]   ;;  %v18737_v41 = vld [vmem:[#allocation4 + $0x1a0] sm:$0xff]  }
 0x65c   :  { %16414 = vmatpush3.bf16.msra.mxu1 %v21653_v19  ;;  %16446 = vmatpush3.bf16.msra.mxu0 %v21653_v19 }
 0x65d   :  { %16463 = vmatprep.subr.bf16.mxu1 %v21550_v25  ;;  %16495 = vmatprep.subr.bf16.mxu0 %v21550_v25 }
 0x65f   :  { %16416 = vmatmul.mubr.bf16.vlgmr.msra.gmra.mxu1 %v18715_v44  ;;  %16448 = vmatmul.mubr.bf16.vlgmr.msra.gmra.mxu0 %v18716_v54  ;;  %v18738_v44 = vld [vmem:[#allocation4 + $0x1e0] sm:$0xff]   ;;  %v18740_v54 = vld [vmem:[#allocation4 + $0x1e8] sm:$0xff]  }
 0x660   :  { %16464 = vmatpush3.bf16.msra.mxu1 %v21550_v25  ;;  %16496 = vmatpush3.bf16.msra.mxu0 %v21550_v25 }
 0x661   :  { %16465 = vmatprep.subr.bf16.mxu1 %v21560_v39  ;;  %16497 = vmatprep.subr.bf16.mxu0 %v21560_v39 }
 0x662   :  { %16419 = vmatprep.mubr.bf16.mxu1 %v18717_v47  ;;  %16451 = vmatprep.mubr.bf16.mxu0 %v18718_v62  ;;  %v18741_v47 = vld [vmem:[#allocation4 + $0x1b0] sm:$0xff]   ;;  %v18744_v62 = vld [vmem:[#allocation4 + $0x1f8] sm:$0xff]  }
 0x664   :  { %16466 = vmatpush3.bf16.msra.mxu1 %v21560_v39  ;;  %16498 = vmatpush3.bf16.msra.mxu0 %v21560_v39 }
 0x665   :  { %16467 = vmatprep.subr.bf16.mxu1 %v21577_v16  ;;  %16499 = vmatprep.subr.bf16.mxu0 %v21577_v16 }
 0x667   :  { %16420 = vmatmul.mubr.bf16.gmra.mxu1 %v18719_v14  ;;  %16452 = vmatmul.mubr.bf16.gmra.mxu0 %v18720_v18  ;;  %v18745_v14 = vld [vmem:[#allocation4 + $0x200] sm:$0xff]   ;;  %v18748_v18 = vld [vmem:[#allocation4 + $0x218] sm:$0xff]  }
 0x668   :  { %16468 = vmatpush3.bf16.msra.mxu1 %v21577_v16  ;;  %16500 = vmatpush3.bf16.msra.mxu0 %v21577_v16 }
 0x669   :  { %16469 = vmatprep.subr.bf16.mxu1 %v21594_v29  ;;  %16501 = vmatprep.subr.bf16.mxu0 %v21594_v29 }
 0x66a   :  { %16423 = vmatprep.mubr.bf16.mxu1 %v18721_v23  ;;  %16455 = vmatprep.mubr.bf16.mxu0 %v18722_v26  ;;  %v18749_v23 = vld [vmem:[#allocation4 + $0x220] sm:$0xff]   ;;  %v18751_v26 = vld [vmem:[#allocation4 + $0x230] sm:$0xff]  }
 0x66c   :  { %16470 = vmatpush3.bf16.msra.mxu1 %v21594_v29  ;;  %16502 = vmatpush3.bf16.msra.mxu0 %v21594_v29 }
 0x66d   :  { %16471 = vmatprep.subr.bf16.mxu1 %v21609_v2  ;;  %16503 = vmatprep.subr.bf16.mxu0 %v21609_v2 }
 0x66f   :  { %16424 = vmatmul.mubr.bf16.gmra.mxu1 %v18723_v15  ;;  %16456 = vmatmul.mubr.bf16.gmra.mxu0 %v18724_v60  ;;  %v18752_v15 = vld [vmem:[#allocation4 + $0x238] sm:$0xff]  }
 0x670   :  { %16472 = vmatpush3.bf16.msra.mxu1 %v21609_v2  ;;  %16504 = vmatpush3.bf16.msra.mxu0 %v21609_v2 }
 0x671   :  { %16473 = vmatprep.subr.bf16.mxu1 %v21627_v55  ;;  %16505 = vmatprep.subr.bf16.mxu0 %v21627_v55 }
 0x672   :  { %16427 = vmatprep.mubr.bf16.mxu1 %v18725_v21  ;;  %16459 = vmatprep.mubr.bf16.mxu0 %v18726_v11 }
 0x674   :  { %16474 = vmatpush3.bf16.msra.mxu1 %v21627_v55  ;;  %16506 = vmatpush3.bf16.msra.mxu0 %v21627_v55 }
 0x675   :  { %16475 = vmatprep.subr.bf16.mxu1 %v21641_v4  ;;  %16507 = vmatprep.subr.bf16.mxu0 %v21641_v4 }
 0x677   :  { %16428 = vmatmul.mubr.bf16.gmra.mxu1 %v18727_v9  ;;  %16460 = vmatmul.mubr.bf16.gmra.mxu0 %v18728_v24 }
 0x678   :  { %16476 = vmatpush3.bf16.msra.mxu1 %v21641_v4  ;;  %16508 = vmatpush3.bf16.msra.mxu0 %v21641_v4 }
 0x679   :  { %16477 = vmatprep.subr.bf16.mxu1 %v21653_v19  ;;  %16509 = vmatprep.subr.bf16.mxu0 %v21653_v19 }
 0x67a   :  { %16479 = vmatprep.mubr.bf16.mxu1 %v18729_v51  ;;  %16511 = vmatprep.mubr.bf16.mxu0 %v18730_v31 }
 0x67c   :  { %16478 = vmatpush3.bf16.msra.mxu1 %v21653_v19  ;;  %16510 = vmatpush3.bf16.msra.mxu0 %v21653_v19 }
 0x67d   :  { %16527 = vmatprep.subr.bf16.mxu1 %v21550_v25  ;;  %7206 = vmatprep.subr.bf16.mxu0 %v23542_v42 }
 0x67f   :  { %16480 = vmatmul.mubr.bf16.vlgmr.msra.gmra.mxu1 %v18731_v28  ;;  %16512 = vmatmul.mubr.bf16.vlgmr.msra.gmra.mxu0 %v18732_v36 }
 0x680   :  { %16528 = vmatpush3.bf16.msra.mxu1 %v21550_v25  ;;  %16483 = vmatprep.mubr.bf16.mxu1 %v18733_v45  ;;  %v18739_v25 = vld [vmem:[#allocation4 + $0x1a8] sm:$0xff]  }
 0x681   :  { %16529 = vmatprep.subr.bf16.mxu1 %v21560_v39  ;;  %16515 = vmatprep.mubr.bf16.mxu0 %v18734_v49 }
 0x684   :  { %16530 = vmatpush3.bf16.msra.mxu1 %v21560_v39  ;;  %v18742_v39 = vld [vmem:[#allocation4 + $0x1f0] sm:$0xff]  }
 0x685   :  { %16531 = vmatprep.subr.bf16.mxu1 %v21577_v16 }
 0x687   :  { %16484 = vmatmul.mubr.bf16.gmra.mxu1 %v18735_v59  ;;  %16516 = vmatmul.mubr.bf16.gmra.mxu0 %v18736_v43 }
 0x688   :  { %16532 = vmatpush3.bf16.msra.mxu1 %v21577_v16  ;;  %16487 = vmatprep.mubr.bf16.mxu1 %v18737_v41  ;;  %v18743_v16 = vld [vmem:[#allocation4 + $0x1b8] sm:$0xff]  }
 0x689   :  { %16533 = vmatprep.subr.bf16.mxu1 %v21594_v29  ;;  %16519 = vmatprep.mubr.bf16.mxu0 %v18738_v44 }
 0x68c   :  { %16534 = vmatpush3.bf16.msra.mxu1 %v21594_v29  ;;  %v18746_v29 = vld [vmem:[#allocation4 + $0x208] sm:$0xff]  }
 0x68d   :  { %16535 = vmatprep.subr.bf16.mxu1 %v21609_v2 }
 0x68f   :  { %16488 = vmatmul.mubr.bf16.gmra.mxu1 %v18739_v25  ;;  %16520 = vmatmul.mubr.bf16.gmra.mxu0 %v18740_v54 }
 0x690   :  { %16536 = vmatpush3.bf16.msra.mxu1 %v21609_v2  ;;  %16491 = vmatprep.mubr.bf16.mxu1 %v18741_v47  ;;  %v18747_v2 = vld [vmem:[#allocation4 + $0x210] sm:$0xff]  }
 0x691   :  { %16537 = vmatprep.subr.bf16.mxu1 %v21627_v55  ;;  %16523 = vmatprep.mubr.bf16.mxu0 %v18742_v39 }
 0x694   :  { %16538 = vmatpush3.bf16.msra.mxu1 %v21627_v55  ;;  %v18750_v55 = vld [vmem:[#allocation4 + $0x228] sm:$0xff]  }
 0x695   :  { %16539 = vmatprep.subr.bf16.mxu1 %v21641_v4 }
 0x697   :  { %16492 = vmatmul.mubr.bf16.gmra.mxu1 %v18743_v16  ;;  %16524 = vmatmul.mubr.bf16.gmra.mxu0 %v18744_v62 }
 0x698   :  { %16540 = vmatpush3.bf16.msra.mxu1 %v21641_v4  ;;  %16543 = vmatprep.mubr.bf16.mxu1 %v18745_v14 }
 0x699   :  { %16541 = vmatprep.subr.bf16.mxu1 %v21653_v19 }
 0x69c   :  { %16542 = vmatpush3.bf16.msra.mxu1 %v21653_v19 }
 0x69f   :  { %16544 = vmatmul.mubr.bf16.vlgmr.msra.gmra.mxu1 %v18746_v29 }
 0x6a0   :  { %16547 = vmatprep.mubr.bf16.mxu1 %v18747_v2 }
 0x6a7   :  { %16548 = vmatmul.mubr.bf16.gmra.mxu1 %v18748_v18 }
 0x6a8   :  { %16551 = vmatprep.mubr.bf16.mxu1 %v18749_v23 }
 0x6af   :  { %16552 = vmatmul.mubr.bf16.gmra.mxu1 %v18750_v55 }
 0x6b0   :  { %16555 = vmatprep.mubr.bf16.mxu1 %v18751_v26 }
 0x6b7   :  { %16556 = vmatmul.mubr.bf16.gmra.mxu1 %v18752_v15 }
 0x6b8   :  { %16575 = vmatprep.mubr.bf16.mxu1 %v21524_v61 }
 0x6df   :  { %v21774_v4 = vpop.f32.mrf.mxu1  ;;  %v16321_v60 = vpop.f32.mrf.mxu0 }
 0x6e1   :  { %v21776_v21 = vpop.f32.mrf.mxu1  ;;  %v5325_v19 = vpop.f32.mrf.mxu0 }
 0x6e3   :  { %v21778_v11 = vpop.f32.mrf.mxu1  ;;  %v16322_v9 = vpop.f32.mrf.mxu0 }
 0x6e4   :  { %v17584_v24 = vpack.i.bf16 %v16322_v9, %v16321_v60 }
 0x6e5   :  { %v21780_v51 = vpop.f32.mrf.mxu1  ;;  %v5328_v31 = vpop.f32.mrf.mxu0 }
 0x6e6   :  { %17585 = vrot.lane.b32.xlu1 %v17584_v24, %s20034_s15  ;;  %v17589_v28 = vpack.i.bf16 %v5328_v31, %v5325_v19 }
 0x6e7   :  { %v21783_v36 = vpop.f32.mrf.mxu1  ;;  %v16325_v45 = vpop.f32.mrf.mxu0 }
 0x6e8   :  { %17590 = vrot.lane.b32.xlu0 %v17589_v28, %s20034_s15 }
 0x6e9   :  { %v21786_v61 = vpop.f32.mrf.mxu1  ;;  %v5341_v49 = vpop.f32.mrf.mxu0 }
 0x6eb   :  { %v21788_v59 = vpop.f32.mrf.mxu1  ;;  %v16326_v43 = vpop.f32.mrf.mxu0 }
 0x6ec   :  { %v17594_v41 = vpack.i.bf16 %v16326_v43, %v16325_v45 }
 0x6ed   :  { %v21790_v44 = vpop.f32.mrf.mxu1  ;;  %v5344_v25 = vpop.f32.mrf.mxu0 }
 0x6ee   :  { %17595 = vrot.lane.b32.xlu1 %v17594_v41, %s20034_s15  ;;  %v17599_v54 = vpack.i.bf16 %v5344_v25, %v5341_v49 }
 0x6ef   :  { %v21793_v47 = vpop.f32.mrf.mxu1  ;;  %v21795_v39 = vpop.f32.mrf.mxu0 }
 0x6f0   :  { %17600 = vrot.lane.b32.xlu0 %v17599_v54, %s20034_s15 }
 0x6f1   :  { %v21798_v16 = vpop.f32.mrf.mxu1  ;;  %v5357_v62 = vpop.f32.mrf.mxu0 }
 0x6f3   :  { %v21800_v14 = vpop.f32.mrf.mxu1  ;;  %v21802_v29 = vpop.f32.mrf.mxu0 }
 0x6f5   :  { %v21806_v18 = vpop.f32.mrf.mxu1  ;;  %v5360_v23 = vpop.f32.mrf.mxu0 }
 0x6f6   :  { %v17604_v55 = vpack.i.bf16 %v5360_v23, %v5357_v62 }
 0x6f7   :  { %v21808_v26 = vpop.f32.mrf.mxu1  ;;  %v21810_v15 = vpop.f32.mrf.mxu0 }
 0x6f8   :  { %23617 = vst [vmem:[#allocation94_spill] sm:$0xff] %v21808_v26  ;;  %17605 = vrot.lane.b32.xlu0 %v17604_v55, %s20034_s15 }
 0x6f9   :  { %v21813_v60 = vpop.f32.mrf.mxu1  ;;  %v21815_v19 = vpop.f32.mrf.mxu0 }
 0x6fb   :  { %v21817_v9 = vpop.f32.mrf.mxu1  ;;  %v21819_v24 = vpop.f32.mrf.mxu0 }
 0x6fc   :  { %23618 = vst [vmem:[#allocation95_spill] sm:$0xff] %v21817_v9 }
 0x6fd   :  { %v21823_v28 = vpop.f32.mrf.mxu1  ;;  %v21825_v45 = vpop.f32.mrf.mxu0 }
 0x6ff   :  { %v16353_v49 = vpop.f32.mrf.mxu1  ;;  %v16385_v43 = vpop.f32.mrf.mxu0 }
 0x701   :  { %v5487_v41 = vpop.f32.mrf.mxu1  ;;  %v5649_v25 = vpop.f32.mrf.mxu0 }
 0x703   :  { %v16354_v54 = vpop.f32.mrf.mxu1  ;;  %v16386_v62 = vpop.f32.mrf.mxu0 }
 0x704   :  { %v17609_v23 = vpack.i.bf16 %v16354_v54, %v16353_v49  ;;  %v17614_v55 = vpack.i.bf16 %v16386_v62, %v16385_v43 }
 0x705   :  { %v5490_v32 = vpop.f32.mrf.mxu1  ;;  %v5652_v56 = vpop.f32.mrf.mxu0 }
 0x706   :  { %17615 = vrot.lane.b32.xlu1 %v17614_v55, %s20058_s3  ;;  %17610 = vrot.lane.b32.xlu0 %v17609_v23, %s20057_s5  ;;  %v17619_v40 = vpack.i.bf16 %v5490_v32, %v5487_v41  ;;  %v17624_v7 = vpack.i.bf16 %v5652_v56, %v5649_v25 }
 0x707   :  { %v16357_v58 = vpop.f32.mrf.mxu1  ;;  %v16389_v38 = vpop.f32.mrf.mxu0 }
 0x709   :  { %v5503_v3 = vpop.f32.mrf.mxu1  ;;  %v5665_v46 = vpop.f32.mrf.mxu0 }
 0x70a   :  { %17625 = vrot.lane.b32.xlu0 %v17624_v7, %s20058_s3  ;;  %17620 = vrot.lane.b32.xlu1 %v17619_v40, %s20057_s5 }
 0x70b   :  { %v16358_v0 = vpop.f32.mrf.mxu1  ;;  %v16390_v49 = vpop.f32.mrf.mxu0 }
 0x70c   :  { %v17629_v43 = vpack.i.bf16 %v16358_v0, %v16357_v58  ;;  %v17634_v54 = vpack.i.bf16 %v16390_v49, %v16389_v38 }
 0x70d   :  { %v5506_v62 = vpop.f32.mrf.mxu1  ;;  %v5668_v57 = vpop.f32.mrf.mxu0 }
 0x70e   :  { %17635 = vrot.lane.b32.xlu1 %v17634_v54, %s20058_s3  ;;  %17630 = vrot.lane.b32.xlu0 %v17629_v43, %s20057_s5  ;;  %v17639_v56 = vpack.i.bf16 %v5506_v62, %v5503_v3  ;;  %v17644_v41 = vpack.i.bf16 %v5668_v57, %v5665_v46 }
 0x70f   :  { %v21833_v23 = vpop.f32.mrf.mxu1  ;;  %v21835_v32 = vpop.f32.mrf.mxu0 }
 0x711   :  { %v5519_v25 = vpop.f32.mrf.mxu1  ;;  %v5681_v7 = vpop.f32.mrf.mxu0 }
 0x712   :  { %17640 = vrot.lane.b32.xlu1 %v17639_v56, %s20057_s5  ;;  %17645 = vrot.lane.b32.xlu0 %v17644_v41, %s20058_s3 }
 0x713   :  { %v21839_v0 = vpop.f32.mrf.mxu0  ;;  %v21841_v40 = vpop.f32.mrf.mxu1 }
 0x715   :  { %v5522_v58 = vpop.f32.mrf.mxu1  ;;  %v5684_v55 = vpop.f32.mrf.mxu0 }
 0x716   :  { %v17649_v49 = vpack.i.bf16 %v5522_v58, %v5519_v25  ;;  %v17654_v43 = vpack.i.bf16 %v5684_v55, %v5681_v7  ;;  %v18753_v55 = vld [vmem:[%s23619_s2 + $0x38] sm:$0xff]  }
 0x717   :  { %v21845_v3 = vpop.f32.mrf.mxu1  ;;  %v21847_v57 = vpop.f32.mrf.mxu0  ;;  %7207 = vmatpush1.bf16.msra.mxu0 %v18753_v55  ;;  %v18755_v55 = vld [vmem:[%s23619_s2 + $0x28] sm:$0xff]  }
 0x718   :  { %17650 = vrot.lane.b32.xlu1 %v17649_v49, %s20057_s5  ;;  %17655 = vrot.lane.b32.xlu0 %v17654_v43, %s20058_s3 }
 0x719   :  { %v21851_v46 = vpop.f32.mrf.mxu0  ;;  %v21853_v54 = vpop.f32.mrf.mxu1  ;;  %7208 = vmatprep.subr.bf16.mxu0 %v23542_v42 }
 0x71b   :  { %v21855_v62 = vpop.f32.mrf.mxu1  ;;  %v21857_v56 = vpop.f32.mrf.mxu0  ;;  %7209 = vmatpush1.bf16.msra.mxu0 %v18754_v6 }
 0x71c   :  { %7210 = vmatprep.subr.bf16.mxu0 %v23542_v42 }
 0x71d   :  { %v21863_v7 = vpop.f32.mrf.mxu1  ;;  %v21865_v58 = vpop.f32.mrf.mxu0 }
 0x71f   :  { %v16417_v49 = vpop.f32.mrf.mxu1  ;;  %v16449_v43 = vpop.f32.mrf.mxu0  ;;  %7211 = vmatpush1.bf16.msra.mxu0 %v18755_v55 }
 0x720   :  { %7212 = vmatprep.subr.bf16.mxu0 %v23542_v42 }
 0x721   :  { %v5811_v37 = vpop.f32.mrf.mxu1  ;;  %v5973_v13 = vpop.f32.mrf.mxu0 }
 0x723   :  { %v16418_v30 = vpop.f32.mrf.mxu1  ;;  %v16450_v10 = vpop.f32.mrf.mxu0  ;;  %7213 = vmatpush1.bf16.msra.mxu0 %v18756_v8 }
 0x724   :  { %v17659_v25 = vpack.i.bf16 %v16418_v30, %v16417_v49  ;;  %v17664_v31 = vpack.i.bf16 %v16450_v10, %v16449_v43  ;;  %v18757_v43 = vld [vmem:[%s23619_s2 + $0x18] sm:$0xff]   ;;  %7214 = vmatprep.subr.bf16.mxu0 %v23542_v42 }
 0x725   :  { %v5814_v41 = vpop.f32.mrf.mxu1  ;;  %v5976_v38 = vpop.f32.mrf.mxu0 }
 0x726   :  { %17665 = vrot.lane.b32.xlu1 %v17664_v31, %s20060_s7  ;;  %17660 = vrot.lane.b32.xlu0 %v17659_v25, %s20018_s0  ;;  %v17674_v17 = vpack.i.bf16 %v5976_v38, %v5973_v13  ;;  %v17669_v53 = vpack.i.bf16 %v5814_v41, %v5811_v37 }
 0x727   :  { %v16421_v2 = vpop.f32.mrf.mxu1  ;;  %v16453_v12 = vpop.f32.mrf.mxu0  ;;  %7215 = vmatpush1.bf16.msra.mxu0 %v18757_v43  ;;  %v18760_v43 = vld [vmem:[%s23619_s2] sm:$0xff]  }
 0x728   :  { %7216 = vmatprep.subr.bf16.mxu0 %v23542_v42 }
 0x729   :  { %v5827_v30 = vpop.f32.mrf.mxu1  ;;  %v5989_v10 = vpop.f32.mrf.mxu0 }
 0x72a   :  { %17675 = vrot.lane.b32.xlu0 %v17674_v17, %s20060_s7  ;;  %17670 = vrot.lane.b32.xlu1 %v17669_v53, %s20018_s0 }
 0x72b   :  { %v16422_v6 = vpop.f32.mrf.mxu1  ;;  %v16454_v31 = vpop.f32.mrf.mxu0 }
 0x72c   :  { %v17679_v25 = vpack.i.bf16 %v16422_v6, %v16421_v2  ;;  %v17684_v49 = vpack.i.bf16 %v16454_v31, %v16453_v12  ;;  %v18758_v2 = vld [vmem:[%s23619_s2 + $0x10] sm:$0xff]   ;;  %v18759_v6 = vld [vmem:[%s23619_s2 + $0x8] sm:$0xff]  }
 0x72d   :  { %v5830_v20 = vpop.f32.mrf.mxu1  ;;  %v5992_v13 = vpop.f32.mrf.mxu0  ;;  %7217 = vmatpush1.bf16.msra.mxu0 %v18758_v2 }
 0x72e   :  { %17685 = vrot.lane.b32.xlu1 %v17684_v49, %s20060_s7  ;;  %17680 = vrot.lane.b32.xlu0 %v17679_v25, %s20018_s0  ;;  %v17694_v53 = vpack.i.bf16 %v5992_v13, %v5989_v10  ;;  %v17689_v38 = vpack.i.bf16 %v5830_v20, %v5827_v30 }
 0x72f   :  { %v21883_v37 = vpop.f32.mrf.mxu1  ;;  %v21885_v17 = vpop.f32.mrf.mxu0  ;;  %7218 = vmatprep.subr.bf16.mxu0 %v23542_v42 }
 0x731   :  { %v5843_v12 = vpop.f32.mrf.mxu1  ;;  %v6005_v8 = vpop.f32.mrf.mxu0  ;;  %7219 = vmatpush1.bf16.msra.mxu0 %v18759_v6 }
 0x732   :  { %17690 = vrot.lane.b32.xlu1 %v17689_v38, %s20018_s0  ;;  %17695 = vrot.lane.b32.xlu0 %v17694_v53, %s20060_s7 }
 0x733   :  { %v21891_v41 = vpop.f32.mrf.mxu0  ;;  %v21893_v55 = vpop.f32.mrf.mxu1  ;;  %7220 = vmatprep.subr.bf16.mxu0 %v23542_v42 }
 0x735   :  { %v5846_v31 = vpop.f32.mrf.mxu1  ;;  %v6008_v10 = vpop.f32.mrf.mxu0  ;;  %7221 = vmatpush1.bf16.msra.mxu0 %v18760_v43 }
 0x736   :  { %7236 = vmatprep.subr.bf16.mxu0 %v23542_v42 }
 0x737   :  { %v21897_v20 = vpop.f32.mrf.mxu1  ;;  %v21899_v30 = vpop.f32.mrf.mxu0 }
 0x739   :  { %v21901_v25 = vpop.f32.mrf.mxu1  ;;  %v21903_v49 = vpop.f32.mrf.mxu0  ;;  %7237 = vmatpush2.bf16.msra.mxu0 %v18761_v33 }
 0x73b   :  { %v21907_v13 = vpop.f32.mrf.mxu1  ;;  %v21909_v53 = vpop.f32.mrf.mxu0 }
 0x73d   :  { %v21915_v63 = vpop.f32.mrf.mxu1  ;;  %v21917_v6 = vpop.f32.mrf.mxu0 }
 0x73f   :  { %v16481_v27 = vpop.f32.mrf.mxu1  ;;  %v16513_v34 = vpop.f32.mrf.mxu0 }
 0x741   :  { %v6135_v50 = vpop.f32.mrf.mxu1  ;;  %v6297_v35 = vpop.f32.mrf.mxu0 }
 0x743   :  { %v16482_v22 = vpop.f32.mrf.mxu1  ;;  %v16514_v1 = vpop.f32.mrf.mxu0 }
 0x744   :  { %v17699_v5 = vpack.i.bf16 %v16482_v22, %v16481_v27  ;;  %v17704_v38 = vpack.i.bf16 %v16514_v1, %v16513_v34  ;;  %v17724_v27 = vpack.i.bf16 %v6008_v10, %v6005_v8  ;;  %v17714_v34 = vpack.i.bf16 %v5846_v31, %v5843_v12 }
 0x745   :  { %v6138_v48 = vpop.f32.mrf.mxu1  ;;  %v6300_v52 = vpop.f32.mrf.mxu0 }
 0x746   :  { %17705 = vrot.lane.b32.xlu1 %v17704_v38, %s20061_s27  ;;  %17700 = vrot.lane.b32.xlu0 %v17699_v5, %s20062_s10  ;;  %v17709_v42 = vpack.i.bf16 %v6138_v48, %v6135_v50  ;;  %v17719_v2 = vpack.i.bf16 %v6300_v52, %v6297_v35  ;;  %v17734_v50 = vpack.i.bf16 %v21841_v40, %v21833_v23 }
 0x747   :  { %v16485_v43 = vpop.f32.mrf.mxu1  ;;  %v16517_v9 = vpop.f32.mrf.mxu0 }
 0x749   :  { %v6151_v26 = vpop.f32.mrf.mxu1  ;;  %v6313_v22 = vpop.f32.mrf.mxu0 }
 0x74a   :  { %17720 = vrot.lane.b32.xlu0 %v17719_v2, %s20061_s27  ;;  %17710 = vrot.lane.b32.xlu1 %v17709_v42, %s20062_s10  ;;  %v23620_v42 = vpack.i.bf16 %v21802_v29, %v21795_v39  ;;  %v17764_v29 = vpack.i.bf16 %v21893_v55, %v21883_v37 }
 0x74b   :  { %v16486_v33 = vpop.f32.mrf.mxu1  ;;  %v16518_v35 = vpop.f32.mrf.mxu0 }
 0x74c   :  { %v17739_v52 = vpack.i.bf16 %v16486_v33, %v16485_v43  ;;  %v17744_v12 = vpack.i.bf16 %v16518_v35, %v16517_v9  ;;  %v23621_v33 = vpack.i.bf16 %v21839_v0, %v21835_v32 }
 0x74d   :  { %v6154_v1 = vpop.f32.mrf.mxu1  ;;  %v6316_v8 = vpop.f32.mrf.mxu0 }
 0x74e   :  { %17725 = vrot.lane.b32.xlu0 %v17724_v27, %s20060_s7  ;;  %17715 = vrot.lane.b32.xlu1 %v17714_v34, %s20018_s0  ;;  %v17749_v23 = vpack.i.bf16 %v6154_v1, %v6151_v26  ;;  %v17759_v40 = vpack.i.bf16 %v6316_v8, %v6313_v22  ;;  %v17774_v34 = vpack.i.bf16 %v21825_v45, %v21815_v19 }
 0x74f   :  { %v16489_v38 = vpop.f32.mrf.mxu1  ;;  %v16521_v2 = vpop.f32.mrf.mxu0  ;;  %v17769_v22 = vpack.i.bf16 %v21891_v41, %v21885_v17 }
 0x751   :  { %v6167_v5 = vpop.f32.mrf.mxu1  ;;  %v6329_v9 = vpop.f32.mrf.mxu0 }
 0x752   :  { %17735 = vrot.lane.b32.xlu0 %v17734_v50, %s20057_s5  ;;  %17730 = vrot.lane.b32.xlu1 %v23620_v42, %s20034_s15 }
 0x753   :  { %v16490_v48 = vpop.f32.mrf.mxu1  ;;  %v16522_v1 = vpop.f32.mrf.mxu0 }
 0x754   :  { %v17779_v55 = vpack.i.bf16 %v16490_v48, %v16489_v38  ;;  %v17784_v35 = vpack.i.bf16 %v16522_v1, %v16521_v2  ;;  %v17794_v38 = vpack.i.bf16 %v21863_v7, %v21853_v54  ;;  %v17804_v48 = vpack.i.bf16 %v21865_v58, %v21851_v46 }
 0x755   :  { %v6170_v31 = vpop.f32.mrf.mxu1  ;;  %v6332_v0 = vpop.f32.mrf.mxu0  ;;  %v23622_v46 = vpack.i.bf16 %v21855_v62, %v21845_v3  ;;  %v23623_v7 = vpack.i.bf16 %v21819_v24, %v21810_v15  ;;  %v23625_v3 = vpack.i.bf16 %v21857_v56, %v21847_v57 }
 0x756   :  { %17745 = vrot.lane.b32.xlu1 %v17744_v12, %s20061_s27  ;;  %17740 = vrot.lane.b32.xlu0 %v17739_v52, %s20062_s10  ;;  %v17789_v45 = vpack.i.bf16 %v6170_v31, %v6167_v5  ;;  %v17799_v17 = vpack.i.bf16 %v6332_v0, %v6329_v9  ;;  %v17809_v5 = vpack.i.bf16 %v21915_v63, %v21901_v25 }
 0x757   :  { %v16493_v10 = vpop.f32.mrf.mxu1  ;;  %v16525_v41 = vpop.f32.mrf.mxu0  ;;  %v17814_v12 = vpack.i.bf16 %v21917_v6, %v21903_v49  ;;  %v23624_v49 = vpack.i.bf16 %v21907_v13, %v21897_v20  ;;  %v23626_v6 = vpack.i.bf16 %v21909_v53, %v21899_v30 }
 0x758   :  { %v17586_v62 = vpop.permute.xlu1 %17585 }
 0x759   :  { %v6183_v27 = vpop.f32.mrf.mxu1  ;;  %v6345_v52 = vpop.f32.mrf.mxu0  ;;  %v17588_v0 = vunpack.i.h.bf16 %v17586_v62 }
 0x75a   :  { %17760 = vrot.lane.b32.xlu0 %v17759_v40, %s20061_s27  ;;  %17750 = vrot.lane.b32.xlu1 %v17749_v23, %s20062_s10  ;;  %v17591_v25 = vpop.permute.xlu0 %17590 }
 0x75b   :  { %v16494_v39 = vpop.f32.mrf.mxu1  ;;  %v16526_v8 = vpop.f32.mrf.mxu0  ;;  %v17593_v1 = vunpack.i.h.bf16 %v17591_v25 }
 0x75c   :  { %v17854_v24 = vpack.i.bf16 %v16494_v39, %v16493_v10  ;;  %v17859_v13 = vpack.i.bf16 %v16526_v8, %v16525_v41 }
 0x75d   :  { %v6186_v43 = vpop.f32.mrf.mxu1  ;;  %v6348_v54 = vpop.f32.mrf.mxu0 }
 0x75e   :  { %17765 = vrot.lane.b32.xlu0 %v17764_v29, %s20018_s0  ;;  %17755 = vrot.lane.b32.xlu1 %v23621_v33, %s20058_s3  ;;  %v17829_v63 = vpack.i.bf16 %v6186_v43, %v6183_v27  ;;  %v17839_v58 = vpack.i.bf16 %v6348_v54, %v6345_v52 }
 0x75f   :  { %v21945_v26 = vpop.f32.mrf.mxu1 }
 0x760   :  { %v21999_v31 = vpop.permute.xlu1 %17595 }
 0x761   :  { %v6459_v50 = vpop.f32.mrf.mxu1 }
 0x762   :  { %17775 = vrot.lane.b32.xlu0 %v17774_v34, %s20034_s15  ;;  %17770 = vrot.lane.b32.xlu1 %v17769_v22, %s20060_s7  ;;  %v21992_v15 = vpop.permute.xlu0 %17600 }
 0x763   :  { %v21953_v37 = vpop.f32.mrf.mxu1 }
 0x764   :  { %v7090_v32 = vpack.c.bf16 %v21953_v37, %v21945_v26 }
 0x765   :  { %v6462_v42 = vpop.f32.mrf.mxu1 }
 0x766   :  { %17785 = vrot.lane.b32.xlu1 %v17784_v35, %s20061_s27  ;;  %17780 = vrot.lane.b32.xlu0 %v17779_v55, %s20062_s10  ;;  %v7088_v19 = vpack.c.bf16 %v6462_v42, %v6459_v50  ;;  %v17592_v50 = vunpack.i.l.bf16 %v17591_v25  ;;  %v17587_v42 = vunpack.i.l.bf16 %v17586_v62 }
 0x768   :  { %14104 = vmatprep.mubr.msk.bf16.mxu0 %vm4795_vm4, %v7088_v19  ;;  %v6970_v19 = vsel %vm4795_vm4, %v21776_v21, %v17592_v50  ;;  %v6972_v21 = vsel %vm4795_vm4, %v21774_v4, %v17587_v42 }
 0x76a   :  { %17800 = vrot.lane.b32.xlu0 %v17799_v17, %s20061_s27  ;;  %17790 = vrot.lane.b32.xlu1 %v17789_v45, %s20062_s10  ;;  %v22001_v20 = vpop.permute.xlu0 %17605  ;;  %v6971_v45 = vsel %vm4795_vm4, %v21780_v51, %v17593_v1  ;;  %v6973_v51 = vsel %vm4795_vm4, %v21778_v11, %v17588_v0 }
 0x76e   :  { %17805 = vrot.lane.b32.xlu0 %v17804_v48, %s20058_s3  ;;  %17795 = vrot.lane.b32.xlu1 %v17794_v38, %s20057_s5 }
 0x772   :  { %17815 = vrot.lane.b32.xlu0 %v17814_v12, %s20060_s7  ;;  %17810 = vrot.lane.b32.xlu1 %v17809_v5, %s20018_s0 }
 0x776   :  { %17825 = vrot.lane.b32.xlu0 %v23622_v46, %s20057_s5  ;;  %17820 = vrot.lane.b32.xlu1 %v23623_v7, %s20034_s15 }
 0x778   :  { %v17616_v57 = vpop.permute.xlu1 %17615  ;;  %v17611_v56 = vpop.permute.xlu0 %17610 }
 0x779   :  { %v17613_v38 = vunpack.i.h.bf16 %v17611_v56  ;;  %v17612_v48 = vunpack.i.l.bf16 %v17611_v56  ;;  %v17618_v7 = vunpack.i.h.bf16 %v17616_v57 }
 0x77a   :  { %17840 = vrot.lane.b32.xlu0 %v17839_v58, %s20061_s27  ;;  %17830 = vrot.lane.b32.xlu1 %v17829_v63, %s20062_s10  ;;  %v17617_v63 = vunpack.i.l.bf16 %v17616_v57 }
 0x77c   :  { %v17626_v23 = vpop.permute.xlu0 %17625  ;;  %v17621_v40 = vpop.permute.xlu1 %17620 }
 0x77d   :  { %v17623_v55 = vunpack.i.h.bf16 %v17621_v40  ;;  %v17622_v35 = vunpack.i.l.bf16 %v17621_v40  ;;  %v17628_v52 = vunpack.i.h.bf16 %v17626_v23  ;;  %v17627_v5 = vunpack.i.l.bf16 %v17626_v23 }
 0x77e   :  { %17845 = vrot.lane.b32.xlu0 %v23624_v49, %s20018_s0  ;;  %17835 = vrot.lane.b32.xlu1 %v23625_v3, %s20058_s3  ;;  %v6989_v49 = vsel %vm4863_vm8, %v6973_v51, %v17613_v38  ;;  %v6988_v3 = vsel %vm4863_vm8, %v6972_v21, %v17612_v48 }
 0x77f   :  { %v6987_v12 = vsel %vm4863_vm8, %v6971_v45, %v17623_v55  ;;  %v6986_v8 = vsel %vm4863_vm8, %v6970_v19, %v17622_v35  ;;  %v7005_v1 = vsel %vm7002_vm10, %v6988_v3, %v17617_v63  ;;  %v7006_v50 = vsel %vm7002_vm10, %v6989_v49, %v17618_v7 }
 0x780   :  { %v22004_v2 = vpop.permute.xlu1 %17635  ;;  %v22006_v10 = vpop.permute.xlu0 %17630  ;;  %v7003_v62 = vsel %vm7002_vm10, %v6986_v8, %v17627_v5  ;;  %v17603_v63 = vunpack.i.h.bf16 %v21992_v15  ;;  %v17602_v49 = vunpack.i.l.bf16 %v21992_v15  ;;  %v17598_v15 = vunpack.i.h.bf16 %v21999_v31 }
 0x782   :  { %17850 = vrot.lane.b32.xlu1 %v23626_v6, %s20060_s7  ;;  %17855 = vrot.lane.b32.xlu0 %v17854_v24, %s20062_s10  ;;  %v7004_v24 = vsel %vm7002_vm10, %v6987_v12, %v17628_v52  ;;  %v22042_v6 = vpop.f32.mrf.mxu1 }
 0x784   :  { %v22008_v27 = vpop.permute.xlu1 %17640  ;;  %v22010_v30 = vpop.permute.xlu0 %17645 }
 0x785   :  { %v22050_v19 = vpop.f32.mrf.mxu1 }
 0x786   :  { %17860 = vrot.lane.b32.xlu1 %v17859_v13, %s20061_s27 }
 0x78a   :  { %v22012_v53 = vpop.permute.xlu1 %17650  ;;  %v22014_v39 = vpop.permute.xlu0 %17655 }
 0x798   :  { %v22016_v29 = vpop.permute.xlu1 %17665  ;;  %v17661_v9 = vpop.permute.xlu0 %17660 }
 0x799   :  { %v17663_v13 = vunpack.i.h.bf16 %v17661_v9  ;;  %v17662_v4 = vunpack.i.l.bf16 %v17661_v9  ;;  %v17668_v40 = vunpack.i.h.bf16 %v22016_v29 }
 0x79b   :  { %v7023_v45 = vsel %vm7019_vm11, %v7006_v50, %v17663_v13  ;;  %v7022_v38 = vsel %vm7019_vm11, %v7005_v1, %v17662_v4 }
 0x79c   :  { %v17676_v43 = vpop.permute.xlu0 %17675  ;;  %v17671_v33 = vpop.permute.xlu1 %17670  ;;  %v7040_v4 = vsel %vm7036_vm12, %v7023_v45, %v17668_v40  ;;  %v6975_v40 = vsel %vm4795_vm4, %v21790_v44, %v17603_v63 }
 0x79d   :  { %v17673_v54 = vunpack.i.h.bf16 %v17671_v33  ;;  %v17672_v46 = vunpack.i.l.bf16 %v17671_v33  ;;  %v17678_v56 = vunpack.i.h.bf16 %v17676_v43  ;;  %v17677_v23 = vunpack.i.l.bf16 %v17676_v43 }
 0x79e   :  { %v17667_v33 = vunpack.i.l.bf16 %v22016_v29 }
 0x79f   :  { %v7021_v11 = vsel %vm7019_vm11, %v7004_v24, %v17673_v54  ;;  %v7020_v57 = vsel %vm7019_vm11, %v7003_v62, %v17672_v46  ;;  %v17597_v54 = vunpack.i.l.bf16 %v21999_v31  ;;  %v17633_v31 = vunpack.i.h.bf16 %v22006_v10 }
 0x7a0   :  { %v22018_v34 = vpop.permute.xlu1 %17685  ;;  %v22020_v22 = vpop.permute.xlu0 %17680  ;;  %v7037_v48 = vsel %vm7036_vm12, %v7020_v57, %v17677_v23  ;;  %v7038_v29 = vsel %vm7036_vm12, %v7021_v11, %v17678_v56  ;;  %v7039_v13 = vsel %vm7036_vm12, %v7022_v38, %v17667_v33  ;;  %v17643_v56 = vunpack.i.h.bf16 %v22008_v27 }
 0x7a1   :  { %v17642_v23 = vunpack.i.l.bf16 %v22008_v27  ;;  %v6976_v1 = vsel %vm4795_vm4, %v21783_v36, %v17597_v54  ;;  %v6974_v27 = vsel %vm4795_vm4, %v21786_v61, %v17602_v49  ;;  %v17632_v33 = vunpack.i.l.bf16 %v22006_v10 }
 0x7a2   :  { %v6991_v37 = vsel %vm4863_vm8, %v6975_v40, %v17643_v56  ;;  %v6977_v10 = vsel %vm4795_vm4, %v21788_v59, %v17598_v15 }
 0x7a3   :  { %v6990_v61 = vsel %vm4863_vm8, %v6974_v27, %v17642_v23  ;;  %v6993_v38 = vsel %vm4863_vm8, %v6977_v10, %v17633_v31 }
 0x7a4   :  { %v22026_v17 = vpop.permute.xlu1 %17690  ;;  %v22028_v41 = vpop.permute.xlu0 %17695 }
 0x7a5   :  { %v17692_v44 = vunpack.i.l.bf16 %v22026_v17  ;;  %v17698_v59 = vunpack.i.h.bf16 %v22028_v41 }
 0x7b8   :  { %v22036_v58 = vpop.permute.xlu1 %17705  ;;  %v17701_v25 = vpop.permute.xlu0 %17700 }
 0x7b9   :  { %v17703_v52 = vunpack.i.h.bf16 %v17701_v25  ;;  %v17702_v5 = vunpack.i.l.bf16 %v17701_v25  ;;  %v22067_v25 = vpop.f32.mrf.mxu1  ;;  %v17708_v62 = vunpack.i.h.bf16 %v22036_v58  ;;  %v17707_v24 = vunpack.i.l.bf16 %v22036_v58 }
 0x7bb   :  { %v7057_v11 = vsel %vm7053_vm13, %v7040_v4, %v17703_v52  ;;  %v7056_v57 = vsel %vm7053_vm13, %v7039_v13, %v17702_v5  ;;  %v6478_v36 = vpop.f32.mrf.mxu1  ;;  %v17697_v5 = vunpack.i.l.bf16 %v22028_v41  ;;  %v17688_v13 = vunpack.i.h.bf16 %v22018_v34 }
 0x7bc   :  { %v17721_v55 = vpop.permute.xlu0 %17720  ;;  %v17711_v35 = vpop.permute.xlu1 %17710  ;;  %v7074_v26 = vsel %vm7070_vm14, %v7057_v11, %v17708_v62  ;;  %v7092_v45 = vpack.c.bf16 %v6478_v36, %v22050_v19 }
 0x7bd   :  { %v17723_v0 = vunpack.i.h.bf16 %v17721_v55  ;;  %v17722_v9 = vunpack.i.l.bf16 %v17721_v55  ;;  %v17713_v42 = vunpack.i.h.bf16 %v17711_v35  ;;  %v17712_v43 = vunpack.i.l.bf16 %v17711_v35 }
 0x7be   :  { %v17648_v55 = vunpack.i.h.bf16 %v22010_v30  ;;  %v17647_v35 = vunpack.i.l.bf16 %v22010_v30 }
 0x7bf   :  { %v7055_v12 = vsel %vm7053_vm13, %v7038_v29, %v17713_v42  ;;  %v7054_v8 = vsel %vm7053_vm13, %v7037_v48, %v17712_v43  ;;  %v17637_v42 = vunpack.i.l.bf16 %v22004_v2  ;;  %v6992_v48 = vsel %vm4863_vm8, %v6976_v1, %v17632_v33 }
 0x7c0   :  { %v7072_v46 = vsel %vm7070_vm14, %v7055_v12, %v17723_v0  ;;  %v7071_v21 = vsel %vm7070_vm14, %v7054_v8, %v17722_v9  ;;  %v22061_v51 = vpop.permute.xlu0 %17725  ;;  %v22063_v7 = vpop.permute.xlu1 %17715  ;;  %v7073_v0 = vsel %vm7070_vm14, %v7056_v57, %v17707_v24  ;;  %v17638_v9 = vunpack.i.h.bf16 %v22004_v2 }
 0x7c1   :  { %v7087_v3 = vpack.c.bf16 %v7072_v46, %v7071_v21  ;;  %v7089_v29 = vpack.c.bf16 %v7074_v26, %v7073_v0  ;;  %v7007_v52 = vsel %vm7002_vm10, %v6990_v61, %v17647_v35  ;;  %v22115_v12 = vpop.f32.mrf.mxu1  ;;  %v17683_v2 = vunpack.i.h.bf16 %v22020_v22 }
 0x7c2   :  { %v17682_v8 = vunpack.i.l.bf16 %v22020_v22  ;;  %v7024_v54 = vsel %vm7019_vm11, %v7007_v52, %v17692_v44  ;;  %v7009_v46 = vsel %vm7002_vm10, %v6992_v48, %v17637_v42  ;;  %v7010_v21 = vsel %vm7002_vm10, %v6993_v38, %v17638_v9 }
 0x7c3   :  { %7239 = vmatmul.mubr.bf16.vlgmr.msra.gmra.mxu0 %v7087_v3  ;;  %v17687_v22 = vunpack.i.l.bf16 %v22018_v34  ;;  %v7041_v4 = vsel %vm7036_vm12, %v7024_v54, %v17697_v5  ;;  %v22128_v23 = vpop.f32.mrf.mxu1  ;;  %v7027_v11 = vsel %vm7019_vm11, %v7010_v21, %v17683_v2  ;;  %v17607_v35 = vunpack.i.l.bf16 %v22001_v20 }
 0x7c4   :  { %v22080_v50 = vpop.permute.xlu0 %17735  ;;  %v22082_v58 = vpop.permute.xlu1 %17730  ;;  %14105 = vmatprep.mubr.msk.bf16.mxu0 %vm4795_vm4, %v7090_v32  ;;  %v17693_v32 = vunpack.i.h.bf16 %v22026_v17  ;;  %v7008_v17 = vsel %vm7002_vm10, %v6991_v37, %v17648_v55  ;;  %v7026_v57 = vsel %vm7019_vm11, %v7009_v46, %v17682_v8  ;;  %v17608_v55 = vunpack.i.h.bf16 %v22001_v20 }
 0x7c5   :  { %v17653_v0 = vunpack.i.h.bf16 %v22012_v53  ;;  %v17652_v26 = vunpack.i.l.bf16 %v22012_v53  ;;  %v7094_v37 = vpack.c.bf16 %v22067_v25, %v22042_v6  ;;  %v7043_v9 = vsel %vm7036_vm12, %v7026_v57, %v17687_v22 }
 0x7c6   :  { %v7025_v19 = vsel %vm7019_vm11, %v7008_v17, %v17693_v32  ;;  %v22144_v32 = vpop.f32.mrf.mxu1  ;;  %v7044_v42 = vsel %vm7036_vm12, %v7027_v11, %v17688_v13  ;;  %v17733_v20 = vunpack.i.h.bf16 %v22082_v58  ;;  %v6979_v38 = vsel %vm4795_vm4, %v21806_v18, %v17608_v55 }
 0x7c7   :  { %v7042_v56 = vsel %vm7036_vm12, %v7025_v19, %v17698_v59  ;;  %v17658_v48 = vunpack.i.h.bf16 %v22014_v39  ;;  %v17718_v17 = vunpack.i.h.bf16 %v22063_v7  ;;  %v17717_v59 = vunpack.i.l.bf16 %v22063_v7 }
 0x7c8   :  { %v22106_v30 = vpop.permute.xlu1 %17745  ;;  %v17741_v43 = vpop.permute.xlu0 %17740  ;;  %v17737_v2 = vunpack.i.l.bf16 %v22080_v50 }
 0x7c9   :  { %v17743_v27 = vunpack.i.h.bf16 %v17741_v43  ;;  %v17742_v40 = vunpack.i.l.bf16 %v17741_v43  ;;  %v17748_v44 = vunpack.i.h.bf16 %v22106_v30  ;;  %v17747_v10 = vunpack.i.l.bf16 %v22106_v30  ;;  %v6494_v5 = vpop.f32.mrf.mxu1 }
 0x7ca   :  { %v17732_v43 = vunpack.i.l.bf16 %v22082_v58  ;;  %v6978_v30 = vsel %vm4795_vm4, %v21798_v16, %v17607_v35  ;;  %v6995_v58 = vsel %vm4863_vm8, %v6979_v38, %v17653_v0  ;;  %v17738_v16 = vunpack.i.h.bf16 %v22080_v50 }
 0x7cb   :  { %7247 = vmatmul.mubr.bf16.gmra.mxu0 %v7089_v29  ;;  %v7061_v53 = vsel %vm7053_vm13, %v7044_v42, %v17743_v27  ;;  %v17657_v29 = vunpack.i.l.bf16 %v22014_v39  ;;  %v6994_v52 = vsel %vm4863_vm8, %v6978_v30, %v17652_v26  ;;  %v6981_v39 = vsel %vm4795_vm4, %v21800_v14, %v17733_v20 }
 0x7cc   :  { %v17761_v63 = vpop.permute.xlu0 %17760  ;;  %v17751_v49 = vpop.permute.xlu1 %17750  ;;  %14106 = vmatprep.mubr.msk.bf16.mxu0 %vm4795_vm4, %v7092_v45  ;;  %v7060_v45 = vsel %vm7053_vm13, %v7043_v9, %v17742_v40  ;;  %v7078_v8 = vsel %vm7070_vm14, %v7061_v53, %v17748_v44  ;;  %v6980_v19 = vsel %vm4795_vm4, %v21793_v47, %v17732_v43  ;;  %v17728_v50 = vunpack.i.h.bf16 %v22061_v51 }
 0x7cd   :  { %v17763_v41 = vunpack.i.h.bf16 %v17761_v63  ;;  %v17762_v3 = vunpack.i.l.bf16 %v17761_v63  ;;  %v17753_v62 = vunpack.i.h.bf16 %v17751_v49  ;;  %v17752_v24 = vunpack.i.l.bf16 %v17751_v49 }
 0x7ce   :  { %v7077_v18 = vsel %vm7070_vm14, %v7060_v45, %v17747_v10  ;;  %v7011_v63 = vsel %vm7002_vm10, %v6994_v52, %v17657_v29  ;;  %v7012_v49 = vsel %vm7002_vm10, %v6995_v58, %v17658_v48 }
 0x7cf   :  { %v7059_v15 = vsel %vm7053_vm13, %v7042_v56, %v17753_v62  ;;  %v7058_v1 = vsel %vm7053_vm13, %v7041_v4, %v17752_v24  ;;  %v7029_v14 = vsel %vm7019_vm11, %v7012_v49, %v17718_v17  ;;  %v7028_v62 = vsel %vm7019_vm11, %v7011_v63, %v17717_v59  ;;  %v22186_v24 = vpop.f32.mrf.mxu1 }
 0x7d0   :  { %v22134_v31 = vpop.permute.xlu0 %17765  ;;  %v17756_v33 = vpop.permute.xlu1 %17755  ;;  %v7075_v34 = vsel %vm7070_vm14, %v7058_v1, %v17762_v3  ;;  %v7076_v36 = vsel %vm7070_vm14, %v7059_v15, %v17763_v41  ;;  %v7096_v41 = vpack.c.bf16 %v6494_v5, %v22128_v23  ;;  %v17727_v3 = vunpack.i.l.bf16 %v22061_v51 }
 0x7d1   :  { %v7091_v61 = vpack.c.bf16 %v7076_v36, %v7075_v34  ;;  %v17758_v54 = vunpack.i.h.bf16 %v17756_v33  ;;  %v17757_v46 = vunpack.i.l.bf16 %v17756_v33  ;;  %v7093_v47 = vpack.c.bf16 %v7078_v8, %v7077_v18  ;;  %v6507_v55 = vpop.f32.mrf.mxu1 }
 0x7d2   :  { %v17768_v13 = vunpack.i.h.bf16 %v22134_v31  ;;  %v17767_v22 = vunpack.i.l.bf16 %v22134_v31  ;;  %v6996_v4 = vsel %vm4863_vm8, %v6980_v19, %v17737_v2  ;;  %v6997_v56 = vsel %vm4863_vm8, %v6981_v39, %v17738_v16 }
 0x7d3   :  { %7255 = vmatmul.mubr.bf16.gmra.mxu0 %v7091_v61  ;;  %v7014_v11 = vsel %vm7002_vm10, %v6997_v56, %v17758_v54  ;;  %v7013_v23 = vsel %vm7002_vm10, %v6996_v4, %v17757_v46  ;;  %v7045_v31 = vsel %vm7036_vm12, %v7028_v62, %v17727_v3  ;;  %v7046_v36 = vsel %vm7036_vm12, %v7029_v14, %v17728_v50  ;;  %v22211_v58 = vpop.f32.mrf.mxu1 }
 0x7d4   :  { %v22154_v6 = vpop.permute.xlu0 %17775  ;;  %v22156_v25 = vpop.permute.xlu1 %17770  ;;  %14107 = vmatprep.mubr.msk.bf16.mxu0 %vm4795_vm4, %v7094_v37  ;;  %v7030_v61 = vsel %vm7019_vm11, %v7013_v23, %v17767_v22  ;;  %v7031_v44 = vsel %vm7019_vm11, %v7014_v11, %v17768_v13  ;;  %v7098_v59 = vpack.c.bf16 %v22144_v32, %v22115_v12 }
 0x7d5   :  { %v17773_v51 = vunpack.i.h.bf16 %v22156_v25  ;;  %v17772_v57 = vunpack.i.l.bf16 %v22156_v25  ;;  %v17778_v43 = vunpack.i.h.bf16 %v22154_v6  ;;  %v17777_v53 = vunpack.i.l.bf16 %v22154_v6  ;;  %v6510_v32 = vpop.f32.mrf.mxu1 }
 0x7d6   :  { %v7100_v50 = vpack.c.bf16 %v6510_v32, %v6507_v55  ;;  %v19340_v32 = vld [vmem:[#allocation4 + $0xc0] sm:$0xff]  }
 0x7d7   :  { %v7047_v45 = vsel %vm7036_vm12, %v7030_v61, %v17772_v57  ;;  %v7048_v25 = vsel %vm7036_vm12, %v7031_v44, %v17773_v51  ;;  %v6983_v2 = vsel %vm4795_vm4, %v21823_v28, %v17778_v43  ;;  %v6982_v18 = vsel %vm4795_vm4, %v21813_v60, %v17777_v53 }
 0x7d8   :  { %v22177_v21 = vpop.permute.xlu1 %17785  ;;  %v17781_v7 = vpop.permute.xlu0 %17780 }
 0x7d9   :  { %v17783_v35 = vunpack.i.h.bf16 %v17781_v7  ;;  %v17782_v0 = vunpack.i.l.bf16 %v17781_v7  ;;  %v17788_v30 = vunpack.i.h.bf16 %v22177_v21  ;;  %v17787_v38 = vunpack.i.l.bf16 %v22177_v21 }
 0x7db   :  { %7263 = vmatmul.mubr.bf16.gmra.mxu0 %v7093_v47  ;;  %v7065_v52 = vsel %vm7053_vm13, %v7048_v25, %v17783_v35  ;;  %v7064_v17 = vsel %vm7053_vm13, %v7047_v45, %v17782_v0  ;;  %v7102_v45 = vpack.c.bf16 %v22211_v58, %v22186_v24 }
 0x7dc   :  { %v17801_v15 = vpop.permute.xlu0 %17800  ;;  %v17791_v1 = vpop.permute.xlu1 %17790  ;;  %14108 = vmatprep.mubr.msk.bf16.mxu0 %vm4795_vm4, %v7096_v41  ;;  %v7081_v54 = vsel %vm7070_vm14, %v7064_v17, %v17787_v38  ;;  %v7082_v12 = vsel %vm7070_vm14, %v7065_v52, %v17788_v30 }
 0x7dd   :  { %v17803_v27 = vunpack.i.h.bf16 %v17801_v15  ;;  %v17802_v40 = vunpack.i.l.bf16 %v17801_v15  ;;  %v17793_v33 = vunpack.i.h.bf16 %v17791_v1  ;;  %v17792_v34 = vunpack.i.l.bf16 %v17791_v1 }
 0x7de   :  { %v7097_v60 = vpack.c.bf16 %v7082_v12, %v7081_v54 }
 0x7df   :  { %v7063_v26 = vsel %vm7053_vm13, %v7046_v36, %v17793_v33  ;;  %v7062_v37 = vsel %vm7053_vm13, %v7045_v31, %v17792_v34  ;;  %v23628_v31 = vld [vmem:[#allocation95_spill] sm:$0xff] }
 0x7e0   :  { %v17806_v10 = vpop.permute.xlu0 %17805  ;;  %v17796_v9 = vpop.permute.xlu1 %17795  ;;  %v7079_v42 = vsel %vm7070_vm14, %v7062_v37, %v17802_v40  ;;  %v7080_v20 = vsel %vm7070_vm14, %v7063_v26, %v17803_v27  ;;  %v23627_v27 = vld [vmem:[#allocation94_spill] sm:$0xff] }
 0x7e1   :  { %v17797_v48 = vunpack.i.l.bf16 %v17796_v9  ;;  %v7095_v29 = vpack.c.bf16 %v7080_v20, %v7079_v42  ;;  %v17798_v6 = vunpack.i.h.bf16 %v17796_v9  ;;  %v17807_v8 = vunpack.i.l.bf16 %v17806_v10 }
 0x7e2   :  { %v17808_v39 = vunpack.i.h.bf16 %v17806_v10 }
 0x7e3   :  { %7271 = vmatmul.mubr.bf16.gmra.mxu0 %v7095_v29  ;;  %v6998_v19 = vsel %vm4863_vm8, %v6982_v18, %v17797_v48  ;;  %v6999_v46 = vsel %vm4863_vm8, %v6983_v2, %v17798_v6 }
 0x7e4   :  { %v17816_v5 = vpop.permute.xlu0 %17815  ;;  %v17811_v16 = vpop.permute.xlu1 %17810  ;;  %14109 = vmatprep.mubr.msk.bf16.mxu0 %vm4795_vm4, %v7098_v59  ;;  %v7015_v49 = vsel %vm7002_vm10, %v6998_v19, %v17807_v8  ;;  %v7016_v14 = vsel %vm7002_vm10, %v6999_v46, %v17808_v39  ;;  %v22256_v46 = vld [vmem:[#allocation10] ss:$0 sm:$0xff] }
 0x7e5   :  { %v17813_v21 = vunpack.i.h.bf16 %v17811_v16  ;;  %v17812_v7 = vunpack.i.l.bf16 %v17811_v16  ;;  %v17818_v41 = vunpack.i.h.bf16 %v17816_v5  ;;  %v17817_v3 = vunpack.i.l.bf16 %v17816_v5 }
 0x7e7   :  { %v7032_v47 = vsel %vm7019_vm11, %v7015_v49, %v17812_v7  ;;  %v7033_v13 = vsel %vm7019_vm11, %v7016_v14, %v17813_v21 }
 0x7e8   :  { %v17826_v63 = vpop.permute.xlu0 %17825  ;;  %v17821_v28 = vpop.permute.xlu1 %17820  ;;  %v7049_v33 = vsel %vm7036_vm12, %v7032_v47, %v17817_v3  ;;  %v7050_v34 = vsel %vm7036_vm12, %v7033_v13, %v17818_v41 }
 0x7e9   :  { %v17822_v62 = vunpack.i.l.bf16 %v17821_v28  ;;  %v17823_v22 = vunpack.i.h.bf16 %v17821_v28  ;;  %v17827_v4 = vunpack.i.l.bf16 %v17826_v63  ;;  %v17828_v1 = vunpack.i.h.bf16 %v17826_v63 }
 0x7eb   :  { %7279 = vmatmul.mubr.bf16.gmra.mxu0 %v7097_v60  ;;  %v6984_v40 = vsel %vm4795_vm4, %v23627_v27, %v17822_v62  ;;  %v6985_v36 = vsel %vm4795_vm4, %v23628_v31, %v17823_v22 }
 0x7ec   :  { %v17841_v56 = vpop.permute.xlu0 %17840  ;;  %v17831_v11 = vpop.permute.xlu1 %17830  ;;  %14110 = vmatprep.mubr.msk.bf16.mxu0 %vm4795_vm4, %v7100_v50  ;;  %v7000_v44 = vsel %vm4863_vm8, %v6984_v40, %v17827_v4  ;;  %v7001_v43 = vsel %vm4863_vm8, %v6985_v36, %v17828_v1 }
 0x7ed   :  { %v17843_v23 = vunpack.i.h.bf16 %v17841_v56  ;;  %v17842_v51 = vunpack.i.l.bf16 %v17841_v56  ;;  %v17833_v57 = vunpack.i.h.bf16 %v17831_v11  ;;  %v17832_v15 = vunpack.i.l.bf16 %v17831_v11 }
 0x7ef   :  { %v7067_v55 = vsel %vm7053_vm13, %v7050_v34, %v17833_v57  ;;  %v7066_v35 = vsel %vm7053_vm13, %v7049_v33, %v17832_v15 }
 0x7f0   :  { %v17846_v0 = vpop.permute.xlu0 %17845  ;;  %v17836_v26 = vpop.permute.xlu1 %17835  ;;  %v7083_v37 = vsel %vm7070_vm14, %v7066_v35, %v17842_v51  ;;  %v7084_v61 = vsel %vm7070_vm14, %v7067_v55, %v17843_v23 }
 0x7f1   :  { %v17838_v10 = vunpack.i.h.bf16 %v17836_v26  ;;  %v17837_v9 = vunpack.i.l.bf16 %v17836_v26  ;;  %v17848_v42 = vunpack.i.h.bf16 %v17846_v0  ;;  %v17847_v20 = vunpack.i.l.bf16 %v17846_v0 }
 0x7f2   :  { %v7099_v53 = vpack.c.bf16 %v7084_v61, %v7083_v37 }
 0x7f3   :  { %v7018_v25 = vsel %vm7002_vm10, %v7001_v43, %v17838_v10  ;;  %v7017_v30 = vsel %vm7002_vm10, %v7000_v44, %v17837_v9 }
 0x7f4   :  { %7287 = vmatmul.mubr.bf16.gmra.mxu0 %v7099_v53  ;;  %v17851_v38 = vpop.permute.xlu1 %17850  ;;  %v17856_v48 = vpop.permute.xlu0 %17855  ;;  %v7034_v17 = vsel %vm7019_vm11, %v7017_v30, %v17847_v20  ;;  %v7035_v59 = vsel %vm7019_vm11, %v7018_v25, %v17848_v42 }
 0x7f5   :  { %v17853_v29 = vunpack.i.h.bf16 %v17851_v38  ;;  %v17852_v52 = vunpack.i.l.bf16 %v17851_v38  ;;  %14111 = vmatprep.mubr.msk.bf16.mxu0 %vm4795_vm4, %v7102_v45  ;;  %v17858_v6 = vunpack.i.h.bf16 %v17856_v48  ;;  %v17857_v5 = vunpack.i.l.bf16 %v17856_v48 }
 0x7f7   :  { %v7051_v16 = vsel %vm7036_vm12, %v7034_v17, %v17852_v52  ;;  %v7052_v24 = vsel %vm7036_vm12, %v7035_v59, %v17853_v29 }
 0x7f8   :  { %v17861_v58 = vpop.permute.xlu1 %17860  ;;  %v7068_v8 = vsel %vm7053_vm13, %v7051_v16, %v17857_v5  ;;  %v7069_v39 = vsel %vm7053_vm13, %v7052_v24, %v17858_v6 }
 0x7f9   :  { %v17863_v2 = vunpack.i.h.bf16 %v17861_v58  ;;  %v17862_v18 = vunpack.i.l.bf16 %v17861_v58 }
 0x7fb   :  { %v7085_v19 = vsel %vm7070_vm14, %v7068_v8, %v17862_v18  ;;  %v7086_v54 = vsel %vm7070_vm14, %v7069_v39, %v17863_v2 }
 0x7fc   :  { %v7101_v12 = vpack.c.bf16 %v7086_v54, %v7085_v19 }
 0x7fe   :  { %7295 = vmatmul.mubr.bf16.gmra.mxu0 %v7101_v12 }
 0x7ff   :  { %16671 = vmatprep.mubr.bf16.mxu0 %v19340_v32 }
 0x883   :  { %v7240_v21 = vpop.f32.mrf.mxu0 }
 0x884   :  { %v7241_v63 = vadd.f32 %v22256_v46, %v7240_v21 }
 0x885   :  { %v7242_v7 = vpop.f32.mrf.mxu0 }
 0x886   :  { %v7303_v50 = vmax.f32 %v7241_v63, 0.0 }
 0x887   :  { %v7243_v28 = vpop.f32.mrf.mxu0 }
 0x888   :  { %v7244_v49 = vadd.f32 %v22256_v46, %v7243_v28 }
 0x889   :  { %v7245_v60 = vpop.f32.mrf.mxu0 }
 0x88a   :  { %v7304_v41 = vmax.f32 %v7244_v49, 0.0 }
 0x88b   :  { %v7248_v3 = vpop.f32.mrf.mxu0 }
 0x88c   :  { %v22260_v14 = vpack.c.bf16 %v7304_v41, %v7303_v50  ;;  %v7249_v47 = vadd.f32 %v22256_v46, %v7248_v3 }
 0x88d   :  { %v7250_v62 = vpop.f32.mrf.mxu0 }
 0x88e   :  { %v7305_v56 = vmax.f32 %v7249_v47, 0.0  ;;  %v19342_v62 = vld [vmem:[#allocation4 + $0xc8] sm:$0xff]   ;;  %v19343_v47 = vld [vmem:[#allocation4 + $0x10] sm:$0xff]  }
 0x88f   :  { %v7251_v13 = vpop.f32.mrf.mxu0 }
 0x890   :  { %v7252_v22 = vadd.f32 %v22256_v46, %v7251_v13  ;;  %v19344_v13 = vld [vmem:[#allocation4 + $0xd0] sm:$0xff]  }
 0x891   :  { %v7253_v4 = vpop.f32.mrf.mxu0 }
 0x892   :  { %v7306_v11 = vmax.f32 %v7252_v22, 0.0  ;;  %v19345_v22 = vld [vmem:[#allocation4 + $0x18] sm:$0xff]  }
 0x893   :  { %v7256_v51 = vpop.f32.mrf.mxu0  ;;  %v19346_v4 = vld [vmem:[#allocation4 + $0xd8] sm:$0xff]  }
 0x894   :  { %v22264_v23 = vpack.c.bf16 %v7306_v11, %v7305_v56  ;;  %v7257_v28 = vadd.f32 %v22256_v46, %v7256_v51  ;;  %v19347_v56 = vld [vmem:[#allocation4 + $0x20] sm:$0xff]   ;;  %v19349_v51 = vld [vmem:[#allocation4 + $0x28] sm:$0xff]  }
 0x895   :  { %v7258_v57 = vpop.f32.mrf.mxu0  ;;  %v19348_v11 = vld [vmem:[#allocation4 + $0xe0] sm:$0xff]  }
 0x896   :  { %v7307_v41 = vmax.f32 %v7257_v28, 0.0  ;;  %v19350_v57 = vld [vmem:[#allocation4 + $0xe8] sm:$0xff]  }
 0x897   :  { %v7259_v15 = vpop.f32.mrf.mxu0  ;;  %v19392_v28 = vld [vmem:[#allocation4 + $0x128] sm:$0xff]  }
 0x898   :  { %v7260_v21 = vadd.f32 %v22256_v46, %v7259_v15  ;;  %v19351_v15 = vld [vmem:[#allocation4 + $0x30] sm:$0xff]  }
 0x899   :  { %v7261_v1 = vpop.f32.mrf.mxu0 }
 0x89a   :  { %v7308_v60 = vmax.f32 %v7260_v21, 0.0  ;;  %v19352_v1 = vld [vmem:[#allocation4 + $0xf0] sm:$0xff]   ;;  %v19390_v21 = vld [vmem:[#allocation4 + $0x118] sm:$0xff]  }
 0x89b   :  { %v7264_v27 = vpop.f32.mrf.mxu0 }
 0x89c   :  { %v7265_v12 = vadd.f32 %v22256_v46, %v7264_v27  ;;  %v22306_v3 = vpack.c.bf16 %v7308_v60, %v7307_v41  ;;  %v19353_v27 = vld [vmem:[#allocation4 + $0x38] sm:$0xff]   ;;  %v19395_v41 = vld [vmem:[#allocation4 + $0x180] sm:$0xff]  }
 0x89d   :  { %v7266_v40 = vpop.f32.mrf.mxu0  ;;  %v19394_v60 = vld [vmem:[#allocation4 + $0x138] sm:$0xff]  }
 0x89e   :  { %v7309_v49 = vmax.f32 %v7265_v12, 0.0  ;;  %v19354_v40 = vld [vmem:[#allocation4 + $0xf8] sm:$0xff]   ;;  %v19388_v12 = vld [vmem:[#allocation4 + $0x108] sm:$0xff]  }
 0x89f   :  { %v7267_v33 = vpop.f32.mrf.mxu0 }
 0x8a0   :  { %v7268_v39 = vadd.f32 %v22256_v46, %v7267_v33  ;;  %v19355_v33 = vld [vmem:[#allocation4 + $0x40] sm:$0xff]  }
 0x8a1   :  { %v7269_v34 = vpop.f32.mrf.mxu0 }
 0x8a2   :  { %v7310_v7 = vmax.f32 %v7268_v39, 0.0  ;;  %v19356_v34 = vld [vmem:[#allocation4 + $0x140] sm:$0xff]   ;;  %v19386_v39 = vld [vmem:[#allocation4 + $0x1f8] sm:$0xff]  }
 0x8a3   :  { %v7272_v31 = vpop.f32.mrf.mxu0 }
 0x8a4   :  { %v7273_v18 = vadd.f32 %v22256_v46, %v7272_v31  ;;  %v22300_v50 = vpack.c.bf16 %v7310_v7, %v7309_v49  ;;  %v19357_v31 = vld [vmem:[#allocation4 + $0x48] sm:$0xff]   ;;  %v19391_v7 = vld [vmem:[#allocation4 + $0x120] sm:$0xff]   ;;  %v19393_v49 = vld [vmem:[#allocation4 + $0x130] sm:$0xff]  }
 0x8a5   :  { %v7274_v36 = vpop.f32.mrf.mxu0 }
 0x8a6   :  { %v7311_v32 = vmax.f32 %v7273_v18, 0.0  ;;  %v19358_v36 = vld [vmem:[#allocation4 + $0x148] sm:$0xff]   ;;  %v19384_v18 = vld [vmem:[#allocation4 + $0x1f0] sm:$0xff]  }
 0x8a7   :  { %v7275_v55 = vpop.f32.mrf.mxu0 }
 0x8a8   :  { %v7276_v24 = vadd.f32 %v22256_v46, %v7275_v55  ;;  %v19359_v55 = vld [vmem:[#allocation4 + $0x50] sm:$0xff]  }
 0x8a9   :  { %v7277_v35 = vpop.f32.mrf.mxu0 }
 0x8aa   :  { %v7312_v19 = vmax.f32 %v7276_v24, 0.0  ;;  %v19360_v35 = vld [vmem:[#allocation4 + $0x150] sm:$0xff]   ;;  %v19382_v24 = vld [vmem:[#allocation4 + $0x1e8] sm:$0xff]  }
 0x8ab   :  { %v7280_v0 = vpop.f32.mrf.mxu0 }
 0x8ac   :  { %v7281_v6 = vadd.f32 %v22256_v46, %v7280_v0  ;;  %v22293_v63 = vpack.c.bf16 %v7312_v19, %v7311_v32  ;;  %v19361_v0 = vld [vmem:[#allocation4 + $0x58] sm:$0xff]   ;;  %v19387_v19 = vld [vmem:[#allocation4 + $0x100] sm:$0xff]   ;;  %v19389_v32 = vld [vmem:[#allocation4 + $0x110] sm:$0xff]  }
 0x8ad   :  { %v7282_v26 = vpop.f32.mrf.mxu0 }
 0x8ae   :  { %v7313_v8 = vmax.f32 %v7281_v6, 0.0  ;;  %v19362_v26 = vld [vmem:[#allocation4 + $0x158] sm:$0xff]   ;;  %v19380_v6 = vld [vmem:[#allocation4 + $0x1e0] sm:$0xff]  }
 0x8af   :  { %v7283_v37 = vpop.f32.mrf.mxu0 }
 0x8b0   :  { %v7284_v29 = vadd.f32 %v22256_v46, %v7283_v37  ;;  %v19363_v37 = vld [vmem:[#allocation4 + $0x60] sm:$0xff]  }
 0x8b1   :  { %v7285_v61 = vpop.f32.mrf.mxu0 }
 0x8b2   :  { %v7314_v58 = vmax.f32 %v7284_v29, 0.0  ;;  %v19364_v61 = vld [vmem:[#allocation4 + $0x160] sm:$0xff]   ;;  %v19376_v29 = vld [vmem:[#allocation4 + $0x1d0] sm:$0xff]  }
 0x8b4   :  { %v7288_v44 = vpop.f32.mrf.mxu0  ;;  %v22285_v54 = vpack.c.bf16 %v7314_v58, %v7313_v8  ;;  %v19383_v58 = vld [vmem:[#allocation4 + $0xb0] sm:$0xff]   ;;  %v19385_v8 = vld [vmem:[#allocation4 + $0xb8] sm:$0xff]  }
 0x8b5   :  { %v7289_v30 = vadd.f32 %v22256_v46, %v7288_v44  ;;  %v19365_v44 = vld [vmem:[#allocation4 + $0x68] sm:$0xff]  }
 0x8b6   :  { %v7290_v10 = vpop.f32.mrf.mxu0 }
 0x8b7   :  { %v7315_v5 = vmax.f32 %v7289_v30, 0.0  ;;  %v19366_v10 = vld [vmem:[#allocation4 + $0x168] sm:$0xff]  }
 0x8b8   :  { %v7291_v9 = vpop.f32.mrf.mxu0  ;;  %v19373_v30 = vld [vmem:[#allocation4 + $0x88] sm:$0xff]  }
 0x8b9   :  { %v7292_v53 = vadd.f32 %v22256_v46, %v7291_v9  ;;  %v19367_v9 = vld [vmem:[#allocation4 + $0x70] sm:$0xff]  }
 0x8ba   :  { %v7293_v42 = vpop.f32.mrf.mxu0 }
 0x8bb   :  { %v7316_v52 = vmax.f32 %v7292_v53, 0.0  ;;  %v19368_v42 = vld [vmem:[#allocation4 + $0x170] sm:$0xff]   ;;  %v19371_v53 = vld [vmem:[#allocation4 + $0x80] sm:$0xff]  }
 0x8bd   :  { %v22275_v2 = vpack.c.bf16 %v7316_v52, %v7315_v5  ;;  %v19377_v52 = vld [vmem:[#allocation4 + $0x98] sm:$0xff]   ;;  %v19381_v5 = vld [vmem:[#allocation4 + $0xa8] sm:$0xff]  }
 0x8be   :  { %v7296_v20 = vpop.f32.mrf.mxu0 }
 0x8bf   :  { %v7297_v45 = vadd.f32 %v22256_v46, %v7296_v20  ;;  %v19369_v20 = vld [vmem:[#allocation4 + $0x78] sm:$0xff]  }
 0x8c0   :  { %v7298_v43 = vpop.f32.mrf.mxu0 }
 0x8c1   :  { %v7317_v17 = vmax.f32 %v7297_v45, 0.0  ;;  %v19370_v43 = vld [vmem:[#allocation4 + $0x178] sm:$0xff]   ;;  %v19372_v45 = vld [vmem:[#allocation4 + $0x1c0] sm:$0xff]  }
 0x8c2   :  { %v7299_v25 = vpop.f32.mrf.mxu0 }
 0x8c3   :  { %v7300_v38 = vadd.f32 %v22256_v46, %v7299_v25  ;;  %v19341_v46 = vld [vmem:[#allocation4 + $0x8] sm:$0xff]   ;;  %v23629_v25 = vmov 0  }
 0x8c4   :  { %v7301_v48 = vpop.f32.mrf.mxu0 }
 0x8c5   :  { %v7318_v59 = vmax.f32 %v7300_v38, 0.0  ;;  %v19374_v38 = vld [vmem:[#allocation4 + $0x1c8] sm:$0xff]   ;;  %v19375_v48 = vld [vmem:[#allocation4 + $0x90] sm:$0xff]  }
 0x8c7   :  { %v22272_v16 = vpack.c.bf16 %v7318_v59, %v7317_v17  ;;  %v19378_v17 = vld [vmem:[#allocation4 + $0x1d8] sm:$0xff]   ;;  %v19379_v59 = vld [vmem:[#allocation4 + $0xa0] sm:$0xff]  }
 0x8c9   :  { %16559 = vmatprep.subr.bf16.mxu1 %v22272_v16  ;;  %16655 = vmatprep.subr.bf16.mxu0 %v22272_v16 }
 0x8ca   :  { %16560 = vmatpush3.bf16.msra.mxu1 %v22272_v16  ;;  %16656 = vmatpush3.bf16.msra.mxu0 %v22272_v16 }
 0x8cb   :  { %16561 = vmatprep.subr.bf16.mxu1 %v22275_v2  ;;  %16657 = vmatprep.subr.bf16.mxu0 %v22275_v2 }
 0x8ce   :  { %16562 = vmatpush3.bf16.msra.mxu1 %v22275_v2  ;;  %16658 = vmatpush3.bf16.msra.mxu0 %v22275_v2 }
 0x8cf   :  { %16563 = vmatprep.subr.bf16.mxu1 %v22285_v54  ;;  %16659 = vmatprep.subr.bf16.mxu0 %v22285_v54 }
 0x8d2   :  { %16564 = vmatpush3.bf16.msra.mxu1 %v22285_v54  ;;  %16660 = vmatpush3.bf16.msra.mxu0 %v22285_v54 }
 0x8d3   :  { %16565 = vmatprep.subr.bf16.mxu1 %v22293_v63  ;;  %16661 = vmatprep.subr.bf16.mxu0 %v22293_v63 }
 0x8d6   :  { %16566 = vmatpush3.bf16.msra.mxu1 %v22293_v63  ;;  %16662 = vmatpush3.bf16.msra.mxu0 %v22293_v63 }
 0x8d7   :  { %16567 = vmatprep.subr.bf16.mxu1 %v22300_v50  ;;  %16663 = vmatprep.subr.bf16.mxu0 %v22300_v50 }
 0x8da   :  { %16568 = vmatpush3.bf16.msra.mxu1 %v22300_v50  ;;  %16664 = vmatpush3.bf16.msra.mxu0 %v22300_v50 }
 0x8db   :  { %16569 = vmatprep.subr.bf16.mxu1 %v22306_v3  ;;  %16665 = vmatprep.subr.bf16.mxu0 %v22306_v3 }
 0x8de   :  { %16570 = vmatpush3.bf16.msra.mxu1 %v22306_v3  ;;  %16666 = vmatpush3.bf16.msra.mxu0 %v22306_v3 }
 0x8df   :  { %16571 = vmatprep.subr.bf16.mxu1 %v22264_v23  ;;  %16667 = vmatprep.subr.bf16.mxu0 %v22264_v23 }
 0x8e2   :  { %16572 = vmatpush3.bf16.msra.mxu1 %v22264_v23  ;;  %16668 = vmatpush3.bf16.msra.mxu0 %v22264_v23 }
 0x8e3   :  { %16573 = vmatprep.subr.bf16.mxu1 %v22260_v14  ;;  %16669 = vmatprep.subr.bf16.mxu0 %v22260_v14 }
 0x8e6   :  { %16574 = vmatpush3.bf16.msra.mxu1 %v22260_v14  ;;  %16670 = vmatpush3.bf16.msra.mxu0 %v22260_v14 }
 0x8e7   :  { %16591 = vmatprep.subr.bf16.mxu1 %v22272_v16  ;;  %16719 = vmatprep.subr.bf16.mxu0 %v22272_v16 }
 0x8e9   :  { %16576 = vmatmul.mubr.bf16.vlgmr.msra.gmra.mxu1 %v19341_v46  ;;  %16672 = vmatmul.mubr.bf16.vlgmr.msra.gmra.mxu0 %v19342_v62  ;;  %v19396_v46 = vld [vmem:[#allocation4 + $0x188] sm:$0xff]   ;;  %v19397_v62 = vld [vmem:[#allocation4 + $0x190] sm:$0xff]  }
 0x8ea   :  { %16592 = vmatpush3.bf16.msra.mxu1 %v22272_v16  ;;  %16720 = vmatpush3.bf16.msra.mxu0 %v22272_v16 }
 0x8eb   :  { %16593 = vmatprep.subr.bf16.mxu1 %v22275_v2  ;;  %16721 = vmatprep.subr.bf16.mxu0 %v22275_v2 }
 0x8ec   :  { %16579 = vmatprep.mubr.bf16.mxu1 %v19343_v47  ;;  %16675 = vmatprep.mubr.bf16.mxu0 %v19344_v13  ;;  %v19398_v47 = vld [vmem:[#allocation4 + $0x198] sm:$0xff]   ;;  %v19399_v13 = vld [vmem:[#allocation4 + $0x1a0] sm:$0xff]  }
 0x8ee   :  { %16594 = vmatpush3.bf16.msra.mxu1 %v22275_v2  ;;  %16722 = vmatpush3.bf16.msra.mxu0 %v22275_v2 }
 0x8ef   :  { %16595 = vmatprep.subr.bf16.mxu1 %v22285_v54  ;;  %16723 = vmatprep.subr.bf16.mxu0 %v22285_v54 }
 0x8f1   :  { %16580 = vmatmul.mubr.bf16.gmra.mxu1 %v19345_v22  ;;  %16676 = vmatmul.mubr.bf16.gmra.mxu0 %v19346_v4  ;;  %v19401_v22 = vld [vmem:[#allocation4 + $0x1b0] sm:$0xff]   ;;  %v19406_v4 = vld [vmem:[#allocation4 + $0x218] sm:$0xff]  }
 0x8f2   :  { %16596 = vmatpush3.bf16.msra.mxu1 %v22285_v54  ;;  %16724 = vmatpush3.bf16.msra.mxu0 %v22285_v54 }
 0x8f3   :  { %16597 = vmatprep.subr.bf16.mxu1 %v22293_v63  ;;  %16725 = vmatprep.subr.bf16.mxu0 %v22293_v63 }
 0x8f4   :  { %16583 = vmatprep.mubr.bf16.mxu1 %v19347_v56  ;;  %16679 = vmatprep.mubr.bf16.mxu0 %v19348_v11  ;;  %v19407_v56 = vld [vmem:[#allocation4 + $0x220] sm:$0xff]   ;;  %v19409_v11 = vld [vmem:[#allocation4 + $0x230] sm:$0xff]  }
 0x8f6   :  { %16598 = vmatpush3.bf16.msra.mxu1 %v22293_v63  ;;  %16726 = vmatpush3.bf16.msra.mxu0 %v22293_v63 }
 0x8f7   :  { %16599 = vmatprep.subr.bf16.mxu1 %v22300_v50  ;;  %16727 = vmatprep.subr.bf16.mxu0 %v22300_v50 }
 0x8f9   :  { %16584 = vmatmul.mubr.bf16.gmra.mxu1 %v19349_v51  ;;  %16680 = vmatmul.mubr.bf16.gmra.mxu0 %v19350_v57  ;;  %v19410_v51 = vld [vmem:[#allocation4 + $0x238] sm:$0xff]  }
 0x8fa   :  { %16600 = vmatpush3.bf16.msra.mxu1 %v22300_v50  ;;  %16728 = vmatpush3.bf16.msra.mxu0 %v22300_v50 }
 0x8fb   :  { %16601 = vmatprep.subr.bf16.mxu1 %v22306_v3  ;;  %16729 = vmatprep.subr.bf16.mxu0 %v22306_v3 }
 0x8fc   :  { %16587 = vmatprep.mubr.bf16.mxu1 %v19351_v15  ;;  %16683 = vmatprep.mubr.bf16.mxu0 %v19352_v1 }
 0x8fe   :  { %16602 = vmatpush3.bf16.msra.mxu1 %v22306_v3  ;;  %16730 = vmatpush3.bf16.msra.mxu0 %v22306_v3 }
 0x8ff   :  { %16603 = vmatprep.subr.bf16.mxu1 %v22264_v23  ;;  %16731 = vmatprep.subr.bf16.mxu0 %v22264_v23 }
 0x901   :  { %16588 = vmatmul.mubr.bf16.gmra.mxu1 %v19353_v27  ;;  %16684 = vmatmul.mubr.bf16.gmra.mxu0 %v19354_v40 }
 0x902   :  { %16604 = vmatpush3.bf16.msra.mxu1 %v22264_v23  ;;  %16732 = vmatpush3.bf16.msra.mxu0 %v22264_v23 }
 0x903   :  { %16605 = vmatprep.subr.bf16.mxu1 %v22260_v14  ;;  %16733 = vmatprep.subr.bf16.mxu0 %v22260_v14 }
 0x904   :  { %16607 = vmatprep.mubr.bf16.mxu1 %v19355_v33  ;;  %16735 = vmatprep.mubr.bf16.mxu0 %v19356_v34 }
 0x906   :  { %16606 = vmatpush3.bf16.msra.mxu1 %v22260_v14  ;;  %16734 = vmatpush3.bf16.msra.mxu0 %v22260_v14 }
 0x907   :  { %16623 = vmatprep.subr.bf16.mxu1 %v22272_v16  ;;  %16783 = vmatprep.subr.bf16.mxu0 %v22272_v16 }
 0x909   :  { %16608 = vmatmul.mubr.bf16.vlgmr.msra.gmra.mxu1 %v19357_v31  ;;  %16736 = vmatmul.mubr.bf16.vlgmr.msra.gmra.mxu0 %v19358_v36 }
 0x90a   :  { %16624 = vmatpush3.bf16.msra.mxu1 %v22272_v16  ;;  %16784 = vmatpush3.bf16.msra.mxu0 %v22272_v16 }
 0x90b   :  { %16625 = vmatprep.subr.bf16.mxu1 %v22275_v2  ;;  %16785 = vmatprep.subr.bf16.mxu0 %v22275_v2 }
 0x90c   :  { %16611 = vmatprep.mubr.bf16.mxu1 %v19359_v55  ;;  %16739 = vmatprep.mubr.bf16.mxu0 %v19360_v35 }
 0x90e   :  { %16626 = vmatpush3.bf16.msra.mxu1 %v22275_v2  ;;  %16786 = vmatpush3.bf16.msra.mxu0 %v22275_v2 }
 0x90f   :  { %16627 = vmatprep.subr.bf16.mxu1 %v22285_v54  ;;  %16787 = vmatprep.subr.bf16.mxu0 %v22285_v54 }
 0x911   :  { %16612 = vmatmul.mubr.bf16.gmra.mxu1 %v19361_v0  ;;  %16740 = vmatmul.mubr.bf16.gmra.mxu0 %v19362_v26 }
 0x912   :  { %16628 = vmatpush3.bf16.msra.mxu1 %v22285_v54  ;;  %16788 = vmatpush3.bf16.msra.mxu0 %v22285_v54 }
 0x913   :  { %16629 = vmatprep.subr.bf16.mxu1 %v22293_v63  ;;  %16789 = vmatprep.subr.bf16.mxu0 %v22293_v63 }
 0x914   :  { %16615 = vmatprep.mubr.bf16.mxu1 %v19363_v37  ;;  %16743 = vmatprep.mubr.bf16.mxu0 %v19364_v61 }
 0x916   :  { %16630 = vmatpush3.bf16.msra.mxu1 %v22293_v63  ;;  %16790 = vmatpush3.bf16.msra.mxu0 %v22293_v63 }
 0x917   :  { %16631 = vmatprep.subr.bf16.mxu1 %v22300_v50  ;;  %16791 = vmatprep.subr.bf16.mxu0 %v22300_v50 }
 0x919   :  { %16616 = vmatmul.mubr.bf16.gmra.mxu1 %v19365_v44  ;;  %16744 = vmatmul.mubr.bf16.gmra.mxu0 %v19366_v10 }
 0x91a   :  { %16632 = vmatpush3.bf16.msra.mxu1 %v22300_v50  ;;  %16792 = vmatpush3.bf16.msra.mxu0 %v22300_v50 }
 0x91b   :  { %16633 = vmatprep.subr.bf16.mxu1 %v22306_v3  ;;  %16793 = vmatprep.subr.bf16.mxu0 %v22306_v3 }
 0x91c   :  { %16619 = vmatprep.mubr.bf16.mxu1 %v19367_v9  ;;  %16747 = vmatprep.mubr.bf16.mxu0 %v19368_v42 }
 0x91e   :  { %16634 = vmatpush3.bf16.msra.mxu1 %v22306_v3  ;;  %16794 = vmatpush3.bf16.msra.mxu0 %v22306_v3 }
 0x91f   :  { %16635 = vmatprep.subr.bf16.mxu1 %v22264_v23  ;;  %16795 = vmatprep.subr.bf16.mxu0 %v22264_v23 }
 0x921   :  { %16620 = vmatmul.mubr.bf16.gmra.mxu1 %v19369_v20  ;;  %16748 = vmatmul.mubr.bf16.gmra.mxu0 %v19370_v43 }
 0x922   :  { %16636 = vmatpush3.bf16.msra.mxu1 %v22264_v23  ;;  %16796 = vmatpush3.bf16.msra.mxu0 %v22264_v23 }
 0x923   :  { %16637 = vmatprep.subr.bf16.mxu1 %v22260_v14  ;;  %16797 = vmatprep.subr.bf16.mxu0 %v22260_v14 }
 0x924   :  { %16639 = vmatprep.mubr.bf16.mxu1 %v19371_v53  ;;  %16799 = vmatprep.mubr.bf16.mxu0 %v19372_v45 }
 0x926   :  { %16638 = vmatpush3.bf16.msra.mxu1 %v22260_v14  ;;  %16798 = vmatpush3.bf16.msra.mxu0 %v22260_v14 }
 0x927   :  { %16687 = vmatprep.subr.bf16.mxu1 %v22272_v16  ;;  %8879 = vmatprep.subr.bf16.mxu0 %v23629_v25 }
 0x929   :  { %16640 = vmatmul.mubr.bf16.vlgmr.msra.gmra.mxu1 %v19373_v30  ;;  %16800 = vmatmul.mubr.bf16.vlgmr.msra.gmra.mxu0 %v19374_v38 }
 0x92a   :  { %16688 = vmatpush3.bf16.msra.mxu1 %v22272_v16  ;;  %16643 = vmatprep.mubr.bf16.mxu1 %v19375_v48 }
 0x92b   :  { %16689 = vmatprep.subr.bf16.mxu1 %v22275_v2  ;;  %16803 = vmatprep.mubr.bf16.mxu0 %v19376_v29 }
 0x92e   :  { %16690 = vmatpush3.bf16.msra.mxu1 %v22275_v2 }
 0x92f   :  { %16691 = vmatprep.subr.bf16.mxu1 %v22285_v54 }
 0x931   :  { %16644 = vmatmul.mubr.bf16.gmra.mxu1 %v19377_v52  ;;  %16804 = vmatmul.mubr.bf16.gmra.mxu0 %v19378_v17 }
 0x932   :  { %16692 = vmatpush3.bf16.msra.mxu1 %v22285_v54  ;;  %16647 = vmatprep.mubr.bf16.mxu1 %v19379_v59 }
 0x933   :  { %16693 = vmatprep.subr.bf16.mxu1 %v22293_v63  ;;  %16807 = vmatprep.mubr.bf16.mxu0 %v19380_v6 }
 0x936   :  { %16694 = vmatpush3.bf16.msra.mxu1 %v22293_v63 }
 0x937   :  { %16695 = vmatprep.subr.bf16.mxu1 %v22300_v50 }
 0x939   :  { %16648 = vmatmul.mubr.bf16.gmra.mxu1 %v19381_v5  ;;  %16808 = vmatmul.mubr.bf16.gmra.mxu0 %v19382_v24 }
 0x93a   :  { %16696 = vmatpush3.bf16.msra.mxu1 %v22300_v50  ;;  %16651 = vmatprep.mubr.bf16.mxu1 %v19383_v58 }
 0x93b   :  { %16697 = vmatprep.subr.bf16.mxu1 %v22306_v3  ;;  %16811 = vmatprep.mubr.bf16.mxu0 %v19384_v18 }
 0x93e   :  { %16698 = vmatpush3.bf16.msra.mxu1 %v22306_v3 }
 0x93f   :  { %16699 = vmatprep.subr.bf16.mxu1 %v22264_v23 }
 0x941   :  { %16652 = vmatmul.mubr.bf16.gmra.mxu1 %v19385_v8  ;;  %16812 = vmatmul.mubr.bf16.gmra.mxu0 %v19386_v39 }
 0x942   :  { %16700 = vmatpush3.bf16.msra.mxu1 %v22264_v23  ;;  %16703 = vmatprep.mubr.bf16.mxu1 %v19387_v19 }
 0x943   :  { %16701 = vmatprep.subr.bf16.mxu1 %v22260_v14 }
 0x946   :  { %16702 = vmatpush3.bf16.msra.mxu1 %v22260_v14 }
 0x947   :  { %16751 = vmatprep.subr.bf16.mxu1 %v22272_v16 }
 0x949   :  { %16704 = vmatmul.mubr.bf16.vlgmr.msra.gmra.mxu1 %v19388_v12 }
 0x94a   :  { %16752 = vmatpush3.bf16.msra.mxu1 %v22272_v16  ;;  %16707 = vmatprep.mubr.bf16.mxu1 %v19389_v32 }
 0x94b   :  { %16753 = vmatprep.subr.bf16.mxu1 %v22275_v2 }
 0x94e   :  { %16754 = vmatpush3.bf16.msra.mxu1 %v22275_v2 }
 0x94f   :  { %16755 = vmatprep.subr.bf16.mxu1 %v22285_v54 }
 0x951   :  { %16708 = vmatmul.mubr.bf16.gmra.mxu1 %v19390_v21 }
 0x952   :  { %16756 = vmatpush3.bf16.msra.mxu1 %v22285_v54  ;;  %16711 = vmatprep.mubr.bf16.mxu1 %v19391_v7 }
 0x953   :  { %16757 = vmatprep.subr.bf16.mxu1 %v22293_v63 }
 0x956   :  { %16758 = vmatpush3.bf16.msra.mxu1 %v22293_v63 }
 0x957   :  { %16759 = vmatprep.subr.bf16.mxu1 %v22300_v50 }
 0x959   :  { %16712 = vmatmul.mubr.bf16.gmra.mxu1 %v19392_v28 }
 0x95a   :  { %16760 = vmatpush3.bf16.msra.mxu1 %v22300_v50  ;;  %16715 = vmatprep.mubr.bf16.mxu1 %v19393_v49 }
 0x95b   :  { %16761 = vmatprep.subr.bf16.mxu1 %v22306_v3 }
 0x95e   :  { %16762 = vmatpush3.bf16.msra.mxu1 %v22306_v3 }
 0x95f   :  { %16763 = vmatprep.subr.bf16.mxu1 %v22264_v23 }
 0x961   :  { %16716 = vmatmul.mubr.bf16.gmra.mxu1 %v19394_v60 }
 0x962   :  { %16764 = vmatpush3.bf16.msra.mxu1 %v22264_v23  ;;  %16767 = vmatprep.mubr.bf16.mxu1 %v19395_v41 }
 0x963   :  { %16765 = vmatprep.subr.bf16.mxu1 %v22260_v14 }
 0x966   :  { %16766 = vmatpush3.bf16.msra.mxu1 %v22260_v14 }
 0x967   :  { %16815 = vmatprep.subr.bf16.mxu1 %v22272_v16 }
 0x969   :  { %16768 = vmatmul.mubr.bf16.vlgmr.msra.gmra.mxu1 %v19396_v46 }
 0x96a   :  { %16816 = vmatpush3.bf16.msra.mxu1 %v22272_v16  ;;  %16771 = vmatprep.mubr.bf16.mxu1 %v19397_v62  ;;  %v19400_v16 = vld [vmem:[#allocation4 + $0x1a8] sm:$0xff]  }
 0x96b   :  { %16817 = vmatprep.subr.bf16.mxu1 %v22275_v2 }
 0x96e   :  { %16818 = vmatpush3.bf16.msra.mxu1 %v22275_v2  ;;  %v19402_v2 = vld [vmem:[#allocation4 + $0x1b8] sm:$0xff]  }
 0x96f   :  { %16819 = vmatprep.subr.bf16.mxu1 %v22285_v54 }
 0x971   :  { %16772 = vmatmul.mubr.bf16.gmra.mxu1 %v19398_v47 }
 0x972   :  { %16820 = vmatpush3.bf16.msra.mxu1 %v22285_v54  ;;  %16775 = vmatprep.mubr.bf16.mxu1 %v19399_v13  ;;  %v19403_v54 = vld [vmem:[#allocation4 + $0x200] sm:$0xff]  }
 0x973   :  { %16821 = vmatprep.subr.bf16.mxu1 %v22293_v63 }
 0x976   :  { %16822 = vmatpush3.bf16.msra.mxu1 %v22293_v63  ;;  %v19404_v63 = vld [vmem:[#allocation4 + $0x208] sm:$0xff]  }
 0x977   :  { %16823 = vmatprep.subr.bf16.mxu1 %v22300_v50 }
 0x979   :  { %16776 = vmatmul.mubr.bf16.gmra.mxu1 %v19400_v16 }
 0x97a   :  { %16824 = vmatpush3.bf16.msra.mxu1 %v22300_v50  ;;  %16779 = vmatprep.mubr.bf16.mxu1 %v19401_v22  ;;  %v19405_v50 = vld [vmem:[#allocation4 + $0x210] sm:$0xff]  }
 0x97b   :  { %16825 = vmatprep.subr.bf16.mxu1 %v22306_v3 }
 0x97e   :  { %16826 = vmatpush3.bf16.msra.mxu1 %v22306_v3  ;;  %v19408_v3 = vld [vmem:[#allocation4 + $0x228] sm:$0xff]  }
 0x97f   :  { %16827 = vmatprep.subr.bf16.mxu1 %v22264_v23 }
 0x981   :  { %16780 = vmatmul.mubr.bf16.gmra.mxu1 %v19402_v2 }
 0x982   :  { %16828 = vmatpush3.bf16.msra.mxu1 %v22264_v23  ;;  %16831 = vmatprep.mubr.bf16.mxu1 %v19403_v54 }
 0x983   :  { %16829 = vmatprep.subr.bf16.mxu1 %v22260_v14 }
 0x986   :  { %16830 = vmatpush3.bf16.msra.mxu1 %v22260_v14 }
 0x989   :  { %16832 = vmatmul.mubr.bf16.vlgmr.msra.gmra.mxu1 %v19404_v63 }
 0x98a   :  { %16835 = vmatprep.mubr.bf16.mxu1 %v19405_v50 }
 0x991   :  { %16836 = vmatmul.mubr.bf16.gmra.mxu1 %v19406_v4 }
 0x992   :  { %16839 = vmatprep.mubr.bf16.mxu1 %v19407_v56 }
 0x999   :  { %16840 = vmatmul.mubr.bf16.gmra.mxu1 %v19408_v3 }
 0x99a   :  { %16843 = vmatprep.mubr.bf16.mxu1 %v19409_v11 }
 0x9a1   :  { %16844 = vmatmul.mubr.bf16.gmra.mxu1 %v19410_v51 }
 0x9a9   :  { %v22435_v23 = vpop.f32.mrf.mxu1  ;;  %v16673_v57 = vpop.f32.mrf.mxu0 }
 0x9ab   :  { %v22437_v15 = vpop.f32.mrf.mxu1  ;;  %v7652_v14 = vpop.f32.mrf.mxu0 }
 0x9ad   :  { %v22439_v1 = vpop.f32.mrf.mxu1  ;;  %v16674_v27 = vpop.f32.mrf.mxu0 }
 0x9ae   :  { %v17864_v40 = vpack.i.bf16 %v16674_v27, %v16673_v57 }
 0x9af   :  { %v22441_v33 = vpop.f32.mrf.mxu1  ;;  %v7655_v34 = vpop.f32.mrf.mxu0 }
 0x9b0   :  { %v17869_v31 = vpack.i.bf16 %v7655_v34, %v7652_v14  ;;  %17865 = vrot.lane.b32.xlu1 %v17864_v40, %s20058_s3 }
 0x9b1   :  { %v22444_v36 = vpop.f32.mrf.mxu1  ;;  %v16677_v55 = vpop.f32.mrf.mxu0 }
 0x9b2   :  { %17870 = vrot.lane.b32.xlu0 %v17869_v31, %s20058_s3 }
 0x9b3   :  { %v22447_v35 = vpop.f32.mrf.mxu1  ;;  %v7668_v0 = vpop.f32.mrf.mxu0 }
 0x9b5   :  { %v22449_v26 = vpop.f32.mrf.mxu1  ;;  %v16678_v37 = vpop.f32.mrf.mxu0 }
 0x9b6   :  { %v17874_v61 = vpack.i.bf16 %v16678_v37, %v16677_v55 }
 0x9b7   :  { %v22451_v44 = vpop.f32.mrf.mxu1  ;;  %v7671_v10 = vpop.f32.mrf.mxu0 }
 0x9b8   :  { %v17879_v9 = vpack.i.bf16 %v7671_v10, %v7668_v0  ;;  %17875 = vrot.lane.b32.xlu1 %v17874_v61, %s20058_s3 }
 0x9b9   :  { %v22454_v42 = vpop.f32.mrf.mxu1  ;;  %v22456_v20 = vpop.f32.mrf.mxu0 }
 0x9ba   :  { %23630 = vst [vmem:[#allocation94_spill] sm:$0xff] %v22454_v42  ;;  %17880 = vrot.lane.b32.xlu0 %v17879_v9, %s20058_s3 }
 0x9bb   :  { %v22459_v43 = vpop.f32.mrf.mxu1  ;;  %v22461_v53 = vpop.f32.mrf.mxu0 }
 0x9bd   :  { %v22463_v45 = vpop.f32.mrf.mxu1  ;;  %v22465_v30 = vpop.f32.mrf.mxu0 }
 0x9bf   :  { %v22469_v48 = vpop.f32.mrf.mxu1  ;;  %v22471_v29 = vpop.f32.mrf.mxu0 }
 0x9c1   :  { %v22473_v52 = vpop.f32.mrf.mxu1  ;;  %v22475_v17 = vpop.f32.mrf.mxu0 }
 0x9c2   :  { %23631 = vst [vmem:[#allocation95_spill] sm:$0xff] %v22473_v52 }
 0x9c3   :  { %v22477_v59 = vpop.f32.mrf.mxu1  ;;  %v22479_v6 = vpop.f32.mrf.mxu0 }
 0x9c4   :  { %23632 = vst [vmem:[#allocation96_spill] sm:$0xff] %v22477_v59 }
 0x9c5   :  { %v22481_v5 = vpop.f32.mrf.mxu1  ;;  %v22483_v24 = vpop.f32.mrf.mxu0 }
 0x9c6   :  { %23633 = vst [vmem:[#allocation97_spill] sm:$0xff] %v22481_v5 }
 0x9c7   :  { %v22487_v18 = vpop.f32.mrf.mxu1  ;;  %v22489_v8 = vpop.f32.mrf.mxu0 }
 0x9c8   :  { %23634 = vst [vmem:[#allocation98_spill] sm:$0xff] %v22487_v18 }
 0x9c9   :  { %v16609_v39 = vpop.f32.mrf.mxu1  ;;  %v16737_v19 = vpop.f32.mrf.mxu0 }
 0x9cb   :  { %v7458_v12 = vpop.f32.mrf.mxu1  ;;  %v7846_v32 = vpop.f32.mrf.mxu0 }
 0x9cd   :  { %v16610_v21 = vpop.f32.mrf.mxu1  ;;  %v16738_v7 = vpop.f32.mrf.mxu0 }
 0x9ce   :  { %v17884_v28 = vpack.i.bf16 %v16610_v21, %v16609_v39  ;;  %v17889_v41 = vpack.i.bf16 %v16738_v7, %v16737_v19 }
 0x9cf   :  { %v7461_v49 = vpop.f32.mrf.mxu1  ;;  %v7849_v60 = vpop.f32.mrf.mxu0 }
 0x9d0   :  { %v17894_v46 = vpack.i.bf16 %v7461_v49, %v7458_v12  ;;  %17885 = vrot.lane.b32.xlu1 %v17884_v28, %s20034_s15  ;;  %v17899_v13 = vpack.i.bf16 %v7849_v60, %v7846_v32 }
 0x9d1   :  { %v16613_v62 = vpop.f32.mrf.mxu1  ;;  %v16741_v47 = vpop.f32.mrf.mxu0 }
 0x9d2   :  { %17895 = vrot.lane.b32.xlu0 %v17894_v46, %s20034_s15 }
 0x9d3   :  { %v7474_v16 = vpop.f32.mrf.mxu1  ;;  %v7862_v22 = vpop.f32.mrf.mxu0 }
 0x9d4   :  { %17890 = vrot.lane.b32.xlu1 %v17889_v41, %s20060_s7 }
 0x9d5   :  { %v16614_v2 = vpop.f32.mrf.mxu1  ;;  %v16742_v54 = vpop.f32.mrf.mxu0 }
 0x9d6   :  { %v17904_v63 = vpack.i.bf16 %v16614_v2, %v16613_v62  ;;  %17900 = vrot.lane.b32.xlu0 %v17899_v13, %s20060_s7  ;;  %v17909_v56 = vpack.i.bf16 %v16742_v54, %v16741_v47 }
 0x9d7   :  { %v7477_v50 = vpop.f32.mrf.mxu1  ;;  %v7865_v4 = vpop.f32.mrf.mxu0 }
 0x9d8   :  { %v17914_v3 = vpack.i.bf16 %v7477_v50, %v7474_v16  ;;  %17905 = vrot.lane.b32.xlu1 %v17904_v63, %s20034_s15  ;;  %v17919_v57 = vpack.i.bf16 %v7865_v4, %v7862_v22 }
 0x9d9   :  { %v22496_v11 = vpop.f32.mrf.mxu1  ;;  %v22498_v51 = vpop.f32.mrf.mxu0 }
 0x9da   :  { %17915 = vrot.lane.b32.xlu0 %v17914_v3, %s20034_s15 }
 0x9db   :  { %v7490_v14 = vpop.f32.mrf.mxu1  ;;  %v22501_v27 = vpop.f32.mrf.mxu0 }
 0x9dc   :  { %17910 = vrot.lane.b32.xlu1 %v17909_v56, %s20060_s7 }
 0x9dd   :  { %v22504_v40 = vpop.f32.mrf.mxu1  ;;  %v22506_v34 = vpop.f32.mrf.mxu0 }
 0x9de   :  { %17920 = vrot.lane.b32.xlu0 %v17919_v57, %s20060_s7 }
 0x9df   :  { %v7493_v0 = vpop.f32.mrf.mxu1  ;;  %v22513_v37 = vpop.f32.mrf.mxu0 }
 0x9e0   :  { %v17924_v61 = vpack.i.bf16 %v7493_v0, %v7490_v14 }
 0x9e1   :  { %v22515_v10 = vpop.f32.mrf.mxu1  ;;  %v22517_v9 = vpop.f32.mrf.mxu0 }
 0x9e2   :  { %17925 = vrot.lane.b32.xlu0 %v17924_v61, %s20034_s15 }
 0x9e3   :  { %v22520_v39 = vpop.f32.mrf.mxu1  ;;  %v22522_v19 = vpop.f32.mrf.mxu0 }
 0x9e5   :  { %v22524_v12 = vpop.f32.mrf.mxu1  ;;  %v22526_v32 = vpop.f32.mrf.mxu0 }
 0x9e7   :  { %v22532_v28 = vpop.f32.mrf.mxu1  ;;  %v22534_v49 = vpop.f32.mrf.mxu0 }
 0x9e9   :  { %v16641_v60 = vpop.f32.mrf.mxu1  ;;  %v16801_v41 = vpop.f32.mrf.mxu0 }
 0x9eb   :  { %v7555_v46 = vpop.f32.mrf.mxu1  ;;  %v8040_v62 = vpop.f32.mrf.mxu0 }
 0x9ed   :  { %v16642_v47 = vpop.f32.mrf.mxu1  ;;  %v16802_v13 = vpop.f32.mrf.mxu0 }
 0x9ee   :  { %v17929_v16 = vpack.i.bf16 %v16642_v47, %v16641_v60  ;;  %v17934_v22 = vpack.i.bf16 %v16802_v13, %v16801_v41 }
 0x9ef   :  { %v7558_v2 = vpop.f32.mrf.mxu1  ;;  %v8043_v54 = vpop.f32.mrf.mxu0 }
 0x9f0   :  { %v17944_v63 = vpack.i.bf16 %v8043_v54, %v8040_v62  ;;  %17935 = vrot.lane.b32.xlu1 %v17934_v22, %s20061_s27  ;;  %17930 = vrot.lane.b32.xlu0 %v17929_v16, %s20057_s5  ;;  %v17939_v56 = vpack.i.bf16 %v7558_v2, %v7555_v46 }
 0x9f1   :  { %v16645_v50 = vpop.f32.mrf.mxu1  ;;  %v16805_v4 = vpop.f32.mrf.mxu0 }
 0x9f3   :  { %v7571_v3 = vpop.f32.mrf.mxu1  ;;  %v8056_v57 = vpop.f32.mrf.mxu0 }
 0x9f4   :  { %17945 = vrot.lane.b32.xlu0 %v17944_v63, %s20061_s27  ;;  %17940 = vrot.lane.b32.xlu1 %v17939_v56, %s20057_s5 }
 0x9f5   :  { %v16646_v14 = vpop.f32.mrf.mxu1  ;;  %v16806_v0 = vpop.f32.mrf.mxu0 }
 0x9f6   :  { %v17949_v61 = vpack.i.bf16 %v16646_v14, %v16645_v50  ;;  %v17954_v60 = vpack.i.bf16 %v16806_v0, %v16805_v4 }
 0x9f7   :  { %v7574_v41 = vpop.f32.mrf.mxu1  ;;  %v8059_v47 = vpop.f32.mrf.mxu0 }
 0x9f8   :  { %17955 = vrot.lane.b32.xlu1 %v17954_v60, %s20061_s27  ;;  %17950 = vrot.lane.b32.xlu0 %v17949_v61, %s20057_s5  ;;  %v17964_v62 = vpack.i.bf16 %v8059_v47, %v8056_v57  ;;  %v17959_v46 = vpack.i.bf16 %v7574_v41, %v7571_v3  ;;  %v18762_v57 = vld [vmem:[%s23635_s13 + $0x38] sm:$0xff]   ;;  %v18763_v61 = vld [vmem:[%s23635_s13 + $0x30] sm:$0xff]  }
 0x9f9   :  { %v22542_v13 = vpop.f32.mrf.mxu1  ;;  %8880 = vmatpush1.bf16.msra.mxu0 %v18762_v57  ;;  %v18765_v57 = vld [vmem:[%s23635_s13 + $0x20] sm:$0xff]   ;;  %v16809_v21 = vpop.f32.mrf.mxu0 }
 0x9fa   :  { %8881 = vmatprep.subr.bf16.mxu0 %v23629_v25 }
 0x9fb   :  { %v22544_v16 = vpop.f32.mrf.mxu1  ;;  %v8072_v2 = vpop.f32.mrf.mxu0 }
 0x9fc   :  { %17960 = vrot.lane.b32.xlu1 %v17959_v46, %s20057_s5  ;;  %17965 = vrot.lane.b32.xlu0 %v17964_v62, %s20061_s27  ;;  %v18764_v62 = vld [vmem:[%s23635_s13 + $0x28] sm:$0xff]  }
 0x9fd   :  { %v22548_v22 = vpop.f32.mrf.mxu1  ;;  %8882 = vmatpush1.bf16.msra.mxu0 %v18763_v61  ;;  %v18766_v61 = vld [vmem:[%s23635_s13 + $0x18] sm:$0xff]   ;;  %v16810_v5 = vpop.f32.mrf.mxu0 }
 0x9fe   :  { %8883 = vmatprep.subr.bf16.mxu0 %v23629_v25 }
 0x9ff   :  { %v22552_v54 = vpop.f32.mrf.mxu1 }
 0xa00   :  { %v17999_v18 = vpack.i.bf16 %v22552_v54, %v22544_v16  ;;  %v23636_v54 = vpack.i.bf16 %v22504_v40, %v22496_v11  ;;  %v23638_v11 = vpack.i.bf16 %v22465_v30, %v22456_v20 }
 0xa01   :  { %v22554_v63 = vpop.f32.mrf.mxu1  ;;  %8884 = vmatpush1.bf16.msra.mxu0 %v18764_v62 }
 0xa02   :  { %8885 = vmatprep.subr.bf16.mxu0 %v23629_v25 }
 0xa03   :  { %v22556_v50 = vpop.f32.mrf.mxu1 }
 0xa05   :  { %v22558_v4 = vpop.f32.mrf.mxu1  ;;  %8886 = vmatpush1.bf16.msra.mxu0 %v18765_v57 }
 0xa06   :  { %8887 = vmatprep.subr.bf16.mxu0 %v23629_v25 }
 0xa07   :  { %v22562_v3 = vpop.f32.mrf.mxu1 }
 0xa09   :  { %v16705_v14 = vpop.f32.mrf.mxu1  ;;  %8888 = vmatpush1.bf16.msra.mxu0 %v18766_v61 }
 0xa0a   :  { %8889 = vmatprep.subr.bf16.mxu0 %v23629_v25 }
 0xa0b   :  { %v7749_v0 = vpop.f32.mrf.mxu1 }
 0xa0d   :  { %v16706_v60 = vpop.f32.mrf.mxu1 }
 0xa0e   :  { %v17969_v41 = vpack.i.bf16 %v16706_v60, %v16705_v14 }
 0xa0f   :  { %v7752_v47 = vpop.f32.mrf.mxu1 }
 0xa10   :  { %v17974_v46 = vpack.i.bf16 %v7752_v47, %v7749_v0  ;;  %17970 = vrot.lane.b32.xlu0 %v17969_v41, %s20018_s0  ;;  %v18767_v47 = vld [vmem:[%s23635_s13 + $0x10] sm:$0xff]  }
 0xa11   :  { %v16709_v7 = vpop.f32.mrf.mxu1  ;;  %8890 = vmatpush1.bf16.msra.mxu0 %v18767_v47 }
 0xa12   :  { %17975 = vrot.lane.b32.xlu1 %v17974_v46, %s20018_s0  ;;  %8891 = vmatprep.subr.bf16.mxu0 %v23629_v25 }
 0xa13   :  { %v7765_v58 = vpop.f32.mrf.mxu1 }
 0xa15   :  { %v16710_v56 = vpop.f32.mrf.mxu1 }
 0xa16   :  { %v17979_v14 = vpack.i.bf16 %v16710_v56, %v16709_v7  ;;  %v18768_v56 = vld [vmem:[%s23635_s13 + $0x8] sm:$0xff]  }
 0xa17   :  { %v7768_v60 = vpop.f32.mrf.mxu1  ;;  %8892 = vmatpush1.bf16.msra.mxu0 %v18768_v56 }
 0xa18   :  { %v17984_v0 = vpack.i.bf16 %v7768_v60, %v7765_v58  ;;  %17980 = vrot.lane.b32.xlu0 %v17979_v14, %s20018_s0  ;;  %8893 = vmatprep.subr.bf16.mxu0 %v23629_v25  ;;  %v18769_v14 = vld [vmem:[%s23635_s13] sm:$0xff]  }
 0xa19   :  { %v22576_v41 = vpop.f32.mrf.mxu1 }
 0xa1a   :  { %17985 = vrot.lane.b32.xlu1 %v17984_v0, %s20018_s0  ;;  %v18770_v0 = vld [vmem:[%s23635_s13 + $0x40] sm:$0xff]  }
 0xa1b   :  { %v7781_v62 = vpop.f32.mrf.mxu1  ;;  %8894 = vmatpush1.bf16.msra.mxu0 %v18769_v14  ;;  %v18004_v14 = vpack.i.bf16 %v22471_v29, %v22461_v53 }
 0xa1c   :  { %8909 = vmatprep.subr.bf16.mxu0 %v23629_v25 }
 0xa1d   :  { %v16714_v7 = vpop.f32.mrf.mxu1 }
 0xa1f   :  { %v7784_v46 = vpop.f32.mrf.mxu1  ;;  %8910 = vmatpush2.bf16.msra.mxu0 %v18770_v0  ;;  %v8075_v0 = vpop.f32.mrf.mxu0 }
 0xa20   :  { %v18019_v53 = vpack.i.bf16 %v8075_v0, %v8072_v2 }
 0xa21   :  { %v22583_v58 = vpop.f32.mrf.mxu1  ;;  %v16813_v40 = vpop.f32.mrf.mxu0 }
 0xa23   :  { %v22585_v57 = vpop.f32.mrf.mxu1  ;;  %v8088_v20 = vpop.f32.mrf.mxu0 }
 0xa25   :  { %v22589_v61 = vpop.f32.mrf.mxu1 }
 0xa27   :  { %v22591_v60 = vpop.f32.mrf.mxu1 }
 0xa29   :  { %v16769_v47 = vpop.f32.mrf.mxu1 }
 0xa2b   :  { %v7943_v55 = vpop.f32.mrf.mxu1 }
 0xa2d   :  { %v16770_v38 = vpop.f32.mrf.mxu1 }
 0xa2e   :  { %v17989_v56 = vpack.i.bf16 %v16770_v38, %v16769_v47  ;;  %v18014_v38 = vpack.i.bf16 %v22513_v37, %v22501_v27 }
 0xa2f   :  { %v7946_v31 = vpop.f32.mrf.mxu1 }
 0xa30   :  { %v17994_v52 = vpack.i.bf16 %v7946_v31, %v7943_v55  ;;  %17990 = vrot.lane.b32.xlu0 %v17989_v56, %s20062_s10  ;;  %v18009_v55 = vpack.i.bf16 %v7784_v46, %v7781_v62  ;;  %v18049_v56 = vpack.i.bf16 %v16714_v7, %v22576_v41  ;;  %v18059_v41 = vpack.i.bf16 %v16810_v5, %v16809_v21 }
 0xa31   :  { %v16773_v59 = vpop.f32.mrf.mxu1  ;;  %v18084_v5 = vpack.i.bf16 %v22489_v8, %v22479_v6  ;;  %v22653_v8 = vpop.permute.xlu0 %17870 }
 0xa32   :  { %17995 = vrot.lane.b32.xlu1 %v17994_v52, %s20062_s10 }
 0xa33   :  { %v7959_v25 = vpop.f32.mrf.mxu1 }
 0xa34   :  { %18005 = vrot.lane.b32.xlu0 %v18004_v14, %s20058_s3 }
 0xa35   :  { %v16774_v42 = vpop.f32.mrf.mxu1 }
 0xa36   :  { %18000 = vrot.lane.b32.xlu1 %v17999_v18, %s20057_s5  ;;  %v23637_v18 = vpack.i.bf16 %v22548_v22, %v22542_v13  ;;  %v18034_v62 = vpack.i.bf16 %v16774_v42, %v16773_v59  ;;  %v18064_v42 = vpack.i.bf16 %v22532_v28, %v22520_v39  ;;  %v23639_v59 = vpack.i.bf16 %v22506_v34, %v22498_v51  ;;  %v16814_v51 = vpop.f32.mrf.mxu0 }
 0xa37   :  { %v7962_v31 = vpop.f32.mrf.mxu1  ;;  %v18079_v34 = vpack.i.bf16 %v22562_v3, %v22556_v50  ;;  %v23640_v50 = vpack.i.bf16 %v22524_v12, %v22515_v10  ;;  %v18124_v3 = vpack.i.bf16 %v22589_v61, %v22583_v58  ;;  %v23642_v10 = vpack.i.bf16 %v22483_v24, %v22475_v17 }
 0xa38   :  { %18015 = vrot.lane.b32.xlu0 %v18014_v38, %s20060_s7  ;;  %v18039_v37 = vpack.i.bf16 %v7962_v31, %v7959_v25  ;;  %v8091_v21 = vpop.f32.mrf.mxu0  ;;  %v18094_v38 = vpack.i.bf16 %v22534_v49, %v22522_v19  ;;  %v18089_v31 = vpack.i.bf16 %v22591_v60, %v22585_v57  ;;  %v23641_v49 = vpack.i.bf16 %v22558_v4, %v22554_v63  ;;  %v22666_v57 = vpop.permute.xlu0 %17880 }
 0xa39   :  { %v16777_v29 = vpop.f32.mrf.mxu1  ;;  %v18099_v6 = vpack.i.bf16 %v8091_v21, %v8088_v20  ;;  %v22669_v60 = vpop.permute.xlu1 %17865  ;;  %v23643_v4 = vpack.i.bf16 %v22526_v32, %v22517_v9  ;;  %v18139_v58 = vpack.i.bf16 %v16814_v51, %v16813_v40  ;;  %v17873_v21 = vunpack.i.h.bf16 %v22653_v8 }
 0xa3a   :  { %18010 = vrot.lane.b32.xlu1 %v18009_v55, %s20018_s0 }
 0xa3b   :  { %v7975_v52 = vpop.f32.mrf.mxu1 }
 0xa3c   :  { %18020 = vrot.lane.b32.xlu0 %v18019_v53, %s20061_s27 }
 0xa3d   :  { %v16778_v16 = vpop.f32.mrf.mxu1  ;;  %v22677_v63 = vpop.permute.xlu1 %17875 }
 0xa3e   :  { %18025 = vrot.lane.b32.xlu1 %v23636_v54, %s20034_s15  ;;  %v18069_v7 = vpack.i.bf16 %v16778_v16, %v16777_v29 }
 0xa3f   :  { %v7978_v27 = vpop.f32.mrf.mxu1 }
 0xa40   :  { %18030 = vrot.lane.b32.xlu0 %v23637_v18, %s20057_s5  ;;  %v18074_v39 = vpack.i.bf16 %v7978_v27, %v7975_v52 }
 0xa41   :  { %v16781_v2 = vpop.f32.mrf.mxu1 }
 0xa42   :  { %18040 = vrot.lane.b32.xlu1 %v18039_v37, %s20062_s10  ;;  %v17886_v53 = vpop.permute.xlu1 %17885 }
 0xa43   :  { %v7991_v46 = vpop.f32.mrf.mxu1 }
 0xa44   :  { %18035 = vrot.lane.b32.xlu0 %v18034_v62, %s20062_s10  ;;  %v17896_v12 = vpop.permute.xlu0 %17895 }
 0xa45   :  { %v16782_v47 = vpop.f32.mrf.mxu1 }
 0xa46   :  { %18045 = vrot.lane.b32.xlu1 %v23638_v11, %s20058_s3  ;;  %v18134_v55 = vpack.i.bf16 %v16782_v47, %v16781_v2  ;;  %v22688_v17 = vpop.permute.xlu1 %17890  ;;  %v17898_v47 = vunpack.i.h.bf16 %v17896_v12 }
 0xa47   :  { %v7994_v25 = vpop.f32.mrf.mxu1 }
 0xa48   :  { %18050 = vrot.lane.b32.xlu0 %v18049_v56, %s20018_s0  ;;  %v18114_v19 = vpack.i.bf16 %v7994_v25, %v7991_v46  ;;  %v22683_v61 = vpop.permute.xlu0 %17900  ;;  %v17897_v56 = vunpack.i.l.bf16 %v17896_v12 }
 0xa49   :  { %v22624_v13 = vpop.f32.mrf.mxu1 }
 0xa4a   :  { %18055 = vrot.lane.b32.xlu1 %v23639_v59, %s20060_s7  ;;  %v22692_v52 = vpop.permute.xlu1 %17905  ;;  %v17887_v59 = vunpack.i.l.bf16 %v17886_v53 }
 0xa4b   :  { %v8137_v22 = vpop.f32.mrf.mxu1 }
 0xa4c   :  { %18065 = vrot.lane.b32.xlu0 %v18064_v42, %s20034_s15  ;;  %v22686_v29 = vpop.permute.xlu0 %17915  ;;  %v17888_v42 = vunpack.i.h.bf16 %v17886_v53 }
 0xa4d   :  { %v22633_v30 = vpop.f32.mrf.mxu1 }
 0xa4e   :  { %18060 = vrot.lane.b32.xlu1 %v18059_v41, %s20061_s27  ;;  %v8763_v14 = vpack.c.bf16 %v22633_v30, %v22624_v13  ;;  %v22696_v54 = vpop.permute.xlu1 %17910 }
 0xa4f   :  { %v8140_v0 = vpop.f32.mrf.mxu1 }
 0xa50   :  { %18070 = vrot.lane.b32.xlu0 %v18069_v7, %s20062_s10  ;;  %v8761_v28 = vpack.c.bf16 %v8140_v0, %v8137_v22  ;;  %v22690_v24 = vpop.permute.xlu0 %17920  ;;  %v8649_v7 = vsel %vm4795_vm4, %v22441_v33, %v17898_v47  ;;  %v8648_v0 = vsel %vm4795_vm4, %v22437_v15, %v17897_v56  ;;  %v8650_v33 = vsel %vm4795_vm4, %v22435_v23, %v17887_v59 }
 0xa51   :  { %v17868_v15 = vunpack.i.h.bf16 %v22669_v60 }
 0xa52   :  { %18075 = vrot.lane.b32.xlu1 %v18074_v39, %s20062_s10  ;;  %14122 = vmatprep.mubr.msk.bf16.mxu0 %vm4795_vm4, %v8761_v28 }
 0xa54   :  { %18085 = vrot.lane.b32.xlu0 %v18084_v5, %s20058_s3  ;;  %v22694_v16 = vpop.permute.xlu0 %17925 }
 0xa56   :  { %18080 = vrot.lane.b32.xlu1 %v18079_v34, %s20057_s5 }
 0xa58   :  { %18095 = vrot.lane.b32.xlu0 %v18094_v38, %s20060_s7  ;;  %v17872_v38 = vunpack.i.l.bf16 %v22653_v8 }
 0xa5a   :  { %18090 = vrot.lane.b32.xlu1 %v18089_v31, %s20018_s0  ;;  %v8651_v31 = vsel %vm4795_vm4, %v22439_v1, %v17888_v42 }
 0xa5c   :  { %18100 = vrot.lane.b32.xlu0 %v18099_v6, %s20061_s27 }
 0xa5e   :  { %18105 = vrot.lane.b32.xlu1 %v23640_v50, %s20034_s15  ;;  %v17867_v50 = vunpack.i.l.bf16 %v22669_v60  ;;  %v17902_v60 = vunpack.i.l.bf16 %v22683_v61 }
 0xa60   :  { %18110 = vrot.lane.b32.xlu0 %v23641_v49, %s20057_s5 }
 0xa62   :  { %18115 = vrot.lane.b32.xlu1 %v18114_v19, %s20062_s10  ;;  %v17931_v9 = vpop.permute.xlu0 %17930  ;;  %v22698_v32 = vpop.permute.xlu1 %17935 }
 0xa63   :  { %v17933_v41 = vunpack.i.h.bf16 %v17931_v9  ;;  %v17932_v20 = vunpack.i.l.bf16 %v17931_v9 }
 0xa64   :  { %18125 = vrot.lane.b32.xlu0 %v18124_v3, %s20018_s0  ;;  %v22730_v3 = vpop.f32.mrf.mxu1 }
 0xa65   :  { %v8667_v19 = vsel %vm4863_vm8, %v8651_v31, %v17933_v41  ;;  %v8666_v49 = vsel %vm4863_vm8, %v8650_v33, %v17932_v20 }
 0xa66   :  { %18120 = vrot.lane.b32.xlu1 %v23642_v10, %s20058_s3  ;;  %v22700_v27 = vpop.permute.xlu0 %17945  ;;  %v17941_v37 = vpop.permute.xlu1 %17940  ;;  %v8682_v53 = vsel %vm7002_vm10, %v8666_v49, %v17867_v50  ;;  %v8683_v9 = vsel %vm7002_vm10, %v8667_v19, %v17868_v15  ;;  %v17917_v15 = vunpack.i.l.bf16 %v22686_v29 }
 0xa67   :  { %v17943_v25 = vunpack.i.h.bf16 %v17941_v37  ;;  %v17942_v40 = vunpack.i.l.bf16 %v17941_v37  ;;  %v17948_v47 = vunpack.i.h.bf16 %v22700_v27  ;;  %v17947_v56 = vunpack.i.l.bf16 %v22700_v27 }
 0xa68   :  { %18135 = vrot.lane.b32.xlu0 %v18134_v55, %s20062_s10 }
 0xa69   :  { %v8665_v28 = vsel %vm4863_vm8, %v8649_v7, %v17943_v25  ;;  %v8664_v51 = vsel %vm4863_vm8, %v8648_v0, %v17942_v40  ;;  %v22742_v40 = vpop.f32.mrf.mxu1 }
 0xa6a   :  { %18130 = vrot.lane.b32.xlu1 %v23643_v4, %s20060_s7  ;;  %v22702_v18 = vpop.permute.xlu0 %17950  ;;  %v22704_v2 = vpop.permute.xlu1 %17955  ;;  %v8680_v10 = vsel %vm7002_vm10, %v8664_v51, %v17872_v38  ;;  %v8681_v1 = vsel %vm7002_vm10, %v8665_v28, %v17873_v21  ;;  %v17893_v28 = vunpack.i.h.bf16 %v22688_v17  ;;  %v17892_v51 = vunpack.i.l.bf16 %v22688_v17 }
 0xa6b   :  { %v17918_v38 = vunpack.i.h.bf16 %v22686_v29  ;;  %v22759_v33 = vpop.f32.mrf.mxu1  ;;  %v17938_v29 = vunpack.i.h.bf16 %v22698_v32 }
 0xa6e   :  { %18140 = vrot.lane.b32.xlu1 %v18139_v58, %s20061_s27  ;;  %v22706_v62 = vpop.permute.xlu0 %17965  ;;  %v22708_v46 = vpop.permute.xlu1 %17960  ;;  %v17903_v58 = vunpack.i.h.bf16 %v22683_v61 }
 0xa6f   :  { %v17963_v17 = vunpack.i.h.bf16 %v22708_v46 }
 0xa82   :  { %v17971_v11 = vpop.permute.xlu0 %17970 }
 0xa83   :  { %v17973_v55 = vunpack.i.h.bf16 %v17971_v11  ;;  %v17972_v8 = vunpack.i.l.bf16 %v17971_v11 }
 0xa84   :  { %v17976_v22 = vpop.permute.xlu1 %17975 }
 0xa85   :  { %v17978_v5 = vunpack.i.h.bf16 %v17976_v22  ;;  %v17977_v34 = vunpack.i.l.bf16 %v17976_v22  ;;  %v8699_v42 = vsel %vm7019_vm11, %v8683_v9, %v17973_v55  ;;  %v8698_v59 = vsel %vm7019_vm11, %v8682_v53, %v17972_v8  ;;  %v8156_v9 = vpop.f32.mrf.mxu1 }
 0xa86   :  { %v8714_v50 = vsel %vm7036_vm12, %v8698_v59, %v17892_v51  ;;  %v8715_v19 = vsel %vm7036_vm12, %v8699_v42, %v17893_v28  ;;  %v17962_v55 = vunpack.i.l.bf16 %v22708_v46  ;;  %v17877_v46 = vunpack.i.l.bf16 %v22677_v63 }
 0xa87   :  { %v8697_v23 = vsel %vm7019_vm11, %v8681_v1, %v17978_v5  ;;  %v8696_v4 = vsel %vm7019_vm11, %v8680_v10, %v17977_v34  ;;  %v17878_v1 = vunpack.i.h.bf16 %v22677_v63  ;;  %v17952_v53 = vunpack.i.l.bf16 %v22702_v18 }
 0xa88   :  { %v8712_v22 = vsel %vm7036_vm12, %v8696_v4, %v17902_v60  ;;  %v8713_v61 = vsel %vm7036_vm12, %v8697_v23, %v17903_v58  ;;  %v17937_v23 = vunpack.i.l.bf16 %v22698_v32  ;;  %v17908_v58 = vunpack.i.h.bf16 %v22692_v52 }
 0xa89   :  { %v8653_v60 = vsel %vm4795_vm4, %v22451_v44, %v17918_v38  ;;  %v8652_v32 = vsel %vm4795_vm4, %v22447_v35, %v17917_v15  ;;  %v17882_v35 = vunpack.i.l.bf16 %v22666_v57  ;;  %v17913_v59 = vunpack.i.h.bf16 %v22696_v54 }
 0xa8a   :  { %v22714_v39 = vpop.permute.xlu0 %17980  ;;  %v8668_v63 = vsel %vm4863_vm8, %v8652_v32, %v17962_v55  ;;  %v8655_v42 = vsel %vm4795_vm4, %v22449_v26, %v17908_v58  ;;  %v17922_v51 = vunpack.i.l.bf16 %v22690_v24  ;;  %v17968_v15 = vunpack.i.h.bf16 %v22706_v62 }
 0xa8b   :  { %v17982_v26 = vunpack.i.l.bf16 %v22714_v39  ;;  %v17912_v32 = vunpack.i.l.bf16 %v22696_v54  ;;  %v17957_v54 = vunpack.i.l.bf16 %v22704_v2 }
 0xa8c   :  { %v22724_v6 = vpop.permute.xlu1 %17985 }
 0xa8d   :  { %v17988_v44 = vunpack.i.h.bf16 %v22724_v6 }
 0xaa2   :  { %v17991_v12 = vpop.permute.xlu0 %17990 }
 0xaa3   :  { %v17993_v20 = vunpack.i.h.bf16 %v17991_v12  ;;  %v17992_v7 = vunpack.i.l.bf16 %v17991_v12  ;;  %v17907_v12 = vunpack.i.l.bf16 %v22692_v52  ;;  %v17987_v52 = vunpack.i.l.bf16 %v22724_v6 }
 0xaa4   :  { %v17996_v37 = vpop.permute.xlu1 %17995 }
 0xaa5   :  { %v17998_v11 = vunpack.i.h.bf16 %v17996_v37  ;;  %v17997_v25 = vunpack.i.l.bf16 %v17996_v37  ;;  %v8731_v8 = vsel %vm7053_vm13, %v8715_v19, %v17993_v20  ;;  %v8730_v10 = vsel %vm7053_vm13, %v8714_v50, %v17992_v7 }
 0xaa6   :  { %v22748_v41 = vpop.permute.xlu0 %18005  ;;  %v17953_v37 = vunpack.i.h.bf16 %v22702_v18  ;;  %v8746_v13 = vsel %vm7070_vm14, %v8730_v10, %v17937_v23  ;;  %v8747_v30 = vsel %vm7070_vm14, %v8731_v8, %v17938_v29  ;;  %v8654_v18 = vsel %vm4795_vm4, %v22444_v36, %v17907_v12 }
 0xaa7   :  { %v8729_v0 = vsel %vm7053_vm13, %v8713_v61, %v17998_v11  ;;  %v8728_v27 = vsel %vm7053_vm13, %v8712_v22, %v17997_v25  ;;  %v8765_v25 = vpack.c.bf16 %v8156_v9, %v22742_v40  ;;  %v8670_v22 = vsel %vm4863_vm8, %v8654_v18, %v17952_v53 }
 0xaa8   :  { %v8745_v5 = vsel %vm7070_vm14, %v8729_v0, %v17948_v47  ;;  %v8744_v34 = vsel %vm7070_vm14, %v8728_v27, %v17947_v56  ;;  %v22756_v21 = vpop.permute.xlu1 %18000  ;;  %v17883_v56 = vunpack.i.h.bf16 %v22666_v57  ;;  %v8762_v61 = vpack.c.bf16 %v8747_v30, %v8746_v13  ;;  %v22813_v0 = vpop.f32.mrf.mxu1 }
 0xaa9   :  { %v8760_v31 = vpack.c.bf16 %v8745_v5, %v8744_v34  ;;  %v8671_v6 = vsel %vm4863_vm8, %v8655_v42, %v17953_v37  ;;  %v17983_v20 = vunpack.i.h.bf16 %v22714_v39  ;;  %v8684_v57 = vsel %vm7002_vm10, %v8668_v63, %v17882_v35 }
 0xaaa   :  { %v22764_v49 = vpop.permute.xlu0 %18015  ;;  %v17923_v40 = vunpack.i.h.bf16 %v22690_v24  ;;  %v8700_v28 = vsel %vm7019_vm11, %v8684_v57, %v17987_v52  ;;  %v17928_v5 = vunpack.i.h.bf16 %v22694_v16  ;;  %v17927_v34 = vunpack.i.l.bf16 %v22694_v16  ;;  %v22830_v10 = vpop.f32.mrf.mxu1 }
 0xaab   :  { %8912 = vmatmul.mubr.bf16.vlgmr.msra.gmra.mxu0 %v8760_v31  ;;  %v8686_v38 = vsel %vm7002_vm10, %v8670_v22, %v17877_v46  ;;  %v8687_v39 = vsel %vm7002_vm10, %v8671_v6, %v17878_v1  ;;  %v8716_v24 = vsel %vm7036_vm12, %v8700_v28, %v17922_v51  ;;  %v18003_v29 = vunpack.i.h.bf16 %v22756_v21  ;;  %v23644_v6 = vld [vmem:[#allocation94_spill] sm:$0xff] }
 0xaac   :  { %v22774_v4 = vpop.permute.xlu1 %18010  ;;  %14123 = vmatprep.mubr.msk.bf16.mxu0 %vm4795_vm4, %v8763_v14  ;;  %v8669_v14 = vsel %vm4863_vm8, %v8653_v60, %v17963_v17  ;;  %v17967_v17 = vunpack.i.l.bf16 %v22706_v62  ;;  %v8703_v55 = vsel %vm7019_vm11, %v8687_v39, %v17983_v20  ;;  %v8702_v12 = vsel %vm7019_vm11, %v8686_v38, %v17982_v26 }
 0xaad   :  { %v8685_v36 = vsel %vm7002_vm10, %v8669_v14, %v17883_v56  ;;  %v8657_v9 = vsel %vm4795_vm4, %v22469_v48, %v17928_v5  ;;  %v18002_v37 = vunpack.i.l.bf16 %v22756_v21  ;;  %v8767_v13 = vpack.c.bf16 %v22759_v33, %v22730_v3  ;;  %v22848_v56 = vpop.f32.mrf.mxu1 }
 0xaae   :  { %v22788_v47 = vpop.permute.xlu0 %18020  ;;  %v8701_v27 = vsel %vm7019_vm11, %v8685_v36, %v17988_v44  ;;  %v8656_v30 = vsel %vm4795_vm4, %v22459_v43, %v17927_v34  ;;  %v17958_v48 = vunpack.i.h.bf16 %v22704_v2  ;;  %v8718_v21 = vsel %vm7036_vm12, %v8702_v12, %v17912_v32 }
 0xaaf   :  { %v8717_v8 = vsel %vm7036_vm12, %v8701_v27, %v17923_v40  ;;  %v8719_v35 = vsel %vm7036_vm12, %v8703_v55, %v17913_v59  ;;  %v18008_v3 = vunpack.i.h.bf16 %v22748_v41  ;;  %v8673_v43 = vsel %vm4863_vm8, %v8657_v9, %v18003_v29  ;;  %v8172_v40 = vpop.f32.mrf.mxu1 }
 0xab0   :  { %v22800_v11 = vpop.permute.xlu1 %18025  ;;  %v18013_v42 = vunpack.i.h.bf16 %v22774_v4  ;;  %v18012_v2 = vunpack.i.l.bf16 %v22774_v4  ;;  %v18007_v59 = vunpack.i.l.bf16 %v22748_v41  ;;  %v8769_v38 = vpack.c.bf16 %v8172_v40, %v22830_v10 }
 0xab1   :  { %v18028_v14 = vunpack.i.h.bf16 %v22800_v11  ;;  %v18027_v63 = vunpack.i.l.bf16 %v22800_v11  ;;  %v8689_v41 = vsel %vm7002_vm10, %v8673_v43, %v18008_v3  ;;  %v18018_v55 = vunpack.i.h.bf16 %v22764_v49 }
 0xab2   :  { %v22811_v7 = vpop.permute.xlu0 %18030  ;;  %v8705_v34 = vsel %vm7019_vm11, %v8689_v41, %v18013_v42  ;;  %v18023_v12 = vunpack.i.h.bf16 %v22788_v47  ;;  %v18022_v10 = vunpack.i.l.bf16 %v22788_v47 }
 0xab3   :  { %8920 = vmatmul.mubr.bf16.gmra.mxu0 %v8762_v61  ;;  %v18032_v22 = vunpack.i.l.bf16 %v22811_v7  ;;  %v8659_v61 = vsel %vm4795_vm4, %v22463_v45, %v18028_v14  ;;  %v8658_v20 = vsel %vm4795_vm4, %v23644_v6, %v18027_v63  ;;  %v18033_v57 = vunpack.i.h.bf16 %v22811_v7 }
 0xab4   :  { %v18041_v31 = vpop.permute.xlu1 %18040  ;;  %14124 = vmatprep.mubr.msk.bf16.mxu0 %vm4795_vm4, %v8765_v25  ;;  %v8672_v25 = vsel %vm4863_vm8, %v8656_v30, %v18002_v37 }
 0xab5   :  { %v18043_v50 = vunpack.i.h.bf16 %v18041_v31  ;;  %v18042_v19 = vunpack.i.l.bf16 %v18041_v31  ;;  %v8688_v51 = vsel %vm7002_vm10, %v8672_v25, %v18007_v59  ;;  %v8674_v7 = vsel %vm4863_vm8, %v8658_v20, %v18032_v22  ;;  %v23645_v22 = vld [vmem:[#allocation98_spill] sm:$0xff] }
 0xab6   :  { %v18036_v16 = vpop.permute.xlu0 %18035  ;;  %v8704_v45 = vsel %vm7019_vm11, %v8688_v51, %v18012_v2  ;;  %v8675_v31 = vsel %vm4863_vm8, %v8659_v61, %v18033_v57  ;;  %v23646_v61 = vld [vmem:[#allocation96_spill] sm:$0xff] }
 0xab7   :  { %v8733_v23 = vsel %vm7053_vm13, %v8717_v8, %v18043_v50  ;;  %v8732_v1 = vsel %vm7053_vm13, %v8716_v24, %v18042_v19  ;;  %v18038_v46 = vunpack.i.h.bf16 %v18036_v16  ;;  %v18037_v58 = vunpack.i.l.bf16 %v18036_v16 }
 0xab8   :  { %v18046_v62 = vpop.permute.xlu1 %18045  ;;  %v8748_v60 = vsel %vm7070_vm14, %v8732_v1, %v17967_v17  ;;  %v8749_v53 = vsel %vm7070_vm14, %v8733_v23, %v17968_v15  ;;  %v22880_v17 = vpop.f32.mrf.mxu1  ;;  %v18017_v24 = vunpack.i.l.bf16 %v22764_v49  ;;  %v8721_v1 = vsel %vm7036_vm12, %v8705_v34, %v18018_v55 }
 0xab9   :  { %v8764_v52 = vpack.c.bf16 %v8749_v53, %v8748_v60  ;;  %v8735_v33 = vsel %vm7053_vm13, %v8719_v35, %v18038_v46  ;;  %v8734_v18 = vsel %vm7053_vm13, %v8718_v21, %v18037_v58  ;;  %v18048_v26 = vunpack.i.h.bf16 %v18046_v62 }
 0xaba   :  { %v18051_v44 = vpop.permute.xlu0 %18050  ;;  %v18047_v27 = vunpack.i.l.bf16 %v18046_v62  ;;  %v8750_v4 = vsel %vm7070_vm14, %v8734_v18, %v17957_v54  ;;  %v8751_v28 = vsel %vm7070_vm14, %v8735_v33, %v17958_v48  ;;  %v8720_v23 = vsel %vm7036_vm12, %v8704_v45, %v18017_v24  ;;  %v8185_v32 = vpop.f32.mrf.mxu1 }
 0xabb   :  { %8928 = vmatmul.mubr.bf16.gmra.mxu0 %v8764_v52  ;;  %v18053_v15 = vunpack.i.h.bf16 %v18051_v44  ;;  %v18052_v39 = vunpack.i.l.bf16 %v18051_v44  ;;  %v8766_v19 = vpack.c.bf16 %v8751_v28, %v8750_v4  ;;  %v8691_v8 = vsel %vm7002_vm10, %v8675_v31, %v18048_v26 }
 0xabc   :  { %v18056_v11 = vpop.permute.xlu1 %18055  ;;  %14125 = vmatprep.mubr.msk.bf16.mxu0 %vm4795_vm4, %v8767_v13  ;;  %v8690_v16 = vsel %vm7002_vm10, %v8674_v7, %v18047_v27  ;;  %v8771_v52 = vpack.c.bf16 %v22848_v56, %v22813_v0  ;;  %v22903_v33 = vpop.f32.mrf.mxu1 }
 0xabd   :  { %v8706_v49 = vsel %vm7019_vm11, %v8690_v16, %v18052_v39  ;;  %v8707_v62 = vsel %vm7019_vm11, %v8691_v8, %v18053_v15  ;;  %v18058_v60 = vunpack.i.h.bf16 %v18056_v11  ;;  %v18057_v53 = vunpack.i.l.bf16 %v18056_v11 }
 0xabe   :  { %v22869_v36 = vpop.permute.xlu0 %18065  ;;  %v8188_v40 = vpop.f32.mrf.mxu1 }
 0xabf   :  { %v8722_v54 = vsel %vm7036_vm12, %v8706_v49, %v18057_v53  ;;  %v8723_v21 = vsel %vm7036_vm12, %v8707_v62, %v18058_v60  ;;  %v18068_v35 = vunpack.i.h.bf16 %v22869_v36  ;;  %v18067_v3 = vunpack.i.l.bf16 %v22869_v36  ;;  %v23647_v49 = vld [vmem:[#allocation97_spill] sm:$0xff]  ;;  %v23648_v60 = vld [vmem:[#allocation95_spill] sm:$0xff] }
 0xac0   :  { %v18061_v5 = vpop.permute.xlu1 %18060  ;;  %v8773_v45 = vpack.c.bf16 %v8188_v40, %v8185_v32 }
 0xac1   :  { %v18063_v2 = vunpack.i.h.bf16 %v18061_v5  ;;  %v18062_v0 = vunpack.i.l.bf16 %v18061_v5  ;;  %v8661_v59 = vsel %vm4795_vm4, %v23645_v22, %v18068_v35  ;;  %v8660_v6 = vsel %vm4795_vm4, %v23646_v61, %v18067_v3 }
 0xac2   :  { %v18071_v50 = vpop.permute.xlu0 %18070 }
 0xac3   :  { %8936 = vmatmul.mubr.bf16.gmra.mxu0 %v8766_v19  ;;  %v18073_v37 = vunpack.i.h.bf16 %v18071_v50  ;;  %v18072_v47 = vunpack.i.l.bf16 %v18071_v50 }
 0xac4   :  { %v18076_v29 = vpop.permute.xlu1 %18075  ;;  %14126 = vmatprep.mubr.msk.bf16.mxu0 %vm4795_vm4, %v8769_v38 }
 0xac5   :  { %v18078_v46 = vunpack.i.h.bf16 %v18076_v29  ;;  %v18077_v58 = vunpack.i.l.bf16 %v18076_v29  ;;  %v8739_v18 = vsel %vm7053_vm13, %v8723_v21, %v18073_v37  ;;  %v8738_v11 = vsel %vm7053_vm13, %v8722_v54, %v18072_v47 }
 0xac6   :  { %v18086_v9 = vpop.permute.xlu0 %18085  ;;  %v8754_v57 = vsel %vm7070_vm14, %v8738_v11, %v18062_v0  ;;  %v8755_v36 = vsel %vm7070_vm14, %v8739_v18, %v18063_v2  ;;  %v8775_v54 = vpack.c.bf16 %v22903_v33, %v22880_v17 }
 0xac7   :  { %v8737_v13 = vsel %vm7053_vm13, %v8721_v1, %v18078_v46  ;;  %v8736_v30 = vsel %vm7053_vm13, %v8720_v23, %v18077_v58  ;;  %v18088_v51 = vunpack.i.h.bf16 %v18086_v9  ;;  %v18087_v41 = vunpack.i.l.bf16 %v18086_v9 }
 0xac8   :  { %v18081_v14 = vpop.permute.xlu1 %18080  ;;  %v8752_v63 = vsel %vm7070_vm14, %v8736_v30, %v18022_v10  ;;  %v8753_v44 = vsel %vm7070_vm14, %v8737_v13, %v18023_v12  ;;  %v8770_v31 = vpack.c.bf16 %v8755_v36, %v8754_v57 }
 0xac9   :  { %v8768_v48 = vpack.c.bf16 %v8753_v44, %v8752_v63  ;;  %v18083_v25 = vunpack.i.h.bf16 %v18081_v14  ;;  %v18082_v42 = vunpack.i.l.bf16 %v18081_v14 }
 0xaca   :  { %v18096_v43 = vpop.permute.xlu0 %18095 }
 0xacb   :  { %8944 = vmatmul.mubr.bf16.gmra.mxu0 %v8768_v48  ;;  %v8677_v26 = vsel %vm4863_vm8, %v8661_v59, %v18083_v25  ;;  %v8676_v27 = vsel %vm4863_vm8, %v8660_v6, %v18082_v42  ;;  %v18098_v55 = vunpack.i.h.bf16 %v18096_v43  ;;  %v18097_v24 = vunpack.i.l.bf16 %v18096_v43 }
 0xacc   :  { %v18091_v56 = vpop.permute.xlu1 %18090  ;;  %14127 = vmatprep.mubr.msk.bf16.mxu0 %vm4795_vm4, %v8771_v52  ;;  %v8692_v34 = vsel %vm7002_vm10, %v8676_v27, %v18087_v41  ;;  %v8693_v7 = vsel %vm7002_vm10, %v8677_v26, %v18088_v51  ;;  %v18771_v27 = vld [vmem:[#allocation6] sm:$0xff]  }
 0xacd   :  { %v18093_v4 = vunpack.i.h.bf16 %v18091_v56  ;;  %v18092_v28 = vunpack.i.l.bf16 %v18091_v56  ;;  %16863 = vmatprep.mubr.bf16.mxu1 %v18771_v27 }
 0xace   :  { %v18101_v20 = vpop.permute.xlu0 %18100 }
 0xacf   :  { %v8708_v15 = vsel %vm7019_vm11, %v8692_v34, %v18092_v28  ;;  %v8709_v39 = vsel %vm7019_vm11, %v8693_v7, %v18093_v4  ;;  %v18103_v16 = vunpack.i.h.bf16 %v18101_v20  ;;  %v18102_v12 = vunpack.i.l.bf16 %v18101_v20  ;;  %v18772_v4 = vld [vmem:[#allocation6 + $0x20] sm:$0xff]   ;;  %v22946_v28 = vld [vmem:[#allocation12] ss:$0 sm:$0xff]  ;;  %v23649_v34 = vld [vmem:[#allocation93_spill] sm:$0xff] }
 0xad0   :  { %v18106_v5 = vpop.permute.xlu1 %18105  ;;  %v8724_v46 = vsel %vm7036_vm12, %v8708_v15, %v18097_v24  ;;  %v8725_v58 = vsel %vm7036_vm12, %v8709_v39, %v18098_v55  ;;  %v23650_v7 = vmax.f32 %v23649_v34, 0.0  ;;  %v23651_v39 = vld [vmem:[#allocation92_spill] sm:$0xff] }
 0xad1   :  { %v18108_v50 = vunpack.i.h.bf16 %v18106_v5  ;;  %v18107_v19 = vunpack.i.l.bf16 %v18106_v5 }
 0xad2   :  { %v18111_v38 = vpop.permute.xlu0 %18110 }
 0xad3   :  { %8952 = vmatmul.mubr.bf16.gmra.mxu0 %v8770_v31  ;;  %v18113_v23 = vunpack.i.h.bf16 %v18111_v38  ;;  %v18112_v1 = vunpack.i.l.bf16 %v18111_v38  ;;  %v8663_v62 = vsel %vm4795_vm4, %v23647_v49, %v18108_v50  ;;  %v8662_v53 = vsel %vm4795_vm4, %v23648_v60, %v18107_v19 }
 0xad4   :  { %v18116_v8 = vpop.permute.xlu1 %18115  ;;  %14128 = vmatprep.mubr.msk.bf16.mxu0 %vm4795_vm4, %v8773_v45  ;;  %v23652_v50 = vmax.f32 %v23651_v39, 0.0 }
 0xad5   :  { %v18118_v10 = vunpack.i.h.bf16 %v18116_v8  ;;  %v18117_v29 = vunpack.i.l.bf16 %v18116_v8  ;;  %v8678_v52 = vsel %vm4863_vm8, %v8662_v53, %v18112_v1  ;;  %v8679_v48 = vsel %vm4863_vm8, %v8663_v62, %v18113_v23  ;;  %v23653_v23 = vld [vmem:[#allocation91_spill] sm:$0xff]  ;;  %v23655_v62 = vld [vmem:[#allocation90_spill] sm:$0xff] }
 0xad6   :  { %v18126_v37 = vpop.permute.xlu0 %18125  ;;  %v23654_v1 = vmax.f32 %v23653_v23, 0.0  ;;  %v23656_v60 = vmax.f32 %v23655_v62, 0.0  ;;  %v23669_v62 = vld [vmem:[#allocation84_spill] sm:$0xff] }
 0xad7   :  { %v8741_v9 = vsel %vm7053_vm13, %v8725_v58, %v18118_v10  ;;  %v8740_v32 = vsel %vm7053_vm13, %v8724_v46, %v18117_v29  ;;  %v18128_v3 = vunpack.i.h.bf16 %v18126_v37  ;;  %v18127_v43 = vunpack.i.l.bf16 %v18126_v37 }
 0xad8   :  { %v18121_v47 = vpop.permute.xlu1 %18120  ;;  %v8756_v13 = vsel %vm7070_vm14, %v8740_v32, %v18102_v12  ;;  %v8757_v30 = vsel %vm7070_vm14, %v8741_v9, %v18103_v16 }
 0xad9   :  { %v18123_v14 = vunpack.i.h.bf16 %v18121_v47  ;;  %v18122_v63 = vunpack.i.l.bf16 %v18121_v47  ;;  %v8772_v44 = vpack.c.bf16 %v8757_v30, %v8756_v13 }
 0xada   :  { %v18136_v42 = vpop.permute.xlu0 %18135 }
 0xadb   :  { %v8695_v21 = vsel %vm7002_vm10, %v8679_v48, %v18123_v14  ;;  %v8694_v35 = vsel %vm7002_vm10, %v8678_v52, %v18122_v63  ;;  %8960 = vmatmul.mubr.bf16.gmra.mxu0 %v8772_v44  ;;  %v18138_v33 = vunpack.i.h.bf16 %v18136_v42  ;;  %v18137_v22 = vunpack.i.l.bf16 %v18136_v42 }
 0xadc   :  { %v18131_v18 = vpop.permute.xlu1 %18130  ;;  %14129 = vmatprep.mubr.msk.bf16.mxu0 %vm4795_vm4, %v8775_v54  ;;  %v8710_v2 = vsel %vm7019_vm11, %v8694_v35, %v18127_v43  ;;  %v8711_v0 = vsel %vm7019_vm11, %v8695_v21, %v18128_v3 }
 0xadd   :  { %v18133_v11 = vunpack.i.h.bf16 %v18131_v18  ;;  %v18132_v25 = vunpack.i.l.bf16 %v18131_v18 }
 0xadf   :  { %v8726_v56 = vsel %vm7036_vm12, %v8710_v2, %v18132_v25  ;;  %v8727_v17 = vsel %vm7036_vm12, %v8711_v0, %v18133_v11 }
 0xae0   :  { %v18141_v59 = vpop.permute.xlu1 %18140  ;;  %v8742_v20 = vsel %vm7053_vm13, %v8726_v56, %v18137_v22  ;;  %v8743_v57 = vsel %vm7053_vm13, %v8727_v17, %v18138_v33 }
 0xae1   :  { %v18143_v61 = vunpack.i.h.bf16 %v18141_v59  ;;  %v18142_v6 = vunpack.i.l.bf16 %v18141_v59 }
 0xae3   :  { %v8758_v36 = vsel %vm7070_vm14, %v8742_v20, %v18142_v6  ;;  %v8759_v40 = vsel %vm7070_vm14, %v8743_v57, %v18143_v61  ;;  %v23657_v57 = vld [vmem:[#allocation82_spill] sm:$0xff] }
 0xae4   :  { %v8774_v26 = vpack.c.bf16 %v8759_v40, %v8758_v36  ;;  %v23658_v36 = vmax.f32 %v23657_v57, 0.0 }
 0xae6   :  { %8968 = vmatmul.mubr.bf16.gmra.mxu0 %v8774_v26  ;;  %v23659_v26 = vld [vmem:[#allocation78_spill] sm:$0xff] }
 0xae7   :  { %16903 = vmatprep.mubr.bf16.mxu0 %v18772_v4  ;;  %v23660_v27 = vmax.f32 %v23659_v26, 0.0  ;;  %v18775_v26 = vld [vmem:[#allocation6 + $0x10] sm:$0xff]  }
 0xb6b   :  { %v8913_v51 = vpop.f32.mrf.mxu0 }
 0xb6c   :  { %v8914_v41 = vadd.f32 %v22946_v28, %v8913_v51 }
 0xb6d   :  { %v8915_v5 = vpop.f32.mrf.mxu0 }
 0xb6e   :  { %v8976_v38 = vadd.f32 %v8914_v41, %v23650_v7 }
 0xb6f   :  { %v8916_v45 = vpop.f32.mrf.mxu0 }
 0xb70   :  { %v8917_v31 = vadd.f32 %v22946_v28, %v8916_v45  ;;  %v8992_v24 = vmax.f32 %v8976_v38, 0.0  ;;  %v23661_v45 = vld [vmem:[#allocation79_spill] sm:$0xff]  ;;  %v23663_v38 = vld [vmem:[#allocation80_spill] sm:$0xff] }
 0xb71   :  { %v8918_v15 = vpop.f32.mrf.mxu0  ;;  %v23662_v34 = vmax.f32 %v23661_v45, 0.0  ;;  %v18781_v45 = vld [vmem:[#allocation6 + $0x38] sm:$0xff]  }
 0xb72   :  { %v8977_v19 = vadd.f32 %v8917_v31, %v23652_v50  ;;  %v23664_v31 = vmax.f32 %v23663_v38, 0.0  ;;  %v23665_v50 = vld [vmem:[#allocation81_spill] sm:$0xff]  ;;  %v18784_v38 = vld [vmem:[#allocation6 + $0x58] sm:$0xff]  }
 0xb73   :  { %v8921_v55 = vpop.f32.mrf.mxu0 }
 0xb74   :  { %v8993_v8 = vmax.f32 %v8977_v19, 0.0  ;;  %v8922_v16 = vadd.f32 %v22946_v28, %v8921_v55  ;;  %v23666_v19 = vmax.f32 %v23665_v50, 0.0  ;;  %v23681_v50 = vmov 0  }
 0xb75   :  { %v8923_v12 = vpop.f32.mrf.mxu0 }
 0xb76   :  { %v22955_v10 = vpack.c.bf16 %v8993_v8, %v8992_v24  ;;  %v8978_v46 = vadd.f32 %v8922_v16, %v23654_v1 }
 0xb77   :  { %v8924_v29 = vpop.f32.mrf.mxu0 }
 0xb78   :  { %v8925_v58 = vadd.f32 %v22946_v28, %v8924_v29  ;;  %v8994_v9 = vmax.f32 %v8978_v46, 0.0  ;;  %v23667_v29 = vld [vmem:[#allocation83_spill] sm:$0xff] }
 0xb79   :  { %v8926_v49 = vpop.f32.mrf.mxu0  ;;  %v23668_v23 = vmax.f32 %v23667_v29, 0.0 }
 0xb7a   :  { %v8979_v53 = vadd.f32 %v8925_v58, %v23656_v60  ;;  %v23670_v60 = vmax.f32 %v23669_v62, 0.0 }
 0xb7b   :  { %v22962_v37 = vpop.f32.mrf.mxu0 }
 0xb7c   :  { %v8995_v32 = vmax.f32 %v8979_v53, 0.0 }
 0xb7d   :  { %v8931_v13 = vpop.f32.mrf.mxu0 }
 0xb7e   :  { %v22964_v47 = vpack.c.bf16 %v8995_v32, %v8994_v9 }
 0xb7f   :  { %v8932_v30 = vpop.f32.mrf.mxu0 }
 0xb81   :  { %v8934_v14 = vpop.f32.mrf.mxu0 }
 0xb82   :  { %v23671_v14 = vld [vmem:[#allocation85_spill] sm:$0xff] }
 0xb83   :  { %v8937_v63 = vpop.f32.mrf.mxu0 }
 0xb84   :  { %v8938_v13 = vadd.f32 %v22946_v28, %v8937_v63  ;;  %v8930_v63 = vadd.f32 %v22946_v28, %v22962_v37 }
 0xb85   :  { %v8939_v44 = vpop.f32.mrf.mxu0 }
 0xb86   :  { %v23672_v44 = vmax.f32 %v23671_v14, 0.0 }
 0xb87   :  { %v8940_v52 = vpop.f32.mrf.mxu0 }
 0xb88   :  { %v8941_v49 = vadd.f32 %v22946_v28, %v8940_v52 }
 0xb89   :  { %v8942_v48 = vpop.f32.mrf.mxu0 }
 0xb8b   :  { %v8945_v54 = vpop.f32.mrf.mxu0 }
 0xb8c   :  { %v8946_v12 = vadd.f32 %v22946_v28, %v8945_v54  ;;  %v8933_v54 = vadd.f32 %v22946_v28, %v8932_v30  ;;  %v23677_v30 = vld [vmem:[#allocation86_spill] sm:$0xff] }
 0xb8d   :  { %v8947_v21 = vpop.f32.mrf.mxu0 }
 0xb8e   :  { %v8984_v48 = vadd.f32 %v8946_v12, %v23672_v44  ;;  %v23673_v21 = vld [vmem:[#allocation87_spill] sm:$0xff] }
 0xb8f   :  { %v8948_v35 = vpop.f32.mrf.mxu0 }
 0xb90   :  { %v8949_v39 = vadd.f32 %v22946_v28, %v8948_v35  ;;  %v23674_v35 = vmax.f32 %v23673_v21, 0.0 }
 0xb91   :  { %v8950_v3 = vpop.f32.mrf.mxu0 }
 0xb92   :  { %v8985_v53 = vadd.f32 %v8949_v39, %v23670_v60  ;;  %v8983_v3 = vadd.f32 %v8941_v49, %v23674_v35  ;;  %v18788_v39 = vld [vmem:[#allocation6 + $0x88] sm:$0xff]  }
 0xb93   :  { %v8953_v43 = vpop.f32.mrf.mxu0 }
 0xb94   :  { %v8954_v5 = vadd.f32 %v22946_v28, %v8953_v43  ;;  %v9001_v43 = vmax.f32 %v8985_v53, 0.0 }
 0xb95   :  { %v8955_v18 = vpop.f32.mrf.mxu0 }
 0xb96   :  { %v8986_v1 = vadd.f32 %v8954_v5, %v23668_v23  ;;  %v18780_v5 = vld [vmem:[#allocation6 + $0x60] sm:$0xff]  }
 0xb97   :  { %v8956_v11 = vpop.f32.mrf.mxu0 }
 0xb98   :  { %v8957_v20 = vadd.f32 %v22946_v28, %v8956_v11  ;;  %v9002_v52 = vmax.f32 %v8986_v1, 0.0  ;;  %v23675_v11 = vld [vmem:[#allocation88_spill] sm:$0xff] }
 0xb99   :  { %v8958_v25 = vpop.f32.mrf.mxu0 }
 0xb9a   :  { %v8987_v55 = vadd.f32 %v8957_v20, %v23666_v19  ;;  %v23676_v25 = vmax.f32 %v23675_v11, 0.0  ;;  %v18786_v19 = vld [vmem:[#allocation6 + $0x78] sm:$0xff]  }
 0xb9b   :  { %v8961_v42 = vpop.f32.mrf.mxu0 }
 0xb9c   :  { %v8962_v61 = vadd.f32 %v22946_v28, %v8961_v42  ;;  %v9003_v9 = vmax.f32 %v8987_v55, 0.0  ;;  %v8982_v42 = vadd.f32 %v8938_v13, %v23676_v25 }
 0xb9d   :  { %v8963_v2 = vpop.f32.mrf.mxu0 }
 0xb9e   :  { %v8988_v7 = vadd.f32 %v8962_v61, %v23662_v34  ;;  %v23005_v18 = vpack.c.bf16 %v9003_v9, %v9002_v52  ;;  %v9000_v2 = vmax.f32 %v8984_v48, 0.0  ;;  %v18782_v34 = vld [vmem:[#allocation6 + $0x68] sm:$0xff]  }
 0xb9f   :  { %v8964_v0 = vpop.f32.mrf.mxu0 }
 0xba0   :  { %v8965_v33 = vadd.f32 %v22946_v28, %v8964_v0  ;;  %v9004_v46 = vmax.f32 %v8988_v7, 0.0  ;;  %v23678_v0 = vmax.f32 %v23677_v30, 0.0  ;;  %v18783_v7 = vld [vmem:[#allocation6 + $0x50] sm:$0xff]   ;;  %v18789_v30 = vld [vmem:[%s23682_s14 + $0x38] sm:$0xff]  }
 0xba1   :  { %v8966_v56 = vpop.f32.mrf.mxu0 }
 0xba2   :  { %v8989_v40 = vadd.f32 %v8965_v33, %v23658_v36  ;;  %v8981_v56 = vadd.f32 %v8933_v54, %v23678_v0  ;;  %v23017_v33 = vpack.c.bf16 %v9001_v43, %v9000_v2  ;;  %v18773_v36 = vld [vmem:[#allocation6 + $0x8] sm:$0xff]  }
 0xba4   :  { %v9005_v24 = vmax.f32 %v8989_v40, 0.0  ;;  %v8997_v61 = vmax.f32 %v8981_v56, 0.0  ;;  %v18774_v40 = vld [vmem:[#allocation6 + $0x28] sm:$0xff]   ;;  %v18790_v56 = vld [vmem:[%s23682_s14 + $0x30] sm:$0xff]  }
 0xba6   :  { %v8969_v17 = vpop.f32.mrf.mxu0  ;;  %v22991_v32 = vpack.c.bf16 %v9005_v24, %v9004_v46 }
 0xba7   :  { %v8970_v22 = vadd.f32 %v22946_v28, %v8969_v17  ;;  %v8999_v17 = vmax.f32 %v8983_v3, 0.0 }
 0xba8   :  { %v8971_v59 = vpop.f32.mrf.mxu0 }
 0xba9   :  { %v8990_v4 = vadd.f32 %v8970_v22, %v23660_v27  ;;  %v23679_v22 = vld [vmem:[#allocation89_spill] sm:$0xff]  ;;  %v8998_v59 = vmax.f32 %v8982_v42, 0.0  ;;  %v18777_v27 = vld [vmem:[#allocation6 + $0x40] sm:$0xff]  }
 0xbaa   :  { %v8972_v6 = vpop.f32.mrf.mxu0 }
 0xbab   :  { %v8973_v51 = vadd.f32 %v22946_v28, %v8972_v6  ;;  %v9006_v8 = vmax.f32 %v8990_v4, 0.0  ;;  %v23680_v28 = vmax.f32 %v23679_v22, 0.0  ;;  %v23025_v6 = vpack.c.bf16 %v8999_v17, %v8998_v59  ;;  %v18776_v4 = vld [vmem:[#allocation6 + $0x18] sm:$0xff]   ;;  %v18791_v22 = vld [vmem:[%s23682_s14 + $0x28] sm:$0xff]  }
 0xbac   :  { %v8974_v41 = vpop.f32.mrf.mxu0 }
 0xbad   :  { %v8991_v15 = vadd.f32 %v8973_v51, %v23664_v31  ;;  %v8980_v37 = vadd.f32 %v8930_v63, %v23680_v28  ;;  %v18778_v51 = vld [vmem:[#allocation6 + $0x48] sm:$0xff]   ;;  %v18779_v41 = vld [vmem:[#allocation6 + $0x30] sm:$0xff]  }
 0xbae   :  { %v18785_v31 = vld [vmem:[#allocation6 + $0x70] sm:$0xff]  }
 0xbaf   :  { %v9007_v16 = vmax.f32 %v8991_v15, 0.0  ;;  %v8996_v20 = vmax.f32 %v8980_v37, 0.0  ;;  %v18787_v15 = vld [vmem:[#allocation6 + $0x80] sm:$0xff]  }
 0xbb1   :  { %v22986_v58 = vpack.c.bf16 %v9007_v16, %v9006_v8  ;;  %v23031_v57 = vpack.c.bf16 %v8997_v61, %v8996_v20  ;;  %v18792_v61 = vld [vmem:[%s23682_s14 + $0x20] sm:$0xff]  }
 0xbb3   :  { %16847 = vmatprep.subr.bf16.mxu1 %v22986_v58  ;;  %16887 = vmatprep.subr.bf16.mxu0 %v22986_v58 }
 0xbb4   :  { %16848 = vmatpush3.bf16.msra.mxu1 %v22986_v58  ;;  %16888 = vmatpush3.bf16.msra.mxu0 %v22986_v58 }
 0xbb5   :  { %16849 = vmatprep.subr.bf16.mxu1 %v22991_v32  ;;  %16889 = vmatprep.subr.bf16.mxu0 %v22991_v32 }
 0xbb8   :  { %16850 = vmatpush3.bf16.msra.mxu1 %v22991_v32  ;;  %16890 = vmatpush3.bf16.msra.mxu0 %v22991_v32 }
 0xbb9   :  { %16851 = vmatprep.subr.bf16.mxu1 %v23005_v18  ;;  %16891 = vmatprep.subr.bf16.mxu0 %v23005_v18 }
 0xbbc   :  { %16852 = vmatpush3.bf16.msra.mxu1 %v23005_v18  ;;  %16892 = vmatpush3.bf16.msra.mxu0 %v23005_v18 }
 0xbbd   :  { %16853 = vmatprep.subr.bf16.mxu1 %v23017_v33  ;;  %16893 = vmatprep.subr.bf16.mxu0 %v23017_v33 }
 0xbc0   :  { %16854 = vmatpush3.bf16.msra.mxu1 %v23017_v33  ;;  %16894 = vmatpush3.bf16.msra.mxu0 %v23017_v33 }
 0xbc1   :  { %16855 = vmatprep.subr.bf16.mxu1 %v23025_v6  ;;  %16895 = vmatprep.subr.bf16.mxu0 %v23025_v6 }
 0xbc4   :  { %16856 = vmatpush3.bf16.msra.mxu1 %v23025_v6  ;;  %16896 = vmatpush3.bf16.msra.mxu0 %v23025_v6 }
 0xbc5   :  { %16857 = vmatprep.subr.bf16.mxu1 %v23031_v57  ;;  %16897 = vmatprep.subr.bf16.mxu0 %v23031_v57 }
 0xbc8   :  { %16858 = vmatpush3.bf16.msra.mxu1 %v23031_v57  ;;  %16898 = vmatpush3.bf16.msra.mxu0 %v23031_v57 }
 0xbc9   :  { %16859 = vmatprep.subr.bf16.mxu1 %v22964_v47  ;;  %16899 = vmatprep.subr.bf16.mxu0 %v22964_v47 }
 0xbcc   :  { %16860 = vmatpush3.bf16.msra.mxu1 %v22964_v47  ;;  %16900 = vmatpush3.bf16.msra.mxu0 %v22964_v47 }
 0xbcd   :  { %16861 = vmatprep.subr.bf16.mxu1 %v22955_v10  ;;  %16901 = vmatprep.subr.bf16.mxu0 %v22955_v10 }
 0xbd0   :  { %16862 = vmatpush3.bf16.msra.mxu1 %v22955_v10  ;;  %16902 = vmatpush3.bf16.msra.mxu0 %v22955_v10 }
 0xbd1   :  { %16867 = vmatprep.subr.bf16.mxu1 %v22986_v58  ;;  %16927 = vmatprep.subr.bf16.mxu0 %v22986_v58 }
 0xbd3   :  { %16864 = vmatmul.mubr.bf16.vlgmr.msra.gmra.mxu1 %v18773_v36  ;;  %16904 = vmatmul.mubr.bf16.vlgmr.msra.gmra.mxu0 %v18774_v40  ;;  %v18794_v36 = vld [vmem:[%s23682_s14 + $0x10] sm:$0xff]  }
 0xbd4   :  { %16868 = vmatpush3.bf16.msra.mxu1 %v22986_v58  ;;  %16928 = vmatpush3.bf16.msra.mxu0 %v22986_v58 }
 0xbd5   :  { %16869 = vmatprep.subr.bf16.mxu1 %v22991_v32  ;;  %16929 = vmatprep.subr.bf16.mxu0 %v22991_v32 }
 0xbd6   :  { %16883 = vmatprep.mubr.bf16.mxu1 %v18775_v26  ;;  %16943 = vmatprep.mubr.bf16.mxu0 %v18777_v27  ;;  %v18795_v27 = vld [vmem:[%s23682_s14 + $0x8] sm:$0xff]  }
 0xbd8   :  { %16870 = vmatpush3.bf16.msra.mxu1 %v22991_v32  ;;  %16930 = vmatpush3.bf16.msra.mxu0 %v22991_v32 }
 0xbd9   :  { %16871 = vmatprep.subr.bf16.mxu1 %v23005_v18  ;;  %16931 = vmatprep.subr.bf16.mxu0 %v23005_v18 }
 0xbdc   :  { %16872 = vmatpush3.bf16.msra.mxu1 %v23005_v18  ;;  %16932 = vmatpush3.bf16.msra.mxu0 %v23005_v18 }
 0xbdd   :  { %16873 = vmatprep.subr.bf16.mxu1 %v23017_v33  ;;  %16933 = vmatprep.subr.bf16.mxu0 %v23017_v33 }
 0xbe0   :  { %16874 = vmatpush3.bf16.msra.mxu1 %v23017_v33  ;;  %16934 = vmatpush3.bf16.msra.mxu0 %v23017_v33 }
 0xbe1   :  { %16875 = vmatprep.subr.bf16.mxu1 %v23025_v6  ;;  %16935 = vmatprep.subr.bf16.mxu0 %v23025_v6 }
 0xbe4   :  { %16876 = vmatpush3.bf16.msra.mxu1 %v23025_v6  ;;  %16936 = vmatpush3.bf16.msra.mxu0 %v23025_v6 }
 0xbe5   :  { %16877 = vmatprep.subr.bf16.mxu1 %v23031_v57  ;;  %16937 = vmatprep.subr.bf16.mxu0 %v23031_v57 }
 0xbe8   :  { %16878 = vmatpush3.bf16.msra.mxu1 %v23031_v57  ;;  %16938 = vmatpush3.bf16.msra.mxu0 %v23031_v57 }
 0xbe9   :  { %16879 = vmatprep.subr.bf16.mxu1 %v22964_v47  ;;  %16939 = vmatprep.subr.bf16.mxu0 %v22964_v47 }
 0xbec   :  { %16880 = vmatpush3.bf16.msra.mxu1 %v22964_v47  ;;  %16940 = vmatpush3.bf16.msra.mxu0 %v22964_v47 }
 0xbed   :  { %16881 = vmatprep.subr.bf16.mxu1 %v22955_v10  ;;  %16941 = vmatprep.subr.bf16.mxu0 %v22955_v10 }
 0xbf0   :  { %16882 = vmatpush3.bf16.msra.mxu1 %v22955_v10  ;;  %16942 = vmatpush3.bf16.msra.mxu0 %v22955_v10 }
 0xbf1   :  { %16907 = vmatprep.subr.bf16.mxu1 %v22986_v58  ;;  %16967 = vmatprep.subr.bf16.mxu0 %v22986_v58 }
 0xbf3   :  { %16884 = vmatmul.mubr.bf16.vlgmr.msra.gmra.mxu1 %v18776_v4  ;;  %16944 = vmatmul.mubr.bf16.vlgmr.msra.gmra.mxu0 %v18778_v51  ;;  %v18796_v4 = vld [vmem:[%s23682_s14] sm:$0xff]  }
 0xbf4   :  { %16908 = vmatpush3.bf16.msra.mxu1 %v22986_v58  ;;  %16968 = vmatpush3.bf16.msra.mxu0 %v22986_v58 }
 0xbf5   :  { %16909 = vmatprep.subr.bf16.mxu1 %v22991_v32  ;;  %16969 = vmatprep.subr.bf16.mxu0 %v22991_v32 }
 0xbf6   :  { %16923 = vmatprep.mubr.bf16.mxu1 %v18779_v41  ;;  %16983 = vmatprep.mubr.bf16.mxu0 %v18780_v5  ;;  %v18797_v5 = vld [vmem:[%s23682_s14 + $0x40] sm:$0xff]  }
 0xbf8   :  { %16910 = vmatpush3.bf16.msra.mxu1 %v22991_v32  ;;  %16970 = vmatpush3.bf16.msra.mxu0 %v22991_v32 }
 0xbf9   :  { %16911 = vmatprep.subr.bf16.mxu1 %v23005_v18  ;;  %16971 = vmatprep.subr.bf16.mxu0 %v23005_v18 }
 0xbfc   :  { %16912 = vmatpush3.bf16.msra.mxu1 %v23005_v18  ;;  %16972 = vmatpush3.bf16.msra.mxu0 %v23005_v18 }
 0xbfd   :  { %16913 = vmatprep.subr.bf16.mxu1 %v23017_v33  ;;  %16973 = vmatprep.subr.bf16.mxu0 %v23017_v33 }
 0xc00   :  { %16914 = vmatpush3.bf16.msra.mxu1 %v23017_v33  ;;  %16974 = vmatpush3.bf16.msra.mxu0 %v23017_v33 }
 0xc01   :  { %16915 = vmatprep.subr.bf16.mxu1 %v23025_v6  ;;  %16975 = vmatprep.subr.bf16.mxu0 %v23025_v6 }
 0xc04   :  { %16916 = vmatpush3.bf16.msra.mxu1 %v23025_v6  ;;  %16976 = vmatpush3.bf16.msra.mxu0 %v23025_v6 }
 0xc05   :  { %16917 = vmatprep.subr.bf16.mxu1 %v23031_v57  ;;  %16977 = vmatprep.subr.bf16.mxu0 %v23031_v57 }
 0xc08   :  { %16918 = vmatpush3.bf16.msra.mxu1 %v23031_v57  ;;  %16978 = vmatpush3.bf16.msra.mxu0 %v23031_v57 }
 0xc09   :  { %16919 = vmatprep.subr.bf16.mxu1 %v22964_v47  ;;  %16979 = vmatprep.subr.bf16.mxu0 %v22964_v47 }
 0xc0c   :  { %16920 = vmatpush3.bf16.msra.mxu1 %v22964_v47  ;;  %16980 = vmatpush3.bf16.msra.mxu0 %v22964_v47 }
 0xc0d   :  { %16921 = vmatprep.subr.bf16.mxu1 %v22955_v10  ;;  %16981 = vmatprep.subr.bf16.mxu0 %v22955_v10 }
 0xc10   :  { %16922 = vmatpush3.bf16.msra.mxu1 %v22955_v10  ;;  %16982 = vmatpush3.bf16.msra.mxu0 %v22955_v10 }
 0xc11   :  { %16947 = vmatprep.subr.bf16.mxu1 %v22986_v58  ;;  %17007 = vmatprep.subr.bf16.mxu0 %v22986_v58 }
 0xc13   :  { %16924 = vmatmul.mubr.bf16.vlgmr.msra.gmra.mxu1 %v18781_v45  ;;  %16984 = vmatmul.mubr.bf16.vlgmr.msra.gmra.mxu0 %v18782_v34 }
 0xc14   :  { %16948 = vmatpush3.bf16.msra.mxu1 %v22986_v58  ;;  %17008 = vmatpush3.bf16.msra.mxu0 %v22986_v58 }
 0xc15   :  { %16949 = vmatprep.subr.bf16.mxu1 %v22991_v32  ;;  %17009 = vmatprep.subr.bf16.mxu0 %v22991_v32 }
 0xc16   :  { %16963 = vmatprep.mubr.bf16.mxu1 %v18783_v7  ;;  %17023 = vmatprep.mubr.bf16.mxu0 %v18787_v15 }
 0xc18   :  { %16950 = vmatpush3.bf16.msra.mxu1 %v22991_v32  ;;  %17010 = vmatpush3.bf16.msra.mxu0 %v22991_v32 }
 0xc19   :  { %16951 = vmatprep.subr.bf16.mxu1 %v23005_v18  ;;  %17011 = vmatprep.subr.bf16.mxu0 %v23005_v18 }
 0xc1c   :  { %16952 = vmatpush3.bf16.msra.mxu1 %v23005_v18  ;;  %17012 = vmatpush3.bf16.msra.mxu0 %v23005_v18 }
 0xc1d   :  { %16953 = vmatprep.subr.bf16.mxu1 %v23017_v33  ;;  %17013 = vmatprep.subr.bf16.mxu0 %v23017_v33 }
 0xc20   :  { %16954 = vmatpush3.bf16.msra.mxu1 %v23017_v33  ;;  %17014 = vmatpush3.bf16.msra.mxu0 %v23017_v33 }
 0xc21   :  { %16955 = vmatprep.subr.bf16.mxu1 %v23025_v6  ;;  %17015 = vmatprep.subr.bf16.mxu0 %v23025_v6 }
 0xc24   :  { %16956 = vmatpush3.bf16.msra.mxu1 %v23025_v6  ;;  %17016 = vmatpush3.bf16.msra.mxu0 %v23025_v6 }
 0xc25   :  { %16957 = vmatprep.subr.bf16.mxu1 %v23031_v57  ;;  %17017 = vmatprep.subr.bf16.mxu0 %v23031_v57 }
 0xc28   :  { %16958 = vmatpush3.bf16.msra.mxu1 %v23031_v57  ;;  %17018 = vmatpush3.bf16.msra.mxu0 %v23031_v57 }
 0xc29   :  { %16959 = vmatprep.subr.bf16.mxu1 %v22964_v47  ;;  %17019 = vmatprep.subr.bf16.mxu0 %v22964_v47 }
 0xc2c   :  { %16960 = vmatpush3.bf16.msra.mxu1 %v22964_v47  ;;  %17020 = vmatpush3.bf16.msra.mxu0 %v22964_v47 }
 0xc2d   :  { %16961 = vmatprep.subr.bf16.mxu1 %v22955_v10  ;;  %17021 = vmatprep.subr.bf16.mxu0 %v22955_v10 }
 0xc30   :  { %16962 = vmatpush3.bf16.msra.mxu1 %v22955_v10  ;;  %17022 = vmatpush3.bf16.msra.mxu0 %v22955_v10 }
 0xc31   :  { %16987 = vmatprep.subr.bf16.mxu1 %v22986_v58 }
 0xc33   :  { %16964 = vmatmul.mubr.bf16.vlgmr.msra.gmra.mxu1 %v18784_v38  ;;  %17024 = vmatmul.mubr.bf16.vlgmr.msra.gmra.mxu0 %v18788_v39 }
 0xc34   :  { %16988 = vmatpush3.bf16.msra.mxu1 %v22986_v58  ;;  %17003 = vmatprep.mubr.bf16.mxu1 %v18785_v31 }
 0xc35   :  { %16989 = vmatprep.subr.bf16.mxu1 %v22991_v32  ;;  %10188 = vmatprep.mubr.bf16.mxu0 %v23681_v50 }
 0xc38   :  { %16990 = vmatpush3.bf16.msra.mxu1 %v22991_v32 }
 0xc39   :  { %16991 = vmatprep.subr.bf16.mxu1 %v23005_v18 }
 0xc3c   :  { %16992 = vmatpush3.bf16.msra.mxu1 %v23005_v18 }
 0xc3d   :  { %16993 = vmatprep.subr.bf16.mxu1 %v23017_v33 }
 0xc40   :  { %16994 = vmatpush3.bf16.msra.mxu1 %v23017_v33 }
 0xc41   :  { %16995 = vmatprep.subr.bf16.mxu1 %v23025_v6 }
 0xc44   :  { %16996 = vmatpush3.bf16.msra.mxu1 %v23025_v6  ;;  %v18793_v6 = vld [vmem:[%s23682_s14 + $0x18] sm:$0xff]  }
 0xc45   :  { %16997 = vmatprep.subr.bf16.mxu1 %v23031_v57 }
 0xc48   :  { %16998 = vmatpush3.bf16.msra.mxu1 %v23031_v57 }
 0xc49   :  { %16999 = vmatprep.subr.bf16.mxu1 %v22964_v47 }
 0xc4c   :  { %17000 = vmatpush3.bf16.msra.mxu1 %v22964_v47 }
 0xc4d   :  { %17001 = vmatprep.subr.bf16.mxu1 %v22955_v10 }
 0xc50   :  { %17002 = vmatpush3.bf16.msra.mxu1 %v22955_v10 }
 0xc51   :  { %9838 = vmatprep.subr.bf16.mxu1 %v23681_v50 }
 0xc53   :  { %17004 = vmatmul.mubr.bf16.vlgmr.msra.gmra.mxu1 %v18786_v19 }
 0xc54   :  { %9839 = vmatpush1.bf16.msra.mxu1 %v18789_v30 }
 0xc55   :  { %9840 = vmatprep.subr.bf16.mxu1 %v23681_v50 }
 0xc58   :  { %9841 = vmatpush1.bf16.msra.mxu1 %v18790_v56 }
 0xc59   :  { %9842 = vmatprep.subr.bf16.mxu1 %v23681_v50 }
 0xc5c   :  { %9843 = vmatpush1.bf16.msra.mxu1 %v18791_v22 }
 0xc5d   :  { %9844 = vmatprep.subr.bf16.mxu1 %v23681_v50 }
 0xc60   :  { %9845 = vmatpush1.bf16.msra.mxu1 %v18792_v61 }
 0xc61   :  { %9846 = vmatprep.subr.bf16.mxu1 %v23681_v50 }
 0xc64   :  { %9847 = vmatpush1.bf16.msra.mxu1 %v18793_v6 }
 0xc65   :  { %9848 = vmatprep.subr.bf16.mxu1 %v23681_v50 }
 0xc68   :  { %9849 = vmatpush1.bf16.msra.mxu1 %v18794_v36 }
 0xc69   :  { %9850 = vmatprep.subr.bf16.mxu1 %v23681_v50 }
 0xc6c   :  { %9851 = vmatpush1.bf16.msra.mxu1 %v18795_v27 }
 0xc6d   :  { %9852 = vmatprep.subr.bf16.mxu1 %v23681_v50 }
 0xc70   :  { %9853 = vmatpush1.bf16.msra.mxu1 %v18796_v4 }
 0xc71   :  { %9868 = vmatprep.subr.bf16.mxu1 %v23681_v50 }
 0xc74   :  { %9869 = vmatpush2.bf16.msra.mxu1 %v18797_v5 }
 0xc93   :  { %v16905_v55 = vpop.f32.mrf.mxu0  ;;  %v23163_v23 = vpop.f32.mrf.mxu1 }
 0xc95   :  { %v9198_v24 = vpop.f32.mrf.mxu0  ;;  %v23165_v47 = vpop.f32.mrf.mxu1 }
 0xc97   :  { %v16906_v8 = vpop.f32.mrf.mxu0  ;;  %v23167_v1 = vpop.f32.mrf.mxu1 }
 0xc98   :  { %v18144_v16 = vpack.i.bf16 %v16906_v8, %v16905_v55 }
 0xc99   :  { %v9201_v12 = vpop.f32.mrf.mxu0  ;;  %v23169_v10 = vpop.f32.mrf.mxu1 }
 0xc9a   :  { %v18149_v29 = vpack.i.bf16 %v9201_v12, %v9198_v24  ;;  %18145 = vrot.lane.b32.xlu0 %v18144_v16, %s20057_s5 }
 0xc9c   :  { %18150 = vrot.lane.b32.xlu1 %v18149_v29, %s20057_s5 }
 0xcb3   :  { %v16885_v46 = vpop.f32.mrf.mxu1  ;;  %v23171_v58 = vpop.f32.mrf.mxu0 }
 0xcb5   :  { %v9132_v49 = vpop.f32.mrf.mxu1  ;;  %v9330_v62 = vpop.f32.mrf.mxu0 }
 0xcb7   :  { %v16886_v60 = vpop.f32.mrf.mxu1  ;;  %v23173_v53 = vpop.f32.mrf.mxu0 }
 0xcb8   :  { %v18154_v9 = vpack.i.bf16 %v16886_v60, %v16885_v46  ;;  %v18194_v32 = vpack.i.bf16 %v23173_v53, %v23171_v58 }
 0xcb9   :  { %v9135_v13 = vpop.f32.mrf.mxu1  ;;  %v9333_v14 = vpop.f32.mrf.mxu0 }
 0xcba   :  { %v18159_v44 = vpack.i.bf16 %v9135_v13, %v9132_v49  ;;  %18155 = vrot.lane.b32.xlu1 %v18154_v9, %s20034_s15  ;;  %v18164_v48 = vpack.i.bf16 %v9333_v14, %v9330_v62 }
 0xcbc   :  { %18160 = vrot.lane.b32.xlu0 %v18159_v44, %s20034_s15 }
 0xcbe   :  { %18165 = vrot.lane.b32.xlu1 %v18164_v48, %s20018_s0 }
 0xcd3   :  { %v16925_v52 = vpop.f32.mrf.mxu1  ;;  %v23180_v54 = vpop.f32.mrf.mxu0 }
 0xcd5   :  { %v9264_v21 = vpop.f32.mrf.mxu1  ;;  %v9462_v35 = vpop.f32.mrf.mxu0 }
 0xcd7   :  { %v16926_v3 = vpop.f32.mrf.mxu1  ;;  %v16986_v43 = vpop.f32.mrf.mxu0 }
 0xcd8   :  { %v18204_v18 = vpack.i.bf16 %v16986_v43, %v23180_v54  ;;  %v18179_v2 = vpack.i.bf16 %v16926_v3, %v16925_v52 }
 0xcd9   :  { %v9267_v63 = vpop.f32.mrf.mxu1  ;;  %v9465_v11 = vpop.f32.mrf.mxu0 }
 0xcda   :  { %v18169_v25 = vpack.i.bf16 %v9267_v63, %v9264_v21  ;;  %v18174_v42 = vpack.i.bf16 %v9465_v11, %v9462_v35 }
 0xcdc   :  { %18175 = vrot.lane.b32.xlu1 %v18174_v42, %s20062_s10  ;;  %18170 = vrot.lane.b32.xlu0 %v18169_v25, %s20058_s3 }
 0xce0   :  { %18180 = vrot.lane.b32.xlu1 %v18179_v2, %s20058_s3 }
 0xcf3   :  { %v16965_v0 = vpop.f32.mrf.mxu1  ;;  %v23196_v20 = vpop.f32.mrf.mxu0 }
 0xcf5   :  { %v9396_v17 = vpop.f32.mrf.mxu1  ;;  %v9594_v57 = vpop.f32.mrf.mxu0 }
 0xcf7   :  { %v16966_v33 = vpop.f32.mrf.mxu1  ;;  %v23200_v40 = vpop.f32.mrf.mxu0 }
 0xcf8   :  { %v18199_v28 = vpack.i.bf16 %v16966_v33, %v16965_v0  ;;  %v9752_v26 = vpack.c.bf16 %v23200_v40, %v23196_v20 }
 0xcf9   :  { %v9399_v37 = vpop.f32.mrf.mxu1  ;;  %v9597_v51 = vpop.f32.mrf.mxu0 }
 0xcfa   :  { %v18184_v59 = vpack.i.bf16 %v9399_v37, %v9396_v17  ;;  %18200 = vrot.lane.b32.xlu1 %v18199_v28, %s20060_s7  ;;  %v9750_v41 = vpack.c.bf16 %v9597_v51, %v9594_v57 }
 0xcfc   :  { %18185 = vrot.lane.b32.xlu0 %v18184_v59, %s20060_s7  ;;  %14158 = vmatprep.mubr.msk.bf16.mxu1 %vm4795_vm4, %v9750_v41 }
 0xd0c   :  { %v18146_v19 = vpop.permute.xlu0 %18145 }
 0xd0d   :  { %v18148_v2 = vunpack.i.h.bf16 %v18146_v19  ;;  %v18147_v30 = vunpack.i.l.bf16 %v18146_v19 }
 0xd0e   :  { %v18151_v39 = vpop.permute.xlu1 %18150 }
 0xd0f   :  { %v18153_v46 = vunpack.i.h.bf16 %v18151_v39  ;;  %v18152_v49 = vunpack.i.l.bf16 %v18151_v39 }
 0xd13   :  { %v17005_v45 = vpop.f32.mrf.mxu1 }
 0xd15   :  { %v9528_v34 = vpop.f32.mrf.mxu1 }
 0xd17   :  { %v17006_v7 = vpop.f32.mrf.mxu1 }
 0xd18   :  { %v18209_v38 = vpack.i.bf16 %v17006_v7, %v17005_v45 }
 0xd19   :  { %v9531_v31 = vpop.f32.mrf.mxu1 }
 0xd1a   :  { %v18189_v15 = vpack.i.bf16 %v9531_v31, %v9528_v34  ;;  %18210 = vrot.lane.b32.xlu1 %v18209_v38, %s20061_s27 }
 0xd1c   :  { %18190 = vrot.lane.b32.xlu0 %v18189_v15, %s20061_s27 }
 0xd20   :  { %18195 = vrot.lane.b32.xlu0 %v18194_v32, %s20018_s0 }
 0xd24   :  { %18205 = vrot.lane.b32.xlu0 %v18204_v18, %s20062_s10 }
 0xd2c   :  { %v18156_v55 = vpop.permute.xlu1 %18155 }
 0xd2d   :  { %v18157_v3 = vunpack.i.l.bf16 %v18156_v55 }
 0xd2e   :  { %v18161_v24 = vpop.permute.xlu0 %18160 }
 0xd2f   :  { %v18163_v8 = vunpack.i.h.bf16 %v18161_v24  ;;  %v18162_v16 = vunpack.i.l.bf16 %v18161_v24  ;;  %v9723_v17 = vsel %vm4795_vm4, %v23163_v23, %v18157_v3 }
 0xd30   :  { %v18166_v12 = vpop.permute.xlu1 %18165 }
 0xd31   :  { %v9722_v62 = vsel %vm4795_vm4, %v23169_v10, %v18163_v8  ;;  %v9721_v60 = vsel %vm4795_vm4, %v23165_v47, %v18162_v16  ;;  %v18168_v13 = vunpack.i.h.bf16 %v18166_v12  ;;  %v18167_v14 = vunpack.i.l.bf16 %v18166_v12 }
 0xd32   :  { %v9725_v44 = vsel %vm4863_vm8, %v9721_v60, %v18152_v49  ;;  %v9726_v48 = vsel %vm4863_vm8, %v9722_v62, %v18153_v46  ;;  %v18158_v10 = vunpack.i.h.bf16 %v18156_v55  ;;  %v18798_v62 = vld [vmem:[#allocation15 + $0x58] ss:$40 sps:$4 sm:$0xff]   ;;  %v18800_v60 = vld [vmem:[#allocation15 + $0x5c] ss:$40 sps:$4 sm:$0xff]  }
 0xd33   :  { %10168 = vmatprep.subr.bf16.mxu0 %v18800_v60  ;;  %v18842_v60 = vld [vmem:[#allocation21 + $0x94] ss:$12 sps:$4 sm:$0xff]  }
 0xd34   :  { %v9724_v56 = vsel %vm4795_vm4, %v23167_v1, %v18158_v10  ;;  %v9727_v1 = vsel %vm4863_vm8, %v9723_v17, %v18147_v30  ;;  %10169 = vmatpush1.bf16.msra.mxu0 %v18798_v62  ;;  %v18815_v30 = vld [vmem:[#allocation15 + $0x54] ss:$40 sps:$4 sm:$0xff]   ;;  %v18819_v17 = vld [vmem:[#allocation15] ss:$40 sps:$4 sm:$0xff]  }
 0xd35   :  { %v9728_v51 = vsel %vm4863_vm8, %v9724_v56, %v18148_v2  ;;  %v9891_v2 = vld [vmem:[#allocation7] sm:$0xf]  ;;  %v18821_v56 = vld [vmem:[#allocation15 + $0x4] ss:$40 sps:$4 sm:$0xff]   ;;  %v18839_v62 = vld [vmem:[#allocation21 + $0xb0] ss:$12 sps:$4 sm:$0xff]  }
 0xd4e   :  { %v18171_v29 = vpop.permute.xlu0 %18170  ;;  %v18176_v32 = vpop.permute.xlu1 %18175 }
 0xd4f   :  { %v18173_v58 = vunpack.i.h.bf16 %v18171_v29  ;;  %v18172_v53 = vunpack.i.l.bf16 %v18171_v29  ;;  %v18178_v43 = vunpack.i.h.bf16 %v18176_v32  ;;  %v18177_v47 = vunpack.i.l.bf16 %v18176_v32 }
 0xd51   :  { %v9730_v52 = vsel %vm7002_vm10, %v9726_v48, %v18173_v58  ;;  %v9729_v54 = vsel %vm7002_vm10, %v9725_v44, %v18172_v53  ;;  %v18803_v58 = vld [vmem:[#allocation15 + $0xc] ss:$40 sps:$4 sm:$0xff]   ;;  %v18801_v53 = vld [vmem:[#allocation15 + $0x8] ss:$40 sps:$4 sm:$0xff]   ;;  %v14148_v48 = vld [vmem:[#allocation13] ss:$0 sm:$0xff] }
 0xd52   :  { %v9733_v18 = vsel %vm7019_vm11, %v9729_v54, %v18167_v14  ;;  %v9734_v63 = vsel %vm7019_vm11, %v9730_v52, %v18168_v13  ;;  %v18181_v11 = vpop.permute.xlu1 %18180  ;;  %10170 = vmatprep.subr.bf16.mxu0 %v18803_v58  ;;  %v18843_v58 = vld [vmem:[#allocation21 + $0x98] ss:$12 sps:$4 sm:$0xff]  }
 0xd53   :  { %v18183_v28 = vunpack.i.h.bf16 %v18181_v11  ;;  %v18182_v37 = vunpack.i.l.bf16 %v18181_v11  ;;  %10171 = vmatpush1.bf16.msra.mxu0 %v18801_v53  ;;  %v18840_v53 = vld [vmem:[#allocation21 + $0x90] ss:$12 sps:$4 sm:$0xff]  }
 0xd55   :  { %v9732_v5 = vsel %vm7002_vm10, %v9728_v51, %v18183_v28  ;;  %v9731_v45 = vsel %vm7002_vm10, %v9727_v1, %v18182_v37  ;;  %v18804_v37 = vld [vmem:[#allocation15 + $0x60] ss:$40 sps:$4 sm:$0xff]   ;;  %v18812_v1 = vld [vmem:[#allocation15 + $0x6c] ss:$40 sps:$4 sm:$0xff]  }
 0xd56   :  { %v18827_v51 = vld [vmem:[#allocation15 + $0x20] ss:$40 sps:$4 sm:$0xff]  }
 0xd6c   :  { %v18201_v6 = vpop.permute.xlu1 %18200 }
 0xd6d   :  { %v18203_v31 = vunpack.i.h.bf16 %v18201_v6  ;;  %v18202_v15 = vunpack.i.l.bf16 %v18201_v6  ;;  %v18823_v6 = vld [vmem:[#allocation15 + $0x70] ss:$40 sps:$4 sm:$0xff]  }
 0xd6e   :  { %v18186_v9 = vpop.permute.xlu0 %18185 }
 0xd6f   :  { %v18188_v21 = vunpack.i.h.bf16 %v18186_v9  ;;  %v18187_v35 = vunpack.i.l.bf16 %v18186_v9 }
 0xd71   :  { %v9738_v25 = vsel %vm7036_vm12, %v9734_v63, %v18188_v21  ;;  %v9737_v42 = vsel %vm7036_vm12, %v9733_v18, %v18187_v35 }
 0xd72   :  { %v9741_v59 = vsel %vm7053_vm13, %v9737_v42, %v18177_v47  ;;  %v9742_v61 = vsel %vm7053_vm13, %v9738_v25, %v18178_v43 }
 0xd8c   :  { %v18211_v38 = vpop.permute.xlu1 %18210 }
 0xd8d   :  { %v18213_v16 = vunpack.i.h.bf16 %v18211_v38  ;;  %v18212_v12 = vunpack.i.l.bf16 %v18211_v38  ;;  %v18830_v38 = vld [vmem:[#allocation18 + $0x28] sm:$0xff]  }
 0xd8e   :  { %v18191_v0 = vpop.permute.xlu0 %18190 }
 0xd8f   :  { %v18193_v33 = vunpack.i.h.bf16 %v18191_v0  ;;  %v18192_v22 = vunpack.i.l.bf16 %v18191_v0  ;;  %v18813_v0 = vld [vmem:[#allocation15 + $0x50] ss:$40 sps:$4 sm:$0xff]  }
 0xd91   :  { %v9746_v57 = vsel %vm7070_vm14, %v9742_v61, %v18193_v33  ;;  %v9745_v36 = vsel %vm7070_vm14, %v9741_v59, %v18192_v22  ;;  %v18806_v33 = vld [vmem:[#allocation15 + $0x64] ss:$40 sps:$4 sm:$0xff]   ;;  %v18825_v22 = vld [vmem:[#allocation15 + $0x74] ss:$40 sps:$4 sm:$0xff]  }
 0xd92   :  { %v9749_v27 = vpack.c.bf16 %v9746_v57, %v9745_v36  ;;  %v18196_v4 = vpop.permute.xlu0 %18195  ;;  %10209 = vmatprep.subr.bf16.mxu0 %v18806_v33  ;;  %v18809_v61 = vld [vmem:[#allocation15 + $0x14] ss:$40 sps:$4 sm:$0xff]   ;;  %v18829_v57 = vld [vmem:[#allocation15 + $0x24] ss:$40 sps:$4 sm:$0xff]  }
 0xd93   :  { %v18198_v23 = vunpack.i.h.bf16 %v18196_v4  ;;  %v18197_v41 = vunpack.i.l.bf16 %v18196_v4 }
 0xd94   :  { %9871 = vmatmul.mubr.bf16.vlgmr.msra.gmra.mxu1 %v9749_v27  ;;  %v18807_v27 = vld [vmem:[#allocation15 + $0x10] ss:$40 sps:$4 sm:$0xff]  }
 0xd95   :  { %v9736_v34 = vsel %vm7019_vm11, %v9732_v5, %v18198_v23  ;;  %v9735_v7 = vsel %vm7019_vm11, %v9731_v45, %v18197_v41  ;;  %14159 = vmatprep.mubr.msk.bf16.mxu1 %vm4795_vm4, %v9752_v26  ;;  %v20063_v26 = vmov 0.0   ;;  %v18810_v41 = vld [vmem:[#allocation15 + $0x68] ss:$40 sps:$4 sm:$0xff]   ;;  %v18818_v5 = vld [vmem:[#allocation15 + $0x1c] ss:$40 sps:$4 sm:$0xff]  }
 0xd96   :  { %v18206_v39 = vpop.permute.xlu0 %18205  ;;  %v9739_v24 = vsel %vm7036_vm12, %v9735_v7, %v18202_v15  ;;  %v9740_v8 = vsel %vm7036_vm12, %v9736_v34, %v18203_v31  ;;  %17027 = vmatprep.subr.bf16.mxu1 %v20063_v26  ;;  %v18816_v45 = vld [vmem:[#allocation15 + $0x18] ss:$40 sps:$4 sm:$0xff]   ;;  %v18831_v31 = vld [vmem:[#allocation18 + $0x20] sm:$0xff]  }
 0xd97   :  { %v18208_v19 = vunpack.i.h.bf16 %v18206_v39  ;;  %v18207_v55 = vunpack.i.l.bf16 %v18206_v39  ;;  %v18822_v34 = vld [vmem:[#allocation18 + $0x38] sm:$0xff]   ;;  %v18826_v7 = vld [vmem:[#allocation18 + $0x30] sm:$0xff]  }
 0xd98   :  { %v18832_v15 = vld [vmem:[#allocation18 + $0x18] sm:$0xff]   ;;  %v18833_v39 = vld [vmem:[#allocation18 + $0x10] sm:$0xff]  }
 0xd99   :  { %v9743_v29 = vsel %vm7053_vm13, %v9739_v24, %v18207_v55  ;;  %v9744_v46 = vsel %vm7053_vm13, %v9740_v8, %v18208_v19  ;;  %v18834_v19 = vld [vmem:[#allocation18 + $0x8] sm:$0xff]   ;;  %v18835_v55 = vld [vmem:[#allocation18] sm:$0xff]  }
 0xd9a   :  { %v9747_v49 = vsel %vm7070_vm14, %v9743_v29, %v18212_v12  ;;  %v9748_v20 = vsel %vm7070_vm14, %v9744_v46, %v18213_v16  ;;  %v10330_v24 = vld [vmem:[%s23683_s6] sm:$0xff]  ;;  %v9962_v16 = vlaneseq }
 0xd9b   :  { %v9751_v40 = vpack.c.bf16 %v9748_v20, %v9747_v49  ;;  %v10331_v8 = vpack.c.bf16 %v10330_v24, %v10330_v24  ;;  %v23287_v46 = vld [vmem:[#allocation16] sm:$0xff] }
 0xd9c   :  { %v23284_v12 = vshrl.u32 %v9962_v16, 7  ;;  %v18836_v20 = vld [vmem:[#allocation21 + $0xa8] ss:$12 sps:$4 sm:$0xff]  }
 0xd9d   :  { %9879 = vmatmul.mubr.bf16.gmra.mxu1 %v9751_v40  ;;  %v18838_v40 = vld [vmem:[#allocation21 + $0xac] ss:$12 sps:$4 sm:$0xff]  }
 0xd9e   :  { %17031 = vmatprep.mubr.msk.bf16.mxu1 %vm20064_vm15, %v20063_v26  ;;  %v9988_v29 = vsub.s32 6, %v23284_v12 }
 0xda0   :  { %v23290_v49 = vrot.slane %v23287_v46, %v9988_v29 }
 0xe54   :  { %v9872_v9 = vpop.f32.mrf.mxu1 }
 0xe55   :  { %v9873_v43 = vadd.f32 %v14148_v48, %v9872_v9  ;;  %v18846_v9 = vld [vmem:[#allocation21 + $0x7c] ss:$12 sps:$4 sm:$0xff]  }
 0xe56   :  { %v9874_v32 = vpop.f32.mrf.mxu1 }
 0xe57   :  { %v9887_v25 = vmax.f32 %v9873_v43, 0.0  ;;  %v18844_v32 = vld [vmem:[#allocation21 + $0x78] ss:$12 sps:$4 sm:$0xff]   ;;  %v18862_v43 = vld [vmem:[#allocation21 + $0x1c] ss:$12 sps:$4 sm:$0xff]  }
 0xe58   :  { %v9875_v13 = vpop.f32.mrf.mxu1 }
 0xe59   :  { %v9876_v35 = vadd.f32 %v14148_v48, %v9875_v13  ;;  %v18847_v13 = vld [vmem:[#allocation21 + $0x80] ss:$12 sps:$4 sm:$0xff]  }
 0xe5a   :  { %v9877_v14 = vpop.f32.mrf.mxu1 }
 0xe5b   :  { %v9888_v63 = vmax.f32 %v9876_v35, 0.0  ;;  %v18850_v14 = vld [vmem:[#allocation21 + $0x64] ss:$12 sps:$4 sm:$0xff]   ;;  %v18858_v35 = vld [vmem:[#allocation21 + $0x34] ss:$12 sps:$4 sm:$0xff]  }
 0xe5d   :  { %v9880_v44 = vpop.f32.mrf.mxu1  ;;  %v9892_v42 = vpack.c.bf16 %v9888_v63, %v9887_v25  ;;  %v18866_v63 = vld [vmem:[#allocation21 + $0x4] ss:$12 sps:$4 sm:$0xff]   ;;  %v18867_v25 = vld [vmem:[#allocation21 + $0x8] ss:$12 sps:$4 sm:$0xff]  }
 0xe5e   :  { %v9881_v54 = vadd.f32 %v14148_v48, %v9880_v44  ;;  %v18848_v44 = vld [vmem:[#allocation21 + $0x60] ss:$12 sps:$4 sm:$0xff]  }
 0xe5f   :  { %v9882_v52 = vpop.f32.mrf.mxu1 }
 0xe60   :  { %v9889_v47 = vmax.f32 %v9881_v54, 0.0  ;;  %v18854_v52 = vld [vmem:[#allocation21 + $0x4c] ss:$12 sps:$4 sm:$0xff]   ;;  %v18852_v54 = vld [vmem:[#allocation21 + $0x48] ss:$12 sps:$4 sm:$0xff]  }
 0xe61   :  { %v9883_v21 = vpop.f32.mrf.mxu1 }
 0xe62   :  { %v9884_v10 = vadd.f32 %v14148_v48, %v9883_v21  ;;  %v18851_v48 = vld [vmem:[#allocation21 + $0x68] ss:$12 sps:$4 sm:$0xff]   ;;  %v18855_v21 = vld [vmem:[#allocation21 + $0x50] ss:$12 sps:$4 sm:$0xff]  }
 0xe63   :  { %v9885_v3 = vpop.f32.mrf.mxu1 }
 0xe64   :  { %v9890_v18 = vmax.f32 %v9884_v10, 0.0  ;;  %v18856_v10 = vld [vmem:[#allocation21 + $0x30] ss:$12 sps:$4 sm:$0xff]   ;;  %v18859_v3 = vld [vmem:[#allocation21 + $0x38] ss:$12 sps:$4 sm:$0xff]  }
 0xe66   :  { %v9893_v11 = vpack.c.bf16 %v9890_v18, %v9889_v47  ;;  %v18860_v47 = vld [vmem:[#allocation21 + $0x18] ss:$12 sps:$4 sm:$0xff]   ;;  %v18863_v18 = vld [vmem:[#allocation21 + $0x20] ss:$12 sps:$4 sm:$0xff]  }
 0xe68   :  { %17028 = vmatpush3.bf16.msra.mxu1 %v9893_v11  ;;  %v18864_v11 = vld [vmem:[#allocation21] ss:$12 sps:$4 sm:$0xff]  }
 0xe69   :  { %17029 = vmatprep.subr.bf16.mxu1 %v20063_v26 }
 0xe6c   :  { %17030 = vmatpush3.bf16.msra.mxu1 %v9892_v42  ;;  %v18870_v42 = vld [vmem:[#allocation24 + $0xac] ss:$12 sps:$4 sm:$0xff]  }
 0xe6d   :  { %10127 = vmatprep.subr.bf16.mxu1 %v18815_v30 }
 0xe6f   :  { %17032 = vmatmul.mubr.msk.bf16.vlgmr.msra.gmra.mxu1 %vm4863_vm8, %v9891_v2 }
 0xe70   :  { %10147 = vmatprep.mubr.bf16.mxu1 %v23681_v50  ;;  %10128 = vmatpush1.bf16.msra.mxu1 %v18813_v0  ;;  %v9980_v0 = vsub.s32 4, %v23284_v12 }
 0xe71   :  { %10129 = vmatprep.subr.bf16.mxu1 %v18821_v56 }
 0xe74   :  { %10130 = vmatpush1.bf16.msra.mxu1 %v18819_v17 }
 0xe75   :  { %10291 = vmatprep.subr.bf16.mxu1 %v18825_v22 }
 0xf2f   :  { %v9931_v28 = vpop.f32.mrf.mxu1 }
 0xf30   :  { %v9937_v59 = vpack.c.bf16 %v9931_v28, %v9931_v28  ;;  %v9981_v28 = vrot.slane %v23287_v46, %v9980_v0  ;;  %v18898_v0 = vld [vmem:[#allocation24 + $0x4] ss:$12 sps:$4 sm:$0xff]  }
 0xf31   :  { %v17033_v36 = vpop.f32.mrf.mxu1 }
 0xf32   :  { %14182 = vmatmul.mubr.msk.bf16.vlgmr.msra.gmra.mxu0 %vm4863_vm8, %v9937_v59  ;;  %14181 = vmatmul.mubr.msk.bf16.vlgmr.msra.gmra.mxu1 %vm4863_vm8, %v9937_v59 }
 0xf33   :  { %10210 = vmatpush1.bf16.msra.mxu0 %v18804_v37  ;;  %10229 = vmatprep.mubr.bf16.mxu0 %v23681_v50  ;;  %v9934_v4 = vpop.f32.mrf.mxu1 }
 0xf34   :  { %10211 = vmatprep.subr.bf16.mxu0 %v18809_v61  ;;  %10292 = vmatpush1.bf16.msra.mxu1 %v18823_v6 }
 0xf35   :  { %10293 = vmatprep.subr.bf16.mxu1 %v18829_v57  ;;  %10311 = vmatprep.mubr.bf16.mxu1 %v23681_v50  ;;  %v17034_v23 = vpop.f32.mrf.mxu1 }
 0xf37   :  { %10212 = vmatpush1.bf16.msra.mxu0 %v18807_v27 }
 0xf38   :  { %10250 = vmatprep.subr.bf16.mxu0 %v18812_v1  ;;  %10294 = vmatpush1.bf16.msra.mxu1 %v18827_v51 }
 0xf39   :  { %10628 = vmatprep.subr.bf16.mxu1 %v18838_v40  ;;  %v18868_v40 = vld [vmem:[#allocation24 + $0xa8] ss:$12 sps:$4 sm:$0xff]  }
 0xf3a   :  { %14183 = vmatmul.mubr.msk.bf16.vlgmr.msra.gmra.mxu0 %vm4863_vm8, %v9937_v59 }
 0xf3b   :  { %10251 = vmatpush1.bf16.msra.mxu0 %v18810_v41  ;;  %10270 = vmatprep.mubr.bf16.mxu0 %v23681_v50 }
 0xf3c   :  { %10252 = vmatprep.subr.bf16.mxu0 %v18818_v5  ;;  %14185 = vmatmul.mubr.msk.bf16.vlgmr.msra.gmra.mxu1 %vm4863_vm8, %v9937_v59 }
 0xf3d   :  { %10660 = vmatprep.mubr.bf16.mxu1 %v23681_v50  ;;  %10629 = vmatpush1.bf16.msra.mxu1 %v18836_v20 }
 0xf3e   :  { %10630 = vmatprep.subr.bf16.mxu1 %v18842_v60  ;;  %v18874_v60 = vld [vmem:[#allocation24 + $0x94] ss:$12 sps:$4 sm:$0xff]  }
 0xf3f   :  { %10253 = vmatpush1.bf16.msra.mxu0 %v18816_v45 }
 0xf40   :  { %17035 = vmatprep.subr.bf16.mxu0 %v20063_v26 }
 0xf41   :  { %10631 = vmatpush1.bf16.msra.mxu1 %v18840_v53  ;;  %v18875_v53 = vld [vmem:[#allocation24 + $0x98] ss:$12 sps:$4 sm:$0xff]  }
 0xf42   :  { %14184 = vmatmul.mubr.msk.bf16.vlgmr.msra.gmra.mxu0 %vm4863_vm8, %v9937_v59  ;;  %10632 = vmatprep.subr.bf16.mxu1 %v18846_v9  ;;  %v18878_v9 = vld [vmem:[#allocation24 + $0x7c] ss:$12 sps:$4 sm:$0xff]  }
 0xf43   :  { %17036 = vmatpush3.bf16.msra.mxu0 %v18822_v34  ;;  %17051 = vmatprep.mubr.msk.bf16.mxu0 %vm20064_vm15, %v20063_v26 }
 0xf44   :  { %17037 = vmatprep.subr.bf16.mxu0 %v20063_v26 }
 0xf45   :  { %10633 = vmatpush1.bf16.msra.mxu1 %v18844_v32  ;;  %v18876_v32 = vld [vmem:[#allocation24 + $0x78] ss:$12 sps:$4 sm:$0xff]  }
 0xf46   :  { %10634 = vmatprep.subr.bf16.mxu1 %v18850_v14  ;;  %v18882_v14 = vld [vmem:[#allocation24 + $0x64] ss:$12 sps:$4 sm:$0xff]  }
 0xf47   :  { %17038 = vmatpush3.bf16.msra.mxu0 %v18826_v7 }
 0xf48   :  { %17039 = vmatprep.subr.bf16.mxu0 %v20063_v26 }
 0xf49   :  { %10635 = vmatpush1.bf16.msra.mxu1 %v18848_v44  ;;  %v18880_v44 = vld [vmem:[#allocation24 + $0x60] ss:$12 sps:$4 sm:$0xff]  }
 0xf4a   :  { %10636 = vmatprep.subr.bf16.mxu1 %v18854_v52  ;;  %v18886_v52 = vld [vmem:[#allocation24 + $0x4c] ss:$12 sps:$4 sm:$0xff]  }
 0xf4b   :  { %17040 = vmatpush3.bf16.msra.mxu0 %v18830_v38  ;;  %v14186_v38 = vld [vmem:[#allocation19] ss:$0 sm:$0xff] }
 0xf4c   :  { %17041 = vmatprep.subr.bf16.mxu0 %v20063_v26 }
 0xf4d   :  { %10637 = vmatpush1.bf16.msra.mxu1 %v18852_v54  ;;  %v18884_v54 = vld [vmem:[#allocation24 + $0x48] ss:$12 sps:$4 sm:$0xff]  }
 0xf4e   :  { %10638 = vmatprep.subr.bf16.mxu1 %v18858_v35  ;;  %v18890_v35 = vld [vmem:[#allocation24 + $0x34] ss:$12 sps:$4 sm:$0xff]  }
 0xf4f   :  { %17042 = vmatpush3.bf16.msra.mxu0 %v18831_v31 }
 0xf50   :  { %17043 = vmatprep.subr.bf16.mxu0 %v20063_v26 }
 0xf51   :  { %10639 = vmatpush1.bf16.msra.mxu1 %v18856_v10  ;;  %v23331_v10 = vsub.s32 1, %v23284_v12 }
 0xf52   :  { %10640 = vmatprep.subr.bf16.mxu1 %v18862_v43  ;;  %v18888_v43 = vld [vmem:[#allocation24 + $0x30] ss:$12 sps:$4 sm:$0xff]  }
 0xf53   :  { %17044 = vmatpush3.bf16.msra.mxu0 %v18832_v15 }
 0xf54   :  { %17045 = vmatprep.subr.bf16.mxu0 %v20063_v26 }
 0xf55   :  { %10641 = vmatpush1.bf16.msra.mxu1 %v18860_v47  ;;  %v18891_v47 = vld [vmem:[#allocation24 + $0x38] ss:$12 sps:$4 sm:$0xff]  }
 0xf56   :  { %10642 = vmatprep.subr.bf16.mxu1 %v18866_v63  ;;  %v9969_v63 = vrot.slane %v23287_v46, %v23331_v10 }
 0xf57   :  { %17046 = vmatpush3.bf16.msra.mxu0 %v18833_v39 }
 0xf58   :  { %17047 = vmatprep.subr.bf16.mxu0 %v20063_v26 }
 0xf59   :  { %10643 = vmatpush1.bf16.msra.mxu1 %v18864_v11 }
 0xf5a   :  { %10887 = vmatprep.subr.bf16.mxu1 %v18870_v42  ;;  %v18895_v42 = vld [vmem:[#allocation24 + $0x20] ss:$12 sps:$4 sm:$0xff]  }
 0xf5b   :  { %17048 = vmatpush3.bf16.msra.mxu0 %v18834_v19 }
 0xf5c   :  { %17049 = vmatprep.subr.bf16.mxu0 %v20063_v26 }
 0xf5f   :  { %17050 = vmatpush3.bf16.msra.mxu0 %v18835_v55 }
 0xf60   :  { %17055 = vmatprep.subr.bf16.mxu0 %v20063_v26 }
 0xf62   :  { %17052 = vmatmul.mubr.bf16.vlgmr.msra.gmra.mxu0 %v10331_v8 }
 0xf63   :  { %17071 = vmatprep.mubr.msk.bf16.mxu0 %vm20064_vm15, %v20063_v26  ;;  %17056 = vmatpush3.bf16.msra.mxu0 %v18839_v62 }
 0xf64   :  { %17057 = vmatprep.subr.bf16.mxu0 %v20063_v26 }
 0xf67   :  { %17058 = vmatpush3.bf16.msra.mxu0 %v18843_v58  ;;  %v18872_v58 = vld [vmem:[#allocation24 + $0x90] ss:$12 sps:$4 sm:$0xff]  }
 0xf68   :  { %17059 = vmatprep.subr.bf16.mxu0 %v20063_v26 }
 0xf6b   :  { %17060 = vmatpush3.bf16.msra.mxu0 %v18847_v13  ;;  %v18879_v13 = vld [vmem:[#allocation24 + $0x80] ss:$12 sps:$4 sm:$0xff]  }
 0xf6c   :  { %17061 = vmatprep.subr.bf16.mxu0 %v20063_v26 }
 0xf6f   :  { %17062 = vmatpush3.bf16.msra.mxu0 %v18851_v48  ;;  %v18883_v48 = vld [vmem:[#allocation24 + $0x68] ss:$12 sps:$4 sm:$0xff]  }
 0xf70   :  { %17063 = vmatprep.subr.bf16.mxu0 %v20063_v26 }
 0xf73   :  { %17064 = vmatpush3.bf16.msra.mxu0 %v18855_v21  ;;  %v18887_v21 = vld [vmem:[#allocation24 + $0x50] ss:$12 sps:$4 sm:$0xff]  }
 0xf74   :  { %17065 = vmatprep.subr.bf16.mxu0 %v20063_v26 }
 0xf77   :  { %17066 = vmatpush3.bf16.msra.mxu0 %v18859_v3  ;;  %v9976_v3 = vsub.s32 3, %v23284_v12 }
 0xf78   :  { %17067 = vmatprep.subr.bf16.mxu0 %v20063_v26 }
 0xf79   :  { %v9977_v11 = vrot.slane %v23287_v46, %v9976_v3 }
 0xf7b   :  { %17068 = vmatpush3.bf16.msra.mxu0 %v18863_v18  ;;  %v18894_v18 = vld [vmem:[#allocation24 + $0x1c] ss:$12 sps:$4 sm:$0xff]  }
 0xf7c   :  { %17069 = vmatprep.subr.bf16.mxu0 %v20063_v26 }
 0xf7f   :  { %17070 = vmatpush3.bf16.msra.mxu0 %v18867_v25  ;;  %v18892_v25 = vld [vmem:[#allocation24 + $0x18] ss:$12 sps:$4 sm:$0xff]  }
 0xf80   :  { %17075 = vmatprep.subr.bf16.mxu0 %v20063_v26 }
 0xff2   :  { %v23300_v2 = vpop.f32.mrf.mxu0  ;;  %v23302_v30 = vpop.f32.mrf.mxu1 }
 0xff4   :  { %v23305_v56 = vpop.f32.mrf.mxu0  ;;  %v23307_v17 = vpop.f32.mrf.mxu1 }
 0xff6   :  { %v10194_v33 = vpop.f32.mrf.mxu0  ;;  %v10153_v22 = vpop.f32.mrf.mxu1 }
 0xff7   :  { %v10152_v33 = vadd.f32 %v23307_v17, %v9969_v63  ;;  %v10193_v22 = vadd.f32 %v23305_v56, %v9977_v11  ;;  %v18902_v17 = vld [vmem:[#allocation28 + $0x38] sm:$0xff]   ;;  %v18928_v63 = vld [vmem:[#allocation28 + $0x40] sm:$0xff]  }
 0xff8   :  { %v10195_v37 = vpop.f32.mrf.mxu0  ;;  %v10154_v59 = vpop.f32.mrf.mxu1  ;;  %v18903_v56 = vld [vmem:[#allocation28 + $0xb8] sm:$0xff]  }
 0xff9   :  { %v18899_v37 = vld [vmem:[#allocation24 + $0x8] ss:$12 sps:$4 sm:$0xff]  }
 0xffa   :  { %v10231_v61 = vpop.f32.mrf.mxu0  ;;  %v23342_v59 = vld [vmem:[%s23684_s29] sm:$0xff] }
 0xffb   :  { %v23310_v6 = vadd.f32 %v10231_v61, %v9981_v28  ;;  %v18896_v28 = vld [vmem:[#allocation24] ss:$12 sps:$4 sm:$0xff]  }
 0xffc   :  { %v23312_v57 = vpop.f32.mrf.mxu0  ;;  %v23314_v36 = vpop.f32.mrf.mxu1  ;;  %v18900_v61 = vld [vmem:[#allocation28 + $0x78] sm:$0xff]  }
 0xffe   :  { %v10235_v27 = vpop.f32.mrf.mxu0  ;;  %v23316_v4 = vpop.f32.mrf.mxu1 }
 0xfff   :  { %v18901_v27 = vld [vmem:[#allocation28 + $0xf8] sm:$0xff]  }
0x1000   :  { %v10236_v1 = vpop.f32.mrf.mxu0  ;;  %v10317_v51 = vpop.f32.mrf.mxu1 }
0x1001   :  { %v10321_v1 = vmax.f32 %v10152_v33, 0.0  ;;  %v10323_v51 = vmax.f32 %v10193_v22, 0.0  ;;  %v18930_v33 = vld [vmem:[#allocation28] sm:$0xff]  }
0x1002   :  { %v10272_v23 = vpop.f32.mrf.mxu0  ;;  %v10318_v41 = vpop.f32.mrf.mxu1 }
0x1003   :  { %v23319_v5 = vadd.f32 %v10272_v23, %v23290_v49  ;;  %v18871_v49 = vld [vmem:[#allocation24 + $0xb0] ss:$12 sps:$4 sm:$0xff]   ;;  %v10709_v23 = vpack.c.bf16 %v23342_v59, %v23342_v59  ;;  %v11007_v41 = vpack.c.bf16 %v10321_v1, %v10321_v1 }
0x1004   :  { %v23321_v45 = vpop.f32.mrf.mxu0 }
0x1006   :  { %v10276_v34 = vpop.f32.mrf.mxu0 }
0x1007   :  { %v18904_v34 = vld [vmem:[#allocation28 + $0x70] sm:$0xff]  }
0x1008   :  { %v10277_v7 = vpop.f32.mrf.mxu0 }
0x1009   :  { %v18905_v7 = vld [vmem:[#allocation28 + $0xf0] sm:$0xff]  }
0x1022   :  { %v10437_v31 = vpop.f32.mrf.mxu0 }
0x1023   :  { %v10438_v15 = vadd.f32 %v14186_v38, %v10437_v31  ;;  %v11009_v38 = vpack.c.bf16 %v10323_v51, %v10323_v51  ;;  %v18906_v31 = vld [vmem:[#allocation28 + $0x30] sm:$0xff]  }
0x1024   :  { %v17053_v39 = vpop.f32.mrf.mxu0 }
0x1025   :  { %v10444_v19 = vmin.f32 %v10438_v15, 0.0  ;;  %vm10443_vm0 = vcmp.gt.f32.partialorder %v10438_v15, 0.0  ;;  %v18908_v39 = vld [vmem:[#allocation28 + $0x68] sm:$0xff]  }
0x1026   :  { %v10440_v55 = vpop.f32.mrf.mxu0 }
0x1027   :  { %v10445_v24 = vmul.f32 1.442695, %v10444_v19  ;;  %v18909_v19 = vld [vmem:[#allocation28 + $0xe8] sm:$0xff]  }
0x1028   :  { %v17054_v8 = vpop.f32.mrf.mxu0  ;;  %v18910_v55 = vld [vmem:[#allocation28 + $0x28] sm:$0xff]  }
0x1029   :  { %19208 = vpow2.f32 %v10445_v24  ;;  %v18911_v24 = vld [vmem:[#allocation28 + $0xa8] sm:$0xff]   ;;  %v18912_v8 = vld [vmem:[#allocation28 + $0x60] sm:$0xff]  }
0x1036   :  { %v19209_v16 = vpop.eup %19208 }
0x1037   :  { %v14195_v29 = vadd.f32 -1.0, %v19209_v16  ;;  %v18913_v16 = vld [vmem:[#allocation28 + $0xe0] sm:$0xff]  }
0x1039   :  { %v10448_v20 = vsel %vm10443_vm0, %v10438_v15, %v14195_v29  ;;  %v18907_v15 = vld [vmem:[#allocation28 + $0xb0] sm:$0xff]   ;;  %v18914_v29 = vld [vmem:[#allocation28 + $0x20] sm:$0xff]   ;;  %vm13630_vm0 = vcmask 605184  }
0x103a   :  { %v10450_v62 = vpack.c.bf16 %v10448_v20, %v10448_v20  ;;  %v18915_v20 = vld [vmem:[#allocation28 + $0xa0] sm:$0xff]  }
0x103c   :  { %10661 = vmatmul.mubr.bf16.vlgmr.msra.gmra.mxu1 %v10450_v62  ;;  %17072 = vmatmul.mubr.bf16.vlgmr.msra.gmra.mxu0 %v10450_v62  ;;  %v18918_v62 = vld [vmem:[#allocation28 + $0x18] sm:$0xff]  }
0x103d   :  { %10888 = vmatpush1.bf16.msra.mxu1 %v18868_v40  ;;  %17076 = vmatpush3.bf16.msra.mxu0 %v18871_v49  ;;  %v18916_v40 = vld [vmem:[#allocation28 + $0x58] sm:$0xff]  }
0x103e   :  { %10889 = vmatprep.subr.bf16.mxu1 %v18874_v60  ;;  %17077 = vmatprep.subr.bf16.mxu0 %v20063_v26  ;;  %v18917_v49 = vld [vmem:[#allocation28 + $0xd8] sm:$0xff]   ;;  %v23348_v60 = vsub.s32 0, %v23284_v12 }
0x103f   :  { %10919 = vmatprep.mubr.bf16.mxu1 %v23681_v50  ;;  %17091 = vmatprep.mubr.msk.bf16.mxu0 %vm20064_vm15, %v20063_v26 }
0x1041   :  { %10890 = vmatpush1.bf16.msra.mxu1 %v18872_v58  ;;  %17078 = vmatpush3.bf16.msra.mxu0 %v18875_v53  ;;  %v18919_v58 = vld [vmem:[#allocation28 + $0x98] sm:$0xff]   ;;  %v18920_v53 = vld [vmem:[#allocation28 + $0x50] sm:$0xff]  }
0x1042   :  { %10891 = vmatprep.subr.bf16.mxu1 %v18878_v9  ;;  %17079 = vmatprep.subr.bf16.mxu0 %v20063_v26  ;;  %v23351_v9 = vsub.s32 2, %v23284_v12 }
0x1045   :  { %10892 = vmatpush1.bf16.msra.mxu1 %v18876_v32  ;;  %17080 = vmatpush3.bf16.msra.mxu0 %v18879_v13  ;;  %v18921_v32 = vld [vmem:[#allocation28 + $0xd0] sm:$0xff]   ;;  %v9984_v13 = vsub.s32 5, %v23284_v12 }
0x1046   :  { %10893 = vmatprep.subr.bf16.mxu1 %v18882_v14  ;;  %17081 = vmatprep.subr.bf16.mxu0 %v20063_v26  ;;  %v9992_v14 = vsub.s32 7, %v23284_v12  ;;  %v18926_v12 = vld [vmem:[#allocation28 + $0x8] sm:$0xff]  }
0x1047   :  { %v9985_v3 = vrot.slane %v23287_v46, %v9984_v13  ;;  %v18957_v13 = vld [vmem:[#allocation28 + $0x1c8] sm:$0xff]  }
0x1049   :  { %10894 = vmatpush1.bf16.msra.mxu1 %v18880_v44  ;;  %17082 = vmatpush3.bf16.msra.mxu0 %v18883_v48  ;;  %v18922_v44 = vld [vmem:[#allocation28 + $0x10] sm:$0xff]   ;;  %v9965_v48 = vrot.slane %v23287_v46, %v23348_v60 }
0x104a   :  { %10895 = vmatprep.subr.bf16.mxu1 %v18886_v52  ;;  %17083 = vmatprep.subr.bf16.mxu0 %v20063_v26  ;;  %v18923_v52 = vld [vmem:[#allocation28 + $0x90] sm:$0xff]  }
0x104d   :  { %10896 = vmatpush1.bf16.msra.mxu1 %v18884_v54  ;;  %17084 = vmatpush3.bf16.msra.mxu0 %v18887_v21  ;;  %v18924_v54 = vld [vmem:[#allocation28 + $0x48] sm:$0xff]   ;;  %v9973_v21 = vrot.slane %v23287_v46, %v23351_v9 }
0x104e   :  { %10897 = vmatprep.subr.bf16.mxu1 %v18890_v35  ;;  %17085 = vmatprep.subr.bf16.mxu0 %v20063_v26  ;;  %v18925_v35 = vld [vmem:[#allocation28 + $0xc8] sm:$0xff]  }
0x104f   :  { %v10191_v11 = vadd.f32 %v23300_v2, %v9973_v21  ;;  %v18934_v2 = vld [vmem:[#allocation28 + $0x138] sm:$0xff]  }
0x1051   :  { %10898 = vmatpush1.bf16.msra.mxu1 %v18888_v43  ;;  %17086 = vmatpush3.bf16.msra.mxu0 %v18891_v47  ;;  %v9993_v43 = vrot.slane %v23287_v46, %v9992_v14  ;;  %v10150_v47 = vadd.f32 %v23302_v30, %v9965_v48  ;;  %v18931_v46 = vld [vmem:[#allocation28 + $0x80] sm:$0xff]   ;;  %v10322_v30 = vmax.f32 %v10191_v11, 0.0  ;;  %v18959_v48 = vld [vmem:[#allocation28 + $0x188] sm:$0xff]  }
0x1052   :  { %10899 = vmatprep.subr.bf16.mxu1 %v18894_v18  ;;  %17087 = vmatprep.subr.bf16.mxu0 %v20063_v26  ;;  %v18927_v18 = vld [vmem:[#allocation28 + $0x88] sm:$0xff]  }
0x1053   :  { %v10320_v22 = vmax.f32 %v10150_v47, 0.0  ;;  %v11008_v51 = vpack.c.bf16 %v10322_v30, %v10322_v30  ;;  %v10326_v47 = vmax.f32 %v23319_v5, 0.0  ;;  %v18969_v5 = vld [vmem:[#allocation28 + $0x228] sm:$0xff]   ;;  %v18974_v30 = vld [vmem:[#allocation28 + $0x250] sm:$0xff]  }
0x1055   :  { %10900 = vmatpush1.bf16.msra.mxu1 %v18892_v25  ;;  %17088 = vmatpush3.bf16.msra.mxu0 %v18895_v42  ;;  %v18929_v25 = vld [vmem:[#allocation28 + $0xc0] sm:$0xff]   ;;  %v10234_v42 = vadd.f32 %v23312_v57, %v9985_v3  ;;  %v11006_v1 = vpack.c.bf16 %v10320_v22, %v10320_v22  ;;  %v18935_v57 = vld [vmem:[#allocation28 + $0x1b8] sm:$0xff]   ;;  %v10324_v3 = vmax.f32 %v23310_v6, 0.0  ;;  %v18967_v6 = vld [vmem:[#allocation28 + $0x230] sm:$0xff]  }
0x1056   :  { %10901 = vmatprep.subr.bf16.mxu1 %v18898_v0  ;;  %17089 = vmatprep.subr.bf16.mxu0 %v20063_v26  ;;  %v10275_v0 = vadd.f32 %v23321_v45, %v9993_v43  ;;  %v18936_v45 = vld [vmem:[#allocation28 + $0x170] sm:$0xff]   ;;  %v18963_v43 = vld [vmem:[#allocation28 + $0x180] sm:$0xff]  }
0x1057   :  { %v11010_v11 = vpack.c.bf16 %v10324_v3, %v10324_v3  ;;  %v18971_v22 = vld [vmem:[#allocation28 + $0x220] sm:$0xff]  }
0x1059   :  { %10902 = vmatpush1.bf16.msra.mxu1 %v18896_v28  ;;  %17090 = vmatpush3.bf16.msra.mxu0 %v18899_v37  ;;  %v18932_v28 = vld [vmem:[#allocation28 + $0x178] sm:$0xff]  }
0x105a   :  { %16081 = vmatprep.subr.bf16.mxu1 %v18900_v61  ;;  %16103 = vmatprep.subr.bf16.mxu0 %v18901_v27  ;;  %v18933_v37 = vld [vmem:[#allocation28 + $0x1f8] sm:$0xff]   ;;  %v10325_v61 = vmax.f32 %v10234_v42, 0.0  ;;  %v10327_v27 = vmax.f32 %v10275_v0, 0.0  ;;  %v11012_v42 = vpack.c.bf16 %v10326_v47, %v10326_v47  ;;  %v18968_v0 = vld [vmem:[#allocation28 + $0x268] sm:$0xff]  }
0x105c   :  { %10920 = vmatmul.mubr.bf16.vlgmr.msra.gmra.mxu1 %v10709_v23  ;;  %17092 = vmatmul.mubr.bf16.vlgmr.msra.gmra.mxu0 %v10709_v23  ;;  %v11011_v23 = vpack.c.bf16 %v10325_v61, %v10325_v61 }
0x105d   :  { %16082 = vmatpush3.bf16.msra.mxu1 %v18902_v17  ;;  %11688 = vmatprep.mubr.bf16.mxu1 %v11007_v41  ;;  %v18937_v17 = vld [vmem:[#allocation28 + $0x1f0] sm:$0xff]  }
0x105e   :  { %16104 = vmatpush3.bf16.msra.mxu0 %v18903_v56  ;;  %11728 = vmatprep.mubr.bf16.mxu0 %v11009_v38  ;;  %v11013_v56 = vpack.c.bf16 %v10327_v27, %v10327_v27  ;;  %v18938_v41 = vld [vmem:[#allocation28 + $0x130] sm:$0xff]   ;;  %v18941_v38 = vld [vmem:[#allocation28 + $0x1e8] sm:$0xff]  }
0x105f   :  { %16083 = vmatprep.subr.bf16.mxu1 %v18904_v34  ;;  %16105 = vmatprep.subr.bf16.mxu0 %v18905_v7  ;;  %v18939_v34 = vld [vmem:[#allocation28 + $0x1b0] sm:$0xff]   ;;  %v18940_v7 = vld [vmem:[#allocation28 + $0x168] sm:$0xff]  }
0x1060   :  { %v18976_v27 = vld [vmem:[#allocation28 + $0x248] sm:$0xff]  }
0x1061   :  { %16084 = vmatpush3.bf16.msra.mxu1 %v18906_v31  ;;  %v18942_v31 = vld [vmem:[#allocation28 + $0x128] sm:$0xff]  }
0x1062   :  { %16106 = vmatpush3.bf16.msra.mxu0 %v18907_v15  ;;  %16085 = vmatprep.subr.bf16.mxu1 %v18908_v39  ;;  %v18943_v15 = vld [vmem:[#allocation28 + $0x1a8] sm:$0xff]   ;;  %v18944_v39 = vld [vmem:[#allocation28 + $0x160] sm:$0xff]  }
0x1063   :  { %16107 = vmatprep.subr.bf16.mxu0 %v18909_v19  ;;  %v18945_v19 = vld [vmem:[#allocation28 + $0x1e0] sm:$0xff]  }
0x1065   :  { %16086 = vmatpush3.bf16.msra.mxu1 %v18910_v55  ;;  %v18946_v55 = vld [vmem:[#allocation28 + $0x120] sm:$0xff]  }
0x1066   :  { %16108 = vmatpush3.bf16.msra.mxu0 %v18911_v24  ;;  %16087 = vmatprep.subr.bf16.mxu1 %v18912_v8  ;;  %v18947_v24 = vld [vmem:[#allocation28 + $0x1a0] sm:$0xff]   ;;  %v18948_v8 = vld [vmem:[#allocation28 + $0x158] sm:$0xff]  }
0x1067   :  { %16109 = vmatprep.subr.bf16.mxu0 %v18913_v16  ;;  %v18949_v16 = vld [vmem:[#allocation28 + $0x1d8] sm:$0xff]  }
0x1069   :  { %16088 = vmatpush3.bf16.msra.mxu1 %v18914_v29  ;;  %v18950_v29 = vld [vmem:[#allocation28 + $0x118] sm:$0xff]  }
0x106a   :  { %16110 = vmatpush3.bf16.msra.mxu0 %v18915_v20  ;;  %16089 = vmatprep.subr.bf16.mxu1 %v18916_v40  ;;  %v18951_v20 = vld [vmem:[#allocation28 + $0x198] sm:$0xff]   ;;  %v18952_v40 = vld [vmem:[#allocation28 + $0x150] sm:$0xff]  }
0x106b   :  { %16111 = vmatprep.subr.bf16.mxu0 %v18917_v49  ;;  %v18953_v49 = vld [vmem:[#allocation28 + $0x1d0] sm:$0xff]  }
0x106d   :  { %16090 = vmatpush3.bf16.msra.mxu1 %v18918_v62  ;;  %v18954_v62 = vld [vmem:[#allocation28 + $0x110] sm:$0xff]  }
0x106e   :  { %16112 = vmatpush3.bf16.msra.mxu0 %v18919_v58  ;;  %16091 = vmatprep.subr.bf16.mxu1 %v18920_v53  ;;  %v18955_v58 = vld [vmem:[#allocation28 + $0x190] sm:$0xff]   ;;  %v18956_v53 = vld [vmem:[#allocation28 + $0x148] sm:$0xff]  }
0x106f   :  { %16113 = vmatprep.subr.bf16.mxu0 %v18921_v32  ;;  %v9959_v32 = vld [vmem:[#allocation16 + $0x8] sm:$0x3] }
0x1070   :  { %v10001_v14 = vrot.slane %v9959_v32, %v23331_v10  ;;  %v9997_v61 = vrot.slane %v9959_v32, %v23348_v60 }
0x1071   :  { %16092 = vmatpush3.bf16.msra.mxu1 %v18922_v44  ;;  %v18958_v44 = vld [vmem:[#allocation28 + $0x108] sm:$0xff]  }
0x1072   :  { %16114 = vmatpush3.bf16.msra.mxu0 %v18923_v52  ;;  %16093 = vmatprep.subr.bf16.mxu1 %v18924_v54  ;;  %v18960_v52 = vld [vmem:[#allocation28 + $0x140] sm:$0xff]   ;;  %v10316_v21 = vadd.f32 %v23316_v4, %v10001_v14 }
0x1073   :  { %16115 = vmatprep.subr.bf16.mxu0 %v18925_v35  ;;  %v18961_v54 = vld [vmem:[#allocation28 + $0x1c0] sm:$0xff]  }
0x1074   :  { %v18962_v35 = vld [vmem:[#allocation28 + $0x100] sm:$0xff]  }
0x1075   :  { %16094 = vmatpush3.bf16.msra.mxu1 %v18926_v12  ;;  %v18964_v12 = vld [vmem:[#allocation28 + $0x278] sm:$0xff]  }
0x1076   :  { %16116 = vmatpush3.bf16.msra.mxu0 %v18927_v18  ;;  %16095 = vmatprep.subr.bf16.mxu1 %v18928_v63  ;;  %v10329_v18 = vmax.f32 %v10316_v21, 0.0  ;;  %v18965_v63 = vld [vmem:[#allocation28 + $0x238] sm:$0xff]  }
0x1077   :  { %16117 = vmatprep.subr.bf16.mxu0 %v18929_v25  ;;  %v18966_v25 = vld [vmem:[#allocation28 + $0x270] sm:$0xff]  }
0x1078   :  { %v11015_v4 = vpack.c.bf16 %v10329_v18, %v10329_v18 }
0x1079   :  { %16096 = vmatpush3.bf16.msra.mxu1 %v18930_v33  ;;  %v18970_v33 = vld [vmem:[#allocation28 + $0x260] sm:$0xff]  }
0x107a   :  { %16118 = vmatpush3.bf16.msra.mxu0 %v18931_v46  ;;  %16125 = vmatprep.subr.bf16.mxu1 %v18932_v28  ;;  %v18972_v46 = vld [vmem:[#allocation28 + $0x258] sm:$0xff]  }
0x107b   :  { %16147 = vmatprep.subr.bf16.mxu0 %v18933_v37  ;;  %v18973_v28 = vld [vmem:[#allocation28 + $0x218] sm:$0xff]   ;;  %v18975_v37 = vld [vmem:[#allocation28 + $0x210] sm:$0xff]  }
0x107c   :  { %11689 = vmatmul.mubr.bf16.vlgmr.msra.gmra.mxu1 %v11006_v1  ;;  %v10314_v1 = vadd.f32 %v23314_v36, %v9997_v61  ;;  %v18981_v36 = vld [vmem:[#allocation27 + $0x30] sm:$0xff]  }
0x107d   :  { %11729 = vmatmul.mubr.bf16.vlgmr.msra.gmra.mxu0 %v11008_v51  ;;  %16126 = vmatpush3.bf16.msra.mxu1 %v18934_v2  ;;  %v18977_v2 = vld [vmem:[#allocation28 + $0x208] sm:$0xff]   ;;  %v18979_v51 = vld [vmem:[#allocation28 + $0x200] sm:$0xff]  }
0x107e   :  { %11768 = vmatprep.mubr.bf16.mxu1 %v11011_v23  ;;  %16148 = vmatpush3.bf16.msra.mxu0 %v18935_v57  ;;  %v18978_v57 = vld [vmem:[#allocation28 + $0x240] sm:$0xff]  }
0x107f   :  { %11808 = vmatprep.mubr.bf16.mxu0 %v11013_v56  ;;  %16127 = vmatprep.subr.bf16.mxu1 %v18936_v45  ;;  %v10328_v45 = vmax.f32 %v10314_v1, 0.0  ;;  %v18982_v56 = vld [vmem:[#allocation27 + $0x28] sm:$0xff]  }
0x1080   :  { %16149 = vmatprep.subr.bf16.mxu0 %v18937_v17  ;;  %v18980_v17 = vld [vmem:[#allocation27 + $0x38] sm:$0xff]  }
0x1081   :  { %16128 = vmatpush3.bf16.msra.mxu1 %v18938_v41  ;;  %v11014_v23 = vpack.c.bf16 %v10328_v45, %v10328_v45  ;;  %v18983_v41 = vld [vmem:[#allocation27 + $0x20] sm:$0xff]  }
0x1082   :  { %16150 = vmatpush3.bf16.msra.mxu0 %v18939_v34  ;;  %16129 = vmatprep.subr.bf16.mxu1 %v18940_v7  ;;  %v12080_v34 = vld [vmem:[%s23685_s11] sm:$0xff]  ;;  %v18984_v7 = vld [vmem:[#allocation27 + $0x18] sm:$0xff]  }
0x1083   :  { %16151 = vmatprep.subr.bf16.mxu0 %v18941_v38  ;;  %12082 = vrot.lane.b32.xlu0 %v12080_v34, %s20034_s15  ;;  %v18985_v38 = vld [vmem:[#allocation27 + $0x10] sm:$0xff]  }
0x1085   :  { %16130 = vmatpush3.bf16.msra.mxu1 %v18942_v31  ;;  %v18986_v31 = vld [vmem:[#allocation27 + $0x8] sm:$0xff]  }
0x1086   :  { %16152 = vmatpush3.bf16.msra.mxu0 %v18943_v15  ;;  %16131 = vmatprep.subr.bf16.mxu1 %v18944_v39  ;;  %v18987_v15 = vld [vmem:[#allocation27] sm:$0xff]  }
0x1087   :  { %16153 = vmatprep.subr.bf16.mxu0 %v18945_v19 }
0x1089   :  { %16132 = vmatpush3.bf16.msra.mxu1 %v18946_v55 }
0x108a   :  { %16154 = vmatpush3.bf16.msra.mxu0 %v18947_v24  ;;  %16133 = vmatprep.subr.bf16.mxu1 %v18948_v8 }
0x108b   :  { %16155 = vmatprep.subr.bf16.mxu0 %v18949_v16 }
0x108d   :  { %16134 = vmatpush3.bf16.msra.mxu1 %v18950_v29 }
0x108e   :  { %16156 = vmatpush3.bf16.msra.mxu0 %v18951_v20  ;;  %16135 = vmatprep.subr.bf16.mxu1 %v18952_v40  ;;  %v10483_v40 = vld [vmem:[#allocation22] sm:$0x7] }
0x108f   :  { %16157 = vmatprep.subr.bf16.mxu0 %v18953_v49  ;;  %v10742_v49 = vld [vmem:[#allocation25] sm:$0x7] }
0x1091   :  { %16136 = vmatpush3.bf16.msra.mxu1 %v18954_v62  ;;  %v10488_v62 = vrot.slane %v10483_v40, %v23348_v60 }
0x1092   :  { %16158 = vmatpush3.bf16.msra.mxu0 %v18955_v58  ;;  %16137 = vmatprep.subr.bf16.mxu1 %v18956_v53  ;;  %v10747_v58 = vrot.slane %v10742_v49, %v23348_v60 }
0x1093   :  { %16159 = vmatprep.subr.bf16.mxu0 %v18957_v13 }
0x1095   :  { %16138 = vmatpush3.bf16.msra.mxu1 %v18958_v44  ;;  %v10751_v44 = vrot.slane %v10742_v49, %v23331_v10 }
0x1096   :  { %16160 = vmatpush3.bf16.msra.mxu0 %v18959_v48  ;;  %16139 = vmatprep.subr.bf16.mxu1 %v18960_v52 }
0x1097   :  { %16161 = vmatprep.subr.bf16.mxu0 %v18961_v54  ;;  %v10492_v54 = vrot.slane %v10483_v40, %v23331_v10 }
0x1099   :  { %16140 = vmatpush3.bf16.msra.mxu1 %v18962_v35 }
0x109a   :  { %16162 = vmatpush3.bf16.msra.mxu0 %v18963_v43  ;;  %16169 = vmatprep.subr.bf16.mxu1 %v18964_v12 }
0x109b   :  { %17095 = vmatprep.subr.bf16.mxu0 %v20063_v26 }
0x109c   :  { %11769 = vmatmul.mubr.bf16.vlgmr.msra.gmra.mxu1 %v11010_v11 }
0x109d   :  { %11809 = vmatmul.mubr.bf16.vlgmr.msra.gmra.mxu0 %v11012_v42  ;;  %16170 = vmatpush3.bf16.msra.mxu1 %v18965_v63 }
0x109e   :  { %11848 = vmatprep.mubr.bf16.mxu1 %v11015_v4  ;;  %16171 = vmatprep.subr.bf16.mxu1 %v18966_v25 }
0x109f   :  { %17111 = vmatprep.mubr.msk.bf16.mxu0 %vm20064_vm15, %v20063_v26  ;;  %17096 = vmatpush3.bf16.msra.mxu0 %v18980_v17 }
0x10a0   :  { %17097 = vmatprep.subr.bf16.mxu0 %v20063_v26 }
0x10a1   :  { %16172 = vmatpush3.bf16.msra.mxu1 %v18967_v6  ;;  %v10755_v6 = vrot.slane %v10742_v49, %v23351_v9 }
0x10a2   :  { %16173 = vmatprep.subr.bf16.mxu1 %v18968_v0 }
0x10a3   :  { %17098 = vmatpush3.bf16.msra.mxu0 %v18981_v36 }
0x10a4   :  { %17099 = vmatprep.subr.bf16.mxu0 %v20063_v26 }
0x10a5   :  { %16174 = vmatpush3.bf16.msra.mxu1 %v18969_v5 }
0x10a6   :  { %16175 = vmatprep.subr.bf16.mxu1 %v18970_v33  ;;  %v10496_v33 = vrot.slane %v10483_v40, %v23351_v9 }
0x10a7   :  { %17100 = vmatpush3.bf16.msra.mxu0 %v18982_v56 }
0x10a8   :  { %17101 = vmatprep.subr.bf16.mxu0 %v20063_v26 }
0x10a9   :  { %16176 = vmatpush3.bf16.msra.mxu1 %v18971_v22 }
0x10aa   :  { %16177 = vmatprep.subr.bf16.mxu1 %v18972_v46 }
0x10ab   :  { %17102 = vmatpush3.bf16.msra.mxu0 %v18983_v41  ;;  %v18988_v41 = vld [vmem:[%s23686_s4 + $0x38] sm:$0xff]  }
0x10ac   :  { %17103 = vmatprep.subr.bf16.mxu0 %v20063_v26 }
0x10ad   :  { %16178 = vmatpush3.bf16.msra.mxu1 %v18973_v28 }
0x10ae   :  { %16179 = vmatprep.subr.bf16.mxu1 %v18974_v30 }
0x10af   :  { %17104 = vmatpush3.bf16.msra.mxu0 %v18984_v7 }
0x10b0   :  { %17105 = vmatprep.subr.bf16.mxu0 %v20063_v26 }
0x10b1   :  { %16180 = vmatpush3.bf16.msra.mxu1 %v18975_v37 }
0x10b2   :  { %16181 = vmatprep.subr.bf16.mxu1 %v18976_v27 }
0x10b3   :  { %17106 = vmatpush3.bf16.msra.mxu0 %v18985_v38 }
0x10b4   :  { %17107 = vmatprep.subr.bf16.mxu0 %v20063_v26 }
0x10b5   :  { %16182 = vmatpush3.bf16.msra.mxu1 %v18977_v2 }
0x10b6   :  { %16183 = vmatprep.subr.bf16.mxu1 %v18978_v57 }
0x10b7   :  { %17108 = vmatpush3.bf16.msra.mxu0 %v18986_v31 }
0x10b8   :  { %17109 = vmatprep.subr.bf16.mxu0 %v20063_v26 }
0x10b9   :  { %16184 = vmatpush3.bf16.msra.mxu1 %v18979_v51 }
0x10ba   :  { %17115 = vmatprep.subr.bf16.mxu1 %v20063_v26 }
0x10bb   :  { %17110 = vmatpush3.bf16.msra.mxu0 %v18987_v15 }
0x10bc   :  { %11849 = vmatmul.mubr.bf16.vlgmr.msra.gmra.mxu1 %v11014_v23 }
0x10bd   :  { %17131 = vmatprep.mubr.msk.bf16.mxu1 %vm20064_vm15, %v20063_v26  ;;  %17116 = vmatpush3.bf16.msra.mxu1 %v18988_v41  ;;  %v19011_v41 = vld [vmem:[#allocation33 + $0x68] ss:$12 sps:$4 sm:$0xff]  }
0x10be   :  { %17117 = vmatprep.subr.bf16.mxu1 %v20063_v26 }
0x10fc   :  { %v10662_v39 = vpop.f32.mrf.mxu1  ;;  %v10703_v19 = vpop.f32.mrf.mxu0 }
0x10fd   :  { %v10663_v13 = vadd.f32 %v10662_v39, %v10488_v62  ;;  %v10704_v57 = vadd.f32 %v10703_v19, %v10496_v33 }
0x10fe   :  { %v10664_v55 = vpop.f32.mrf.mxu1  ;;  %v17073_v24 = vpop.f32.mrf.mxu0 }
0x10ff   :  { %v10665_v63 = vadd.f32 %v10664_v55, %v10492_v54  ;;  %v18989_v54 = vld [vmem:[%s23686_s4 + $0x30] sm:$0xff]  }
0x1100   :  { %v10666_v8 = vpop.f32.mrf.mxu1  ;;  %v10706_v16 = vpop.f32.mrf.mxu0  ;;  %17118 = vmatpush3.bf16.msra.mxu1 %v18989_v54  ;;  %v19028_v54 = vld [vmem:[#allocation33 + $0xc0] ss:$12 sps:$4 sm:$0xff]  }
0x1101   :  { %17119 = vmatprep.subr.bf16.mxu1 %v20063_v26 }
0x1102   :  { %v10667_v29 = vpop.f32.mrf.mxu1  ;;  %v17074_v20 = vpop.f32.mrf.mxu0 }
0x111c   :  { %v10921_v53 = vpop.f32.mrf.mxu1  ;;  %v10962_v32 = vpop.f32.mrf.mxu0 }
0x111d   :  { %v10922_v14 = vadd.f32 %v10921_v53, %v10747_v58  ;;  %v10963_v46 = vadd.f32 %v10962_v32, %v10755_v6 }
0x111e   :  { %v10923_v48 = vpop.f32.mrf.mxu1  ;;  %v17093_v52 = vpop.f32.mrf.mxu0 }
0x111f   :  { %v10968_v21 = vadd.f32 %v10922_v14, %v10663_v13  ;;  %v10924_v12 = vadd.f32 %v10923_v48, %v10751_v44 }
0x1120   :  { %v10925_v35 = vpop.f32.mrf.mxu1  ;;  %v10965_v3 = vpop.f32.mrf.mxu0 }
0x1121   :  { %v14244_v43 = vmul.f32 -1.442695, %v10968_v21  ;;  %v10975_v11 = vadd.f32 %v10924_v12, %v10665_v63  ;;  %v18990_v21 = vld [vmem:[%s23686_s4 + $0x28] sm:$0xff]   ;;  %v18991_v35 = vld [vmem:[%s23686_s4 + $0x20] sm:$0xff]   ;;  %v18992_v3 = vld [vmem:[%s23686_s4 + $0x18] sm:$0xff]  }
0x1122   :  { %v10926_v47 = vpop.f32.mrf.mxu1  ;;  %v17094_v18 = vpop.f32.mrf.mxu0  ;;  %17120 = vmatpush3.bf16.msra.mxu1 %v18990_v21  ;;  %v18994_v12 = vld [vmem:[%s23686_s4 + $0x8] sm:$0xff]  }
0x1123   :  { %19210 = vpow2.f32 %v14244_v43  ;;  %v14245_v25 = vmul.f32 -1.442695, %v10975_v11  ;;  %17121 = vmatprep.subr.bf16.mxu1 %v20063_v26  ;;  %v18993_v43 = vld [vmem:[%s23686_s4 + $0x10] sm:$0xff]   ;;  %v18995_v47 = vld [vmem:[%s23686_s4] sm:$0xff]   ;;  %v23411_v18 = vpop.permute.xlu0 %12082  ;;  %v19031_v21 = vld [vmem:[#allocation33 + $0xc8] ss:$12 sps:$4 sm:$0xff]  }
0x1125   :  { %19212 = vpow2.f32 %v14245_v25 }
0x1126   :  { %17122 = vmatpush3.bf16.msra.mxu1 %v18991_v35 }
0x1127   :  { %17123 = vmatprep.subr.bf16.mxu1 %v20063_v26 }
0x112a   :  { %17124 = vmatpush3.bf16.msra.mxu1 %v18992_v3 }
0x112b   :  { %17125 = vmatprep.subr.bf16.mxu1 %v20063_v26 }
0x112e   :  { %17126 = vmatpush3.bf16.msra.mxu1 %v18993_v43 }
0x112f   :  { %17127 = vmatprep.subr.bf16.mxu1 %v20063_v26 }
0x1130   :  { %v19211_v42 = vpop.eup %19210 }
0x1131   :  { %v10972_v4 = vadd.f32 1.0, %v19211_v42  ;;  %v14334_v42 = vld [vmem:[#allocation30] ss:$0 sm:$0xff] }
0x1132   :  { %v19213_v0 = vpop.eup %19212  ;;  %17128 = vmatpush3.bf16.msra.mxu1 %v18994_v12  ;;  %v19034_v12 = vld [vmem:[#allocation36 + $0xac] ss:$12 sps:$4 sm:$0xff]  }
0x1133   :  { %19214 = vrcp.f32 %v10972_v4  ;;  %v10979_v22 = vadd.f32 1.0, %v19213_v0  ;;  %17129 = vmatprep.subr.bf16.mxu1 %v20063_v26 }
0x1135   :  { %19216 = vrcp.f32 %v10979_v22 }
0x1136   :  { %17130 = vmatpush3.bf16.msra.mxu1 %v18995_v47 }
0x1137   :  { %12339 = vmatprep.subr.bf16.mxu1 %v23681_v50 }
0x113c   :  { %v16097_v5 = vpop.f32.mrf.mxu1 }
0x113d   :  { %v16119_v28 = vpop.f32.mrf.mxu0 }
0x113e   :  { %v16098_v30 = vpop.f32.mrf.mxu1 }
0x113f   :  { %v16099_v37 = vadd.f32 %v16098_v30, %v16097_v5  ;;  %v16120_v61 = vpop.f32.mrf.mxu0 }
0x1140   :  { %v19215_v27 = vpop.eup %19214  ;;  %v16121_v2 = vadd.f32 %v16120_v61, %v16119_v28  ;;  %v16100_v1 = vpop.f32.mrf.mxu1 }
0x1141   :  { %v10982_v51 = vmul.f32 %v19215_v27, %v10963_v46  ;;  %v16122_v45 = vpop.f32.mrf.mxu0  ;;  %v18996_v27 = vld [vmem:[#allocation33 + $0xa8] ss:$12 sps:$4 sm:$0xff]   ;;  %v18999_v1 = vld [vmem:[#allocation33 + $0xb0] ss:$12 sps:$4 sm:$0xff]  }
0x1142   :  { %v11731_v23 = vadd.f32 %v16121_v2, %v16099_v37  ;;  %v16101_v17 = vpop.f32.mrf.mxu1  ;;  %v19217_v34 = vpop.eup %19216  ;;  %v18998_v2 = vld [vmem:[#allocation33 + $0xac] ss:$12 sps:$4 sm:$0xff]   ;;  %v19000_v45 = vld [vmem:[#allocation33 + $0x90] ss:$12 sps:$4 sm:$0xff]  }
0x1143   :  { %v10983_v36 = vadd.f32 %v10982_v51, %v10704_v57  ;;  %v16123_v56 = vpop.f32.mrf.mxu0  ;;  %v10985_v7 = vsub.f32 1.0, %v19217_v34  ;;  %v10987_v15 = vmul.f32 %v19217_v34, %v23342_v59  ;;  %v19002_v57 = vld [vmem:[#allocation33 + $0x94] ss:$12 sps:$4 sm:$0xff]   ;;  %12298 = vmatprep.subr.bf16.mxu0 %v18998_v2  ;;  %v19003_v51 = vld [vmem:[#allocation33 + $0x98] ss:$12 sps:$4 sm:$0xff]  }
0x1144   :  { %v19007_v17 = vld [vmem:[#allocation33 + $0x80] ss:$12 sps:$4 sm:$0xff]   ;;  %v19010_v56 = vld [vmem:[#allocation33 + $0x64] ss:$12 sps:$4 sm:$0xff]   ;;  %v19046_v2 = vld [vmem:[#allocation36 + $0x4c] ss:$12 sps:$4 sm:$0xff]  }
0x1145   :  { %19218 = vtanh.f32 %v10983_v36  ;;  %v19004_v36 = vld [vmem:[#allocation33 + $0x78] ss:$12 sps:$4 sm:$0xff]   ;;  %v19008_v34 = vld [vmem:[#allocation33 + $0x60] ss:$12 sps:$4 sm:$0xff]  }
0x1152   :  { %v19219_v38 = vpop.eup %19218 }
0x1153   :  { %v10986_v31 = vmul.f32 %v19219_v38, %v10985_v7  ;;  %v19014_v7 = vld [vmem:[#allocation33 + $0x4c] ss:$12 sps:$4 sm:$0xff]   ;;  %v19015_v38 = vld [vmem:[#allocation33 + $0x50] ss:$12 sps:$4 sm:$0xff]  }
0x1155   :  { %v10988_v39 = vadd.f32 %v10987_v15, %v10986_v31  ;;  %v19012_v31 = vld [vmem:[#allocation33 + $0x48] ss:$12 sps:$4 sm:$0xff]  }
0x1156   :  { %v19018_v15 = vld [vmem:[#allocation33 + $0x34] ss:$12 sps:$4 sm:$0xff]  }
0x1157   :  { %12092 = vrot.lane.b32.xlu0 %v10988_v39, %s20034_s15  ;;  %v10989_v19 = vpack.c.bf16 %v10988_v39, %v10988_v39  ;;  %13632 = vst [vmem:[%s20265_s9] sm:$0xff] %v10988_v39  ;;  %v19019_v39 = vld [vmem:[#allocation33 + $0x38] ss:$12 sps:$4 sm:$0xff]  }
0x1159   :  { %17112 = vmatmul.mubr.bf16.vlgmr.msra.gmra.mxu0 %v10989_v19  ;;  %v19016_v19 = vld [vmem:[#allocation33 + $0x30] ss:$12 sps:$4 sm:$0xff]  }
0x115a   :  { %12299 = vmatpush1.bf16.msra.mxu0 %v18996_v27  ;;  %v19041_v27 = vld [vmem:[#allocation36 + $0x60] ss:$12 sps:$4 sm:$0xff]  }
0x115b   :  { %12300 = vmatprep.subr.bf16.mxu0 %v19002_v57  ;;  %v19049_v57 = vld [vmem:[#allocation36 + $0x34] ss:$12 sps:$4 sm:$0xff]  }
0x115c   :  { %v16141_v55 = vpop.f32.mrf.mxu1 }
0x115d   :  { %v16163_v24 = vpop.f32.mrf.mxu0 }
0x115e   :  { %v16142_v8 = vpop.f32.mrf.mxu1  ;;  %12301 = vmatpush1.bf16.msra.mxu0 %v19000_v45  ;;  %v19052_v45 = vld [vmem:[#allocation36 + $0x1c] ss:$12 sps:$4 sm:$0xff]  }
0x115f   :  { %v16143_v16 = vadd.f32 %v16142_v8, %v16141_v55  ;;  %v16164_v29 = vpop.f32.mrf.mxu0  ;;  %v19022_v55 = vld [vmem:[#allocation33 + $0x1c] ss:$12 sps:$4 sm:$0xff]   ;;  %v19020_v8 = vld [vmem:[#allocation33 + $0x18] ss:$12 sps:$4 sm:$0xff]  }
0x1160   :  { %v16165_v20 = vadd.f32 %v16164_v29, %v16163_v24  ;;  %v16144_v40 = vpop.f32.mrf.mxu1  ;;  %v19023_v24 = vld [vmem:[#allocation33 + $0x20] ss:$12 sps:$4 sm:$0xff]   ;;  %v19027_v29 = vld [vmem:[#allocation33 + $0x8] ss:$12 sps:$4 sm:$0xff]  }
0x1161   :  { %v11771_v49 = vadd.f32 %v16143_v16, %v11731_v23  ;;  %v16166_v62 = vpop.f32.mrf.mxu0  ;;  %v19006_v23 = vld [vmem:[#allocation33 + $0x7c] ss:$12 sps:$4 sm:$0xff]   ;;  %v19026_v16 = vld [vmem:[#allocation33 + $0x4] ss:$12 sps:$4 sm:$0xff]  }
0x1162   :  { %v16145_v58 = vpop.f32.mrf.mxu1  ;;  %12302 = vmatprep.subr.bf16.mxu0 %v19006_v23  ;;  %v14336_v40 = vld [vmem:[#allocation31] ss:$0 sm:$0xff]  ;;  %v19050_v23 = vld [vmem:[#allocation36 + $0x18] ss:$12 sps:$4 sm:$0xff]  }
0x1163   :  { %v11811_v59 = vadd.f32 %v16165_v20, %v11771_v49  ;;  %v16167_v53 = vpop.f32.mrf.mxu0  ;;  %12303 = vmatpush1.bf16.msra.mxu0 %v19004_v36  ;;  %v19024_v20 = vld [vmem:[#allocation33] ss:$12 sps:$4 sm:$0xff]   ;;  %v19053_v36 = vld [vmem:[#allocation36] ss:$12 sps:$4 sm:$0xff]  }
0x1164   :  { %12304 = vmatprep.subr.bf16.mxu0 %v19010_v56  ;;  %v19061_v56 = vld [vmem:[#allocation36 + $0x16c] ss:$12 sps:$4 sm:$0xff]  }
0x1167   :  { %12305 = vmatpush1.bf16.msra.mxu0 %v19008_v34  ;;  %v19067_v34 = vld [vmem:[#allocation36 + $0x154] ss:$12 sps:$4 sm:$0xff]  }
0x1168   :  { %12306 = vmatprep.subr.bf16.mxu0 %v19014_v7  ;;  %v19065_v7 = vld [vmem:[#allocation36 + $0x150] ss:$12 sps:$4 sm:$0xff]  }
0x116b   :  { %12307 = vmatpush1.bf16.msra.mxu0 %v19012_v31  ;;  %v19068_v31 = vld [vmem:[#allocation36 + $0x1f8] ss:$12 sps:$4 sm:$0xff]  }
0x116c   :  { %12308 = vmatprep.subr.bf16.mxu0 %v19018_v15  ;;  %v19073_v15 = vld [vmem:[#allocation36 + $0x13c] ss:$12 sps:$4 sm:$0xff]  }
0x116f   :  { %12309 = vmatpush1.bf16.msra.mxu0 %v19016_v19  ;;  %v19076_v19 = vld [vmem:[#allocation36 + $0x1e4] ss:$12 sps:$4 sm:$0xff]  }
0x1170   :  { %12310 = vmatprep.subr.bf16.mxu0 %v19022_v55  ;;  %v19074_v55 = vld [vmem:[#allocation36 + $0x1e0] ss:$12 sps:$4 sm:$0xff]  }
0x1173   :  { %12311 = vmatpush1.bf16.msra.mxu0 %v19020_v8  ;;  %v19077_v8 = vld [vmem:[#allocation36 + $0x120] ss:$12 sps:$4 sm:$0xff]  }
0x1174   :  { %12312 = vmatprep.subr.bf16.mxu0 %v19026_v16  ;;  %v19082_v16 = vld [vmem:[#allocation36 + $0x1cc] ss:$12 sps:$4 sm:$0xff]  }
0x1177   :  { %12313 = vmatpush1.bf16.msra.mxu0 %v19024_v20  ;;  %v19085_v20 = vld [vmem:[#allocation36 + $0x10c] ss:$12 sps:$4 sm:$0xff]  }
0x117c   :  { %v16185_v32 = vpop.f32.mrf.mxu1 }
0x117e   :  { %v16186_v13 = vpop.f32.mrf.mxu1 }
0x117f   :  { %v16187_v14 = vadd.f32 %v16186_v13, %v16185_v32 }
0x1180   :  { %v16188_v44 = vpop.f32.mrf.mxu1 }
0x1181   :  { %v11851_v48 = vadd.f32 %v16187_v14, %v11811_v59 }
0x1182   :  { %v16189_v52 = vpop.f32.mrf.mxu1 }
0x1183   :  { %v19030_v52 = vld [vmem:[#allocation33 + $0xc4] ss:$12 sps:$4 sm:$0xff]  }
0x1184   :  { %12328 = vmatprep.subr.bf16.mxu0 %v19030_v52  ;;  %v19098_v52 = vld [vmem:[#allocation36 + $0x180] ss:$12 sps:$4 sm:$0xff]  }
0x1185   :  { %12329 = vmatpush2.bf16.msra.mxu0 %v19028_v54  ;;  %v19103_v54 = vld [vmem:[#allocation36 + $0xc4] ss:$12 sps:$4 sm:$0xff]  }
0x1186   :  { %12897 = vmatprep.subr.bf16.mxu0 %v19034_v12 }
0x11c9   :  { %v23413_v63 = vpop.permute.xlu0 %12092 }
0x11ca   :  { %v12097_v11 = vpack.c.bf16 %v23413_v63, %v23413_v63 }
0x11cc   :  { %14372 = vmatprep.mubr.msk.bf16.mxu0 %vm4795_vm4, %v12097_v11 }
0x1219   :  { %v11938_v25 = vpop.f32.mrf.mxu0 }
0x121a   :  { %v11939_v4 = vadd.f32 %v11938_v25, %v11851_v48 }
0x121b   :  { %v17113_v6 = vpop.f32.mrf.mxu0 }
0x121c   :  { %v11951_v0 = vadd.f32 %v14334_v42, %v11939_v4  ;;  %v19058_v42 = vld [vmem:[#allocation36 + $0x22c] ss:$12 sps:$4 sm:$0xff]  }
0x121d   :  { %v11941_v5 = vpop.f32.mrf.mxu0 }
0x121e   :  { %v11953_v33 = vmin.f32 %v11951_v0, 0.0  ;;  %vm11952_vm1 = vcmp.gt.f32.partialorder %v11951_v0, 0.0  ;;  %v19032_v5 = vld [vmem:[#allocation36 + $0xa8] ss:$12 sps:$4 sm:$0xff]  }
0x121f   :  { %v17114_v22 = vpop.f32.mrf.mxu0 }
0x1220   :  { %v11954_v46 = vmul.f32 1.442695, %v11953_v33  ;;  %v19056_v33 = vld [vmem:[#allocation36 + $0x228] ss:$12 sps:$4 sm:$0xff]  }
0x1222   :  { %19220 = vpow2.f32 %v11954_v46  ;;  %v19037_v46 = vld [vmem:[#allocation36 + $0x94] ss:$12 sps:$4 sm:$0xff]  }
0x122f   :  { %v19221_v28 = vpop.eup %19220 }
0x1230   :  { %v14335_v30 = vadd.f32 -1.0, %v19221_v28  ;;  %v19064_v28 = vld [vmem:[#allocation36 + $0x214] ss:$12 sps:$4 sm:$0xff]  }
0x1232   :  { %v11957_v37 = vsel %vm11952_vm1, %v11951_v0, %v14335_v30  ;;  %v19062_v30 = vld [vmem:[#allocation36 + $0x210] ss:$12 sps:$4 sm:$0xff]  }
0x1233   :  { %v11958_v61 = vpack.c.bf16 %v11957_v37, %v11957_v37  ;;  %v19040_v37 = vld [vmem:[#allocation36 + $0x7c] ss:$12 sps:$4 sm:$0xff]  }
0x1235   :  { %17132 = vmatmul.mubr.bf16.vlgmr.msra.gmra.mxu1 %v11958_v61  ;;  %v19038_v61 = vld [vmem:[#allocation36 + $0x78] ss:$12 sps:$4 sm:$0xff]  }
0x1236   :  { %14373 = vmatprep.mubr.msk.bf16.mxu1 %vm4795_vm4, %v12097_v11  ;;  %12340 = vmatpush1.bf16.msra.mxu1 %v18999_v1  ;;  %v19044_v1 = vld [vmem:[#allocation36 + $0x48] ss:$12 sps:$4 sm:$0xff]  }
0x1237   :  { %12341 = vmatprep.subr.bf16.mxu1 %v23681_v50 }
0x123a   :  { %12342 = vmatpush1.bf16.msra.mxu1 %v19003_v51  ;;  %v19047_v51 = vld [vmem:[#allocation36 + $0x30] ss:$12 sps:$4 sm:$0xff]  }
0x123b   :  { %12343 = vmatprep.subr.bf16.mxu1 %v23681_v50 }
0x123e   :  { %12344 = vmatpush1.bf16.msra.mxu1 %v19007_v17  ;;  %v19055_v17 = vld [vmem:[#allocation36 + $0x4] ss:$12 sps:$4 sm:$0xff]  }
0x123f   :  { %12345 = vmatprep.subr.bf16.mxu1 %v23681_v50 }
0x1242   :  { %12346 = vmatpush1.bf16.msra.mxu1 %v19011_v41  ;;  %v19059_v41 = vld [vmem:[#allocation36 + $0x168] ss:$12 sps:$4 sm:$0xff]  }
0x1243   :  { %12347 = vmatprep.subr.bf16.mxu1 %v23681_v50 }
0x1246   :  { %12348 = vmatpush1.bf16.msra.mxu1 %v19015_v38  ;;  %v19070_v38 = vld [vmem:[#allocation36 + $0x1fc] ss:$12 sps:$4 sm:$0xff]  }
0x1247   :  { %12349 = vmatprep.subr.bf16.mxu1 %v23681_v50 }
0x124a   :  { %12350 = vmatpush1.bf16.msra.mxu1 %v19019_v39  ;;  %v19071_v39 = vld [vmem:[#allocation36 + $0x138] ss:$12 sps:$4 sm:$0xff]  }
0x124b   :  { %12351 = vmatprep.subr.bf16.mxu1 %v23681_v50 }
0x124e   :  { %12352 = vmatpush1.bf16.msra.mxu1 %v19023_v24  ;;  %v19079_v24 = vld [vmem:[#allocation36 + $0x124] ss:$12 sps:$4 sm:$0xff]  }
0x124f   :  { %12353 = vmatprep.subr.bf16.mxu1 %v23681_v50 }
0x1252   :  { %12354 = vmatpush1.bf16.msra.mxu1 %v19027_v29  ;;  %v19080_v29 = vld [vmem:[#allocation36 + $0x1c8] ss:$12 sps:$4 sm:$0xff]  }
0x1253   :  { %12369 = vmatprep.subr.bf16.mxu1 %v23681_v50 }
0x1256   :  { %12370 = vmatpush2.bf16.msra.mxu1 %v19031_v21  ;;  %v19101_v21 = vld [vmem:[#allocation36 + $0xc0] ss:$12 sps:$4 sm:$0xff]  }
0x1257   :  { %12938 = vmatprep.subr.bf16.mxu1 %v19058_v42 }
0x12f5   :  { %v12064_v49 = vpop.f32.mrf.mxu1 }
0x12f6   :  { %v23427_v62 = vadd.f32 %v14336_v40, %v12064_v49  ;;  %v19083_v40 = vld [vmem:[#allocation36 + $0x108] ss:$12 sps:$4 sm:$0xff]  }
0x12f7   :  { %v17133_v58 = vpop.f32.mrf.mxu1  ;;  %v19088_v49 = vld [vmem:[#allocation36 + $0x1b4] ss:$12 sps:$4 sm:$0xff]  }
0x12f8   :  { %v12071_v59 = vand.u32 2147483647, %v23427_v62  ;;  %v12070_v3 = vmax.f32 %v23427_v62, 0.0  ;;  %v19086_v58 = vld [vmem:[#allocation36 + $0x1b0] ss:$12 sps:$4 sm:$0xff]  }
0x12f9   :  { %v12067_v53 = vpop.f32.mrf.mxu1 }
0x12fa   :  { %v12072_v32 = vsub.f32 0.0, %v12071_v59  ;;  %v19091_v59 = vld [vmem:[#allocation36 + $0xf4] ss:$12 sps:$4 sm:$0xff]   ;;  %v19089_v53 = vld [vmem:[#allocation36 + $0xf0] ss:$12 sps:$4 sm:$0xff]  }
0x12fb   :  { %v17134_v13 = vpop.f32.mrf.mxu1 }
0x12fc   :  { %v12073_v14 = vmul.f32 1.442695, %v12072_v32  ;;  %v19094_v32 = vld [vmem:[#allocation36 + $0x19c] ss:$12 sps:$4 sm:$0xff]   ;;  %v19092_v13 = vld [vmem:[#allocation36 + $0x198] ss:$12 sps:$4 sm:$0xff]  }
0x12fe   :  { %19222 = vpow2.f32 %v12073_v14  ;;  %v19097_v14 = vld [vmem:[#allocation36 + $0xdc] ss:$12 sps:$4 sm:$0xff]  }
0x130b   :  { %v19223_v44 = vpop.eup %19222 }
0x130c   :  { %v12075_v48 = vadd.f32 1.0, %v19223_v44  ;;  %v19095_v44 = vld [vmem:[#allocation36 + $0xd8] ss:$12 sps:$4 sm:$0xff]  }
0x130e   :  { %19224 = vlog2.f32 %v12075_v48  ;;  %v19100_v48 = vld [vmem:[#allocation36 + $0x184] ss:$12 sps:$4 sm:$0xff]  }
0x131b   :  { %v19225_v35 = vpop.eup %19224 }
0x131c   :  { %v12077_v43 = vmul.f32 0.6931472, %v19225_v35  ;;  %v19104_v35 = vld [vmem:[#allocation36 + $0x170] ss:$12 sps:$4 sm:$0xff]  }
0x131e   :  { %v12078_v47 = vadd.f32 %v12077_v43, %v12070_v3  ;;  %v12134_v3 = vld [vmem:[#allocation34] sm:$0x7] }
0x131f   :  { %v12139_v43 = vrot.slane %v12134_v3, %v23348_v60  ;;  %v12147_v12 = vrot.slane %v12134_v3, %v23351_v9  ;;  %v12143_v42 = vrot.slane %v12134_v3, %v23331_v10  ;;  %v19127_v3 = vld [vmem:[#allocation36 + $0x188] ss:$12 sps:$4 sm:$0xff]  }
0x1320   :  { %v23431_v11 = vadd.f32 0.1, %v12078_v47 }
0x1322   :  { %v12085_v25 = vmul.f32 %v23411_v18, %v23431_v11  ;;  %v19035_v18 = vld [vmem:[#allocation36 + $0x90] ss:$12 sps:$4 sm:$0xff]  }
0x1324   :  { %12087 = vrot.lane.b32.xlu1 %v12085_v25, %s20061_s27 }
0x1396   :  { %v12088_v4 = vpop.permute.xlu1 %12087 }
0x1397   :  { %v23437_v6 = vadd.f32 %v12088_v4, %v23427_v62 }
0x1399   :  { %v12095_v0 = vsel %vm4795_vm4, %v23437_v6, %v23413_v63  ;;  %v19043_v63 = vld [vmem:[#allocation36 + $0x64] ss:$12 sps:$4 sm:$0xff]  }
0x139a   :  { %v12096_v22 = vpack.c.bf16 %v12095_v0, %v12095_v0 }
0x139c   :  { %12331 = vmatmul.mubr.bf16.vlgmr.msra.gmra.mxu0 %v12096_v22  ;;  %12372 = vmatmul.mubr.bf16.vlgmr.msra.gmra.mxu1 %v12096_v22 }
0x139d   :  { %12898 = vmatpush1.bf16.msra.mxu0 %v19032_v5  ;;  %12939 = vmatpush1.bf16.msra.mxu1 %v19056_v33 }
0x139e   :  { %12899 = vmatprep.subr.bf16.mxu0 %v19037_v46  ;;  %12940 = vmatprep.subr.bf16.mxu1 %v19064_v28 }
0x139f   :  { %12970 = vmatprep.mubr.bf16.mxu1 %v23681_v50 }
0x13a1   :  { %12900 = vmatpush1.bf16.msra.mxu0 %v19035_v18  ;;  %12941 = vmatpush1.bf16.msra.mxu1 %v19062_v30 }
0x13a2   :  { %12901 = vmatprep.subr.bf16.mxu0 %v19040_v37  ;;  %12942 = vmatprep.subr.bf16.mxu1 %v19070_v38 }
0x13a5   :  { %12902 = vmatpush1.bf16.msra.mxu0 %v19038_v61  ;;  %12943 = vmatpush1.bf16.msra.mxu1 %v19068_v31  ;;  %v19106_v31 = vld [vmem:[#allocation36 + $0x158] ss:$12 sps:$4 sm:$0xff]  }
0x13a6   :  { %12903 = vmatprep.subr.bf16.mxu0 %v19043_v63  ;;  %12944 = vmatprep.subr.bf16.mxu1 %v19076_v19 }
0x13a9   :  { %12904 = vmatpush1.bf16.msra.mxu0 %v19041_v27  ;;  %12945 = vmatpush1.bf16.msra.mxu1 %v19074_v55  ;;  %v19108_v55 = vld [vmem:[#allocation36 + $0x98] ss:$12 sps:$4 sm:$0xff]  }
0x13aa   :  { %12905 = vmatprep.subr.bf16.mxu0 %v19046_v2  ;;  %12946 = vmatprep.subr.bf16.mxu1 %v19082_v16  ;;  %v19111_v16 = vld [vmem:[#allocation36 + $0x80] ss:$12 sps:$4 sm:$0xff]  }
0x13ad   :  { %12906 = vmatpush1.bf16.msra.mxu0 %v19044_v1  ;;  %12947 = vmatpush1.bf16.msra.mxu1 %v19080_v29  ;;  %v19112_v29 = vld [vmem:[#allocation36 + $0x128] ss:$12 sps:$4 sm:$0xff]  }
0x13ae   :  { %12907 = vmatprep.subr.bf16.mxu0 %v19049_v57  ;;  %12948 = vmatprep.subr.bf16.mxu1 %v19088_v49  ;;  %v19115_v49 = vld [vmem:[#allocation36 + $0x110] ss:$12 sps:$4 sm:$0xff]  }
0x13b1   :  { %12908 = vmatpush1.bf16.msra.mxu0 %v19047_v51  ;;  %12949 = vmatpush1.bf16.msra.mxu1 %v19086_v58  ;;  %v19116_v58 = vld [vmem:[#allocation36 + $0x1e8] ss:$12 sps:$4 sm:$0xff]  }
0x13b2   :  { %12909 = vmatprep.subr.bf16.mxu0 %v19052_v45  ;;  %12950 = vmatprep.subr.bf16.mxu1 %v19094_v32  ;;  %v19119_v32 = vld [vmem:[#allocation36 + $0x1d0] ss:$12 sps:$4 sm:$0xff]  }
0x13b5   :  { %12910 = vmatpush1.bf16.msra.mxu0 %v19050_v23  ;;  %12951 = vmatpush1.bf16.msra.mxu1 %v19092_v13  ;;  %v19120_v13 = vld [vmem:[#allocation36 + $0x38] ss:$12 sps:$4 sm:$0xff]  }
0x13b6   :  { %12911 = vmatprep.subr.bf16.mxu0 %v19055_v17  ;;  %12952 = vmatprep.subr.bf16.mxu1 %v19100_v48  ;;  %v19123_v48 = vld [vmem:[#allocation36 + $0x20] ss:$12 sps:$4 sm:$0xff]  }
0x13b9   :  { %12912 = vmatpush1.bf16.msra.mxu0 %v19053_v36  ;;  %12953 = vmatpush1.bf16.msra.mxu1 %v19098_v52  ;;  %v19124_v52 = vld [vmem:[#allocation36 + $0xc8] ss:$12 sps:$4 sm:$0xff]  }
0x13ba   :  { %12913 = vmatprep.subr.bf16.mxu0 %v19061_v56  ;;  %16209 = vmatprep.subr.bf16.mxu1 %v19104_v35  ;;  %v19105_v56 = vld [vmem:[#allocation36 + $0xb0] ss:$12 sps:$4 sm:$0xff]   ;;  %v19130_v35 = vld [vmem:[#allocation39 + $0x74] ss:$8 sps:$4 sm:$0xff]  }
0x13bd   :  { %12914 = vmatpush2.bf16.msra.mxu0 %v19059_v41 }
0x13be   :  { %12915 = vmatprep.subr.bf16.mxu0 %v19067_v34 }
0x13c1   :  { %12916 = vmatpush2.bf16.msra.mxu0 %v19065_v7 }
0x13c2   :  { %12917 = vmatprep.subr.bf16.mxu0 %v19073_v15 }
0x13c5   :  { %12918 = vmatpush2.bf16.msra.mxu0 %v19071_v39  ;;  %v19107_v39 = vld [vmem:[#allocation36 + $0x230] ss:$12 sps:$4 sm:$0xff]  }
0x13c6   :  { %12919 = vmatprep.subr.bf16.mxu0 %v19079_v24  ;;  %v19109_v24 = vld [vmem:[#allocation36 + $0x140] ss:$12 sps:$4 sm:$0xff]  }
0x13c9   :  { %12920 = vmatpush2.bf16.msra.mxu0 %v19077_v8  ;;  %v19110_v8 = vld [vmem:[#allocation36 + $0x218] ss:$12 sps:$4 sm:$0xff]  }
0x13ca   :  { %12921 = vmatprep.subr.bf16.mxu0 %v19085_v20  ;;  %v19113_v20 = vld [vmem:[#allocation36 + $0x200] ss:$12 sps:$4 sm:$0xff]  }
0x13cd   :  { %12922 = vmatpush2.bf16.msra.mxu0 %v19083_v40  ;;  %v19114_v40 = vld [vmem:[#allocation36 + $0x68] ss:$12 sps:$4 sm:$0xff]  }
0x13ce   :  { %12923 = vmatprep.subr.bf16.mxu0 %v19091_v59  ;;  %v19117_v59 = vld [vmem:[#allocation36 + $0x50] ss:$12 sps:$4 sm:$0xff]  }
0x13d1   :  { %12924 = vmatpush2.bf16.msra.mxu0 %v19089_v53  ;;  %v19118_v53 = vld [vmem:[#allocation36 + $0xf8] ss:$12 sps:$4 sm:$0xff]  }
0x13d2   :  { %12925 = vmatprep.subr.bf16.mxu0 %v19097_v14  ;;  %v19121_v14 = vld [vmem:[#allocation36 + $0xe0] ss:$12 sps:$4 sm:$0xff]  }
0x13d5   :  { %12926 = vmatpush2.bf16.msra.mxu0 %v19095_v44  ;;  %v19122_v44 = vld [vmem:[#allocation36 + $0x1b8] ss:$12 sps:$4 sm:$0xff]  }
0x13d6   :  { %12927 = vmatprep.subr.bf16.mxu0 %v19103_v54  ;;  %v19125_v54 = vld [vmem:[#allocation36 + $0x1a0] ss:$12 sps:$4 sm:$0xff]  }
0x13d9   :  { %12928 = vmatpush2.bf16.msra.mxu0 %v19101_v21  ;;  %v19126_v21 = vld [vmem:[#allocation36 + $0x8] ss:$12 sps:$4 sm:$0xff]  }
0x13da   :  { %17135 = vmatprep.subr.bf16.mxu0 %v20063_v26 }
0x145c   :  { %v12332_v47 = vpop.f32.mrf.mxu0  ;;  %v12373_v25 = vpop.f32.mrf.mxu1 }
0x145d   :  { %v12333_v4 = vadd.f32 %v12332_v47, %v12139_v43  ;;  %v12374_v0 = vadd.f32 %v12373_v25, %v12147_v12  ;;  %v19128_v43 = vld [vmem:[#allocation39 + $0x70] ss:$8 sps:$4 sm:$0xff]   ;;  %v19133_v12 = vld [vmem:[#allocation39 + $0x64] ss:$8 sps:$4 sm:$0xff]   ;;  %v19131_v47 = vld [vmem:[#allocation39 + $0x60] ss:$8 sps:$4 sm:$0xff]  }
0x145e   :  { %v12334_v5 = vpop.f32.mrf.mxu0  ;;  %v12375_v33 = vpop.f32.mrf.mxu1  ;;  %v19136_v25 = vld [vmem:[#allocation39 + $0x54] ss:$8 sps:$4 sm:$0xff]  }
0x145f   :  { %v12382_v22 = vmin.f32 %v12333_v4, 0.0  ;;  %v12384_v46 = vmin.f32 %v12374_v0, 0.0  ;;  %v12335_v28 = vadd.f32 %v12334_v5, %v12143_v42  ;;  %vm12381_vm3 = vcmp.gt.f32.partialorder %v12374_v0, 0.0  ;;  %v19134_v42 = vld [vmem:[#allocation39 + $0x50] ss:$8 sps:$4 sm:$0xff]  }
0x1460   :  { %v12336_v18 = vpop.f32.mrf.mxu0  ;;  %v12376_v30 = vpop.f32.mrf.mxu1  ;;  %vm12379_vm5 = vcmp.gt.f32.partialorder %v12333_v4, 0.0  ;;  %v19142_v5 = vld [vmem:[#allocation39 + $0x34] ss:$8 sps:$4 sm:$0xff]   ;;  %v19140_v33 = vld [vmem:[#allocation39 + $0x30] ss:$8 sps:$4 sm:$0xff]  }
0x1461   :  { %v12385_v37 = vmul.f32 1.442695, %v12382_v22  ;;  %v12389_v61 = vmul.f32 1.442695, %v12384_v46  ;;  %v12383_v63 = vmin.f32 %v12335_v28, 0.0  ;;  %vm12380_vm6 = vcmp.gt.f32.partialorder %v12335_v28, 0.0 }
0x1462   :  { %v12337_v27 = vpop.f32.mrf.mxu0  ;;  %v12377_v2 = vpop.f32.mrf.mxu1  ;;  %v19145_v22 = vld [vmem:[#allocation39 + $0x24] ss:$8 sps:$4 sm:$0xff]   ;;  %v19143_v46 = vld [vmem:[#allocation39 + $0x20] ss:$8 sps:$4 sm:$0xff]   ;;  %v19146_v18 = vld [vmem:[#allocation39 + $0x10] ss:$8 sps:$4 sm:$0xff]  }
0x1463   :  { %19226 = vpow2.f32 %v12385_v37  ;;  %v12387_v1 = vmul.f32 1.442695, %v12383_v63  ;;  %v19149_v30 = vld [vmem:[#allocation39] ss:$8 sps:$4 sm:$0xff]   ;;  %v19154_v37 = vld [vmem:[#allocation39 + $0xf4] ss:$8 sps:$4 sm:$0xff]  }
0x1464   :  { %19228 = vpow2.f32 %v12389_v61  ;;  %v19152_v61 = vld [vmem:[#allocation39 + $0xf0] ss:$8 sps:$4 sm:$0xff]   ;;  %v19157_v63 = vld [vmem:[#allocation39 + $0xe4] ss:$8 sps:$4 sm:$0xff]   ;;  %v19155_v27 = vld [vmem:[#allocation39 + $0xe0] ss:$8 sps:$4 sm:$0xff]  }
0x1465   :  { %19230 = vpow2.f32 %v12387_v1  ;;  %v19160_v2 = vld [vmem:[#allocation39 + $0xd4] ss:$8 sps:$4 sm:$0xff]   ;;  %v19158_v1 = vld [vmem:[#allocation39 + $0xd0] ss:$8 sps:$4 sm:$0xff]  }
0x1470   :  { %v19227_v57 = vpop.eup %19226 }
0x1471   :  { %v19229_v51 = vpop.eup %19228  ;;  %v14374_v45 = vadd.f32 -1.0, %v19227_v57  ;;  %v19163_v57 = vld [vmem:[#allocation39 + $0xc4] ss:$8 sps:$4 sm:$0xff]  }
0x1472   :  { %v14376_v23 = vadd.f32 -1.0, %v19229_v51  ;;  %v19231_v17 = vpop.eup %19230  ;;  %v19161_v51 = vld [vmem:[#allocation39 + $0xc0] ss:$8 sps:$4 sm:$0xff]  }
0x1473   :  { %v14375_v41 = vadd.f32 -1.0, %v19231_v17  ;;  %v12394_v34 = vsel %vm12379_vm5, %v12333_v4, %v14374_v45  ;;  %v19139_v4 = vld [vmem:[#allocation39 + $0x44] ss:$8 sps:$4 sm:$0xff]   ;;  %v19166_v45 = vld [vmem:[#allocation39 + $0xb4] ss:$8 sps:$4 sm:$0xff]  }
0x1474   :  { %v12396_v36 = vsel %vm12381_vm3, %v12374_v0, %v14376_v23  ;;  %v12397_v19 = vpack.c.bf16 %v12394_v34, %v12394_v34  ;;  %v19137_v0 = vld [vmem:[#allocation39 + $0x40] ss:$8 sps:$4 sm:$0xff]   ;;  %v19164_v23 = vld [vmem:[#allocation39 + $0xb0] ss:$8 sps:$4 sm:$0xff]   ;;  %v19169_v17 = vld [vmem:[#allocation39 + $0xa4] ss:$8 sps:$4 sm:$0xff]  }
0x1475   :  { %v23447_v7 = vpack.c.bf16 %v12396_v36, %v12396_v36  ;;  %v12395_v38 = vsel %vm12380_vm6, %v12335_v28, %v14375_v41  ;;  %v19148_v28 = vld [vmem:[#allocation39 + $0x14] ss:$8 sps:$4 sm:$0xff]   ;;  %v19167_v36 = vld [vmem:[#allocation39 + $0xa0] ss:$8 sps:$4 sm:$0xff]   ;;  %v19170_v41 = vld [vmem:[#allocation39 + $0x90] ss:$8 sps:$4 sm:$0xff]  }
0x1476   :  { %v12398_v15 = vpack.c.bf16 %v12395_v38, %v12395_v38  ;;  %v19173_v34 = vld [vmem:[#allocation39 + $0x80] ss:$8 sps:$4 sm:$0xff]   ;;  %v19178_v38 = vld [vmem:[#allocation39 + $0x174] ss:$8 sps:$4 sm:$0xff]  }
0x1477   :  { %12971 = vmatmul.mubr.bf16.vlgmr.msra.gmra.mxu1 %v23447_v7 }
0x1478   :  { %16210 = vmatpush3.bf16.msra.mxu1 %v19105_v56  ;;  %12929 = vmatprep.mubr.bf16.mxu0 %v12398_v15  ;;  %v19172_v56 = vld [vmem:[#allocation39 + $0x94] ss:$8 sps:$4 sm:$0xff]  }
0x1479   :  { %13011 = vmatprep.mubr.bf16.mxu1 %v12398_v15  ;;  %12930 = vmatmul.mubr.bf16.vlgmr.msra.gmra.mxu0 %v12397_v19  ;;  %v19181_v15 = vld [vmem:[#allocation39 + $0x164] ss:$8 sps:$4 sm:$0xff]  }
0x147a   :  { %16211 = vmatprep.subr.bf16.mxu1 %v19106_v31  ;;  %17136 = vmatpush3.bf16.msra.mxu0 %v19107_v39  ;;  %v19176_v31 = vld [vmem:[#allocation39 + $0x170] ss:$8 sps:$4 sm:$0xff]   ;;  %v19179_v39 = vld [vmem:[#allocation39 + $0x160] ss:$8 sps:$4 sm:$0xff]  }
0x147b   :  { %17151 = vmatprep.mubr.msk.bf16.mxu0 %vm20064_vm15, %v20063_v26  ;;  %17137 = vmatprep.subr.bf16.mxu0 %v20063_v26 }
0x147c   :  { %16212 = vmatpush3.bf16.msra.mxu1 %v19108_v55  ;;  %v19182_v55 = vld [vmem:[#allocation39 + $0x150] ss:$8 sps:$4 sm:$0xff]  }
0x147d   :  { %16213 = vmatprep.subr.bf16.mxu1 %v19109_v24  ;;  %v19187_v24 = vld [vmem:[#allocation39 + $0x144] ss:$8 sps:$4 sm:$0xff]  }
0x147e   :  { %17138 = vmatpush3.bf16.msra.mxu0 %v19110_v8  ;;  %v19185_v8 = vld [vmem:[#allocation39 + $0x140] ss:$8 sps:$4 sm:$0xff]  }
0x147f   :  { %17139 = vmatprep.subr.bf16.mxu0 %v20063_v26 }
0x1480   :  { %16214 = vmatpush3.bf16.msra.mxu1 %v19111_v16  ;;  %v19190_v16 = vld [vmem:[#allocation39 + $0x134] ss:$8 sps:$4 sm:$0xff]  }
0x1481   :  { %16215 = vmatprep.subr.bf16.mxu1 %v19112_v29  ;;  %v19188_v29 = vld [vmem:[#allocation39 + $0x130] ss:$8 sps:$4 sm:$0xff]  }
0x1482   :  { %17140 = vmatpush3.bf16.msra.mxu0 %v19113_v20  ;;  %v19193_v20 = vld [vmem:[#allocation39 + $0x124] ss:$8 sps:$4 sm:$0xff]  }
0x1483   :  { %17141 = vmatprep.subr.bf16.mxu0 %v20063_v26 }
0x1484   :  { %16216 = vmatpush3.bf16.msra.mxu1 %v19114_v40  ;;  %v19191_v40 = vld [vmem:[#allocation39 + $0x120] ss:$8 sps:$4 sm:$0xff]  }
0x1485   :  { %16217 = vmatprep.subr.bf16.mxu1 %v19115_v49  ;;  %v19196_v49 = vld [vmem:[#allocation39 + $0x114] ss:$8 sps:$4 sm:$0xff]  }
0x1486   :  { %17142 = vmatpush3.bf16.msra.mxu0 %v19116_v58  ;;  %v19194_v58 = vld [vmem:[#allocation39 + $0x110] ss:$8 sps:$4 sm:$0xff]  }
0x1487   :  { %17143 = vmatprep.subr.bf16.mxu0 %v20063_v26 }
0x1488   :  { %16218 = vmatpush3.bf16.msra.mxu1 %v19117_v59  ;;  %v19199_v59 = vld [vmem:[#allocation39 + $0x104] ss:$8 sps:$4 sm:$0xff]  }
0x1489   :  { %16219 = vmatprep.subr.bf16.mxu1 %v19118_v53  ;;  %v19197_v53 = vld [vmem:[#allocation39 + $0x100] ss:$8 sps:$4 sm:$0xff]  }
0x148a   :  { %17144 = vmatpush3.bf16.msra.mxu0 %v19119_v32  ;;  %v12496_v32 = vld [vmem:[#allocation37] sm:$0x7] }
0x148b   :  { %17145 = vmatprep.subr.bf16.mxu0 %v20063_v26 }
0x148c   :  { %16220 = vmatpush3.bf16.msra.mxu1 %v19120_v13 }
0x148d   :  { %16221 = vmatprep.subr.bf16.mxu1 %v19121_v14  ;;  %v12501_v14 = vrot.slane %v12496_v32, %v23348_v60 }
0x148e   :  { %17146 = vmatpush3.bf16.msra.mxu0 %v19122_v44 }
0x148f   :  { %17147 = vmatprep.subr.bf16.mxu0 %v20063_v26 }
0x1490   :  { %16222 = vmatpush3.bf16.msra.mxu1 %v19123_v48  ;;  %v12505_v48 = vrot.slane %v12496_v32, %v23331_v10 }
0x1491   :  { %16223 = vmatprep.subr.bf16.mxu1 %v19124_v52 }
0x1492   :  { %17148 = vmatpush3.bf16.msra.mxu0 %v19125_v54 }
0x1493   :  { %17149 = vmatprep.subr.bf16.mxu0 %v20063_v26 }
0x1494   :  { %16224 = vmatpush3.bf16.msra.mxu1 %v19126_v21 }
0x1495   :  { %13380 = vmatprep.subr.bf16.mxu1 %v19130_v35 }
0x1496   :  { %17150 = vmatpush3.bf16.msra.mxu0 %v19127_v3 }
0x1497   :  { %13012 = vmatmul.mubr.bf16.vlgmr.msra.gmra.mxu1 %v12397_v19  ;;  %13421 = vmatprep.subr.bf16.mxu0 %v19178_v38  ;;  %v19184_v19 = vld [vmem:[#allocation39 + $0x154] ss:$8 sps:$4 sm:$0xff]  }
0x1498   :  { %13381 = vmatpush1.bf16.msra.mxu1 %v19128_v43 }
0x1499   :  { %13382 = vmatprep.subr.bf16.mxu1 %v19133_v12  ;;  %17152 = vmatmul.mubr.bf16.vlgmr.msra.gmra.mxu0 %v23447_v7  ;;  %v19175_v7 = vld [vmem:[#allocation39 + $0x84] ss:$8 sps:$4 sm:$0xff]  }
0x149a   :  { %13453 = vmatprep.mubr.bf16.mxu0 %v23681_v50  ;;  %v19151_v50 = vld [vmem:[#allocation39 + $0x4] ss:$8 sps:$4 sm:$0xff]   ;;  %13422 = vmatpush1.bf16.msra.mxu0 %v19176_v31 }
0x149b   :  { %13423 = vmatprep.subr.bf16.mxu0 %v19181_v15 }
0x149c   :  { %13383 = vmatpush1.bf16.msra.mxu1 %v19131_v47 }
0x149d   :  { %13384 = vmatprep.subr.bf16.mxu1 %v19136_v25 }
0x149e   :  { %13424 = vmatpush1.bf16.msra.mxu0 %v19179_v39  ;;  %v19200_v39 = vld [vmem:[%s20255_s17 + $0x38] sm:$0xff]  }
0x149f   :  { %13425 = vmatprep.subr.bf16.mxu0 %v19184_v19  ;;  %v19201_v19 = vld [vmem:[%s20255_s17 + $0x30] sm:$0xff]  }
0x14a0   :  { %13385 = vmatpush1.bf16.msra.mxu1 %v19134_v42 }
0x14a1   :  { %13386 = vmatprep.subr.bf16.mxu1 %v19139_v4 }
0x14a2   :  { %13426 = vmatpush1.bf16.msra.mxu0 %v19182_v55  ;;  %v19202_v55 = vld [vmem:[%s20255_s17 + $0x28] sm:$0xff]  }
0x14a3   :  { %13427 = vmatprep.subr.bf16.mxu0 %v19187_v24  ;;  %v19203_v24 = vld [vmem:[%s20255_s17 + $0x20] sm:$0xff]  }
0x14a4   :  { %13387 = vmatpush1.bf16.msra.mxu1 %v19137_v0 }
0x14a5   :  { %13388 = vmatprep.subr.bf16.mxu1 %v19142_v5 }
0x14a6   :  { %13428 = vmatpush1.bf16.msra.mxu0 %v19185_v8  ;;  %v19204_v8 = vld [vmem:[%s20255_s17 + $0x18] sm:$0xff]  }
0x14a7   :  { %13429 = vmatprep.subr.bf16.mxu0 %v19190_v16  ;;  %v19205_v16 = vld [vmem:[%s20255_s17 + $0x10] sm:$0xff]  }
0x14a8   :  { %13389 = vmatpush1.bf16.msra.mxu1 %v19140_v33 }
0x14a9   :  { %13390 = vmatprep.subr.bf16.mxu1 %v19145_v22 }
0x14aa   :  { %13430 = vmatpush1.bf16.msra.mxu0 %v19188_v29  ;;  %v19206_v29 = vld [vmem:[%s20255_s17 + $0x8] sm:$0xff]  }
0x14ab   :  { %13431 = vmatprep.subr.bf16.mxu0 %v19193_v20  ;;  %v19207_v20 = vld [vmem:[%s20255_s17] sm:$0xff]   ;;  %s23687_s17 = sld [smem:[#allocation59_spill]] }
0x14ac   :  { %13391 = vmatpush1.bf16.msra.mxu1 %v19143_v46 }
0x14ad   :  { %13392 = vmatprep.subr.bf16.mxu1 %v19148_v28 }
0x14ae   :  { %13432 = vmatpush1.bf16.msra.mxu0 %v19191_v40 }
0x14af   :  { %13433 = vmatprep.subr.bf16.mxu0 %v19196_v49 }
0x14b0   :  { %13393 = vmatpush1.bf16.msra.mxu1 %v19146_v18 }
0x14b1   :  { %13394 = vmatprep.subr.bf16.mxu1 %v19151_v50 }
0x14b2   :  { %13434 = vmatpush1.bf16.msra.mxu0 %v19194_v58 }
0x14b3   :  { %13435 = vmatprep.subr.bf16.mxu0 %v19199_v59 }
0x14b4   :  { %13395 = vmatpush1.bf16.msra.mxu1 %v19149_v30 }
0x14b5   :  { %13396 = vmatprep.subr.bf16.mxu1 %v19154_v37 }
0x14b6   :  { %13436 = vmatpush1.bf16.msra.mxu0 %v19197_v53  ;;  %v13128_v53 = vld [vmem:[#allocation40] sm:$0x3] }
0x14b7   :  { %17155 = vmatprep.subr.bf16.mxu0 %v20063_v26 }
0x14b8   :  { %13397 = vmatpush2.bf16.msra.mxu1 %v19152_v61 }
0x14b9   :  { %13398 = vmatprep.subr.bf16.mxu1 %v19157_v63 }
0x14bc   :  { %13399 = vmatpush2.bf16.msra.mxu1 %v19155_v27  ;;  %v12509_v27 = vrot.slane %v12496_v32, %v23351_v9  ;;  %v13133_v32 = vrot.slane %v13128_v53, %v23348_v60  ;;  %v14501_v60 = vld [vmem:[#allocation42] ss:$0 sm:$0xff] }
0x14bd   :  { %13400 = vmatprep.subr.bf16.mxu1 %v19160_v2 }
0x14c0   :  { %13401 = vmatpush2.bf16.msra.mxu1 %v19158_v1 }
0x14c1   :  { %13402 = vmatprep.subr.bf16.mxu1 %v19163_v57 }
0x14c4   :  { %13403 = vmatpush2.bf16.msra.mxu1 %v19161_v51 }
0x14c5   :  { %13404 = vmatprep.subr.bf16.mxu1 %v19166_v45 }
0x14c8   :  { %13405 = vmatpush2.bf16.msra.mxu1 %v19164_v23 }
0x14c9   :  { %13406 = vmatprep.subr.bf16.mxu1 %v19169_v17 }
0x14cc   :  { %13407 = vmatpush2.bf16.msra.mxu1 %v19167_v36 }
0x14cd   :  { %13408 = vmatprep.subr.bf16.mxu1 %v19172_v56 }
0x14d0   :  { %13409 = vmatpush2.bf16.msra.mxu1 %v19170_v41 }
0x14d1   :  { %13410 = vmatprep.subr.bf16.mxu1 %v19175_v7 }
0x14d4   :  { %13411 = vmatpush2.bf16.msra.mxu1 %v19173_v34 }
0x1537   :  { %v12972_v13 = vpop.f32.mrf.mxu1 }
0x1539   :  { %v12974_v44 = vpop.f32.mrf.mxu1  ;;  %v12931_v52 = vpop.f32.mrf.mxu0 }
0x153a   :  { %v12932_v54 = vadd.f32 %v12931_v52, %v12501_v14 }
0x153b   :  { %v12976_v21 = vpop.f32.mrf.mxu1  ;;  %v12933_v35 = vpop.f32.mrf.mxu0 }
0x153c   :  { %v12973_v3 = vadd.f32 %v12972_v13, %v12932_v54  ;;  %v12934_v43 = vadd.f32 %v12933_v35, %v12505_v48  ;;  %v13137_v13 = vrot.slane %v13128_v53, %v23331_v10 }
0x153d   :  { %v12977_v12 = vpop.f32.mrf.mxu1  ;;  %v12935_v47 = vpop.f32.mrf.mxu0 }
0x153e   :  { %v13062_v25 = vmin.f32 %v12973_v3, 0.0  ;;  %v12975_v42 = vadd.f32 %v12974_v44, %v12934_v43  ;;  %vm13059_vm7 = vcmp.gt.f32.partialorder %v12973_v3, 0.0 }
0x153f   :  { %v12936_v4 = vpop.f32.mrf.mxu0 }
0x1540   :  { %v13065_v0 = vmul.f32 1.442695, %v13062_v25  ;;  %v13063_v5 = vmin.f32 %v12975_v42, 0.0  ;;  %vm13060_vm9 = vcmp.gt.f32.partialorder %v12975_v42, 0.0 }
0x1542   :  { %19232 = vpow2.f32 %v13065_v0  ;;  %v13067_v33 = vmul.f32 1.442695, %v13063_v5 }
0x1544   :  { %19234 = vpow2.f32 %v13067_v33 }
0x154f   :  { %v19233_v22 = vpop.eup %19232 }
0x1550   :  { %v14449_v46 = vadd.f32 -1.0, %v19233_v22 }
0x1551   :  { %v19235_v28 = vpop.eup %19234 }
0x1552   :  { %v14450_v18 = vadd.f32 -1.0, %v19235_v28  ;;  %v13074_v50 = vsel %vm13059_vm7, %v12973_v3, %v14449_v46 }
0x1553   :  { %v13077_v61 = vpack.c.bf16 %v13074_v50, %v13074_v50 }
0x1554   :  { %v13075_v30 = vsel %vm13060_vm9, %v12975_v42, %v14450_v18 }
0x1555   :  { %v13078_v37 = vpack.c.bf16 %v13075_v30, %v13075_v30  ;;  %v13591_v30 = vld [vmem:[%s23687_s17] sm:$0xff] }
0x1557   :  { %v16225_v63 = vpop.f32.mrf.mxu1  ;;  %13412 = vmatprep.mubr.bf16.mxu1 %v13078_v37 }
0x1558   :  { %13413 = vmatmul.mubr.bf16.vlgmr.msra.gmra.mxu1 %v13077_v61 }
0x1559   :  { %v16226_v2 = vpop.f32.mrf.mxu1  ;;  %v13053_v57 = vpop.f32.mrf.mxu0 }
0x155a   :  { %v16227_v1 = vadd.f32 %v16226_v2, %v16225_v63 }
0x155b   :  { %v16228_v51 = vpop.f32.mrf.mxu1  ;;  %v17153_v23 = vpop.f32.mrf.mxu0 }
0x155c   :  { %v13014_v45 = vadd.f32 %v16227_v1, %v12509_v27 }
0x155d   :  { %v16229_v17 = vpop.f32.mrf.mxu1  ;;  %v13056_v56 = vpop.f32.mrf.mxu0 }
0x155e   :  { %v13054_v36 = vadd.f32 %v13053_v57, %v13014_v45 }
0x155f   :  { %v17154_v34 = vpop.f32.mrf.mxu0 }
0x1560   :  { %v13064_v41 = vmin.f32 %v13054_v36, 0.0  ;;  %vm13061_vm12 = vcmp.gt.f32.partialorder %v13054_v36, 0.0 }
0x1562   :  { %v13069_v7 = vmul.f32 1.442695, %v13064_v41 }
0x1564   :  { %19236 = vpow2.f32 %v13069_v7 }
0x1571   :  { %v19237_v38 = vpop.eup %19236 }
0x1572   :  { %v14451_v9 = vadd.f32 -1.0, %v19237_v38 }
0x1574   :  { %v13076_v31 = vsel %vm13061_vm12, %v13054_v36, %v14451_v9 }
0x1575   :  { %v13079_v15 = vpack.c.bf16 %v13076_v31, %v13076_v31 }
0x1577   :  { %13454 = vmatmul.mubr.bf16.vlgmr.msra.gmra.mxu0 %v13079_v15 }
0x1578   :  { %17171 = vmatprep.mubr.msk.bf16.mxu0 %vm20064_vm15, %v20063_v26  ;;  %17156 = vmatpush3.bf16.msra.mxu0 %v19200_v39  ;;  %vm13628_vm15 = vcmask 588800  }
0x1579   :  { %17157 = vmatprep.subr.bf16.mxu0 %v20063_v26 }
0x157c   :  { %17158 = vmatpush3.bf16.msra.mxu0 %v19201_v19 }
0x157d   :  { %17159 = vmatprep.subr.bf16.mxu0 %v20063_v26 }
0x1580   :  { %17160 = vmatpush3.bf16.msra.mxu0 %v19202_v55 }
0x1581   :  { %17161 = vmatprep.subr.bf16.mxu0 %v20063_v26 }
0x1584   :  { %17162 = vmatpush3.bf16.msra.mxu0 %v19203_v24 }
0x1585   :  { %17163 = vmatprep.subr.bf16.mxu0 %v20063_v26 }
0x1588   :  { %17164 = vmatpush3.bf16.msra.mxu0 %v19204_v8 }
0x1589   :  { %17165 = vmatprep.subr.bf16.mxu0 %v20063_v26 }
0x158c   :  { %17166 = vmatpush3.bf16.msra.mxu0 %v19205_v16 }
0x158d   :  { %17167 = vmatprep.subr.bf16.mxu0 %v20063_v26 }
0x1590   :  { %17168 = vmatpush3.bf16.msra.mxu0 %v19206_v29 }
0x1591   :  { %17169 = vmatprep.subr.bf16.mxu0 %v20063_v26 }
0x1594   :  { %17170 = vmatpush3.bf16.msra.mxu0 %v19207_v20 }
0x1618   :  { %v13414_v40 = vpop.f32.mrf.mxu1 }
0x1619   :  { %v13415_v14 = vadd.f32 %v13414_v40, %v13133_v32 }
0x161a   :  { %v13416_v49 = vpop.f32.mrf.mxu1 }
0x161b   :  { %v13417_v48 = vadd.f32 %v13416_v49, %v13137_v13 }
0x161c   :  { %v13418_v58 = vpop.f32.mrf.mxu1 }
0x161e   :  { %v13419_v59 = vpop.f32.mrf.mxu1 }
0x1637   :  { %v13455_v44 = vpop.f32.mrf.mxu0 }
0x1638   :  { %v13456_v52 = vadd.f32 %v13455_v44, %v13415_v14 }
0x1639   :  { %v13457_v54 = vpop.f32.mrf.mxu0 }
0x163a   :  { %v13463_v21 = vmin.f32 %v13456_v52, 0.0  ;;  %v13458_v35 = vadd.f32 %v13457_v54, %v13417_v48  ;;  %vm13462_vm13 = vcmp.gt.f32.partialorder %v13456_v52, 0.0 }
0x163b   :  { %v13459_v3 = vpop.f32.mrf.mxu0 }
0x163c   :  { %v13464_v43 = vmul.f32 1.442695, %v13463_v21 }
0x163d   :  { %v13460_v12 = vpop.f32.mrf.mxu0 }
0x163e   :  { %19238 = vpow2.f32 %v13464_v43 }
0x164b   :  { %v19239_v47 = vpop.eup %19238 }
0x164c   :  { %v14500_v25 = vadd.f32 -1.0, %v19239_v47 }
0x164e   :  { %v13467_v42 = vsel %vm13462_vm13, %v13456_v52, %v14500_v25 }
0x164f   :  { %v13468_v4 = vpack.c.bf16 %v13467_v42, %v13467_v42 }
0x1651   :  { %17172 = vmatmul.mubr.bf16.vlgmr.msra.gmra.mxu0 %v13468_v4 }
0x1711   :  { %v13574_v10 = vpop.f32.mrf.mxu0 }
0x1712   :  { %v13575_v0 = vadd.f32 %v14501_v60, %v13574_v10 }
0x1713   :  { %v17173_v5 = vpop.f32.mrf.mxu0 }
0x1714   :  { %v13580_v33 = vsel %vm4761_vm2, %v13575_v0, -inf  ;;  %v13592_v63 = vadd.f32 %v13591_v30, %v13575_v0 }
0x1715   :  { %13581 = vmax.xlane.f32.xlu1 %v13580_v33  ;;  %v13577_v22 = vpop.f32.mrf.mxu0 }
0x1716   :  { %v13593_v27 = vsel %vm4761_vm2, %v13592_v63, -inf }
0x1717   :  { %v17174_v46 = vpop.f32.mrf.mxu0 }
0x1726   :  { %13599 = vrot.lane.b32.xlu1 %v23427_v62, %s20034_s15 }
0x172a   :  { %13607 = vrot.lane.b32.xlu1 %v13575_v0, %s20058_s3 }
0x179e   :  { %v13582_v28 = vpop.xlane.xlu1 %13581 }
0x179f   :  { %v13583_v18 = vsub.f32 %v13575_v0, %v13582_v28 }
0x17a1   :  { %v13584_v50 = vmul.f32 1.442695, %v13583_v18 }
0x17a2   :  { %v13600_v45 = vpop.permute.xlu1 %13599 }
0x17a3   :  { %19240 = vpow2.f32 %v13584_v50 }
0x17a6   :  { %v13608_v17 = vpop.permute.xlu1 %13607 }
0x17b0   :  { %v19241_v37 = vpop.eup %19240 }
0x17b1   :  { %v13586_v61 = vsel %vm4761_vm2, %v19241_v37, 0.0  ;;  %vm13625_vm2 = vcmask 457728  }
0x17b2   :  { %13587 = vadd.xlane.f32.xlu0 %v13586_v61 }
0x17b6   :  { %13594 = vmax.xlane.f32.xlu0 %v13593_v27 }
0x17cc   :  { %13603 = vrot.lane.b32.xlu0 %v23431_v11, %s20034_s15  ;;  %v13622_v11 = vsel %vm4795_vm4, %v23437_v6, %v13600_v45 }
0x183b   :  { %v13588_v2 = vpop.xlane.xlu0 %13587 }
0x183c   :  { %19242 = vrcp.f32 %v13588_v2 }
0x183f   :  { %v13595_v62 = vpop.xlane.xlu0 %13594 }
0x1840   :  { %vm13596_vm14 = vcmp.ge.f32.partialorder %v13592_v63, %v13595_v62 }
0x1841   :  { %v13597_v1 = vsel %vm13596_vm14, 1.0, %v20063_v26 }
0x1842   :  { %13615 = vrot.lane.b32.xlu0 %v13597_v1, %s20018_s0 }
0x1843   :  { %v13604_v23 = vpop.permute.xlu0 %13603 }
0x1844   :  { %v13623_v36 = vsel %vm4863_vm8, %v13622_v11, %v13604_v23 }
0x1845   :  { %v13624_v26 = vsel %vm7002_vm10, %v13623_v36, %v13608_v17 }
0x1849   :  { %v19243_v57 = vpop.eup %19242 }
0x184a   :  { %v13590_v51 = vmul.f32 %v19243_v57, %v19241_v37 }
0x184c   :  { %13611 = vrot.lane.b32.xlu1 %v13590_v51, %s20065_s16 }
0x1850   :  { %13619 = vrot.lane.b32.xlu1 %v13458_v35, %s20066_s21 }
0x18b4   :  { %v13616_v34 = vpop.permute.xlu0 %13615 }
0x18be   :  { %v13612_v56 = vpop.permute.xlu1 %13611 }
0x18bf   :  { %v13626_v41 = vsel %vm13625_vm2, %v13624_v26, %v13612_v56 }
0x18c0   :  { %v13627_v7 = vsel %vm7019_vm11, %v13626_v41, %v13616_v34 }
0x18c2   :  { %v13620_v38 = vpop.permute.xlu1 %13619 }
0x18c3   :  { %v13629_v9 = vsel %vm13628_vm15, %v13627_v7, %v13620_v38 }
0x18c4   :  { %v13631_v31 = vsel %vm13630_vm0, %v13629_v9, 0.0 }
0x18c5   :  { %13633 = vst [vmem:[%s20265_s9 + $0x8] sm:$0xff] %v13631_v31 }
0x18c6   :  { %13638 = vsyncpa [#allocation3], 1 }
0x18c7   :  { %13639 = vsyncpa [#allocation5], 1 }
0x18c8   :  { %13640 = vsyncpa [#allocation8], 1 }
0x18c9   :  { %13641 = vsyncpa [#allocation11], 1 }
0x18ca   :  { %13642 = vsyncpa [#allocation14], 1 }
0x18cb   :  { %13643 = vsyncpa [#allocation17], 1 }
0x18cc   :  { %13644 = vsyncpa [#allocation20], 1 }
0x18cd   :  { %13645 = vsyncpa [#allocation23], 1 }
0x18ce   :  { %13646 = vsyncpa [#allocation26], 1 }
0x18cf   :  { %13647 = vsyncpa [#allocation29], 1 }
0x18d0   :  { %13648 = vsyncpa [#allocation32], 1 }
0x18d1   :  { %13649 = vsyncpa [#allocation35], 1 }
0x18d2   :  { %13650 = vsyncpa [#allocation38], 1 }
0x18d3   :  { %13651 = vsyncpa [#allocation41], 1 }

</bundles_post_ra>
